<compile_context>
chip_gen: v7x
topology: tpu7x:2x2x1
jax: 0.10.0
libtpu: 0.0.40
codegen_flags: <defaults>
</compile_context>

<pallas_src>
import jax
import jax.numpy as jnp
from jax import lax
from jax.experimental import pallas as pl
from jax.experimental.pallas import tpu as pltpu

BF16 = jnp.bfloat16
F32 = jnp.float32
EMB_C = 128
LSTM_H = 256


# ---------------------------------------------------------------- fused kernel
def _conv3_layer(xpad_sc, x, wcat_ref, bias=None, scale=None, shift=None):
    """Conv1d(k=3, pad=1) (+bias) -> ReLU (-> BN eval affine), channel-last.

    The 3 taps are K-concatenated along lanes so the conv is ONE MXU matmul
    with K = 3*Cin.  Rows 0 and T+1 of xpad_sc hold the zero halo.
    """
    Bb, T, cin = x.shape
    xpad_sc[:, 1:T + 1, :cin] = x
    xcat = jnp.concatenate(
        [xpad_sc[:, 0:T, :cin],         # x[t-1]
         x,                             # x[t]
         xpad_sc[:, 2:T + 2, :cin]],    # x[t+1]
        axis=-1).astype(BF16)           # (Bb, T, 3*cin), lane-aligned concat
    y = jnp.einsum('btk,kd->btd', xcat, wcat_ref[...],
                   preferred_element_type=jnp.float32)
    if bias is not None:
        y = y + bias
    y = jnp.maximum(y, 0.0)
    if scale is not None:
        y = y * scale + shift
    return y


def _encoder_kernel(
        # inputs
        emb_ref,
        w1_ref, b1_ref,
        w2_ref, s128_ref, t128_ref,
        w3_ref, b3_ref,
        w4_ref, s256_ref, t256_ref,
        wih_ref, whh_ref, blstm_ref,
        wa1_ref, ba1_ref, wa2_ref,
        wo1_ref, bo1_ref, wo2_ref, bo2_ref,
        # outputs
        out_ref, wts_ref,
        # scratch
        xpad_sc, xw_sc, hseq_sc):
    Bb, T, _ = emb_ref.shape
    H = LSTM_H

    # Zero the halo rows once per grid step (rows 1..T are overwritten below).
    zero_row = jnp.zeros((Bb, 1, xpad_sc.shape[-1]), jnp.float32)
    xpad_sc[:, 0:1, :] = zero_row
    xpad_sc[:, T + 1:T + 2, :] = zero_row

    # ----- conv stack: (Conv+b -> ReLU -> Conv -> ReLU -> BN affine) x 2 -----
    x = emb_ref[...]                                            # (Bb, T, 128) f32
    x = _conv3_layer(xpad_sc, x, w1_ref, bias=b1_ref[...])
    x = _conv3_layer(xpad_sc, x, w2_ref, scale=s128_ref[...], shift=t128_ref[...])
    x = _conv3_layer(xpad_sc, x, w3_ref, bias=b3_ref[...])
    x = _conv3_layer(xpad_sc, x, w4_ref, scale=s256_ref[...], shift=t256_ref[...])
    # x: (Bb, T, 256) f32

    # ----- LSTM: input projection hoisted out of the recurrence --------------
    xw_sc[...] = (jnp.einsum('bth,hg->btg', x.astype(BF16), wih_ref[...],
                             preferred_element_type=jnp.float32)
                  + blstm_ref[...])                              # (Bb, T, 4H)

    def lstm_step(t, carry):
        h, c = carry
        g = xw_sc[:, pl.ds(t, 1), :][:, 0, :] + jnp.dot(
            h.astype(BF16), whh_ref[...], preferred_element_type=jnp.float32)
        i_g = jax.nn.sigmoid(g[:, 0 * H:1 * H])
        f_g = jax.nn.sigmoid(g[:, 1 * H:2 * H])
        g_g = jnp.tanh(g[:, 2 * H:3 * H])
        o_g = jax.nn.sigmoid(g[:, 3 * H:4 * H])
        c = f_g * c + i_g * g_g
        h = o_g * jnp.tanh(c)
        hseq_sc[:, pl.ds(t, 1), :] = h[:, None, :]
        return (h, c)

    zeros_bh = jnp.zeros((Bb, H), jnp.float32)
    lax.fori_loop(0, T, lstm_step, (zeros_bh, zeros_bh),
                  unroll=True if T <= 32 else 8)

    # ----- temporal self-attention + output head ------------------------------
    hseq = hseq_sc[...]                                          # (Bb, T, H) f32
    e = jnp.tanh(jnp.einsum('bth,hd->btd', hseq.astype(BF16), wa1_ref[...],
                            preferred_element_type=jnp.float32) + ba1_ref[...])
    scores = jnp.sum(e * wa2_ref[...], axis=-1)                  # (Bb, T)
    m = jnp.max(scores, axis=-1, keepdims=True)
    p = jnp.exp(scores - m)
    w = p / jnp.sum(p, axis=-1, keepdims=True)                   # (Bb, T)
    wts_ref[...] = w                                             # lane-dense out

    attended = jnp.sum(hseq * w[:, :, None], axis=1)             # (Bb, H) f32
    z = jnp.maximum(
        jnp.dot(attended.astype(BF16), wo1_ref[...],
                preferred_element_type=jnp.float32) + bo1_ref[...], 0.0)
    out_ref[...] = jnp.dot(z.astype(BF16), wo2_ref[...],
                           preferred_element_type=jnp.float32) + bo2_ref[...]


# ------------------------------------------------------------------- wrappers
def _prep_conv_w(w):
    """(Cout, Cin, 3) Conv1d weight -> (3*Cin, Cout) bf16, taps [t-1; t; t+1]."""
    return jnp.concatenate([w[:, :, 0].T, w[:, :, 1].T, w[:, :, 2].T],
                           axis=0).astype(BF16)


def _full_spec(a):
    zeros = (0,) * a.ndim
    return pl.BlockSpec(a.shape, lambda b: zeros)


def self_attn_text_encoder(params, text_inputs, *, batch_block=8):
    """Returns (text_outputs (B,128), temporal_weights (B,T,1))."""
    B, T = text_inputs.shape
    # Embedding gather (padding_idx=0 row is zero in the table) -- plain-JAX glue.
    emb = jnp.take(params['emb'], text_inputs, axis=0)           # (B, T, 128) f32

    weights = (
        _prep_conv_w(params['c128_1_w']), params['c128_1_b'].reshape(1, 128),
        _prep_conv_w(params['c128_2_w']),
        params['bn128_scale'].reshape(1, 128), params['bn128_shift'].reshape(1, 128),
        _prep_conv_w(params['c256_1_w']), params['c256_1_b'].reshape(1, 256),
        _prep_conv_w(params['c256_2_w']),
        params['bn256_scale'].reshape(1, 256), params['bn256_shift'].reshape(1, 256),
        params['lstm_wih'].T.astype(BF16), params['lstm_whh'].T.astype(BF16),
        (params['lstm_bih'] + params['lstm_bhh']).reshape(1, 4 * LSTM_H),
        params['attn_w1'].astype(BF16), params['attn_b1'].reshape(1, LSTM_H),
        params['attn_w2'].reshape(1, LSTM_H),     # score bias is a softmax no-op
        params['out_w1'].astype(BF16), params['out_b1'].reshape(1, LSTM_H),
        params['out_w2'].astype(BF16), params['out_b2'].reshape(1, 128),
    )

    BB = B if B <= batch_block else batch_block
    grid = (pl.cdiv(B, BB),)

    out, wts = pl.pallas_call(
        _encoder_kernel,
        out_shape=(jax.ShapeDtypeStruct((B, 128), F32),
                   jax.ShapeDtypeStruct((B, T), F32)),
        grid=grid,
        in_specs=[pl.BlockSpec((BB, T, EMB_C), lambda b: (b, 0, 0))] +
                 [_full_spec(a) for a in weights],
        out_specs=(pl.BlockSpec((BB, 128), lambda b: (b, 0)),
                   pl.BlockSpec((BB, T), lambda b: (b, 0))),
        scratch_shapes=[pltpu.VMEM((BB, T + 2, 256), F32),        # conv halo pad
                        pltpu.VMEM((BB, T, 4 * LSTM_H), F32),     # hoisted x@W_ih
                        pltpu.VMEM((BB, T, LSTM_H), F32)],        # LSTM h sequence
        compiler_params=pltpu.CompilerParams(
            dimension_semantics=("parallel",),
            vmem_limit_bytes=48 * 1024 * 1024),
    )(emb, *weights)

    return out, wts[:, :, None]                                   # (B,128), (B,T,1)


# ----------------------------------------------------------------- param init
def init_params(key, dict_size):
    ks = jax.random.split(key, 20)
    n = lambda k, shp, s=0.05: (s * jax.random.normal(k, shp)).astype(jnp.float32)
    eps = 1e-5

    emb = n(ks[0], (dict_size, 128))
    emb = emb.at[0].set(0.0)                                       # padding_idx=0

    def bn(kg, kb, km, kv, C):
        gamma = 1.0 + n(kg, (C,))
        beta = n(kb, (C,))
        mean = n(km, (C,))
        var = jnp.abs(n(kv, (C,))) + 0.5
        scale = gamma / jnp.sqrt(var + eps)
        shift = beta - mean * scale
        return scale, shift

    bn128_scale, bn128_shift = bn(ks[5], ks[6], ks[7], ks[8], 128)
    bn256_scale, bn256_shift = bn(ks[11], ks[12], ks[13], ks[14], 256)

    # Linear-layer weights are stored (in, out); Conv1d weights as (Cout, Cin, 3).
    return dict(
        emb=emb,
        c128_1_w=n(ks[1], (128, 128, 3)), c128_1_b=n(ks[2], (128,)),
        c128_2_w=n(ks[3], (128, 128, 3)),
        bn128_scale=bn128_scale, bn128_shift=bn128_shift,
        c256_1_w=n(ks[4], (256, 128, 3)), c256_1_b=n(ks[9], (256,)),
        c256_2_w=n(ks[10], (256, 256, 3)),
        bn256_scale=bn256_scale, bn256_shift=bn256_shift,
        lstm_wih=n(ks[15], (1024, 256)), lstm_whh=n(ks[16], (1024, 256)),
        lstm_bih=n(ks[17], (1024,)), lstm_bhh=n(ks[18], (1024,)),
        attn_w1=n(ks[19], (256, 256)), attn_b1=jnp.zeros((256,), jnp.float32),
        attn_w2=n(jax.random.fold_in(key, 100), (256, 1)),
        attn_b2=jnp.zeros((1,), jnp.float32),
        out_w1=n(jax.random.fold_in(key, 101), (256, 256)),
        out_b1=jnp.zeros((256,), jnp.float32),
        out_w2=n(jax.random.fold_in(key, 102), (256, 128)),
        out_b2=jnp.zeros((128,), jnp.float32),
    )


if __name__ == "__main__":
    key = jax.random.PRNGKey(0)
    dict_size = 50
    B, T = 2, 8

    params = init_params(key, dict_size)
    text_inputs = jax.random.randint(jax.random.fold_in(key, 999),
                                     (B, T), 0, dict_size, dtype=jnp.int32)

    text_outputs, temporal_weights = self_attn_text_encoder(params, text_inputs)
    jax.block_until_ready((text_outputs, temporal_weights))

    assert text_outputs.shape == (B, 128)
    assert temporal_weights.shape == (B, T, 1)
    assert bool(jnp.all(jnp.isfinite(text_outputs)))
    assert bool(jnp.all(jnp.isfinite(temporal_weights)))
    assert bool(jnp.allclose(jnp.sum(temporal_weights[:, :, 0], axis=-1),
                             1.0, atol=1e-3))
    print("KERNEL_OK")
</pallas_src>

<mosaic_0001>
module attributes {stable_mosaic.version = 11 : i64} {
  func.func @_encoder_kernel(%arg0: i32, %arg1: memref<2x8x128xf32, #tpu.memory_space<vmem>>, %arg2: memref<384x128xbf16, #tpu.memory_space<vmem>>, %arg3: memref<1x128xf32, #tpu.memory_space<vmem>>, %arg4: memref<384x128xbf16, #tpu.memory_space<vmem>>, %arg5: memref<1x128xf32, #tpu.memory_space<vmem>>, %arg6: memref<1x128xf32, #tpu.memory_space<vmem>>, %arg7: memref<384x256xbf16, #tpu.memory_space<vmem>>, %arg8: memref<1x256xf32, #tpu.memory_space<vmem>>, %arg9: memref<768x256xbf16, #tpu.memory_space<vmem>>, %arg10: memref<1x256xf32, #tpu.memory_space<vmem>>, %arg11: memref<1x256xf32, #tpu.memory_space<vmem>>, %arg12: memref<256x1024xbf16, #tpu.memory_space<vmem>>, %arg13: memref<256x1024xbf16, #tpu.memory_space<vmem>>, %arg14: memref<1x1024xf32, #tpu.memory_space<vmem>>, %arg15: memref<256x256xbf16, #tpu.memory_space<vmem>>, %arg16: memref<1x256xf32, #tpu.memory_space<vmem>>, %arg17: memref<1x256xf32, #tpu.memory_space<vmem>>, %arg18: memref<256x256xbf16, #tpu.memory_space<vmem>>, %arg19: memref<1x256xf32, #tpu.memory_space<vmem>>, %arg20: memref<256x128xbf16, #tpu.memory_space<vmem>>, %arg21: memref<1x128xf32, #tpu.memory_space<vmem>>, %arg22: memref<2x128xf32, #tpu.memory_space<vmem>>, %arg23: memref<2x8xf32, #tpu.memory_space<vmem>>, %arg24: memref<2x10x256xf32, #tpu.memory_space<vmem>>, %arg25: memref<2x8x1024xf32, #tpu.memory_space<vmem>>, %arg26: memref<2x8x256xf32, #tpu.memory_space<vmem>>) attributes {dimension_semantics = [#tpu.dimension_semantics<parallel>], iteration_bounds = array<i64: 1>, scalar_prefetch = 0 : i64, scratch_operands = 3 : i64, tpu.core_type = #tpu.core_type<tc>, window_params = [{transform_indices = @transform_0, window_bounds = array<i64: 2, 8, 128>}, {pipeline_mode = #tpu.pipeline_mode<synchronous>, transform_indices = @transform_1, window_bounds = array<i64: 384, 128>}, {pipeline_mode = #tpu.pipeline_mode<synchronous>, transform_indices = @transform_2, window_bounds = array<i64: 1, 128>}, {pipeline_mode = #tpu.pipeline_mode<synchronous>, transform_indices = @transform_3, window_bounds = array<i64: 384, 128>}, {pipeline_mode = #tpu.pipeline_mode<synchronous>, transform_indices = @transform_4, window_bounds = array<i64: 1, 128>}, {pipeline_mode = #tpu.pipeline_mode<synchronous>, transform_indices = @transform_5, window_bounds = array<i64: 1, 128>}, {pipeline_mode = #tpu.pipeline_mode<synchronous>, transform_indices = @transform_6, window_bounds = array<i64: 384, 256>}, {pipeline_mode = #tpu.pipeline_mode<synchronous>, transform_indices = @transform_7, window_bounds = array<i64: 1, 256>}, {pipeline_mode = #tpu.pipeline_mode<synchronous>, transform_indices = @transform_8, window_bounds = array<i64: 768, 256>}, {pipeline_mode = #tpu.pipeline_mode<synchronous>, transform_indices = @transform_9, window_bounds = array<i64: 1, 256>}, {pipeline_mode = #tpu.pipeline_mode<synchronous>, transform_indices = @transform_10, window_bounds = array<i64: 1, 256>}, {pipeline_mode = #tpu.pipeline_mode<synchronous>, transform_indices = @transform_11, window_bounds = array<i64: 256, 1024>}, {pipeline_mode = #tpu.pipeline_mode<synchronous>, transform_indices = @transform_12, window_bounds = array<i64: 256, 1024>}, {pipeline_mode = #tpu.pipeline_mode<synchronous>, transform_indices = @transform_13, window_bounds = array<i64: 1, 1024>}, {pipeline_mode = #tpu.pipeline_mode<synchronous>, transform_indices = @transform_14, window_bounds = array<i64: 256, 256>}, {pipeline_mode = #tpu.pipeline_mode<synchronous>, transform_indices = @transform_15, window_bounds = array<i64: 1, 256>}, {pipeline_mode = #tpu.pipeline_mode<synchronous>, transform_indices = @transform_16, window_bounds = array<i64: 1, 256>}, {pipeline_mode = #tpu.pipeline_mode<synchronous>, transform_indices = @transform_17, window_bounds = array<i64: 256, 256>}, {pipeline_mode = #tpu.pipeline_mode<synchronous>, transform_indices = @transform_18, window_bounds = array<i64: 1, 256>}, {pipeline_mode = #tpu.pipeline_mode<synchronous>, transform_indices = @transform_19, window_bounds = array<i64: 256, 128>}, {pipeline_mode = #tpu.pipeline_mode<synchronous>, transform_indices = @transform_20, window_bounds = array<i64: 1, 128>}, {transform_indices = @transform_21, window_bounds = array<i64: 2, 128>}, {transform_indices = @transform_22, window_bounds = array<i64: 2, 8>}]} {
    %cst = arith.constant 0.000000e+00 : f32
    %0 = vector.broadcast %cst : f32 to vector<2x1x256xf32>
    %c0 = arith.constant 0 : index
    %c0_0 = arith.constant 0 : index
    %c0_1 = arith.constant 0 : index
    %1 = vector.load %arg24[%c0, %c0_0, %c0_1] : memref<2x10x256xf32, #tpu.memory_space<vmem>>, vector<2x1x256xf32>
    tpu.vector_store %arg24[%c0, %c0_0, %c0_1], %0 {strides = array<i32>} : memref<2x10x256xf32, #tpu.memory_space<vmem>>, vector<2x1x256xf32>,
    %c0_2 = arith.constant 0 : index
    %c9 = arith.constant 9 : index
    %c0_3 = arith.constant 0 : index
    %2 = vector.load %arg24[%c0_2, %c9, %c0_3] : memref<2x10x256xf32, #tpu.memory_space<vmem>>, vector<2x1x256xf32>
    tpu.vector_store %arg24[%c0_2, %c9, %c0_3], %0 {strides = array<i32>} : memref<2x10x256xf32, #tpu.memory_space<vmem>>, vector<2x1x256xf32>,
    %c0_4 = arith.constant 0 : index
    %c0_5 = arith.constant 0 : index
    %c0_6 = arith.constant 0 : index
    %3 = vector.load %arg1[%c0_4, %c0_5, %c0_6] : memref<2x8x128xf32, #tpu.memory_space<vmem>>, vector<2x8x128xf32>
    %c0_7 = arith.constant 0 : index
    %c0_8 = arith.constant 0 : index
    %4 = vector.load %arg3[%c0_7, %c0_8] : memref<1x128xf32, #tpu.memory_space<vmem>>, vector<1x128xf32>
    %c0_9 = arith.constant 0 : index
    %c1 = arith.constant 1 : index
    %c0_10 = arith.constant 0 : index
    %5 = vector.load %arg24[%c0_9, %c1, %c0_10] : memref<2x10x256xf32, #tpu.memory_space<vmem>>, vector<2x8x128xf32>
    tpu.vector_store %arg24[%c0_9, %c1, %c0_10], %3 {strides = array<i32>} : memref<2x10x256xf32, #tpu.memory_space<vmem>>, vector<2x8x128xf32>,
    %c0_11 = arith.constant 0 : index
    %c0_12 = arith.constant 0 : index
    %c0_13 = arith.constant 0 : index
    %6 = vector.load %arg24[%c0_11, %c0_12, %c0_13] : memref<2x10x256xf32, #tpu.memory_space<vmem>>, vector<2x8x128xf32>
    %c0_14 = arith.constant 0 : index
    %c2 = arith.constant 2 : index
    %c0_15 = arith.constant 0 : index
    %7 = vector.load %arg24[%c0_14, %c2, %c0_15] : memref<2x10x256xf32, #tpu.memory_space<vmem>>, vector<2x8x128xf32>
    %8 = tpu.concatenate %6, %3, %7 in 2 : vector<2x8x128xf32>, vector<2x8x128xf32>, vector<2x8x128xf32> -> vector<2x8x384xf32>
    %9 = arith.truncf %8 : vector<2x8x384xf32> to vector<2x8x384xbf16>
    %c0_16 = arith.constant 0 : index
    %c0_17 = arith.constant 0 : index
    %10 = vector.load %arg2[%c0_16, %c0_17] : memref<384x128xbf16, #tpu.memory_space<vmem>>, vector<384x128xbf16>
    "tpu.trace_start"() <{level = 10 : i32, message = "btk,kd->btd"}> : () -> ()
    %cst_18 = arith.constant dense<0.000000e+00> : vector<2x8x128xf32>
    %11 = tpu.matmul %9, %10, %cst_18 {dimension_numbers = #tpu.dot_dimension_numbers<[2], [0], [0, 1], [1], [0, 0, 0, 1, 1, 1], [], []>} : vector<2x8x384xbf16>, vector<384x128xbf16>, vector<2x8x128xf32> -> vector<2x8x128xf32>
    "tpu.trace_stop"() : () -> ()
    %12 = vector.shape_cast %4 : vector<1x128xf32> to vector<1x1x128xf32>
    %13 = vector.broadcast %12 : vector<1x1x128xf32> to vector<2x8x128xf32>
    %14 = arith.addf %11, %13 : vector<2x8x128xf32>
    %cst_19 = arith.constant 0.000000e+00 : f32
    %15 = vector.broadcast %cst_19 : f32 to vector<2x8x128xf32>
    %16 = arith.maximumf %14, %15 : vector<2x8x128xf32>
    %c0_20 = arith.constant 0 : index
    %c0_21 = arith.constant 0 : index
    %17 = vector.load %arg5[%c0_20, %c0_21] : memref<1x128xf32, #tpu.memory_space<vmem>>, vector<1x128xf32>
    %c0_22 = arith.constant 0 : index
    %c0_23 = arith.constant 0 : index
    %18 = vector.load %arg6[%c0_22, %c0_23] : memref<1x128xf32, #tpu.memory_space<vmem>>, vector<1x128xf32>
    %c0_24 = arith.constant 0 : index
    %c1_25 = arith.constant 1 : index
    %c0_26 = arith.constant 0 : index
    %19 = vector.load %arg24[%c0_24, %c1_25, %c0_26] : memref<2x10x256xf32, #tpu.memory_space<vmem>>, vector<2x8x128xf32>
    tpu.vector_store %arg24[%c0_24, %c1_25, %c0_26], %16 {strides = array<i32>} : memref<2x10x256xf32, #tpu.memory_space<vmem>>, vector<2x8x128xf32>,
    %c0_27 = arith.constant 0 : index
    %c0_28 = arith.constant 0 : index
    %c0_29 = arith.constant 0 : index
    %20 = vector.load %arg24[%c0_27, %c0_28, %c0_29] : memref<2x10x256xf32, #tpu.memory_space<vmem>>, vector<2x8x128xf32>
    %c0_30 = arith.constant 0 : index
    %c2_31 = arith.constant 2 : index
    %c0_32 = arith.constant 0 : index
    %21 = vector.load %arg24[%c0_30, %c2_31, %c0_32] : memref<2x10x256xf32, #tpu.memory_space<vmem>>, vector<2x8x128xf32>
    %22 = tpu.concatenate %20, %16, %21 in 2 : vector<2x8x128xf32>, vector<2x8x128xf32>, vector<2x8x128xf32> -> vector<2x8x384xf32>
    %23 = arith.truncf %22 : vector<2x8x384xf32> to vector<2x8x384xbf16>
    %c0_33 = arith.constant 0 : index
    %c0_34 = arith.constant 0 : index
    %24 = vector.load %arg4[%c0_33, %c0_34] : memref<384x128xbf16, #tpu.memory_space<vmem>>, vector<384x128xbf16>
    "tpu.trace_start"() <{level = 10 : i32, message = "btk,kd->btd"}> : () -> ()
    %cst_35 = arith.constant dense<0.000000e+00> : vector<2x8x128xf32>
    %25 = tpu.matmul %23, %24, %cst_35 {dimension_numbers = #tpu.dot_dimension_numbers<[2], [0], [0, 1], [1], [0, 0, 0, 1, 1, 1], [], []>} : vector<2x8x384xbf16>, vector<384x128xbf16>, vector<2x8x128xf32> -> vector<2x8x128xf32>
    "tpu.trace_stop"() : () -> ()
    %cst_36 = arith.constant 0.000000e+00 : f32
    %26 = vector.broadcast %cst_36 : f32 to vector<2x8x128xf32>
    %27 = arith.maximumf %25, %26 : vector<2x8x128xf32>
    %28 = vector.shape_cast %17 : vector<1x128xf32> to vector<1x1x128xf32>
    %29 = vector.broadcast %28 : vector<1x1x128xf32> to vector<2x8x128xf32>
    %30 = arith.mulf %27, %29 : vector<2x8x128xf32>
    %31 = vector.shape_cast %18 : vector<1x128xf32> to vector<1x1x128xf32>
    %32 = vector.broadcast %31 : vector<1x1x128xf32> to vector<2x8x128xf32>
    %33 = arith.addf %30, %32 : vector<2x8x128xf32>
    %c0_37 = arith.constant 0 : index
    %c0_38 = arith.constant 0 : index
    %34 = vector.load %arg8[%c0_37, %c0_38] : memref<1x256xf32, #tpu.memory_space<vmem>>, vector<1x256xf32>
    %c0_39 = arith.constant 0 : index
    %c1_40 = arith.constant 1 : index
    %c0_41 = arith.constant 0 : index
    %35 = vector.load %arg24[%c0_39, %c1_40, %c0_41] : memref<2x10x256xf32, #tpu.memory_space<vmem>>, vector<2x8x128xf32>
    tpu.vector_store %arg24[%c0_39, %c1_40, %c0_41], %33 {strides = array<i32>} : memref<2x10x256xf32, #tpu.memory_space<vmem>>, vector<2x8x128xf32>,
    %c0_42 = arith.constant 0 : index
    %c0_43 = arith.constant 0 : index
    %c0_44 = arith.constant 0 : index
    %36 = vector.load %arg24[%c0_42, %c0_43, %c0_44] : memref<2x10x256xf32, #tpu.memory_space<vmem>>, vector<2x8x128xf32>
    %c0_45 = arith.constant 0 : index
    %c2_46 = arith.constant 2 : index
    %c0_47 = arith.constant 0 : index
    %37 = vector.load %arg24[%c0_45, %c2_46, %c0_47] : memref<2x10x256xf32, #tpu.memory_space<vmem>>, vector<2x8x128xf32>
    %38 = tpu.concatenate %36, %33, %37 in 2 : vector<2x8x128xf32>, vector<2x8x128xf32>, vector<2x8x128xf32> -> vector<2x8x384xf32>
    %39 = arith.truncf %38 : vector<2x8x384xf32> to vector<2x8x384xbf16>
    %c0_48 = arith.constant 0 : index
    %c0_49 = arith.constant 0 : index
    %40 = vector.load %arg7[%c0_48, %c0_49] : memref<384x256xbf16, #tpu.memory_space<vmem>>, vector<384x256xbf16>
    "tpu.trace_start"() <{level = 10 : i32, message = "btk,kd->btd"}> : () -> ()
    %cst_50 = arith.constant dense<0.000000e+00> : vector<2x8x256xf32>
    %41 = tpu.matmul %39, %40, %cst_50 {dimension_numbers = #tpu.dot_dimension_numbers<[2], [0], [0, 1], [1], [0, 0, 0, 1, 1, 1], [], []>} : vector<2x8x384xbf16>, vector<384x256xbf16>, vector<2x8x256xf32> -> vector<2x8x256xf32>
    "tpu.trace_stop"() : () -> ()
    %42 = vector.shape_cast %34 : vector<1x256xf32> to vector<1x1x256xf32>
    %43 = vector.broadcast %42 : vector<1x1x256xf32> to vector<2x8x256xf32>
    %44 = arith.addf %41, %43 : vector<2x8x256xf32>
    %cst_51 = arith.constant 0.000000e+00 : f32
    %45 = vector.broadcast %cst_51 : f32 to vector<2x8x256xf32>
    %46 = arith.maximumf %44, %45 : vector<2x8x256xf32>
    %c0_52 = arith.constant 0 : index
    %c0_53 = arith.constant 0 : index
    %47 = vector.load %arg10[%c0_52, %c0_53] : memref<1x256xf32, #tpu.memory_space<vmem>>, vector<1x256xf32>
    %c0_54 = arith.constant 0 : index
    %c0_55 = arith.constant 0 : index
    %48 = vector.load %arg11[%c0_54, %c0_55] : memref<1x256xf32, #tpu.memory_space<vmem>>, vector<1x256xf32>
    %c0_56 = arith.constant 0 : index
    %c1_57 = arith.constant 1 : index
    %c0_58 = arith.constant 0 : index
    %49 = vector.load %arg24[%c0_56, %c1_57, %c0_58] : memref<2x10x256xf32, #tpu.memory_space<vmem>>, vector<2x8x256xf32>
    tpu.vector_store %arg24[%c0_56, %c1_57, %c0_58], %46 {strides = array<i32>} : memref<2x10x256xf32, #tpu.memory_space<vmem>>, vector<2x8x256xf32>,
    %c0_59 = arith.constant 0 : index
    %c0_60 = arith.constant 0 : index
    %c0_61 = arith.constant 0 : index
    %50 = vector.load %arg24[%c0_59, %c0_60, %c0_61] : memref<2x10x256xf32, #tpu.memory_space<vmem>>, vector<2x8x256xf32>
    %c0_62 = arith.constant 0 : index
    %c2_63 = arith.constant 2 : index
    %c0_64 = arith.constant 0 : index
    %51 = vector.load %arg24[%c0_62, %c2_63, %c0_64] : memref<2x10x256xf32, #tpu.memory_space<vmem>>, vector<2x8x256xf32>
    %52 = tpu.concatenate %50, %46, %51 in 2 : vector<2x8x256xf32>, vector<2x8x256xf32>, vector<2x8x256xf32> -> vector<2x8x768xf32>
    %53 = arith.truncf %52 : vector<2x8x768xf32> to vector<2x8x768xbf16>
    %c0_65 = arith.constant 0 : index
    %c0_66 = arith.constant 0 : index
    %54 = vector.load %arg9[%c0_65, %c0_66] : memref<768x256xbf16, #tpu.memory_space<vmem>>, vector<768x256xbf16>
    "tpu.trace_start"() <{level = 10 : i32, message = "btk,kd->btd"}> : () -> ()
    %cst_67 = arith.constant dense<0.000000e+00> : vector<2x8x256xf32>
    %55 = tpu.matmul %53, %54, %cst_67 {dimension_numbers = #tpu.dot_dimension_numbers<[2], [0], [0, 1], [1], [0, 0, 0, 1, 1, 1], [], []>} : vector<2x8x768xbf16>, vector<768x256xbf16>, vector<2x8x256xf32> -> vector<2x8x256xf32>
    "tpu.trace_stop"() : () -> ()
    %cst_68 = arith.constant 0.000000e+00 : f32
    %56 = vector.broadcast %cst_68 : f32 to vector<2x8x256xf32>
    %57 = arith.maximumf %55, %56 : vector<2x8x256xf32>
    %58 = vector.shape_cast %47 : vector<1x256xf32> to vector<1x1x256xf32>
    %59 = vector.broadcast %58 : vector<1x1x256xf32> to vector<2x8x256xf32>
    %60 = arith.mulf %57, %59 : vector<2x8x256xf32>
    %61 = vector.shape_cast %48 : vector<1x256xf32> to vector<1x1x256xf32>
    %62 = vector.broadcast %61 : vector<1x1x256xf32> to vector<2x8x256xf32>
    %63 = arith.addf %60, %62 : vector<2x8x256xf32>
    %64 = arith.truncf %63 : vector<2x8x256xf32> to vector<2x8x256xbf16>
    %c0_69 = arith.constant 0 : index
    %c0_70 = arith.constant 0 : index
    %65 = vector.load %arg12[%c0_69, %c0_70] : memref<256x1024xbf16, #tpu.memory_space<vmem>>, vector<256x1024xbf16>
    "tpu.trace_start"() <{level = 10 : i32, message = "bth,hg->btg"}> : () -> ()
    %cst_71 = arith.constant dense<0.000000e+00> : vector<2x8x1024xf32>
    %66 = tpu.matmul %64, %65, %cst_71 {dimension_numbers = #tpu.dot_dimension_numbers<[2], [0], [0, 1], [1], [0, 0, 0, 1, 1, 1], [], []>} : vector<2x8x256xbf16>, vector<256x1024xbf16>, vector<2x8x1024xf32> -> vector<2x8x1024xf32>
    "tpu.trace_stop"() : () -> ()
    %c0_72 = arith.constant 0 : index
    %c0_73 = arith.constant 0 : index
    %67 = vector.load %arg14[%c0_72, %c0_73] : memref<1x1024xf32, #tpu.memory_space<vmem>>, vector<1x1024xf32>
    %68 = vector.shape_cast %67 : vector<1x1024xf32> to vector<1x1x1024xf32>
    %69 = vector.broadcast %68 : vector<1x1x1024xf32> to vector<2x8x1024xf32>
    %70 = arith.addf %66, %69 : vector<2x8x1024xf32>
    %c0_74 = arith.constant 0 : index
    %c0_75 = arith.constant 0 : index
    %c0_76 = arith.constant 0 : index
    %71 = vector.load %arg25[%c0_74, %c0_75, %c0_76] : memref<2x8x1024xf32, #tpu.memory_space<vmem>>, vector<2x8x1024xf32>
    tpu.vector_store %arg25[%c0_74, %c0_75, %c0_76], %70 {strides = array<i32>} : memref<2x8x1024xf32, #tpu.memory_space<vmem>>, vector<2x8x1024xf32>,
    %cst_77 = arith.constant 0.000000e+00 : f32
    %72 = vector.broadcast %cst_77 : f32 to vector<2x256xf32>
    %c0_i32 = arith.constant 0 : i32
    %c0_78 = arith.constant 0 : index
    %73 = arith.index_cast %c0_i32 : i32 to index
    %c0_79 = arith.constant 0 : index
    %74 = vector.load %arg25[%c0_78, %73, %c0_79] : memref<2x8x1024xf32, #tpu.memory_space<vmem>>, vector<2x1x1024xf32>
    %75 = vector.shape_cast %74 : vector<2x1x1024xf32> to vector<2x1024xf32>
    %76 = arith.truncf %72 : vector<2x256xf32> to vector<2x256xbf16>
    %c0_80 = arith.constant 0 : index
    %c0_81 = arith.constant 0 : index
    %77 = vector.load %arg13[%c0_80, %c0_81] : memref<256x1024xbf16, #tpu.memory_space<vmem>>, vector<256x1024xbf16>
    %cst_82 = arith.constant dense<0.000000e+00> : vector<2x1024xf32>
    %78 = tpu.matmul %76, %77, %cst_82 {dimension_numbers = #tpu.dot_dimension_numbers<[1], [0], [0], [1], [0, 0, 1, 1], [], []>} : vector<2x256xbf16>, vector<256x1024xbf16>, vector<2x1024xf32> -> vector<2x1024xf32>
    %79 = arith.addf %75, %78 : vector<2x1024xf32>
    %80 = vector.extract_strided_slice %79 {offsets = [0, 0], sizes = [2, 256], strides = [1, 1]} : vector<2x1024xf32> to vector<2x256xf32>
    %81 = arith.negf %80 : vector<2x256xf32>
    %82 = math.exp %81 : vector<2x256xf32>
    %cst_83 = arith.constant 1.000000e+00 : f32
    %83 = vector.broadcast %cst_83 : f32 to vector<2x256xf32>
    %84 = arith.addf %83, %82 : vector<2x256xf32>
    %85 = arith.divf %83, %84 : vector<2x256xf32>
    %86 = vector.extract_strided_slice %79 {offsets = [0, 256], sizes = [2, 256], strides = [1, 1]} : vector<2x1024xf32> to vector<2x256xf32>
    %87 = arith.negf %86 : vector<2x256xf32>
    %88 = math.exp %87 : vector<2x256xf32>
    %cst_84 = arith.constant 1.000000e+00 : f32
    %89 = vector.broadcast %cst_84 : f32 to vector<2x256xf32>
    %90 = arith.addf %89, %88 : vector<2x256xf32>
    %91 = arith.divf %89, %90 : vector<2x256xf32>
    %92 = vector.extract_strided_slice %79 {offsets = [0, 512], sizes = [2, 256], strides = [1, 1]} : vector<2x1024xf32> to vector<2x256xf32>
    %93 = math.tanh %92 : vector<2x256xf32>
    %94 = vector.extract_strided_slice %79 {offsets = [0, 768], sizes = [2, 256], strides = [1, 1]} : vector<2x1024xf32> to vector<2x256xf32>
    %95 = arith.negf %94 : vector<2x256xf32>
    %96 = math.exp %95 : vector<2x256xf32>
    %cst_85 = arith.constant 1.000000e+00 : f32
    %97 = vector.broadcast %cst_85 : f32 to vector<2x256xf32>
    %98 = arith.addf %97, %96 : vector<2x256xf32>
    %99 = arith.divf %97, %98 : vector<2x256xf32>
    %100 = arith.mulf %91, %72 : vector<2x256xf32>
    %101 = arith.mulf %85, %93 : vector<2x256xf32>
    %102 = arith.addf %100, %101 : vector<2x256xf32>
    %103 = math.tanh %102 : vector<2x256xf32>
    %104 = arith.mulf %99, %103 : vector<2x256xf32>
    %105 = vector.shape_cast %104 : vector<2x256xf32> to vector<2x1x256xf32>
    %c0_86 = arith.constant 0 : index
    %106 = arith.index_cast %c0_i32 : i32 to index
    %c0_87 = arith.constant 0 : index
    %107 = vector.load %arg26[%c0_86, %106, %c0_87] : memref<2x8x256xf32, #tpu.memory_space<vmem>>, vector<2x1x256xf32>
    tpu.vector_store %arg26[%c0_86, %106, %c0_87], %105 {strides = array<i32>} : memref<2x8x256xf32, #tpu.memory_space<vmem>>, vector<2x1x256xf32>,
    %c1_i32 = arith.constant 1 : i32
    %c0_88 = arith.constant 0 : index
    %108 = arith.index_cast %c1_i32 : i32 to index
    %c0_89 = arith.constant 0 : index
    %109 = vector.load %arg25[%c0_88, %108, %c0_89] : memref<2x8x1024xf32, #tpu.memory_space<vmem>>, vector<2x1x1024xf32>
    %110 = vector.shape_cast %109 : vector<2x1x1024xf32> to vector<2x1024xf32>
    %111 = arith.truncf %104 : vector<2x256xf32> to vector<2x256xbf16>
    %c0_90 = arith.constant 0 : index
    %c0_91 = arith.constant 0 : index
    %112 = vector.load %arg13[%c0_90, %c0_91] : memref<256x1024xbf16, #tpu.memory_space<vmem>>, vector<256x1024xbf16>
    %cst_92 = arith.constant dense<0.000000e+00> : vector<2x1024xf32>
    %113 = tpu.matmul %111, %112, %cst_92 {dimension_numbers = #tpu.dot_dimension_numbers<[1], [0], [0], [1], [0, 0, 1, 1], [], []>} : vector<2x256xbf16>, vector<256x1024xbf16>, vector<2x1024xf32> -> vector<2x1024xf32>
    %114 = arith.addf %110, %113 : vector<2x1024xf32>
    %115 = vector.extract_strided_slice %114 {offsets = [0, 0], sizes = [2, 256], strides = [1, 1]} : vector<2x1024xf32> to vector<2x256xf32>
    %116 = arith.negf %115 : vector<2x256xf32>
    %117 = math.exp %116 : vector<2x256xf32>
    %cst_93 = arith.constant 1.000000e+00 : f32
    %118 = vector.broadcast %cst_93 : f32 to vector<2x256xf32>
    %119 = arith.addf %118, %117 : vector<2x256xf32>
    %120 = arith.divf %118, %119 : vector<2x256xf32>
    %121 = vector.extract_strided_slice %114 {offsets = [0, 256], sizes = [2, 256], strides = [1, 1]} : vector<2x1024xf32> to vector<2x256xf32>
    %122 = arith.negf %121 : vector<2x256xf32>
    %123 = math.exp %122 : vector<2x256xf32>
    %cst_94 = arith.constant 1.000000e+00 : f32
    %124 = vector.broadcast %cst_94 : f32 to vector<2x256xf32>
    %125 = arith.addf %124, %123 : vector<2x256xf32>
    %126 = arith.divf %124, %125 : vector<2x256xf32>
    %127 = vector.extract_strided_slice %114 {offsets = [0, 512], sizes = [2, 256], strides = [1, 1]} : vector<2x1024xf32> to vector<2x256xf32>
    %128 = math.tanh %127 : vector<2x256xf32>
    %129 = vector.extract_strided_slice %114 {offsets = [0, 768], sizes = [2, 256], strides = [1, 1]} : vector<2x1024xf32> to vector<2x256xf32>
    %130 = arith.negf %129 : vector<2x256xf32>
    %131 = math.exp %130 : vector<2x256xf32>
    %cst_95 = arith.constant 1.000000e+00 : f32
    %132 = vector.broadcast %cst_95 : f32 to vector<2x256xf32>
    %133 = arith.addf %132, %131 : vector<2x256xf32>
    %134 = arith.divf %132, %133 : vector<2x256xf32>
    %135 = arith.mulf %126, %102 : vector<2x256xf32>
    %136 = arith.mulf %120, %128 : vector<2x256xf32>
    %137 = arith.addf %135, %136 : vector<2x256xf32>
    %138 = math.tanh %137 : vector<2x256xf32>
    %139 = arith.mulf %134, %138 : vector<2x256xf32>
    %140 = vector.shape_cast %139 : vector<2x256xf32> to vector<2x1x256xf32>
    %c0_96 = arith.constant 0 : index
    %141 = arith.index_cast %c1_i32 : i32 to index
    %c0_97 = arith.constant 0 : index
    %142 = vector.load %arg26[%c0_96, %141, %c0_97] : memref<2x8x256xf32, #tpu.memory_space<vmem>>, vector<2x1x256xf32>
    tpu.vector_store %arg26[%c0_96, %141, %c0_97], %140 {strides = array<i32>} : memref<2x8x256xf32, #tpu.memory_space<vmem>>, vector<2x1x256xf32>,
    %c2_i32 = arith.constant 2 : i32
    %c0_98 = arith.constant 0 : index
    %143 = arith.index_cast %c2_i32 : i32 to index
    %c0_99 = arith.constant 0 : index
    %144 = vector.load %arg25[%c0_98, %143, %c0_99] : memref<2x8x1024xf32, #tpu.memory_space<vmem>>, vector<2x1x1024xf32>
    %145 = vector.shape_cast %144 : vector<2x1x1024xf32> to vector<2x1024xf32>
    %146 = arith.truncf %139 : vector<2x256xf32> to vector<2x256xbf16>
    %c0_100 = arith.constant 0 : index
    %c0_101 = arith.constant 0 : index
    %147 = vector.load %arg13[%c0_100, %c0_101] : memref<256x1024xbf16, #tpu.memory_space<vmem>>, vector<256x1024xbf16>
    %cst_102 = arith.constant dense<0.000000e+00> : vector<2x1024xf32>
    %148 = tpu.matmul %146, %147, %cst_102 {dimension_numbers = #tpu.dot_dimension_numbers<[1], [0], [0], [1], [0, 0, 1, 1], [], []>} : vector<2x256xbf16>, vector<256x1024xbf16>, vector<2x1024xf32> -> vector<2x1024xf32>
    %149 = arith.addf %145, %148 : vector<2x1024xf32>
    %150 = vector.extract_strided_slice %149 {offsets = [0, 0], sizes = [2, 256], strides = [1, 1]} : vector<2x1024xf32> to vector<2x256xf32>
    %151 = arith.negf %150 : vector<2x256xf32>
    %152 = math.exp %151 : vector<2x256xf32>
    %cst_103 = arith.constant 1.000000e+00 : f32
    %153 = vector.broadcast %cst_103 : f32 to vector<2x256xf32>
    %154 = arith.addf %153, %152 : vector<2x256xf32>
    %155 = arith.divf %153, %154 : vector<2x256xf32>
    %156 = vector.extract_strided_slice %149 {offsets = [0, 256], sizes = [2, 256], strides = [1, 1]} : vector<2x1024xf32> to vector<2x256xf32>
    %157 = arith.negf %156 : vector<2x256xf32>
    %158 = math.exp %157 : vector<2x256xf32>
    %cst_104 = arith.constant 1.000000e+00 : f32
    %159 = vector.broadcast %cst_104 : f32 to vector<2x256xf32>
    %160 = arith.addf %159, %158 : vector<2x256xf32>
    %161 = arith.divf %159, %160 : vector<2x256xf32>
    %162 = vector.extract_strided_slice %149 {offsets = [0, 512], sizes = [2, 256], strides = [1, 1]} : vector<2x1024xf32> to vector<2x256xf32>
    %163 = math.tanh %162 : vector<2x256xf32>
    %164 = vector.extract_strided_slice %149 {offsets = [0, 768], sizes = [2, 256], strides = [1, 1]} : vector<2x1024xf32> to vector<2x256xf32>
    %165 = arith.negf %164 : vector<2x256xf32>
    %166 = math.exp %165 : vector<2x256xf32>
    %cst_105 = arith.constant 1.000000e+00 : f32
    %167 = vector.broadcast %cst_105 : f32 to vector<2x256xf32>
    %168 = arith.addf %167, %166 : vector<2x256xf32>
    %169 = arith.divf %167, %168 : vector<2x256xf32>
    %170 = arith.mulf %161, %137 : vector<2x256xf32>
    %171 = arith.mulf %155, %163 : vector<2x256xf32>
    %172 = arith.addf %170, %171 : vector<2x256xf32>
    %173 = math.tanh %172 : vector<2x256xf32>
    %174 = arith.mulf %169, %173 : vector<2x256xf32>
    %175 = vector.shape_cast %174 : vector<2x256xf32> to vector<2x1x256xf32>
    %c0_106 = arith.constant 0 : index
    %176 = arith.index_cast %c2_i32 : i32 to index
    %c0_107 = arith.constant 0 : index
    %177 = vector.load %arg26[%c0_106, %176, %c0_107] : memref<2x8x256xf32, #tpu.memory_space<vmem>>, vector<2x1x256xf32>
    tpu.vector_store %arg26[%c0_106, %176, %c0_107], %175 {strides = array<i32>} : memref<2x8x256xf32, #tpu.memory_space<vmem>>, vector<2x1x256xf32>,
    %c3_i32 = arith.constant 3 : i32
    %c0_108 = arith.constant 0 : index
    %178 = arith.index_cast %c3_i32 : i32 to index
    %c0_109 = arith.constant 0 : index
    %179 = vector.load %arg25[%c0_108, %178, %c0_109] : memref<2x8x1024xf32, #tpu.memory_space<vmem>>, vector<2x1x1024xf32>
    %180 = vector.shape_cast %179 : vector<2x1x1024xf32> to vector<2x1024xf32>
    %181 = arith.truncf %174 : vector<2x256xf32> to vector<2x256xbf16>
    %c0_110 = arith.constant 0 : index
    %c0_111 = arith.constant 0 : index
    %182 = vector.load %arg13[%c0_110, %c0_111] : memref<256x1024xbf16, #tpu.memory_space<vmem>>, vector<256x1024xbf16>
    %cst_112 = arith.constant dense<0.000000e+00> : vector<2x1024xf32>
    %183 = tpu.matmul %181, %182, %cst_112 {dimension_numbers = #tpu.dot_dimension_numbers<[1], [0], [0], [1], [0, 0, 1, 1], [], []>} : vector<2x256xbf16>, vector<256x1024xbf16>, vector<2x1024xf32> -> vector<2x1024xf32>
    %184 = arith.addf %180, %183 : vector<2x1024xf32>
    %185 = vector.extract_strided_slice %184 {offsets = [0, 0], sizes = [2, 256], strides = [1, 1]} : vector<2x1024xf32> to vector<2x256xf32>
    %186 = arith.negf %185 : vector<2x256xf32>
    %187 = math.exp %186 : vector<2x256xf32>
    %cst_113 = arith.constant 1.000000e+00 : f32
    %188 = vector.broadcast %cst_113 : f32 to vector<2x256xf32>
    %189 = arith.addf %188, %187 : vector<2x256xf32>
    %190 = arith.divf %188, %189 : vector<2x256xf32>
    %191 = vector.extract_strided_slice %184 {offsets = [0, 256], sizes = [2, 256], strides = [1, 1]} : vector<2x1024xf32> to vector<2x256xf32>
    %192 = arith.negf %191 : vector<2x256xf32>
    %193 = math.exp %192 : vector<2x256xf32>
    %cst_114 = arith.constant 1.000000e+00 : f32
    %194 = vector.broadcast %cst_114 : f32 to vector<2x256xf32>
    %195 = arith.addf %194, %193 : vector<2x256xf32>
    %196 = arith.divf %194, %195 : vector<2x256xf32>
    %197 = vector.extract_strided_slice %184 {offsets = [0, 512], sizes = [2, 256], strides = [1, 1]} : vector<2x1024xf32> to vector<2x256xf32>
    %198 = math.tanh %197 : vector<2x256xf32>
    %199 = vector.extract_strided_slice %184 {offsets = [0, 768], sizes = [2, 256], strides = [1, 1]} : vector<2x1024xf32> to vector<2x256xf32>
    %200 = arith.negf %199 : vector<2x256xf32>
    %201 = math.exp %200 : vector<2x256xf32>
    %cst_115 = arith.constant 1.000000e+00 : f32
    %202 = vector.broadcast %cst_115 : f32 to vector<2x256xf32>
    %203 = arith.addf %202, %201 : vector<2x256xf32>
    %204 = arith.divf %202, %203 : vector<2x256xf32>
    %205 = arith.mulf %196, %172 : vector<2x256xf32>
    %206 = arith.mulf %190, %198 : vector<2x256xf32>
    %207 = arith.addf %205, %206 : vector<2x256xf32>
    %208 = math.tanh %207 : vector<2x256xf32>
    %209 = arith.mulf %204, %208 : vector<2x256xf32>
    %210 = vector.shape_cast %209 : vector<2x256xf32> to vector<2x1x256xf32>
    %c0_116 = arith.constant 0 : index
    %211 = arith.index_cast %c3_i32 : i32 to index
    %c0_117 = arith.constant 0 : index
    %212 = vector.load %arg26[%c0_116, %211, %c0_117] : memref<2x8x256xf32, #tpu.memory_space<vmem>>, vector<2x1x256xf32>
    tpu.vector_store %arg26[%c0_116, %211, %c0_117], %210 {strides = array<i32>} : memref<2x8x256xf32, #tpu.memory_space<vmem>>, vector<2x1x256xf32>,
    %c4_i32 = arith.constant 4 : i32
    %c0_118 = arith.constant 0 : index
    %213 = arith.index_cast %c4_i32 : i32 to index
    %c0_119 = arith.constant 0 : index
    %214 = vector.load %arg25[%c0_118, %213, %c0_119] : memref<2x8x1024xf32, #tpu.memory_space<vmem>>, vector<2x1x1024xf32>
    %215 = vector.shape_cast %214 : vector<2x1x1024xf32> to vector<2x1024xf32>
    %216 = arith.truncf %209 : vector<2x256xf32> to vector<2x256xbf16>
    %c0_120 = arith.constant 0 : index
    %c0_121 = arith.constant 0 : index
    %217 = vector.load %arg13[%c0_120, %c0_121] : memref<256x1024xbf16, #tpu.memory_space<vmem>>, vector<256x1024xbf16>
    %cst_122 = arith.constant dense<0.000000e+00> : vector<2x1024xf32>
    %218 = tpu.matmul %216, %217, %cst_122 {dimension_numbers = #tpu.dot_dimension_numbers<[1], [0], [0], [1], [0, 0, 1, 1], [], []>} : vector<2x256xbf16>, vector<256x1024xbf16>, vector<2x1024xf32> -> vector<2x1024xf32>
    %219 = arith.addf %215, %218 : vector<2x1024xf32>
    %220 = vector.extract_strided_slice %219 {offsets = [0, 0], sizes = [2, 256], strides = [1, 1]} : vector<2x1024xf32> to vector<2x256xf32>
    %221 = arith.negf %220 : vector<2x256xf32>
    %222 = math.exp %221 : vector<2x256xf32>
    %cst_123 = arith.constant 1.000000e+00 : f32
    %223 = vector.broadcast %cst_123 : f32 to vector<2x256xf32>
    %224 = arith.addf %223, %222 : vector<2x256xf32>
    %225 = arith.divf %223, %224 : vector<2x256xf32>
    %226 = vector.extract_strided_slice %219 {offsets = [0, 256], sizes = [2, 256], strides = [1, 1]} : vector<2x1024xf32> to vector<2x256xf32>
    %227 = arith.negf %226 : vector<2x256xf32>
    %228 = math.exp %227 : vector<2x256xf32>
    %cst_124 = arith.constant 1.000000e+00 : f32
    %229 = vector.broadcast %cst_124 : f32 to vector<2x256xf32>
    %230 = arith.addf %229, %228 : vector<2x256xf32>
    %231 = arith.divf %229, %230 : vector<2x256xf32>
    %232 = vector.extract_strided_slice %219 {offsets = [0, 512], sizes = [2, 256], strides = [1, 1]} : vector<2x1024xf32> to vector<2x256xf32>
    %233 = math.tanh %232 : vector<2x256xf32>
    %234 = vector.extract_strided_slice %219 {offsets = [0, 768], sizes = [2, 256], strides = [1, 1]} : vector<2x1024xf32> to vector<2x256xf32>
    %235 = arith.negf %234 : vector<2x256xf32>
    %236 = math.exp %235 : vector<2x256xf32>
    %cst_125 = arith.constant 1.000000e+00 : f32
    %237 = vector.broadcast %cst_125 : f32 to vector<2x256xf32>
    %238 = arith.addf %237, %236 : vector<2x256xf32>
    %239 = arith.divf %237, %238 : vector<2x256xf32>
    %240 = arith.mulf %231, %207 : vector<2x256xf32>
    %241 = arith.mulf %225, %233 : vector<2x256xf32>
    %242 = arith.addf %240, %241 : vector<2x256xf32>
    %243 = math.tanh %242 : vector<2x256xf32>
    %244 = arith.mulf %239, %243 : vector<2x256xf32>
    %245 = vector.shape_cast %244 : vector<2x256xf32> to vector<2x1x256xf32>
    %c0_126 = arith.constant 0 : index
    %246 = arith.index_cast %c4_i32 : i32 to index
    %c0_127 = arith.constant 0 : index
    %247 = vector.load %arg26[%c0_126, %246, %c0_127] : memref<2x8x256xf32, #tpu.memory_space<vmem>>, vector<2x1x256xf32>
    tpu.vector_store %arg26[%c0_126, %246, %c0_127], %245 {strides = array<i32>} : memref<2x8x256xf32, #tpu.memory_space<vmem>>, vector<2x1x256xf32>,
    %c5_i32 = arith.constant 5 : i32
    %c0_128 = arith.constant 0 : index
    %248 = arith.index_cast %c5_i32 : i32 to index
    %c0_129 = arith.constant 0 : index
    %249 = vector.load %arg25[%c0_128, %248, %c0_129] : memref<2x8x1024xf32, #tpu.memory_space<vmem>>, vector<2x1x1024xf32>
    %250 = vector.shape_cast %249 : vector<2x1x1024xf32> to vector<2x1024xf32>
    %251 = arith.truncf %244 : vector<2x256xf32> to vector<2x256xbf16>
    %c0_130 = arith.constant 0 : index
    %c0_131 = arith.constant 0 : index
    %252 = vector.load %arg13[%c0_130, %c0_131] : memref<256x1024xbf16, #tpu.memory_space<vmem>>, vector<256x1024xbf16>
    %cst_132 = arith.constant dense<0.000000e+00> : vector<2x1024xf32>
    %253 = tpu.matmul %251, %252, %cst_132 {dimension_numbers = #tpu.dot_dimension_numbers<[1], [0], [0], [1], [0, 0, 1, 1], [], []>} : vector<2x256xbf16>, vector<256x1024xbf16>, vector<2x1024xf32> -> vector<2x1024xf32>
    %254 = arith.addf %250, %253 : vector<2x1024xf32>
    %255 = vector.extract_strided_slice %254 {offsets = [0, 0], sizes = [2, 256], strides = [1, 1]} : vector<2x1024xf32> to vector<2x256xf32>
    %256 = arith.negf %255 : vector<2x256xf32>
    %257 = math.exp %256 : vector<2x256xf32>
    %cst_133 = arith.constant 1.000000e+00 : f32
    %258 = vector.broadcast %cst_133 : f32 to vector<2x256xf32>
    %259 = arith.addf %258, %257 : vector<2x256xf32>
    %260 = arith.divf %258, %259 : vector<2x256xf32>
    %261 = vector.extract_strided_slice %254 {offsets = [0, 256], sizes = [2, 256], strides = [1, 1]} : vector<2x1024xf32> to vector<2x256xf32>
    %262 = arith.negf %261 : vector<2x256xf32>
    %263 = math.exp %262 : vector<2x256xf32>
    %cst_134 = arith.constant 1.000000e+00 : f32
    %264 = vector.broadcast %cst_134 : f32 to vector<2x256xf32>
    %265 = arith.addf %264, %263 : vector<2x256xf32>
    %266 = arith.divf %264, %265 : vector<2x256xf32>
    %267 = vector.extract_strided_slice %254 {offsets = [0, 512], sizes = [2, 256], strides = [1, 1]} : vector<2x1024xf32> to vector<2x256xf32>
    %268 = math.tanh %267 : vector<2x256xf32>
    %269 = vector.extract_strided_slice %254 {offsets = [0, 768], sizes = [2, 256], strides = [1, 1]} : vector<2x1024xf32> to vector<2x256xf32>
    %270 = arith.negf %269 : vector<2x256xf32>
    %271 = math.exp %270 : vector<2x256xf32>
    %cst_135 = arith.constant 1.000000e+00 : f32
    %272 = vector.broadcast %cst_135 : f32 to vector<2x256xf32>
    %273 = arith.addf %272, %271 : vector<2x256xf32>
    %274 = arith.divf %272, %273 : vector<2x256xf32>
    %275 = arith.mulf %266, %242 : vector<2x256xf32>
    %276 = arith.mulf %260, %268 : vector<2x256xf32>
    %277 = arith.addf %275, %276 : vector<2x256xf32>
    %278 = math.tanh %277 : vector<2x256xf32>
    %279 = arith.mulf %274, %278 : vector<2x256xf32>
    %280 = vector.shape_cast %279 : vector<2x256xf32> to vector<2x1x256xf32>
    %c0_136 = arith.constant 0 : index
    %281 = arith.index_cast %c5_i32 : i32 to index
    %c0_137 = arith.constant 0 : index
    %282 = vector.load %arg26[%c0_136, %281, %c0_137] : memref<2x8x256xf32, #tpu.memory_space<vmem>>, vector<2x1x256xf32>
    tpu.vector_store %arg26[%c0_136, %281, %c0_137], %280 {strides = array<i32>} : memref<2x8x256xf32, #tpu.memory_space<vmem>>, vector<2x1x256xf32>,
    %c6_i32 = arith.constant 6 : i32
    %c0_138 = arith.constant 0 : index
    %283 = arith.index_cast %c6_i32 : i32 to index
    %c0_139 = arith.constant 0 : index
    %284 = vector.load %arg25[%c0_138, %283, %c0_139] : memref<2x8x1024xf32, #tpu.memory_space<vmem>>, vector<2x1x1024xf32>
    %285 = vector.shape_cast %284 : vector<2x1x1024xf32> to vector<2x1024xf32>
    %286 = arith.truncf %279 : vector<2x256xf32> to vector<2x256xbf16>
    %c0_140 = arith.constant 0 : index
    %c0_141 = arith.constant 0 : index
    %287 = vector.load %arg13[%c0_140, %c0_141] : memref<256x1024xbf16, #tpu.memory_space<vmem>>, vector<256x1024xbf16>
    %cst_142 = arith.constant dense<0.000000e+00> : vector<2x1024xf32>
    %288 = tpu.matmul %286, %287, %cst_142 {dimension_numbers = #tpu.dot_dimension_numbers<[1], [0], [0], [1], [0, 0, 1, 1], [], []>} : vector<2x256xbf16>, vector<256x1024xbf16>, vector<2x1024xf32> -> vector<2x1024xf32>
    %289 = arith.addf %285, %288 : vector<2x1024xf32>
    %290 = vector.extract_strided_slice %289 {offsets = [0, 0], sizes = [2, 256], strides = [1, 1]} : vector<2x1024xf32> to vector<2x256xf32>
    %291 = arith.negf %290 : vector<2x256xf32>
    %292 = math.exp %291 : vector<2x256xf32>
    %cst_143 = arith.constant 1.000000e+00 : f32
    %293 = vector.broadcast %cst_143 : f32 to vector<2x256xf32>
    %294 = arith.addf %293, %292 : vector<2x256xf32>
    %295 = arith.divf %293, %294 : vector<2x256xf32>
    %296 = vector.extract_strided_slice %289 {offsets = [0, 256], sizes = [2, 256], strides = [1, 1]} : vector<2x1024xf32> to vector<2x256xf32>
    %297 = arith.negf %296 : vector<2x256xf32>
    %298 = math.exp %297 : vector<2x256xf32>
    %cst_144 = arith.constant 1.000000e+00 : f32
    %299 = vector.broadcast %cst_144 : f32 to vector<2x256xf32>
    %300 = arith.addf %299, %298 : vector<2x256xf32>
    %301 = arith.divf %299, %300 : vector<2x256xf32>
    %302 = vector.extract_strided_slice %289 {offsets = [0, 512], sizes = [2, 256], strides = [1, 1]} : vector<2x1024xf32> to vector<2x256xf32>
    %303 = math.tanh %302 : vector<2x256xf32>
    %304 = vector.extract_strided_slice %289 {offsets = [0, 768], sizes = [2, 256], strides = [1, 1]} : vector<2x1024xf32> to vector<2x256xf32>
    %305 = arith.negf %304 : vector<2x256xf32>
    %306 = math.exp %305 : vector<2x256xf32>
    %cst_145 = arith.constant 1.000000e+00 : f32
    %307 = vector.broadcast %cst_145 : f32 to vector<2x256xf32>
    %308 = arith.addf %307, %306 : vector<2x256xf32>
    %309 = arith.divf %307, %308 : vector<2x256xf32>
    %310 = arith.mulf %301, %277 : vector<2x256xf32>
    %311 = arith.mulf %295, %303 : vector<2x256xf32>
    %312 = arith.addf %310, %311 : vector<2x256xf32>
    %313 = math.tanh %312 : vector<2x256xf32>
    %314 = arith.mulf %309, %313 : vector<2x256xf32>
    %315 = vector.shape_cast %314 : vector<2x256xf32> to vector<2x1x256xf32>
    %c0_146 = arith.constant 0 : index
    %316 = arith.index_cast %c6_i32 : i32 to index
    %c0_147 = arith.constant 0 : index
    %317 = vector.load %arg26[%c0_146, %316, %c0_147] : memref<2x8x256xf32, #tpu.memory_space<vmem>>, vector<2x1x256xf32>
    tpu.vector_store %arg26[%c0_146, %316, %c0_147], %315 {strides = array<i32>} : memref<2x8x256xf32, #tpu.memory_space<vmem>>, vector<2x1x256xf32>,
    %c7_i32 = arith.constant 7 : i32
    %c0_148 = arith.constant 0 : index
    %318 = arith.index_cast %c7_i32 : i32 to index
    %c0_149 = arith.constant 0 : index
    %319 = vector.load %arg25[%c0_148, %318, %c0_149] : memref<2x8x1024xf32, #tpu.memory_space<vmem>>, vector<2x1x1024xf32>
    %320 = vector.shape_cast %319 : vector<2x1x1024xf32> to vector<2x1024xf32>
    %321 = arith.truncf %314 : vector<2x256xf32> to vector<2x256xbf16>
    %c0_150 = arith.constant 0 : index
    %c0_151 = arith.constant 0 : index
    %322 = vector.load %arg13[%c0_150, %c0_151] : memref<256x1024xbf16, #tpu.memory_space<vmem>>, vector<256x1024xbf16>
    %cst_152 = arith.constant dense<0.000000e+00> : vector<2x1024xf32>
    %323 = tpu.matmul %321, %322, %cst_152 {dimension_numbers = #tpu.dot_dimension_numbers<[1], [0], [0], [1], [0, 0, 1, 1], [], []>} : vector<2x256xbf16>, vector<256x1024xbf16>, vector<2x1024xf32> -> vector<2x1024xf32>
    %324 = arith.addf %320, %323 : vector<2x1024xf32>
    %325 = vector.extract_strided_slice %324 {offsets = [0, 0], sizes = [2, 256], strides = [1, 1]} : vector<2x1024xf32> to vector<2x256xf32>
    %326 = arith.negf %325 : vector<2x256xf32>
    %327 = math.exp %326 : vector<2x256xf32>
    %cst_153 = arith.constant 1.000000e+00 : f32
    %328 = vector.broadcast %cst_153 : f32 to vector<2x256xf32>
    %329 = arith.addf %328, %327 : vector<2x256xf32>
    %330 = arith.divf %328, %329 : vector<2x256xf32>
    %331 = vector.extract_strided_slice %324 {offsets = [0, 256], sizes = [2, 256], strides = [1, 1]} : vector<2x1024xf32> to vector<2x256xf32>
    %332 = arith.negf %331 : vector<2x256xf32>
    %333 = math.exp %332 : vector<2x256xf32>
    %cst_154 = arith.constant 1.000000e+00 : f32
    %334 = vector.broadcast %cst_154 : f32 to vector<2x256xf32>
    %335 = arith.addf %334, %333 : vector<2x256xf32>
    %336 = arith.divf %334, %335 : vector<2x256xf32>
    %337 = vector.extract_strided_slice %324 {offsets = [0, 512], sizes = [2, 256], strides = [1, 1]} : vector<2x1024xf32> to vector<2x256xf32>
    %338 = math.tanh %337 : vector<2x256xf32>
    %339 = vector.extract_strided_slice %324 {offsets = [0, 768], sizes = [2, 256], strides = [1, 1]} : vector<2x1024xf32> to vector<2x256xf32>
    %340 = arith.negf %339 : vector<2x256xf32>
    %341 = math.exp %340 : vector<2x256xf32>
    %cst_155 = arith.constant 1.000000e+00 : f32
    %342 = vector.broadcast %cst_155 : f32 to vector<2x256xf32>
    %343 = arith.addf %342, %341 : vector<2x256xf32>
    %344 = arith.divf %342, %343 : vector<2x256xf32>
    %345 = arith.mulf %336, %312 : vector<2x256xf32>
    %346 = arith.mulf %330, %338 : vector<2x256xf32>
    %347 = arith.addf %345, %346 : vector<2x256xf32>
    %348 = math.tanh %347 : vector<2x256xf32>
    %349 = arith.mulf %344, %348 : vector<2x256xf32>
    %350 = vector.shape_cast %349 : vector<2x256xf32> to vector<2x1x256xf32>
    %c0_156 = arith.constant 0 : index
    %351 = arith.index_cast %c7_i32 : i32 to index
    %c0_157 = arith.constant 0 : index
    %352 = vector.load %arg26[%c0_156, %351, %c0_157] : memref<2x8x256xf32, #tpu.memory_space<vmem>>, vector<2x1x256xf32>
    tpu.vector_store %arg26[%c0_156, %351, %c0_157], %350 {strides = array<i32>} : memref<2x8x256xf32, #tpu.memory_space<vmem>>, vector<2x1x256xf32>,
    %c8_i32 = arith.constant 8 : i32
    %c0_158 = arith.constant 0 : index
    %c0_159 = arith.constant 0 : index
    %c0_160 = arith.constant 0 : index
    %353 = vector.load %arg26[%c0_158, %c0_159, %c0_160] : memref<2x8x256xf32, #tpu.memory_space<vmem>>, vector<2x8x256xf32>
    %354 = arith.truncf %353 : vector<2x8x256xf32> to vector<2x8x256xbf16>
    %c0_161 = arith.constant 0 : index
    %c0_162 = arith.constant 0 : index
    %355 = vector.load %arg15[%c0_161, %c0_162] : memref<256x256xbf16, #tpu.memory_space<vmem>>, vector<256x256xbf16>
    "tpu.trace_start"() <{level = 10 : i32, message = "bth,hd->btd"}> : () -> ()
    %cst_163 = arith.constant dense<0.000000e+00> : vector<2x8x256xf32>
    %356 = tpu.matmul %354, %355, %cst_163 {dimension_numbers = #tpu.dot_dimension_numbers<[2], [0], [0, 1], [1], [0, 0, 0, 1, 1, 1], [], []>} : vector<2x8x256xbf16>, vector<256x256xbf16>, vector<2x8x256xf32> -> vector<2x8x256xf32>
    "tpu.trace_stop"() : () -> ()
    %c0_164 = arith.constant 0 : index
    %c0_165 = arith.constant 0 : index
    %357 = vector.load %arg16[%c0_164, %c0_165] : memref<1x256xf32, #tpu.memory_space<vmem>>, vector<1x256xf32>
    %358 = vector.shape_cast %357 : vector<1x256xf32> to vector<1x1x256xf32>
    %359 = vector.broadcast %358 : vector<1x1x256xf32> to vector<2x8x256xf32>
    %360 = arith.addf %356, %359 : vector<2x8x256xf32>
    %361 = math.tanh %360 : vector<2x8x256xf32>
    %c0_166 = arith.constant 0 : index
    %c0_167 = arith.constant 0 : index
    %362 = vector.load %arg17[%c0_166, %c0_167] : memref<1x256xf32, #tpu.memory_space<vmem>>, vector<1x256xf32>
    %363 = vector.shape_cast %362 : vector<1x256xf32> to vector<1x1x256xf32>
    %364 = vector.broadcast %363 : vector<1x1x256xf32> to vector<2x8x256xf32>
    %365 = arith.mulf %361, %364 : vector<2x8x256xf32>
    %cst_168 = arith.constant dense<0.000000e+00> : vector<2x8xf32>
    %366 = vector.multi_reduction <add>, %365, %cst_168 [2] : vector<2x8x256xf32> to vector<2x8xf32>
    %cst_169 = arith.constant dense<0xFF800000> : vector<2xf32>
    %367 = vector.multi_reduction <maximumf>, %366, %cst_169 [1] : vector<2x8xf32> to vector<2xf32>
    %368 = vector.shape_cast %367 : vector<2xf32> to vector<2x1xf32>
    %369 = vector.broadcast %368 : vector<2x1xf32> to vector<2x8xf32>
    %370 = arith.subf %366, %369 : vector<2x8xf32>
    %371 = math.exp %370 : vector<2x8xf32>
    %cst_170 = arith.constant dense<0.000000e+00> : vector<2xf32>
    %372 = vector.multi_reduction <add>, %371, %cst_170 [1] : vector<2x8xf32> to vector<2xf32>
    %373 = vector.shape_cast %372 : vector<2xf32> to vector<2x1xf32>
    %374 = vector.broadcast %373 : vector<2x1xf32> to vector<2x8xf32>
    %375 = arith.divf %371, %374 : vector<2x8xf32>
    %c0_171 = arith.constant 0 : index
    %c0_172 = arith.constant 0 : index
    %376 = vector.load %arg23[%c0_171, %c0_172] : memref<2x8xf32, #tpu.memory_space<vmem>>, vector<2x8xf32>
    tpu.vector_store %arg23[%c0_171, %c0_172], %375 {strides = array<i32>} : memref<2x8xf32, #tpu.memory_space<vmem>>, vector<2x8xf32>,
    %377 = vector.shape_cast %375 : vector<2x8xf32> to vector<2x8x1xf32>
    %378 = vector.broadcast %377 : vector<2x8x1xf32> to vector<2x8x256xf32>
    %379 = arith.mulf %353, %378 : vector<2x8x256xf32>
    %cst_173 = arith.constant dense<0.000000e+00> : vector<2x256xf32>
    %380 = vector.multi_reduction <add>, %379, %cst_173 [1] : vector<2x8x256xf32> to vector<2x256xf32>
    %381 = arith.truncf %380 : vector<2x256xf32> to vector<2x256xbf16>
    %c0_174 = arith.constant 0 : index
    %c0_175 = arith.constant 0 : index
    %382 = vector.load %arg18[%c0_174, %c0_175] : memref<256x256xbf16, #tpu.memory_space<vmem>>, vector<256x256xbf16>
    %cst_176 = arith.constant dense<0.000000e+00> : vector<2x256xf32>
    %383 = tpu.matmul %381, %382, %cst_176 {dimension_numbers = #tpu.dot_dimension_numbers<[1], [0], [0], [1], [0, 0, 1, 1], [], []>} : vector<2x256xbf16>, vector<256x256xbf16>, vector<2x256xf32> -> vector<2x256xf32>
    %c0_177 = arith.constant 0 : index
    %c0_178 = arith.constant 0 : index
    %384 = vector.load %arg19[%c0_177, %c0_178] : memref<1x256xf32, #tpu.memory_space<vmem>>, vector<1x256xf32>
    %385 = vector.broadcast %384 : vector<1x256xf32> to vector<2x256xf32>
    %386 = arith.addf %383, %385 : vector<2x256xf32>
    %cst_179 = arith.constant 0.000000e+00 : f32
    %387 = vector.broadcast %cst_179 : f32 to vector<2x256xf32>
    %388 = arith.maximumf %386, %387 : vector<2x256xf32>
    %389 = arith.truncf %388 : vector<2x256xf32> to vector<2x256xbf16>
    %c0_180 = arith.constant 0 : index
    %c0_181 = arith.constant 0 : index
    %390 = vector.load %arg20[%c0_180, %c0_181] : memref<256x128xbf16, #tpu.memory_space<vmem>>, vector<256x128xbf16>
    %cst_182 = arith.constant dense<0.000000e+00> : vector<2x128xf32>
    %391 = tpu.matmul %389, %390, %cst_182 {dimension_numbers = #tpu.dot_dimension_numbers<[1], [0], [0], [1], [0, 0, 1, 1], [], []>} : vector<2x256xbf16>, vector<256x128xbf16>, vector<2x128xf32> -> vector<2x128xf32>
    %c0_183 = arith.constant 0 : index
    %c0_184 = arith.constant 0 : index
    %392 = vector.load %arg21[%c0_183, %c0_184] : memref<1x128xf32, #tpu.memory_space<vmem>>, vector<1x128xf32>
    %393 = vector.broadcast %392 : vector<1x128xf32> to vector<2x128xf32>
    %394 = arith.addf %391, %393 : vector<2x128xf32>
    %c0_185 = arith.constant 0 : index
    %c0_186 = arith.constant 0 : index
    %395 = vector.load %arg22[%c0_185, %c0_186] : memref<2x128xf32, #tpu.memory_space<vmem>>, vector<2x128xf32>
    tpu.vector_store %arg22[%c0_185, %c0_186], %394 {strides = array<i32>} : memref<2x128xf32, #tpu.memory_space<vmem>>, vector<2x128xf32>,
    return
  }
  func.func @transform_0(%arg0: i32) -> (i32, i32, i32) {
    %c0_i32 = arith.constant 0 : i32
    %c0_i32_0 = arith.constant 0 : i32
    %c0_i32_1 = arith.constant 0 : i32
    return %arg0, %c0_i32, %c0_i32_0 : i32, i32, i32
  }
  func.func @transform_1(%arg0: i32) -> (i32, i32) {
    %c0_i32 = arith.constant 0 : i32
    %c0_i32_0 = arith.constant 0 : i32
    %c0_i32_1 = arith.constant 0 : i32
    return %c0_i32, %c0_i32_0 : i32, i32
  }
  func.func @transform_2(%arg0: i32) -> (i32, i32) {
    %c0_i32 = arith.constant 0 : i32
    %c0_i32_0 = arith.constant 0 : i32
    %c0_i32_1 = arith.constant 0 : i32
    return %c0_i32, %c0_i32_0 : i32, i32
  }
  func.func @transform_3(%arg0: i32) -> (i32, i32) {
    %c0_i32 = arith.constant 0 : i32
    %c0_i32_0 = arith.constant 0 : i32
    %c0_i32_1 = arith.constant 0 : i32
    return %c0_i32, %c0_i32_0 : i32, i32
  }
  func.func @transform_4(%arg0: i32) -> (i32, i32) {
    %c0_i32 = arith.constant 0 : i32
    %c0_i32_0 = arith.constant 0 : i32
    %c0_i32_1 = arith.constant 0 : i32
    return %c0_i32, %c0_i32_0 : i32, i32
  }
  func.func @transform_5(%arg0: i32) -> (i32, i32) {
    %c0_i32 = arith.constant 0 : i32
    %c0_i32_0 = arith.constant 0 : i32
    %c0_i32_1 = arith.constant 0 : i32
    return %c0_i32, %c0_i32_0 : i32, i32
  }
  func.func @transform_6(%arg0: i32) -> (i32, i32) {
    %c0_i32 = arith.constant 0 : i32
    %c0_i32_0 = arith.constant 0 : i32
    %c0_i32_1 = arith.constant 0 : i32
    return %c0_i32, %c0_i32_0 : i32, i32
  }
  func.func @transform_7(%arg0: i32) -> (i32, i32) {
    %c0_i32 = arith.constant 0 : i32
    %c0_i32_0 = arith.constant 0 : i32
    %c0_i32_1 = arith.constant 0 : i32
    return %c0_i32, %c0_i32_0 : i32, i32
  }
  func.func @transform_8(%arg0: i32) -> (i32, i32) {
    %c0_i32 = arith.constant 0 : i32
    %c0_i32_0 = arith.constant 0 : i32
    %c0_i32_1 = arith.constant 0 : i32
    return %c0_i32, %c0_i32_0 : i32, i32
  }
  func.func @transform_9(%arg0: i32) -> (i32, i32) {
    %c0_i32 = arith.constant 0 : i32
    %c0_i32_0 = arith.constant 0 : i32
    %c0_i32_1 = arith.constant 0 : i32
    return %c0_i32, %c0_i32_0 : i32, i32
  }
  func.func @transform_10(%arg0: i32) -> (i32, i32) {
    %c0_i32 = arith.constant 0 : i32
    %c0_i32_0 = arith.constant 0 : i32
    %c0_i32_1 = arith.constant 0 : i32
    return %c0_i32, %c0_i32_0 : i32, i32
  }
  func.func @transform_11(%arg0: i32) -> (i32, i32) {
    %c0_i32 = arith.constant 0 : i32
    %c0_i32_0 = arith.constant 0 : i32
    %c0_i32_1 = arith.constant 0 : i32
    return %c0_i32, %c0_i32_0 : i32, i32
  }
  func.func @transform_12(%arg0: i32) -> (i32, i32) {
    %c0_i32 = arith.constant 0 : i32
    %c0_i32_0 = arith.constant 0 : i32
    %c0_i32_1 = arith.constant 0 : i32
    return %c0_i32, %c0_i32_0 : i32, i32
  }
  func.func @transform_13(%arg0: i32) -> (i32, i32) {
    %c0_i32 = arith.constant 0 : i32
    %c0_i32_0 = arith.constant 0 : i32
    %c0_i32_1 = arith.constant 0 : i32
    return %c0_i32, %c0_i32_0 : i32, i32
  }
  func.func @transform_14(%arg0: i32) -> (i32, i32) {
    %c0_i32 = arith.constant 0 : i32
    %c0_i32_0 = arith.constant 0 : i32
    %c0_i32_1 = arith.constant 0 : i32
    return %c0_i32, %c0_i32_0 : i32, i32
  }
  func.func @transform_15(%arg0: i32) -> (i32, i32) {
    %c0_i32 = arith.constant 0 : i32
    %c0_i32_0 = arith.constant 0 : i32
    %c0_i32_1 = arith.constant 0 : i32
    return %c0_i32, %c0_i32_0 : i32, i32
  }
  func.func @transform_16(%arg0: i32) -> (i32, i32) {
    %c0_i32 = arith.constant 0 : i32
    %c0_i32_0 = arith.constant 0 : i32
    %c0_i32_1 = arith.constant 0 : i32
    return %c0_i32, %c0_i32_0 : i32, i32
  }
  func.func @transform_17(%arg0: i32) -> (i32, i32) {
    %c0_i32 = arith.constant 0 : i32
    %c0_i32_0 = arith.constant 0 : i32
    %c0_i32_1 = arith.constant 0 : i32
    return %c0_i32, %c0_i32_0 : i32, i32
  }
  func.func @transform_18(%arg0: i32) -> (i32, i32) {
    %c0_i32 = arith.constant 0 : i32
    %c0_i32_0 = arith.constant 0 : i32
    %c0_i32_1 = arith.constant 0 : i32
    return %c0_i32, %c0_i32_0 : i32, i32
  }
  func.func @transform_19(%arg0: i32) -> (i32, i32) {
    %c0_i32 = arith.constant 0 : i32
    %c0_i32_0 = arith.constant 0 : i32
    %c0_i32_1 = arith.constant 0 : i32
    return %c0_i32, %c0_i32_0 : i32, i32
  }
  func.func @transform_20(%arg0: i32) -> (i32, i32) {
    %c0_i32 = arith.constant 0 : i32
    %c0_i32_0 = arith.constant 0 : i32
    %c0_i32_1 = arith.constant 0 : i32
    return %c0_i32, %c0_i32_0 : i32, i32
  }
  func.func @transform_21(%arg0: i32) -> (i32, i32) {
    %c0_i32 = arith.constant 0 : i32
    %c0_i32_0 = arith.constant 0 : i32
    return %arg0, %c0_i32 : i32, i32
  }
  func.func @transform_22(%arg0: i32) -> (i32, i32) {
    %c0_i32 = arith.constant 0 : i32
    %c0_i32_0 = arith.constant 0 : i32
    return %arg0, %c0_i32 : i32, i32
  }
}

</mosaic_0001>

<bundles_post_ra>
// kernel: tpu_custom_call.1
= control target key start
LH: loop header
LB: loop body
LE: loop exit
PB: predicated region body
PF: predicated region fallthrough
CT: control target
= control target key end

     0   :  { %s18152_s0 = inlined_call_operand.hbm [shape: f32[2,8,128], index: 0, kind: input, shape index: {}]   ;;  %s18153_s1 = inlined_call_operand.hbm [shape: bf16[384,128], index: 1, kind: input, shape index: {}]   ;;  %s18154_s2 = inlined_call_operand.hbm [shape: f32[1,128], index: 2, kind: input, shape index: {}]   ;;  %s18155_s3 = inlined_call_operand.hbm [shape: bf16[384,128], index: 3, kind: input, shape index: {}]   ;;  %s18156_s4 = inlined_call_operand.hbm [shape: f32[1,128], index: 4, kind: input, shape index: {}]   ;;  %s18157_s5 = inlined_call_operand.hbm [shape: f32[1,128], index: 5, kind: input, shape index: {}]   ;;  %s18158_s6 = inlined_call_operand.hbm [shape: bf16[384,256], index: 6, kind: input, shape index: {}]   ;;  %s18159_s7 = inlined_call_operand.vmem [shape: f32[1,256], index: 7, kind: input, shape index: {}]   ;;  %s18160_s8 = inlined_call_operand.hbm [shape: bf16[768,256], index: 8, kind: input, shape index: {}]   ;;  %s18161_s9 = inlined_call_operand.vmem [shape: f32[1,256], index: 9, kind: input, shape index: {}]   ;;  %s18162_s10 = inlined_call_operand.vmem [shape: f32[1,256], index: 10, kind: input, shape index: {}]   ;;  %s18163_s11 = inlined_call_operand.hbm [shape: bf16[256,1024], index: 11, kind: input, shape index: {}]   ;;  %s18164_s12 = inlined_call_operand.hbm [shape: bf16[256,1024], index: 12, kind: input, shape index: {}]   ;;  %s18165_s13 = inlined_call_operand.vmem [shape: f32[1,1024], index: 13, kind: input, shape index: {}]   ;;  %s18166_s14 = inlined_call_operand.hbm [shape: bf16[256,256], index: 14, kind: input, shape index: {}]   ;;  %s18167_s15 = inlined_call_operand.vmem [shape: f32[1,256], index: 15, kind: input, shape index: {}]   ;;  %s18168_s16 = inlined_call_operand.vmem [shape: f32[1,256], index: 16, kind: input, shape index: {}]   ;;  %s18169_s17 = inlined_call_operand.hbm [shape: bf16[256,256], index: 17, kind: input, shape index: {}]   ;;  %s18170_s18 = inlined_call_operand.vmem [shape: f32[1,256], index: 18, kind: input, shape index: {}]   ;;  %s18171_s19 = inlined_call_operand.hbm [shape: bf16[256,128], index: 19, kind: input, shape index: {}]   ;;  %s18172_s20 = inlined_call_operand.vmem [shape: f32[1,128], index: 20, kind: input, shape index: {}]   ;;  %s18173_s21 = inlined_call_operand.hbm [shape: f32[2,128], index: 21, kind: output, shape index: {0}]   ;;  %s18174_s22 = inlined_call_operand.hbm [shape: f32[2,8], index: 22, kind: output, shape index: {1}]  }
   0x1   :  { %18425 = sst [smem:[#allocation118_spill]] %s18152_s0 }
   0x2   :  { %18426 = sst [smem:[#allocation119_spill]] %s18153_s1 }
   0x3   :  { %18427 = sst [smem:[#allocation120_spill]] %s18154_s2 }
   0x4   :  { %18428 = sst [smem:[#allocation121_spill]] %s18155_s3 }
   0x5   :  { %18429 = sst [smem:[#allocation122_spill]] %s18156_s4 }
   0x6   :  { %18430 = sst [smem:[#allocation123_spill]] %s18157_s5 }
   0x7   :  { %18431 = sst [smem:[#allocation124_spill]] %s18158_s6 }
   0x8   :  { %18432 = sst [smem:[#allocation125_spill]] %s18172_s20 }
   0x9   :  { %18433 = sst [smem:[#allocation126_spill]] %s18173_s21 }
   0xa   :  { %18434 = sst [smem:[#allocation127_spill]] %s18174_s22 }
   0xb   :  { %28 = vsyncpa [#allocation6], 0 }
   0xc   :  { %29 = vsyncpa [#allocation9], 0 }
   0xd   :  { %30 = vsyncpa [#allocation12], 0 }
   0xe   :  { %31 = vsyncpa [#allocation15], 0 }
   0xf   :  { %32 = vsyncpa [#allocation18], 0 }
  0x10   :  { %33 = vsyncpa [#allocation21], 0 }
  0x11   :  { %34 = vsyncpa [#allocation24], 0 }
  0x12   :  { %35 = vsyncpa [#allocation7], 0 }
  0x13   :  { %36 = vsyncpa [#allocation28], 0  ;;  %s15792_s3 = smov [#allocation8]   ;;  %s18435_s4 = sld [smem:[#allocation119_spill]] }
  0x14   :  { %s54_s28 = sshll.u32 %s15792_s3, 4  ;;  %s55_s28 = int_to_ptr.vmem [resolvable:$true] %s54_s28 }
  0x19   :  { %s15444_s0 = scalar_lea.hbm %s18435_s4, 3072 }
  0x1a   :  { %p15445_p0 = scmp.ne.s32.totalorder %s18435_s4, %s15444_s0  ;;  %p15448_p1 = scmp.lt.u32.totalorder %s15444_s0, %s18435_s4 }
  0x1c   :  { %p15450_p2 = pnand %p15448_p1, %p15445_p0 }
  0x1e   :  { %15453 = shalt.err (!%p15450_p2)
}
  0x1f   :  { %s15454_s6 = scalar_lea.vmem %s55_s28, 3072  ;;  %p15459_p4 = scmp.lt.s32.totalorder %s55_s28, %s55_s28 }
  0x20   :  { %p15455_p3 = scmp.ne.s32.totalorder %s55_s28, %s15454_s6  ;;  %p15460_p5 = scmp.lt.s32.totalorder %s15454_s6, %s15454_s6 }
  0x22   :  { %p15461_p6 = por %p15460_p5, %p15459_p4 }
  0x24   :  { %p15462_p7 = pnand %p15461_p6, %p15455_p3 }
  0x26   :  { %15465 = shalt.err (!%p15462_p7)
}
  0x27   :  { %s18184_s25 = smov 64   ;;  %s15794_s26 = smov 4  }
  0x28   :  { %60 = dma.hbm_to_vmem [thread:$0]  %s18435_s4, 3072, %s55_s28, [#allocation9], %s18184_s25, %s18184_s25, %s15794_s26  }
  0x29   :  { %s15795_s3 = smov [#allocation11]   ;;  %s15796_s30 = smov [#allocation14]  }
  0x2a   :  { %s76_s29 = sshll.u32 %s15795_s3, 4  ;;  %s99_s0 = sshll.u32 %s15796_s30, 4  ;;  %s77_s29 = int_to_ptr.vmem [resolvable:$true] %s76_s29  ;;  %s100_s0 = int_to_ptr.vmem [resolvable:$true] %s99_s0 }
  0x2b   :  { %s18436_s5 = sld [smem:[#allocation121_spill]] }
  0x31   :  { %s15466_s24 = scalar_lea.hbm %s18436_s5, 3072 }
  0x32   :  { %p15467_p8 = scmp.ne.s32.totalorder %s18436_s5, %s15466_s24  ;;  %p15470_p9 = scmp.lt.u32.totalorder %s15466_s24, %s18436_s5 }
  0x34   :  { %p15472_p10 = pnand %p15470_p9, %p15467_p8 }
  0x36   :  { %15475 = shalt.err (!%p15472_p10)
}
  0x37   :  { %s15476_s28 = scalar_lea.vmem %s77_s29, 3072  ;;  %p15481_p12 = scmp.lt.s32.totalorder %s77_s29, %s77_s29 }
  0x38   :  { %p15477_p11 = scmp.ne.s32.totalorder %s77_s29, %s15476_s28  ;;  %p15482_p13 = scmp.lt.s32.totalorder %s15476_s28, %s15476_s28 }
  0x3a   :  { %p15483_p0 = por %p15482_p13, %p15481_p12 }
  0x3c   :  { %p15484_p1 = pnand %p15483_p0, %p15477_p11 }
  0x3e   :  { %15487 = shalt.err (!%p15484_p1)
}
  0x3f   :  { %82 = dma.hbm_to_vmem [thread:$0]  %s18436_s5, 3072, %s77_s29, [#allocation12], %s18184_s25, %s18184_s25, %s15794_s26  }
  0x40   :  { %s18437_s22 = sld [smem:[#allocation123_spill]] }
  0x46   :  { %s15488_s27 = scalar_lea.hbm %s18437_s22, 16 }
  0x47   :  { %p15489_p2 = scmp.ne.s32.totalorder %s18437_s22, %s15488_s27  ;;  %p15492_p3 = scmp.lt.u32.totalorder %s15488_s27, %s18437_s22 }
  0x49   :  { %p15494_p4 = pnand %p15492_p3, %p15489_p2 }
  0x4b   :  { %15497 = shalt.err (!%p15494_p4)
}
  0x4c   :  { %s15498_s24 = scalar_lea.vmem %s100_s0, 16  ;;  %s15502_s6 = scalar_lea.vmem %s100_s0, 32 }
  0x4d   :  { %p15499_p5 = scmp.ne.s32.totalorder %s100_s0, %s15498_s24  ;;  %p15503_p6 = scmp.lt.s32.totalorder %s100_s0, %s100_s0 }
  0x4e   :  { %p15504_p7 = scmp.lt.s32.totalorder %s15502_s6, %s15498_s24 }
  0x50   :  { %p15505_p8 = por %p15504_p7, %p15503_p6 }
  0x52   :  { %p15506_p9 = pnand %p15505_p8, %p15499_p5 }
  0x54   :  { %15509 = shalt.err (!%p15506_p9)
}
  0x55   :  { %102 = dma.hbm_to_vmem [thread:$0]  %s18437_s22, 16, %s100_s0, [#allocation15]  }
  0x56   :  { %s15797_s28 = smov [#allocation17]   ;;  %s15510_s20 = scalar_lea.hbm %s18160_s8, 12288 }
  0x57   :  { %s122_s4 = sshll.u32 %s15797_s28, 4  ;;  %p15511_p10 = scmp.ne.s32.totalorder %s18160_s8, %s15510_s20  ;;  %s123_s4 = int_to_ptr.vmem [resolvable:$true] %s122_s4 }
  0x58   :  { %p15514_p11 = scmp.lt.u32.totalorder %s15510_s20, %s18160_s8 }
  0x5a   :  { %p15516_p12 = pnand %p15514_p11, %p15511_p10 }
  0x5c   :  { %15519 = shalt.err (!%p15516_p12)
}
  0x5d   :  { %s15520_s1 = scalar_lea.vmem %s123_s4, 12288  ;;  %p15525_p0 = scmp.lt.s32.totalorder %s123_s4, %s123_s4 }
  0x5e   :  { %p15521_p13 = scmp.ne.s32.totalorder %s123_s4, %s15520_s1  ;;  %p15526_p1 = scmp.lt.s32.totalorder %s15520_s1, %s15520_s1 }
  0x60   :  { %p15527_p2 = por %p15526_p1, %p15525_p0 }
  0x62   :  { %p15528_p3 = pnand %p15527_p2, %p15521_p13 }
  0x64   :  { %15531 = shalt.err (!%p15528_p3)
}
  0x65   :  { %s15798_s0 = smov 128   ;;  %s15799_s22 = smov 8  }
  0x66   :  { %128 = dma.hbm_to_vmem [thread:$0]  %s18160_s8, 12288, %s123_s4, [#allocation18], %s15798_s0, %s15798_s0, %s15799_s22  }
  0x67   :  { %s15800_s29 = smov [#allocation20]   ;;  %s15801_s28 = smov [#allocation23]  }
  0x68   :  { %s150_s5 = sshll.u32 %s15800_s29, 4  ;;  %s180_s2 = sshll.u32 %s15801_s28, 4  ;;  %s151_s5 = int_to_ptr.vmem [resolvable:$true] %s150_s5  ;;  %s15989_s2 = int_to_ptr.vmem [resolvable:$true] %s180_s2 }
  0x69   :  { %s15532_s27 = scalar_lea.hbm %s18164_s12, 16384 }
  0x6a   :  { %p15533_p4 = scmp.ne.s32.totalorder %s18164_s12, %s15532_s27  ;;  %p15536_p5 = scmp.lt.u32.totalorder %s15532_s27, %s18164_s12 }
  0x6c   :  { %p15538_p6 = pnand %p15536_p5, %p15533_p4 }
  0x6e   :  { %15541 = shalt.err (!%p15538_p6)
}
  0x6f   :  { %s15542_s8 = scalar_lea.vmem %s151_s5, 16384  ;;  %p15547_p8 = scmp.lt.s32.totalorder %s151_s5, %s151_s5 }
  0x70   :  { %p15543_p7 = scmp.ne.s32.totalorder %s151_s5, %s15542_s8  ;;  %p15548_p9 = scmp.lt.s32.totalorder %s15542_s8, %s15542_s8 }
  0x72   :  { %p15549_p10 = por %p15548_p9, %p15547_p8 }
  0x74   :  { %p15550_p11 = pnand %p15549_p10, %p15543_p7 }
  0x76   :  { %15553 = shalt.err (!%p15550_p11)
}
  0x77   :  { %s15802_s4 = smov 512   ;;  %s15803_s24 = smov 32  }
  0x78   :  { %156 = dma.hbm_to_vmem [thread:$0]  %s18164_s12, 16384, %s151_s5, [#allocation21], %s15802_s4, %s15802_s4, %s15803_s24  }
  0x79   :  { %s15554_s20 = scalar_lea.hbm %s18169_s17, 4096 }
  0x7a   :  { %p15555_p12 = scmp.ne.s32.totalorder %s18169_s17, %s15554_s20  ;;  %p15558_p13 = scmp.lt.u32.totalorder %s15554_s20, %s18169_s17 }
  0x7c   :  { %p15560_p0 = pnand %p15558_p13, %p15555_p12 }
  0x7e   :  { %15563 = shalt.err (!%p15560_p0)
}
  0x7f   :  { %s15564_s1 = scalar_lea.vmem %s15989_s2, 4096  ;;  %p15569_p2 = scmp.lt.s32.totalorder %s15989_s2, %s15989_s2 }
  0x80   :  { %p15565_p1 = scmp.ne.s32.totalorder %s15989_s2, %s15564_s1  ;;  %p15570_p3 = scmp.lt.s32.totalorder %s15564_s1, %s15564_s1 }
  0x82   :  { %p15571_p4 = por %p15570_p3, %p15569_p2 }
  0x84   :  { %p15572_p5 = pnand %p15571_p4, %p15565_p1 }
  0x86   :  { %15575 = shalt.err (!%p15572_p5)
}
  0x87   :  { %186 = dma.hbm_to_vmem [thread:$0]  %s18169_s17, 4096, %s15989_s2, [#allocation24], %s15798_s0, %s15798_s0, %s15799_s22  }
  0x88   :  { %s15804_s8 = smov [#allocation5]   ;;  %s15805_s29 = smov [#allocation10]  }
  0x89   :  { %s42_s6 = sshll.u32 %s15804_s8, 4  ;;  %s67_s28 = sshll.u32 %s15805_s29, 4  ;;  %s43_s6 = int_to_ptr.vmem [resolvable:$true] %s42_s6  ;;  %s68_s28 = int_to_ptr.vmem [resolvable:$true] %s67_s28 }
  0x8a   :  { %s18438_s27 = sld [smem:[#allocation118_spill]] }
  0x90   :  { %s15576_s3 = scalar_lea.hbm %s18438_s27, 256 }
  0x91   :  { %p15577_p6 = scmp.ne.s32.totalorder %s18438_s27, %s15576_s3  ;;  %p15580_p7 = scmp.lt.u32.totalorder %s15576_s3, %s18438_s27 }
  0x93   :  { %p15582_p8 = pnand %p15580_p7, %p15577_p6 }
  0x95   :  { %15585 = shalt.err (!%p15582_p8)
}
  0x96   :  { %s15586_s17 = scalar_lea.vmem %s43_s6, 256  ;;  %p15591_p10 = scmp.lt.s32.totalorder %s43_s6, %s43_s6 }
  0x97   :  { %p15587_p9 = scmp.ne.s32.totalorder %s43_s6, %s15586_s17  ;;  %p15592_p11 = scmp.lt.s32.totalorder %s15586_s17, %s15586_s17 }
  0x99   :  { %p15593_p12 = por %p15592_p11, %p15591_p10 }
  0x9b   :  { %p15594_p13 = pnand %p15593_p12, %p15587_p9 }
  0x9d   :  { %15597 = shalt.err (!%p15594_p13)
}
  0x9e   :  { %48 = dma.hbm_to_vmem [thread:$0]  %s18438_s27, 256, %s43_s6, [#allocation6], %s15798_s0, %s15798_s0, %s15799_s22  }
  0x9f   :  { %s18439_s25 = sld [smem:[#allocation120_spill]] }
  0xa5   :  { %s15598_s29 = scalar_lea.hbm %s18439_s25, 16 }
  0xa6   :  { %p15599_p0 = scmp.ne.s32.totalorder %s18439_s25, %s15598_s29  ;;  %p15602_p1 = scmp.lt.u32.totalorder %s15598_s29, %s18439_s25 }
  0xa8   :  { %p15604_p2 = pnand %p15602_p1, %p15599_p0 }
  0xaa   :  { %15607 = shalt.err (!%p15604_p2)
}
  0xab   :  { %s15608_s23 = scalar_lea.vmem %s68_s28, 16  ;;  %s15612_s1 = scalar_lea.vmem %s68_s28, 32 }
  0xac   :  { %p15609_p3 = scmp.ne.s32.totalorder %s68_s28, %s15608_s23  ;;  %p15613_p4 = scmp.lt.s32.totalorder %s68_s28, %s68_s28 }
  0xad   :  { %p15614_p5 = scmp.lt.s32.totalorder %s15612_s1, %s15608_s23 }
  0xaf   :  { %p15615_p6 = por %p15614_p5, %p15613_p4 }
  0xb1   :  { %p15616_p7 = pnand %p15615_p6, %p15609_p3 }
  0xb3   :  { %15619 = shalt.err (!%p15616_p7)
}
  0xb4   :  { %70 = dma.hbm_to_vmem [thread:$0]  %s18439_s25, 16, %s68_s28, [#allocation9]  }
  0xb5   :  { %s15806_s17 = smov [#allocation13]   ;;  %s15807_s12 = smov [#allocation16]  }
  0xb6   :  { %s89_s2 = sshll.u32 %s15806_s17, 4  ;;  %s108_s5 = sshll.u32 %s15807_s12, 4  ;;  %s90_s2 = int_to_ptr.vmem [resolvable:$true] %s89_s2  ;;  %s16053_s5 = int_to_ptr.vmem [resolvable:$true] %s108_s5 }
  0xb7   :  { %s18440_s21 = sld [smem:[#allocation122_spill]] }
  0xbd   :  { %s15620_s20 = scalar_lea.hbm %s18440_s21, 16 }
  0xbe   :  { %p15621_p8 = scmp.ne.s32.totalorder %s18440_s21, %s15620_s20  ;;  %p15624_p9 = scmp.lt.u32.totalorder %s15620_s20, %s18440_s21 }
  0xc0   :  { %p15626_p10 = pnand %p15624_p9, %p15621_p8 }
  0xc2   :  { %15629 = shalt.err (!%p15626_p10)
}
  0xc3   :  { %s15630_s28 = scalar_lea.vmem %s90_s2, 16  ;;  %s15634_s25 = scalar_lea.vmem %s90_s2, 32 }
  0xc4   :  { %p15631_p11 = scmp.ne.s32.totalorder %s90_s2, %s15630_s28  ;;  %p15635_p12 = scmp.lt.s32.totalorder %s90_s2, %s90_s2 }
  0xc5   :  { %p15636_p13 = scmp.lt.s32.totalorder %s15634_s25, %s15630_s28 }
  0xc7   :  { %p15637_p0 = por %p15636_p13, %p15635_p12 }
  0xc9   :  { %p15638_p1 = pnand %p15637_p0, %p15631_p11 }
  0xcb   :  { %15641 = shalt.err (!%p15638_p1)
}
  0xcc   :  { %92 = dma.hbm_to_vmem [thread:$0]  %s18440_s21, 16, %s90_s2, [#allocation12]  }
  0xcd   :  { %s18441_s8 = sld [smem:[#allocation124_spill]] }
  0xd3   :  { %s15642_s29 = scalar_lea.hbm %s18441_s8, 6144 }
  0xd4   :  { %p15643_p2 = scmp.ne.s32.totalorder %s18441_s8, %s15642_s29  ;;  %p15646_p3 = scmp.lt.u32.totalorder %s15642_s29, %s18441_s8 }
  0xd6   :  { %p15648_p4 = pnand %p15646_p3, %p15643_p2 }
  0xd8   :  { %15651 = shalt.err (!%p15648_p4)
}
  0xd9   :  { %s15652_s1 = scalar_lea.vmem %s16053_s5, 6144  ;;  %p15657_p6 = scmp.lt.s32.totalorder %s16053_s5, %s16053_s5 }
  0xda   :  { %p15653_p5 = scmp.ne.s32.totalorder %s16053_s5, %s15652_s1  ;;  %p15658_p7 = scmp.lt.s32.totalorder %s15652_s1, %s15652_s1 }
  0xdc   :  { %p15659_p8 = por %p15658_p7, %p15657_p6 }
  0xde   :  { %p15660_p9 = pnand %p15659_p8, %p15653_p5 }
  0xe0   :  { %15663 = shalt.err (!%p15660_p9)
}
  0xe1   :  { %114 = dma.hbm_to_vmem [thread:$0]  %s18441_s8, 6144, %s16053_s5, [#allocation15], %s15798_s0, %s15798_s0, %s15799_s22  }
  0xe2   :  { %s15808_s28 = smov [#allocation19]   ;;  %s15809_s6 = smov [#allocation22]  }
  0xe3   :  { %s138_s25 = sshll.u32 %s15808_s28, 4  ;;  %s164_s27 = sshll.u32 %s15809_s6, 4  ;;  %s139_s25 = int_to_ptr.vmem [resolvable:$true] %s138_s25  ;;  %s16087_s27 = int_to_ptr.vmem [resolvable:$true] %s164_s27 }
  0xe4   :  { %s15664_s29 = scalar_lea.hbm %s18163_s11, 16384 }
  0xe5   :  { %p15665_p10 = scmp.ne.s32.totalorder %s18163_s11, %s15664_s29  ;;  %p15668_p11 = scmp.lt.u32.totalorder %s15664_s29, %s18163_s11 }
  0xe7   :  { %p15670_p12 = pnand %p15668_p11, %p15665_p10 }
  0xe9   :  { %15673 = shalt.err (!%p15670_p12)
}
  0xea   :  { %s15674_s5 = scalar_lea.vmem %s139_s25, 16384  ;;  %p15679_p0 = scmp.lt.s32.totalorder %s139_s25, %s139_s25 }
  0xeb   :  { %p15675_p13 = scmp.ne.s32.totalorder %s139_s25, %s15674_s5  ;;  %p15680_p1 = scmp.lt.s32.totalorder %s15674_s5, %s15674_s5 }
  0xed   :  { %p15681_p2 = por %p15680_p1, %p15679_p0 }
  0xef   :  { %p15682_p3 = pnand %p15681_p2, %p15675_p13 }
  0xf1   :  { %15685 = shalt.err (!%p15682_p3)
}
  0xf2   :  { %144 = dma.hbm_to_vmem [thread:$0]  %s18163_s11, 16384, %s139_s25, [#allocation18], %s15802_s4, %s15802_s4, %s15803_s24  }
  0xf3   :  { %s15686_s28 = scalar_lea.hbm %s18166_s14, 4096 }
  0xf4   :  { %p15687_p4 = scmp.ne.s32.totalorder %s18166_s14, %s15686_s28  ;;  %p15690_p5 = scmp.lt.u32.totalorder %s15686_s28, %s18166_s14 }
  0xf6   :  { %p15692_p6 = pnand %p15690_p5, %p15687_p4 }
  0xf8   :  { %15695 = shalt.err (!%p15692_p6)
}
  0xf9   :  { %s15696_s3 = scalar_lea.vmem %s16087_s27, 4096  ;;  %p15701_p8 = scmp.lt.s32.totalorder %s16087_s27, %s16087_s27 }
  0xfa   :  { %p15697_p7 = scmp.ne.s32.totalorder %s16087_s27, %s15696_s3  ;;  %p15702_p9 = scmp.lt.s32.totalorder %s15696_s3, %s15696_s3 }
  0xfc   :  { %p15703_p10 = por %p15702_p9, %p15701_p8 }
  0xfe   :  { %p15704_p11 = pnand %p15703_p10, %p15697_p7 }
 0x100   :  { %15707 = shalt.err (!%p15704_p11)
}
 0x101   :  { %170 = dma.hbm_to_vmem [thread:$0]  %s18166_s14, 4096, %s16087_s27, [#allocation21], %s15798_s0, %s15798_s0, %s15799_s22  }
 0x102   :  { %s15810_s24 = smov [#allocation25]   ;;  %s15708_s23 = scalar_lea.hbm %s18171_s19, 2048 }
 0x103   :  { %s194_s25 = sshll.u32 %s15810_s24, 4  ;;  %p15709_p12 = scmp.ne.s32.totalorder %s18171_s19, %s15708_s23  ;;  %s195_s25 = int_to_ptr.vmem [resolvable:$true] %s194_s25 }
 0x104   :  { %p15712_p13 = scmp.lt.u32.totalorder %s15708_s23, %s18171_s19 }
 0x106   :  { %p15714_p0 = pnand %p15712_p13, %p15709_p12 }
 0x108   :  { %15717 = shalt.err (!%p15714_p0)
}
 0x109   :  { %s15718_s21 = scalar_lea.vmem %s195_s25, 2048  ;;  %p15723_p2 = scmp.lt.s32.totalorder %s195_s25, %s195_s25 }
 0x10a   :  { %p15719_p1 = scmp.ne.s32.totalorder %s195_s25, %s15718_s21  ;;  %p15724_p3 = scmp.lt.s32.totalorder %s15718_s21, %s15718_s21 }
 0x10c   :  { %p15725_p4 = por %p15724_p3, %p15723_p2 }
 0x10e   :  { %p15726_p5 = pnand %p15725_p4, %p15719_p1 }
 0x110   :  { %15729 = shalt.err (!%p15726_p5)
}
 0x111   :  { %s18442_s14 = smov 64  }
 0x112   :  { %200 = dma.hbm_to_vmem [thread:$0]  %s18171_s19, 2048, %s195_s25, [#allocation24], %s18442_s14, %s18442_s14, %s15794_s26  }
 0x113   :  { %15774 = dma.done.wait [#allocation6], 256  }
 0x114   :  { %15775 = vsyncadd [#allocation6], 4294967040 }
 0x115   :  { %15776 = dma.done.wait [#allocation9], 3088  }
 0x116   :  { %15777 = vsyncadd [#allocation9], 4294964208 }
 0x117   :  { %15778 = dma.done.wait [#allocation12], 3088  }
 0x118   :  { %15779 = vsyncadd [#allocation12], 4294964208 }
 0x119   :  { %15780 = dma.done.wait [#allocation15], 6160  }
 0x11a   :  { %15781 = vsyncadd [#allocation15], 4294961136 }
 0x11b   :  { %15782 = dma.done.wait [#allocation18], 28672  }
 0x11c   :  { %15783 = vsyncadd [#allocation18], 4294938624 }
 0x11d   :  { %15784 = dma.done.wait [#allocation21], 20480  }
 0x11e   :  { %15785 = vsyncadd [#allocation21], 4294946816 }
 0x11f   :  { %15786 = dma.done.wait [#allocation24], 6144  }
 0x120   :  { %15787 = vsyncadd [#allocation24], 4294961152  ;;  %v18185_v0 = vlaneseq  ;;  %v15811_v1 = vmov 0.0   ;;  %vm15812_vm0 = vmmov 0   ;;  %v14796_v3 = vld [vmem:[#allocation8 + $0x40] sm:$0xff]   ;;  %v14799_v6 = vld [vmem:[#allocation8 + $0x48] sm:$0xff]  }
 0x121   :  { %14713 = vmatprep.subr.bf16.mxu1 %v15811_v1  ;;  %14729 = vmatprep.mubr.msk.bf16.mxu1 %vm15812_vm0, %v15811_v1  ;;  %v14797_v4 = vld [vmem:[#allocation8] sm:$0xff]   ;;  %v14800_v7 = vld [vmem:[#allocation8 + $0x8] sm:$0xff]   ;;  %v14802_v9 = vld [vmem:[#allocation8 + $0x50] sm:$0xff]   ;;  %vm281_vm2 = vcmask 1045504   ;;  %vm4498_vm3 = vcmask 1041409   ;;  %vm12531_vm4 = vcmask 58368  }
 0x122   :  { %vm16143_vm1 = vcmp.lt.s32.totalorder %v18185_v0, 256  ;;  %14629 = vmatprep.subr.bf16.mxu0 %v14796_v3  ;;  %v14798_v5 = vld [vmem:[#allocation8 + $0x80] sm:$0xff]   ;;  %v14801_v8 = vld [vmem:[#allocation8 + $0x88] sm:$0xff]   ;;  %v14803_v10 = vld [vmem:[#allocation8 + $0x10] sm:$0xff]   ;;  %s15815_s3 = smov [#allocation27]  }
 0x123   :  { %247 = vst.msk [vmem:[#allocation2] ss:$8 sm:$0x3] %vm16143_vm1, %v15811_v1  ;;  %250 = vst.msk [vmem:[#allocation2 + $0x20] ss:$8 sm:$0x3] %vm16143_vm1, %v15811_v1  ;;  %14630 = vmatpush3.bf16.msra.mxu0 %v14797_v4  ;;  %14714 = vmatpush3.bf16.msra.mxu1 %v14798_v5 }
 0x124   :  { %253 = vst.msk [vmem:[#allocation2 + $0x11] ss:$8 sm:$0x3] %vm16143_vm1, %v15811_v1  ;;  %256 = vst.msk [vmem:[#allocation2 + $0x31] ss:$8 sm:$0x3] %vm16143_vm1, %v15811_v1  ;;  %14631 = vmatprep.subr.bf16.mxu0 %v14799_v6  ;;  %14715 = vmatprep.subr.bf16.mxu1 %v15811_v1 }
 0x125   :  { %v14804_v11 = vld [vmem:[#allocation8 + $0x90] sm:$0xff]   ;;  %v14805_v12 = vld [vmem:[#allocation8 + $0x58] sm:$0xff]   ;;  %v14808_v15 = vld [vmem:[#allocation8 + $0x60] sm:$0xff]   ;;  %s13096_s11 = sshll.u32 %s15815_s3, 4  ;;  %s13097_s11 = int_to_ptr.vmem [resolvable:$true] %s13096_s11 }
 0x126   :  { %v14806_v13 = vld [vmem:[#allocation8 + $0x18] sm:$0xff]   ;;  %v14809_v16 = vld [vmem:[#allocation8 + $0x20] sm:$0xff]   ;;  %v14811_v18 = vld [vmem:[#allocation8 + $0x68] sm:$0xff]   ;;  %p15735_p7 = scmp.lt.s32.totalorder %s13097_s11, %s13097_s11 }
 0x127   :  { %14632 = vmatpush3.bf16.msra.mxu0 %v14800_v7  ;;  %14716 = vmatpush3.bf16.msra.mxu1 %v14801_v8  ;;  %v14807_v14 = vld [vmem:[#allocation8 + $0x98] sm:$0xff]   ;;  %v14810_v17 = vld [vmem:[#allocation8 + $0xa0] sm:$0xff]   ;;  %v14812_v19 = vld [vmem:[#allocation8 + $0x28] sm:$0xff]  }
 0x128   :  { %14633 = vmatprep.subr.bf16.mxu0 %v14802_v9  ;;  %14717 = vmatprep.subr.bf16.mxu1 %v15811_v1  ;;  %v14813_v20 = vld [vmem:[#allocation8 + $0xa8] sm:$0xff]   ;;  %v14814_v21 = vld [vmem:[#allocation8 + $0x70] sm:$0xff]   ;;  %v259_v24 = vld [vmem:[#allocation5 + $0x8] sm:$0xff] }
 0x129   :  { %v14815_v22 = vld [vmem:[#allocation8 + $0x30] sm:$0xff]   ;;  %v14817_v26 = vld [vmem:[#allocation8 + $0x78] sm:$0xff]   ;;  %v264_v28 = vrot.slane %v259_v24, 7  ;;  %v14820_v32 = vld [vmem:[#allocation11 + $0x40] sm:$0xff]  }
 0x12a   :  { %v258_v23 = vld [vmem:[#allocation5] sm:$0xff]  ;;  %v14818_v30 = vld [vmem:[#allocation8 + $0x38] sm:$0xff]   ;;  %v14821_v33 = vld [vmem:[#allocation11] sm:$0xff]  }
 0x12b   :  { %14634 = vmatpush3.bf16.msra.mxu0 %v14803_v10  ;;  %14718 = vmatpush3.bf16.msra.mxu1 %v14804_v11  ;;  %v14816_v25 = vld [vmem:[#allocation8 + $0xb0] sm:$0xff]   ;;  %v263_v27 = vrot.slane %v258_v23, 7  ;;  %v14611_v29 = vpack.c.bf16 %v259_v24, %v258_v23  ;;  %269 = vst [vmem:[#allocation2 + $0x20] sm:$0xfe] %v264_v28  ;;  %270 = vst [vmem:[#allocation2 + $0x30] sm:$0x1] %v264_v28 }
 0x12c   :  { %14635 = vmatprep.subr.bf16.mxu0 %v14805_v12  ;;  %14719 = vmatprep.subr.bf16.mxu1 %v15811_v1  ;;  %v14819_v31 = vld [vmem:[#allocation8 + $0xb8] sm:$0xff]   ;;  %v14822_v34 = vld [vmem:[#allocation11 + $0x48] sm:$0xff]   ;;  %v14823_v46 = vld [vmem:[#allocation11 + $0x80] sm:$0xff]  }
 0x12d   :  { %267 = vst [vmem:[#allocation2] sm:$0xfe] %v263_v27  ;;  %268 = vst [vmem:[#allocation2 + $0x10] sm:$0x1] %v263_v27  ;;  %544 = vmatprep.mubr.bf16.mxu0 %v14611_v29  ;;  %v14824_v47 = vld [vmem:[#allocation11 + $0x8] sm:$0xff]   ;;  %v14825_v51 = vld [vmem:[#allocation11 + $0x50] sm:$0xff]  }
 0x12e   :  { %v14826_v52 = vld [vmem:[#allocation11 + $0x88] sm:$0xff]   ;;  %v14827_v53 = vld [vmem:[#allocation11 + $0x10] sm:$0xff]   ;;  %v14828_v54 = vld [vmem:[#allocation11 + $0x58] sm:$0xff]  }
 0x12f   :  { %14636 = vmatpush3.bf16.msra.mxu0 %v14806_v13  ;;  %14720 = vmatpush3.bf16.msra.mxu1 %v14807_v14  ;;  %v14829_v55 = vld [vmem:[#allocation11 + $0x90] sm:$0xff]   ;;  %v14830_v56 = vld [vmem:[#allocation11 + $0x18] sm:$0xff]   ;;  %v14831_v57 = vld [vmem:[#allocation11 + $0x60] sm:$0xff]  }
 0x130   :  { %14637 = vmatprep.subr.bf16.mxu0 %v14808_v15  ;;  %14721 = vmatprep.subr.bf16.mxu1 %v15811_v1  ;;  %v14832_v58 = vld [vmem:[#allocation11 + $0x98] sm:$0xff]   ;;  %v14833_v59 = vld [vmem:[#allocation11 + $0x20] sm:$0xff]   ;;  %v14834_v60 = vld [vmem:[#allocation11 + $0x68] sm:$0xff]  }
 0x131   :  { %v14835_v61 = vld [vmem:[#allocation11 + $0xa0] sm:$0xff]   ;;  %v14836_v62 = vld [vmem:[#allocation11 + $0x28] sm:$0xff]   ;;  %v14837_v63 = vld [vmem:[#allocation11 + $0x70] sm:$0xff]  }
 0x132   :  { %v272_v36 = vld [vmem:[#allocation2 + $0x20] sm:$0xff]  ;;  %v276_v41 = vld [vmem:[#allocation2 + $0x30] sm:$0x3] }
 0x133   :  { %14638 = vmatpush3.bf16.msra.mxu0 %v14809_v16  ;;  %14722 = vmatpush3.bf16.msra.mxu1 %v14810_v17  ;;  %v275_v40 = vld [vmem:[#allocation2 + $0x20] sm:$0xfc]  ;;  %v286_v45 = vrot.slane %v276_v41, 2  ;;  %v14838_v3 = vld [vmem:[#allocation11 + $0xa8] sm:$0xff]   ;;  %v14840_v5 = vld [vmem:[#allocation11 + $0x78] sm:$0xff]  }
 0x134   :  { %14639 = vmatprep.subr.bf16.mxu0 %v14811_v18  ;;  %14723 = vmatprep.subr.bf16.mxu1 %v15811_v1  ;;  %v271_v35 = vld [vmem:[#allocation2] sm:$0xff]  ;;  %v274_v39 = vld [vmem:[#allocation2 + $0x10] sm:$0x3]  ;;  %v285_v44 = vrot.slane %v275_v40, 2  ;;  %v14849_v41 = vld [vmem:[#allocation16 + $0x14] ss:$8 sps:$4 sm:$0xff]  }
 0x135   :  { %v273_v37 = vld [vmem:[#allocation2] sm:$0xfc]  ;;  %v14610_v38 = vpack.c.bf16 %v272_v36, %v271_v35  ;;  %v283_v43 = vrot.slane %v274_v39, 2  ;;  %v14842_v7 = vld [vmem:[#allocation11 + $0x38] sm:$0xff]   ;;  %v12264_v2 = vld [vmem:[%s18167_s15] sm:$0x3] }
 0x136   :  { %v282_v42 = vrot.slane %v273_v37, 2  ;;  %v287_v49 = vsel %vm281_vm2, %v285_v44, %v286_v45  ;;  %v14839_v4 = vld [vmem:[#allocation11 + $0x30] sm:$0xff]   ;;  %v14843_v8 = vld [vmem:[#allocation11 + $0xb8] sm:$0xff]  }
 0x137   :  { %14640 = vmatpush3.bf16.msra.mxu0 %v14812_v19  ;;  %14724 = vmatpush3.bf16.msra.mxu1 %v14813_v20  ;;  %v14841_v6 = vld [vmem:[#allocation11 + $0xb0] sm:$0xff]   ;;  %v13115_v12 = vld [vmem:[#allocation10] ss:$0 sm:$0xff] }
 0x138   :  { %14641 = vmatprep.subr.bf16.mxu0 %v14814_v21  ;;  %14725 = vmatprep.subr.bf16.mxu1 %v15811_v1  ;;  %v284_v48 = vsel %vm281_vm2, %v282_v42, %v283_v43  ;;  %v14846_v9 = vld [vmem:[#allocation16 + $0x4] ss:$8 sps:$4 sm:$0xff]   ;;  %v14847_v45 = vld [vmem:[#allocation16 + $0x10] ss:$8 sps:$4 sm:$0xff]  }
 0x139   :  { %v14612_v50 = vpack.c.bf16 %v287_v49, %v284_v48  ;;  %v14855_v48 = vld [vmem:[#allocation16 + $0x34] ss:$8 sps:$4 sm:$0xff]   ;;  %v14853_v49 = vld [vmem:[#allocation16 + $0x30] ss:$8 sps:$4 sm:$0xff]  }
 0x13b   :  { %14642 = vmatpush3.bf16.msra.mxu0 %v14815_v22  ;;  %14726 = vmatpush3.bf16.msra.mxu1 %v14816_v25 }
 0x13c   :  { %14643 = vmatprep.subr.bf16.mxu0 %v14817_v26  ;;  %14727 = vmatprep.subr.bf16.mxu1 %v15811_v1 }
 0x13f   :  { %14644 = vmatpush3.bf16.msra.mxu0 %v14818_v30  ;;  %14728 = vmatpush3.bf16.msra.mxu1 %v14819_v31 }
 0x140   :  { %14660 = vmatprep.subr.bf16.mxu0 %v14820_v32  ;;  %14733 = vmatprep.subr.bf16.mxu1 %v15811_v1 }
 0x142   :  { %545 = vmatmul.mubr.bf16.vlgmr.msra.gmra.mrb[0].mxu0 %v14610_v38  ;;  %14730 = vmatmul.mubr.bf16.vlgmr.msra.gmra.mrb[0].mxu1 %v14612_v50  ;;  %v14858_v50 = vld [vmem:[#allocation16 + $0x44] ss:$8 sps:$4 sm:$0xff]  }
 0x143   :  { %14661 = vmatpush3.bf16.msra.mxu0 %v14821_v33  ;;  %14734 = vmatpush3.bf16.msra.mxu1 %v14823_v46  ;;  %v14852_v46 = vld [vmem:[#allocation16 + $0x24] ss:$8 sps:$4 sm:$0xff]  }
 0x144   :  { %14662 = vmatprep.subr.bf16.mxu0 %v14822_v34  ;;  %14735 = vmatprep.subr.bf16.mxu1 %v15811_v1  ;;  %v14844_v34 = vld [vmem:[#allocation16] ss:$8 sps:$4 sm:$0xff]  }
 0x145   :  { %14749 = vmatprep.mubr.msk.bf16.mxu1 %vm15812_vm0, %v15811_v1 }
 0x147   :  { %14663 = vmatpush3.bf16.msra.mxu0 %v14824_v47  ;;  %14736 = vmatpush3.bf16.msra.mxu1 %v14826_v52  ;;  %v14850_v47 = vld [vmem:[#allocation16 + $0x20] ss:$8 sps:$4 sm:$0xff]   ;;  %v14861_v52 = vld [vmem:[#allocation16 + $0x54] ss:$8 sps:$4 sm:$0xff]  }
 0x148   :  { %14664 = vmatprep.subr.bf16.mxu0 %v14825_v51  ;;  %14737 = vmatprep.subr.bf16.mxu1 %v15811_v1  ;;  %v14856_v51 = vld [vmem:[#allocation16 + $0x40] ss:$8 sps:$4 sm:$0xff]  }
 0x14b   :  { %14665 = vmatpush3.bf16.msra.mxu0 %v14827_v53  ;;  %14738 = vmatpush3.bf16.msra.mxu1 %v14829_v55  ;;  %v14859_v53 = vld [vmem:[#allocation16 + $0x50] ss:$8 sps:$4 sm:$0xff]   ;;  %v14862_v55 = vld [vmem:[#allocation16 + $0x60] ss:$8 sps:$4 sm:$0xff]  }
 0x14c   :  { %14666 = vmatprep.subr.bf16.mxu0 %v14828_v54  ;;  %14739 = vmatprep.subr.bf16.mxu1 %v15811_v1  ;;  %v14864_v54 = vld [vmem:[#allocation16 + $0x64] ss:$8 sps:$4 sm:$0xff]  }
 0x14f   :  { %14667 = vmatpush3.bf16.msra.mxu0 %v14830_v56  ;;  %14740 = vmatpush3.bf16.msra.mxu1 %v14832_v58  ;;  %v14867_v56 = vld [vmem:[#allocation16 + $0x74] ss:$8 sps:$4 sm:$0xff]   ;;  %v14870_v58 = vld [vmem:[#allocation16 + $0x84] ss:$8 sps:$4 sm:$0xff]  }
 0x150   :  { %14668 = vmatprep.subr.bf16.mxu0 %v14831_v57  ;;  %14741 = vmatprep.subr.bf16.mxu1 %v15811_v1  ;;  %v14865_v57 = vld [vmem:[#allocation16 + $0x70] ss:$8 sps:$4 sm:$0xff]  }
 0x153   :  { %14669 = vmatpush3.bf16.msra.mxu0 %v14833_v59  ;;  %14742 = vmatpush3.bf16.msra.mxu1 %v14835_v61  ;;  %v14868_v59 = vld [vmem:[#allocation16 + $0x80] ss:$8 sps:$4 sm:$0xff]   ;;  %v14871_v61 = vld [vmem:[#allocation16 + $0x90] ss:$8 sps:$4 sm:$0xff]  }
 0x154   :  { %14670 = vmatprep.subr.bf16.mxu0 %v14834_v60  ;;  %14743 = vmatprep.subr.bf16.mxu1 %v15811_v1  ;;  %v14873_v60 = vld [vmem:[#allocation16 + $0x94] ss:$8 sps:$4 sm:$0xff]  }
 0x157   :  { %14671 = vmatpush3.bf16.msra.mxu0 %v14836_v62  ;;  %14744 = vmatpush3.bf16.msra.mxu1 %v14838_v3  ;;  %v14876_v62 = vld [vmem:[#allocation16 + $0xa4] ss:$8 sps:$4 sm:$0xff]   ;;  %v14879_v3 = vld [vmem:[#allocation16 + $0xb4] ss:$8 sps:$4 sm:$0xff]  }
 0x158   :  { %14672 = vmatprep.subr.bf16.mxu0 %v14837_v63  ;;  %14745 = vmatprep.subr.bf16.mxu1 %v15811_v1  ;;  %v14874_v63 = vld [vmem:[#allocation16 + $0xa0] ss:$8 sps:$4 sm:$0xff]  }
 0x15b   :  { %14673 = vmatpush3.bf16.msra.mxu0 %v14839_v4  ;;  %14746 = vmatpush3.bf16.msra.mxu1 %v14841_v6  ;;  %v14877_v4 = vld [vmem:[#allocation16 + $0xb0] ss:$8 sps:$4 sm:$0xff]   ;;  %v14880_v6 = vld [vmem:[#allocation16 + $0xc0] ss:$8 sps:$4 sm:$0xff]  }
 0x15c   :  { %14674 = vmatprep.subr.bf16.mxu0 %v14840_v5  ;;  %14747 = vmatprep.subr.bf16.mxu1 %v15811_v1  ;;  %v14882_v5 = vld [vmem:[#allocation16 + $0xc4] ss:$8 sps:$4 sm:$0xff]  }
 0x15f   :  { %14675 = vmatpush3.bf16.msra.mxu0 %v14842_v7  ;;  %14748 = vmatpush3.bf16.msra.mxu1 %v14843_v8  ;;  %v14885_v7 = vld [vmem:[#allocation16 + $0xd4] ss:$8 sps:$4 sm:$0xff]   ;;  %v14883_v8 = vld [vmem:[#allocation16 + $0xd0] ss:$8 sps:$4 sm:$0xff]  }
 0x160   :  { %1294 = vmatprep.subr.bf16.mxu0 %v14846_v9  ;;  %v14886_v9 = vld [vmem:[#allocation16 + $0xe0] ss:$8 sps:$4 sm:$0xff]  }
 0x215   :  { %v14645_v10 = vpop.f32.mrb[0].mxu0  ;;  %v587_v17 = vpop.f32.mrb[0].mxu1 }
 0x216   :  { %v14646_v11 = vpop.f32.mrb[1].mxu0  ;;  %v14731_v19 = vpop.f32.mrb[1].mxu1 }
 0x217   :  { %v14647_v13 = vadd.f32 %v14646_v11, %v14645_v10  ;;  %v14648_v14 = vpop.f32.mrb[2].mxu0  ;;  %v590_v22 = vpop.f32.mrb[2].mxu1  ;;  %v14888_v10 = vld [vmem:[#allocation16 + $0xe4] ss:$8 sps:$4 sm:$0xff]   ;;  %v14891_v11 = vld [vmem:[#allocation16 + $0xf4] ss:$8 sps:$4 sm:$0xff]  }
 0x218   :  { %v14649_v15 = vpop.f32.mrb[3].mxu0  ;;  %v14732_v23 = vpop.f32.mrb[3].mxu1  ;;  %v14924_v19 = vld [vmem:[#allocation17 + $0x24] ss:$8 sps:$4 sm:$0xff]  }
 0x219   :  { %v547_v16 = vadd.f32 %v14647_v13, %v13115_v12  ;;  %v14650_v18 = vadd.f32 %v14649_v15, %v14648_v14  ;;  %v14894_v13 = vld [vmem:[#allocation16 + $0x104] ss:$8 sps:$4 sm:$0xff]   ;;  %v15813_v14 = vmov 0   ;;  %v14916_v15 = vld [vmem:[#allocation17] ss:$8 sps:$4 sm:$0xff]  }
 0x21a   :  { %14795 = vset.pattern.permute.xlu0 %v15813_v14  ;;  %14794 = vset.pattern.permute.xlu1 %v15813_v14  ;;  %v14930_v23 = vld [vmem:[#allocation17 + $0x44] ss:$8 sps:$4 sm:$0xff]  }
 0x21b   :  { %v588_v20 = vadd.f32 %v587_v17, %v547_v16  ;;  %v550_v21 = vadd.f32 %v14650_v18, %v13115_v12  ;;  %v14889_v12 = vld [vmem:[#allocation16 + $0xf0] ss:$8 sps:$4 sm:$0xff]   ;;  %v14918_v16 = vld [vmem:[#allocation17 + $0x4] ss:$8 sps:$4 sm:$0xff]   ;;  %v14921_v17 = vld [vmem:[#allocation17 + $0x14] ss:$8 sps:$4 sm:$0xff]  }
 0x21c   :  { %2066 = vmatprep.subr.bf16.mxu1 %v14918_v16  ;;  %v14919_v18 = vld [vmem:[#allocation17 + $0x10] ss:$8 sps:$4 sm:$0xff]   ;;  %v14910_v16 = vld [vmem:[#allocation16 + $0x160] ss:$8 sps:$4 sm:$0xff]  }
 0x21d   :  { %v594_v24 = vmax.f32 %v588_v20, 0.0  ;;  %v591_v1 = vadd.f32 %v590_v22, %v550_v21  ;;  %v14922_v20 = vld [vmem:[#allocation17 + $0x20] ss:$8 sps:$4 sm:$0xff]   ;;  %v14927_v21 = vld [vmem:[#allocation17 + $0x34] ss:$8 sps:$4 sm:$0xff]  }
 0x21e   :  { %v14925_v22 = vld [vmem:[#allocation17 + $0x30] ss:$8 sps:$4 sm:$0xff]  }
 0x21f   :  { %v600_v25 = vrot.slane %v594_v24, 7  ;;  %v595_v26 = vmax.f32 %v591_v1, 0.0  ;;  %v14933_v1 = vld [vmem:[#allocation17 + $0x54] ss:$8 sps:$4 sm:$0xff]  }
 0x221   :  { %604 = vst [vmem:[#allocation2] sm:$0xfe] %v600_v25  ;;  %605 = vst [vmem:[#allocation2 + $0x10] sm:$0x1] %v600_v25  ;;  %v601_v27 = vrot.slane %v595_v26, 7  ;;  %v14614_v28 = vpack.c.bf16 %v595_v26, %v594_v24 }
 0x222   :  { %v14928_v24 = vld [vmem:[#allocation17 + $0x40] ss:$8 sps:$4 sm:$0xff]   ;;  %v14931_v25 = vld [vmem:[#allocation17 + $0x50] ss:$8 sps:$4 sm:$0xff]   ;;  %v14936_v26 = vld [vmem:[#allocation17 + $0x64] ss:$8 sps:$4 sm:$0xff]  }
 0x223   :  { %606 = vst [vmem:[#allocation2 + $0x20] sm:$0xfe] %v601_v27  ;;  %607 = vst [vmem:[#allocation2 + $0x30] sm:$0x1] %v601_v27  ;;  %874 = vmatprep.mubr.bf16.mxu0 %v14614_v28  ;;  %v14934_v27 = vld [vmem:[#allocation17 + $0x60] ss:$8 sps:$4 sm:$0xff]  }
 0x224   :  { %v14939_v28 = vld [vmem:[#allocation17 + $0x74] ss:$8 sps:$4 sm:$0xff]  }
 0x228   :  { %v610_v29 = vld [vmem:[#allocation2] sm:$0xfc]  ;;  %v611_v30 = vld [vmem:[#allocation2 + $0x10] sm:$0x3] }
 0x229   :  { %v608_v31 = vld [vmem:[#allocation2] sm:$0xff]  ;;  %v618_v32 = vrot.slane %v610_v29, 2  ;;  %v619_v33 = vrot.slane %v611_v30, 2 }
 0x22a   :  { %v609_v35 = vld [vmem:[#allocation2 + $0x20] sm:$0xff]  ;;  %v613_v37 = vld [vmem:[#allocation2 + $0x30] sm:$0x3] }
 0x22b   :  { %v612_v36 = vld [vmem:[#allocation2 + $0x20] sm:$0xfc]  ;;  %v14613_v38 = vpack.c.bf16 %v609_v35, %v608_v31  ;;  %v622_v40 = vrot.slane %v613_v37, 2  ;;  %v620_v42 = vsel %vm281_vm2, %v618_v32, %v619_v33  ;;  %v14940_v31 = vld [vmem:[#allocation17 + $0x80] ss:$8 sps:$4 sm:$0xff]  }
 0x22c   :  { %v621_v39 = vrot.slane %v612_v36, 2  ;;  %v14937_v29 = vld [vmem:[#allocation17 + $0x70] ss:$8 sps:$4 sm:$0xff]   ;;  %v14942_v30 = vld [vmem:[#allocation17 + $0x84] ss:$8 sps:$4 sm:$0xff]  }
 0x22d   :  { %875 = vmatmul.mubr.bf16.vlgmr.msra.gmra.mrb[4].mxu0 %v14613_v38  ;;  %v14945_v32 = vld [vmem:[#allocation17 + $0x94] ss:$8 sps:$4 sm:$0xff]   ;;  %v14943_v33 = vld [vmem:[#allocation17 + $0x90] ss:$8 sps:$4 sm:$0xff]   ;;  %v14946_v35 = vld [vmem:[#allocation17 + $0xa0] ss:$8 sps:$4 sm:$0xff]  }
 0x22e   :  { %v623_v43 = vsel %vm281_vm2, %v621_v39, %v622_v40  ;;  %1295 = vmatpush1.bf16.msra.mxu0 %v14844_v34  ;;  %v14948_v34 = vld [vmem:[#allocation17 + $0xa4] ss:$8 sps:$4 sm:$0xff]  }
 0x22f   :  { %v14615_v44 = vpack.c.bf16 %v623_v43, %v620_v42  ;;  %1296 = vmatprep.subr.bf16.mxu0 %v14849_v41 }
 0x231   :  { %14750 = vmatmul.mubr.bf16.vlgmr.msra.gmra.mrb[4].mxu1 %v14615_v44 }
 0x232   :  { %1297 = vmatpush1.bf16.msra.mxu0 %v14847_v45  ;;  %2067 = vmatpush1.bf16.msra.mxu1 %v14916_v15  ;;  %v13170_v45 = vld [vmem:[#allocation13] ss:$0 sm:$0xff] }
 0x233   :  { %1298 = vmatprep.subr.bf16.mxu0 %v14852_v46  ;;  %2068 = vmatprep.subr.bf16.mxu1 %v14921_v17  ;;  %v14915_v17 = vld [vmem:[#allocation16 + $0x174] ss:$8 sps:$4 sm:$0xff]  }
 0x236   :  { %1299 = vmatpush1.bf16.msra.mxu0 %v14850_v47  ;;  %2069 = vmatpush1.bf16.msra.mxu1 %v14919_v18 }
 0x237   :  { %1300 = vmatprep.subr.bf16.mxu0 %v14855_v48  ;;  %2070 = vmatprep.subr.bf16.mxu1 %v14924_v19 }
 0x23a   :  { %1301 = vmatpush1.bf16.msra.mxu0 %v14853_v49  ;;  %2071 = vmatpush1.bf16.msra.mxu1 %v14922_v20 }
 0x23b   :  { %1302 = vmatprep.subr.bf16.mxu0 %v14858_v50  ;;  %2072 = vmatprep.subr.bf16.mxu1 %v14927_v21  ;;  %v13171_v50 = vld [vmem:[#allocation14] ss:$0 sm:$0xff] }
 0x23e   :  { %1303 = vmatpush1.bf16.msra.mxu0 %v14856_v51  ;;  %2073 = vmatpush1.bf16.msra.mxu1 %v14925_v22  ;;  %v14913_v22 = vld [vmem:[#allocation16 + $0x170] ss:$8 sps:$4 sm:$0xff]  }
 0x23f   :  { %1304 = vmatprep.subr.bf16.mxu0 %v14861_v52  ;;  %2074 = vmatprep.subr.bf16.mxu1 %v14930_v23 }
 0x242   :  { %1305 = vmatpush1.bf16.msra.mxu0 %v14859_v53  ;;  %2075 = vmatpush1.bf16.msra.mxu1 %v14928_v24 }
 0x243   :  { %1306 = vmatprep.subr.bf16.mxu0 %v14864_v54  ;;  %2076 = vmatprep.subr.bf16.mxu1 %v14933_v1 }
 0x246   :  { %1307 = vmatpush1.bf16.msra.mxu0 %v14862_v55  ;;  %2077 = vmatpush1.bf16.msra.mxu1 %v14931_v25 }
 0x247   :  { %1308 = vmatprep.subr.bf16.mxu0 %v14867_v56  ;;  %2078 = vmatprep.subr.bf16.mxu1 %v14936_v26 }
 0x24a   :  { %1309 = vmatpush1.bf16.msra.mxu0 %v14865_v57  ;;  %2079 = vmatpush1.bf16.msra.mxu1 %v14934_v27  ;;  %v14951_v27 = vld [vmem:[#allocation17 + $0xb4] ss:$8 sps:$4 sm:$0xff]  }
 0x24b   :  { %1310 = vmatprep.subr.bf16.mxu0 %v14870_v58  ;;  %2080 = vmatprep.subr.bf16.mxu1 %v14939_v28  ;;  %v14949_v28 = vld [vmem:[#allocation17 + $0xb0] ss:$8 sps:$4 sm:$0xff]  }
 0x24e   :  { %1311 = vmatpush1.bf16.msra.mxu0 %v14868_v59  ;;  %2081 = vmatpush1.bf16.msra.mxu1 %v14937_v29  ;;  %v14892_v59 = vld [vmem:[#allocation16 + $0x100] ss:$8 sps:$4 sm:$0xff]   ;;  %v14954_v29 = vld [vmem:[#allocation17 + $0xc4] ss:$8 sps:$4 sm:$0xff]  }
 0x24f   :  { %1312 = vmatprep.subr.bf16.mxu0 %v14873_v60  ;;  %2082 = vmatprep.subr.bf16.mxu1 %v14942_v30  ;;  %v14952_v30 = vld [vmem:[#allocation17 + $0xc0] ss:$8 sps:$4 sm:$0xff]  }
 0x252   :  { %1313 = vmatpush1.bf16.msra.mxu0 %v14871_v61  ;;  %2083 = vmatpush1.bf16.msra.mxu1 %v14940_v31  ;;  %v14957_v31 = vld [vmem:[#allocation17 + $0xd4] ss:$8 sps:$4 sm:$0xff]  }
 0x253   :  { %1314 = vmatprep.subr.bf16.mxu0 %v14876_v62  ;;  %2084 = vmatprep.subr.bf16.mxu1 %v14945_v32  ;;  %v14955_v32 = vld [vmem:[#allocation17 + $0xd0] ss:$8 sps:$4 sm:$0xff]  }
 0x256   :  { %1315 = vmatpush1.bf16.msra.mxu0 %v14874_v63  ;;  %2085 = vmatpush1.bf16.msra.mxu1 %v14943_v33  ;;  %v14897_v63 = vld [vmem:[#allocation16 + $0x114] ss:$8 sps:$4 sm:$0xff]   ;;  %v14958_v33 = vld [vmem:[#allocation17 + $0xe0] ss:$8 sps:$4 sm:$0xff]  }
 0x257   :  { %1316 = vmatprep.subr.bf16.mxu0 %v14879_v3  ;;  %2086 = vmatprep.subr.bf16.mxu1 %v14948_v34  ;;  %v14895_v3 = vld [vmem:[#allocation16 + $0x110] ss:$8 sps:$4 sm:$0xff]   ;;  %v14960_v34 = vld [vmem:[#allocation17 + $0xe4] ss:$8 sps:$4 sm:$0xff]  }
 0x25a   :  { %1317 = vmatpush1.bf16.msra.mxu0 %v14877_v4  ;;  %2087 = vmatpush1.bf16.msra.mxu1 %v14946_v35  ;;  %v14900_v4 = vld [vmem:[#allocation16 + $0x124] ss:$8 sps:$4 sm:$0xff]   ;;  %v14963_v35 = vld [vmem:[#allocation17 + $0xf4] ss:$8 sps:$4 sm:$0xff]  }
 0x25b   :  { %1318 = vmatprep.subr.bf16.mxu0 %v14882_v5  ;;  %v14898_v5 = vld [vmem:[#allocation16 + $0x120] ss:$8 sps:$4 sm:$0xff]   ;;  %2088 = vmatprep.subr.bf16.mxu1 %v14951_v27 }
 0x25c   :  { %v2261_v27 = vld [vmem:[#allocation19 + $0xe0] sm:$0xff] }
 0x25e   :  { %1319 = vmatpush1.bf16.msra.mxu0 %v14880_v6  ;;  %v14903_v6 = vld [vmem:[#allocation16 + $0x134] ss:$8 sps:$4 sm:$0xff]   ;;  %2089 = vmatpush1.bf16.msra.mxu1 %v14949_v28  ;;  %v14978_v28 = vld [vmem:[#allocation17 + $0x144] ss:$8 sps:$4 sm:$0xff]  }
 0x25f   :  { %1320 = vmatprep.subr.bf16.mxu0 %v14885_v7  ;;  %v14901_v7 = vld [vmem:[#allocation16 + $0x130] ss:$8 sps:$4 sm:$0xff]   ;;  %2090 = vmatprep.subr.bf16.mxu1 %v14954_v29 }
 0x262   :  { %1321 = vmatpush1.bf16.msra.mxu0 %v14883_v8  ;;  %v14906_v8 = vld [vmem:[#allocation16 + $0x144] ss:$8 sps:$4 sm:$0xff]   ;;  %2091 = vmatpush1.bf16.msra.mxu1 %v14952_v30 }
 0x263   :  { %1322 = vmatprep.subr.bf16.mxu0 %v14888_v10  ;;  %v14909_v10 = vld [vmem:[#allocation16 + $0x154] ss:$8 sps:$4 sm:$0xff]   ;;  %2092 = vmatprep.subr.bf16.mxu1 %v14957_v31  ;;  %v14976_v31 = vld [vmem:[#allocation17 + $0x140] ss:$8 sps:$4 sm:$0xff]  }
 0x266   :  { %1323 = vmatpush1.bf16.msra.mxu0 %v14886_v9  ;;  %v14904_v9 = vld [vmem:[#allocation16 + $0x140] ss:$8 sps:$4 sm:$0xff]   ;;  %2093 = vmatpush1.bf16.msra.mxu1 %v14955_v32 }
 0x267   :  { %1324 = vmatprep.subr.bf16.mxu0 %v14891_v11  ;;  %v14907_v11 = vld [vmem:[#allocation16 + $0x150] ss:$8 sps:$4 sm:$0xff]   ;;  %2094 = vmatprep.subr.bf16.mxu1 %v14960_v34  ;;  %v2265_v32 = vld [vmem:[#allocation19 + $0x100] sm:$0xff]  ;;  %v14981_v34 = vld [vmem:[#allocation17 + $0x154] ss:$8 sps:$4 sm:$0xff]  }
 0x26a   :  { %1325 = vmatpush1.bf16.msra.mxu0 %v14889_v12  ;;  %v14912_v12 = vld [vmem:[#allocation16 + $0x164] ss:$8 sps:$4 sm:$0xff]   ;;  %2095 = vmatpush1.bf16.msra.mxu1 %v14958_v33 }
 0x26b   :  { %1337 = vmatprep.subr.bf16.mxu0 %v14894_v13  ;;  %2096 = vmatprep.subr.bf16.mxu1 %v14963_v35  ;;  %v2269_v33 = vld [vmem:[#allocation19 + $0x120] sm:$0xff] }
 0x26c   :  { %v13360_v35 = vcombine.high %v2265_v32, %v2269_v33 }
 0x300   :  { %v14676_v36 = vpop.f32.mrb[4].mxu0 }
 0x301   :  { %v14677_v37 = vpop.f32.mrb[5].mxu0 }
 0x302   :  { %v14678_v38 = vadd.f32 %v14677_v37, %v14676_v36  ;;  %v14679_v39 = vpop.f32.mrb[6].mxu0  ;;  %v14961_v36 = vld [vmem:[#allocation17 + $0xf0] ss:$8 sps:$4 sm:$0xff]   ;;  %v14966_v37 = vld [vmem:[#allocation17 + $0x104] ss:$8 sps:$4 sm:$0xff]  }
 0x303   :  { %v14680_v40 = vpop.f32.mrb[7].mxu0  ;;  %2097 = vmatpush1.bf16.msra.mxu1 %v14961_v36  ;;  %v13359_v36 = vcombine.low %v2265_v32, %v2269_v33  ;;  %v15011_v33 = vld [vmem:[#allocation17 + $0x1f4] ss:$8 sps:$4 sm:$0xff]  }
 0x304   :  { %v917_v41 = vpop.f32.mrb[4].mxu1  ;;  %v14681_v42 = vadd.f32 %v14680_v40, %v14679_v39  ;;  %2109 = vmatprep.subr.bf16.mxu1 %v14966_v37  ;;  %v14979_v37 = vld [vmem:[#allocation17 + $0x150] ss:$8 sps:$4 sm:$0xff]  }
 0x305   :  { %v918_v43 = vadd.f32 %v14678_v38, %v917_v41  ;;  %v14751_v44 = vpop.f32.mrb[5].mxu1  ;;  %v16186_v38 = vshrl.u32 %v18185_v0, 7  ;;  %v942_v41 = vld [vmem:[%s18159_s7] sm:$0x3] }
 0x306   :  { %v920_v46 = vpop.f32.mrb[6].mxu1 }
 0x307   :  { %v924_v47 = vmax.f32 %v918_v43, 0.0  ;;  %v921_v48 = vadd.f32 %v14681_v42, %v920_v46  ;;  %v14752_v49 = vpop.f32.mrb[7].mxu1  ;;  %18445 = vst [vmem:[#allocation38_spill] sm:$0xff] %v16186_v38  ;;  %v16189_v39 = vsub.s32 0, %v16186_v38  ;;  %v16192_v40 = vsub.s32 1, %v16186_v38 }
 0x309   :  { %v932_v51 = vmul.f32 %v13170_v45, %v924_v47  ;;  %v925_v52 = vmax.f32 %v921_v48, 0.0  ;;  %v1029_v42 = vrot.slane %v942_v41, %v16189_v39  ;;  %v1033_v43 = vrot.slane %v942_v41, %v16192_v40  ;;  %v2273_v41 = vld [vmem:[#allocation19 + $0x140] sm:$0xff] }
 0x30b   :  { %v940_v53 = vadd.f32 %v13171_v50, %v932_v51  ;;  %v933_v54 = vmul.f32 %v13170_v45, %v925_v52 }
 0x30d   :  { %v945_v55 = vrot.slane %v940_v53, 7  ;;  %v941_v56 = vadd.f32 %v13171_v50, %v933_v54 }
 0x30f   :  { %949 = vst [vmem:[#allocation2] sm:$0xfe] %v945_v55  ;;  %950 = vst [vmem:[#allocation2 + $0x10] sm:$0x1] %v945_v55  ;;  %v946_v57 = vrot.slane %v941_v56, 7  ;;  %v14617_v58 = vpack.c.bf16 %v941_v56, %v940_v53 }
 0x311   :  { %951 = vst [vmem:[#allocation2 + $0x20] sm:$0xfe] %v946_v57  ;;  %952 = vst [vmem:[#allocation2 + $0x30] sm:$0x1] %v946_v57  ;;  %1326 = vmatprep.mubr.bf16.mxu0 %v14617_v58 }
 0x316   :  { %v953_v60 = vld [vmem:[#allocation2] sm:$0xff]  ;;  %v956_v19 = vld [vmem:[#allocation2 + $0x10] sm:$0x3] }
 0x317   :  { %v955_v18 = vld [vmem:[#allocation2] sm:$0xfc]  ;;  %v964_v24 = vrot.slane %v956_v19, 2 }
 0x318   :  { %v954_v61 = vld [vmem:[#allocation2 + $0x20] sm:$0xff]  ;;  %v958_v15 = vld [vmem:[#allocation2 + $0x30] sm:$0x3]  ;;  %v963_v23 = vrot.slane %v955_v18, 2 }
 0x319   :  { %v14616_v62 = vpack.c.bf16 %v954_v61, %v953_v60  ;;  %v957_v13 = vld [vmem:[#allocation2 + $0x20] sm:$0xfc]  ;;  %v967_v21 = vrot.slane %v958_v15, 2  ;;  %v2241_v15 = vld [vmem:[#allocation19 + $0x40] sm:$0xff] }
 0x31a   :  { %v966_v20 = vrot.slane %v957_v13, 2  ;;  %v965_v25 = vsel %vm281_vm2, %v963_v23, %v964_v24  ;;  %v14975_v23 = vld [vmem:[#allocation17 + $0x134] ss:$8 sps:$4 sm:$0xff]  }
 0x31b   :  { %1327 = vmatmul.mubr.bf16.vlgmr.msra.gmra.mrb[8].mxu0 %v14616_v62 }
 0x31c   :  { %1338 = vmatpush1.bf16.msra.mxu0 %v14892_v59  ;;  %1369 = vmatprep.mubr.bf16.mxu0 %v15813_v14  ;;  %v968_v1 = vsel %vm281_vm2, %v966_v20, %v967_v21  ;;  %v14970_v20 = vld [vmem:[#allocation17 + $0x120] ss:$8 sps:$4 sm:$0xff]  }
 0x31d   :  { %1339 = vmatprep.subr.bf16.mxu0 %v14897_v63  ;;  %v14618_v26 = vpack.c.bf16 %v968_v1, %v965_v25  ;;  %v2249_v21 = vld [vmem:[#allocation19 + $0x80] sm:$0xff]  ;;  %v14973_v25 = vld [vmem:[#allocation17 + $0x130] ss:$8 sps:$4 sm:$0xff]  }
 0x320   :  { %1340 = vmatpush1.bf16.msra.mxu0 %v14895_v3 }
 0x321   :  { %1341 = vmatprep.subr.bf16.mxu0 %v14900_v4 }
 0x324   :  { %1342 = vmatpush1.bf16.msra.mxu0 %v14898_v5  ;;  %v14964_v5 = vld [vmem:[#allocation17 + $0x100] ss:$8 sps:$4 sm:$0xff]  }
 0x325   :  { %1343 = vmatprep.subr.bf16.mxu0 %v14903_v6 }
 0x328   :  { %1344 = vmatpush1.bf16.msra.mxu0 %v14901_v7 }
 0x329   :  { %1345 = vmatprep.subr.bf16.mxu0 %v14906_v8  ;;  %v14969_v8 = vld [vmem:[#allocation17 + $0x114] ss:$8 sps:$4 sm:$0xff]  }
 0x32c   :  { %1346 = vmatpush1.bf16.msra.mxu0 %v14904_v9  ;;  %v2233_v9 = vld [vmem:[#allocation19] sm:$0xff] }
 0x32d   :  { %1347 = vmatprep.subr.bf16.mxu0 %v14909_v10  ;;  %v2237_v10 = vld [vmem:[#allocation19 + $0x20] sm:$0xff] }
 0x32e   :  { %v13328_v13 = vcombine.high %v2233_v9, %v2237_v10 }
 0x330   :  { %1348 = vmatpush1.bf16.msra.mxu0 %v14907_v11  ;;  %v14967_v11 = vld [vmem:[#allocation17 + $0x110] ss:$8 sps:$4 sm:$0xff]  }
 0x331   :  { %1349 = vmatprep.subr.bf16.mxu0 %v14912_v12  ;;  %v13327_v12 = vcombine.low %v2233_v9, %v2237_v10  ;;  %v14994_v10 = vld [vmem:[#allocation17 + $0x1a0] ss:$8 sps:$4 sm:$0xff]  }
 0x334   :  { %1350 = vmatpush1.bf16.msra.mxu0 %v14910_v16  ;;  %v2245_v16 = vld [vmem:[#allocation19 + $0x60] sm:$0xff] }
 0x335   :  { %1351 = vmatprep.subr.bf16.mxu0 %v14915_v17  ;;  %v14972_v17 = vld [vmem:[#allocation17 + $0x124] ss:$8 sps:$4 sm:$0xff]   ;;  %v13336_v18 = vcombine.high %v2241_v15, %v2245_v16  ;;  %v13335_v19 = vcombine.low %v2241_v15, %v2245_v16 }
 0x338   :  { %1352 = vmatpush1.bf16.msra.mxu0 %v14913_v22  ;;  %v2253_v22 = vld [vmem:[#allocation19 + $0xa0] sm:$0xff] }
 0x339   :  { %3055 = vmatprep.subr.bf16.mxu0 %v13328_v13  ;;  %v13344_v24 = vcombine.high %v2249_v21, %v2253_v22  ;;  %v13343_v1 = vcombine.low %v2249_v21, %v2253_v22  ;;  %v14999_v13 = vld [vmem:[#allocation17 + $0x1b4] ss:$8 sps:$4 sm:$0xff]  }
 0x33b   :  { %1370 = vmatmul.mubr.bf16.vlgmr.msra.gmra.mrb[8].mxu0 %v14618_v26  ;;  %v2257_v26 = vld [vmem:[#allocation19 + $0xc0] sm:$0xff] }
 0x33c   :  { %3056 = vmatpush1.bf16.msra.mxu0 %v13327_v12  ;;  %v13352_v29 = vcombine.high %v2257_v26, %v2261_v27  ;;  %v13351_v30 = vcombine.low %v2257_v26, %v2261_v27  ;;  %v2317_v12 = vld [vmem:[#allocation19 + $0x2a0] sm:$0xff] }
 0x33d   :  { %3057 = vmatprep.subr.bf16.mxu0 %v13336_v18  ;;  %v2321_v18 = vld [vmem:[#allocation19 + $0x2c0] sm:$0xff] }
 0x340   :  { %3058 = vmatpush1.bf16.msra.mxu0 %v13335_v19  ;;  %v2325_v19 = vld [vmem:[#allocation19 + $0x2e0] sm:$0xff] }
 0x341   :  { %3059 = vmatprep.subr.bf16.mxu0 %v13344_v24  ;;  %v13416_v21 = vcombine.high %v2321_v18, %v2325_v19  ;;  %v13415_v22 = vcombine.low %v2321_v18, %v2325_v19  ;;  %v2329_v24 = vld [vmem:[#allocation19 + $0x300] sm:$0xff]  ;;  %v15059_v19 = vld [vmem:[#allocation17 + $0x2f4] ss:$8 sps:$4 sm:$0xff]  }
 0x342   :  { %v15054_v18 = vld [vmem:[#allocation17 + $0x2e0] ss:$8 sps:$4 sm:$0xff]  }
 0x344   :  { %3060 = vmatpush1.bf16.msra.mxu0 %v13343_v1  ;;  %v2333_v1 = vld [vmem:[#allocation19 + $0x320] sm:$0xff] }
 0x345   :  { %3061 = vmatprep.subr.bf16.mxu0 %v13352_v29  ;;  %v13424_v26 = vcombine.high %v2329_v24, %v2333_v1  ;;  %v13423_v27 = vcombine.low %v2329_v24, %v2333_v1  ;;  %v15008_v29 = vld [vmem:[#allocation17 + $0x1e4] ss:$8 sps:$4 sm:$0xff]   ;;  %v2235_v24 = vld [vmem:[#allocation19 + $0x10] sm:$0xff] }
 0x346   :  { %v2239_v1 = vld [vmem:[#allocation19 + $0x30] sm:$0xff] }
 0x348   :  { %3062 = vmatpush1.bf16.msra.mxu0 %v13351_v30  ;;  %v15006_v30 = vld [vmem:[#allocation17 + $0x1e0] ss:$8 sps:$4 sm:$0xff]  }
 0x349   :  { %3063 = vmatprep.subr.bf16.mxu0 %v13360_v35 }
 0x34c   :  { %3064 = vmatpush1.bf16.msra.mxu0 %v13359_v36 }
 0x40e   :  { %v1371_v44 = vpop.f32.mrb[8].mxu0 }
 0x40f   :  { %v14753_v45 = vadd.f32 %v1371_v44, %v1029_v42  ;;  %v1373_v46 = vpop.f32.mrb[9].mxu0 }
 0x410   :  { %v14754_v47 = vadd.f32 %v1373_v46, %v1033_v43  ;;  %v1375_v48 = vpop.f32.mrb[10].mxu0  ;;  %v14982_v46 = vld [vmem:[#allocation17 + $0x160] ss:$8 sps:$4 sm:$0xff]  }
 0x411   :  { %v1380_v49 = vmax.f32 %v14753_v45, 0.0  ;;  %v14755_v50 = vadd.f32 %v1375_v48, %v1029_v42  ;;  %v1377_v51 = vpop.f32.mrb[11].mxu0  ;;  %v2277_v42 = vld [vmem:[#allocation19 + $0x160] sm:$0xff] }
 0x412   :  { %v1381_v52 = vmax.f32 %v14754_v47, 0.0  ;;  %v14756_v53 = vadd.f32 %v1377_v51, %v1033_v43  ;;  %v14984_v43 = vld [vmem:[#allocation17 + $0x164] ss:$8 sps:$4 sm:$0xff]   ;;  %v13368_v44 = vcombine.high %v2273_v41, %v2277_v42  ;;  %v13367_v45 = vcombine.low %v2273_v41, %v2277_v42  ;;  %v15009_v41 = vld [vmem:[#allocation17 + $0x1f0] ss:$8 sps:$4 sm:$0xff]  }
 0x413   :  { %v1390_v54 = vrot.slane %v1380_v49, 7  ;;  %v1382_v55 = vmax.f32 %v14755_v50, 0.0  ;;  %v2281_v47 = vld [vmem:[#allocation19 + $0x180] sm:$0xff] }
 0x414   :  { %v1391_v56 = vrot.slane %v1381_v52, 7  ;;  %v1383_v57 = vmax.f32 %v14756_v53, 0.0  ;;  %3065 = vmatprep.subr.bf16.mxu0 %v13368_v44  ;;  %v2285_v48 = vld [vmem:[#allocation19 + $0x1a0] sm:$0xff] }
 0x415   :  { %1400 = vst [vmem:[#allocation2 + $0x10] sm:$0x1] %v1390_v54  ;;  %1398 = vst [vmem:[#allocation2] sm:$0xfe] %v1390_v54  ;;  %v1392_v58 = vrot.slane %v1382_v55, 7  ;;  %v16199_v59 = vpack.c.bf16 %v1382_v55, %v1380_v49  ;;  %v13376_v50 = vcombine.high %v2281_v47, %v2285_v48  ;;  %3066 = vmatpush1.bf16.msra.mxu0 %v13367_v45  ;;  %v2289_v53 = vld [vmem:[#allocation19 + $0x1c0] sm:$0xff] }
 0x416   :  { %1399 = vst [vmem:[#allocation2 + $0x8] sm:$0xfe] %v1391_v56  ;;  %1401 = vst [vmem:[#allocation2 + $0x18] sm:$0x1] %v1391_v56  ;;  %v1393_v60 = vrot.slane %v1383_v57, 7  ;;  %v14622_v61 = vpack.c.bf16 %v1383_v57, %v1381_v52  ;;  %v13375_v51 = vcombine.low %v2281_v47, %v2285_v48  ;;  %v2293_v54 = vld [vmem:[#allocation19 + $0x1e0] sm:$0xff] }
 0x417   :  { %1404 = vst [vmem:[#allocation2 + $0x30] sm:$0x1] %v1392_v58  ;;  %1402 = vst [vmem:[#allocation2 + $0x20] sm:$0xfe] %v1392_v58  ;;  %v14987_v49 = vld [vmem:[#allocation17 + $0x174] ss:$8 sps:$4 sm:$0xff]   ;;  %3067 = vmatprep.subr.bf16.mxu0 %v13376_v50  ;;  %v13384_v56 = vcombine.high %v2289_v53, %v2293_v54  ;;  %v13383_v57 = vcombine.low %v2289_v53, %v2293_v54 }
 0x418   :  { %1403 = vst [vmem:[#allocation2 + $0x28] sm:$0xfe] %v1393_v60  ;;  %1405 = vst [vmem:[#allocation2 + $0x38] sm:$0x1] %v1393_v60  ;;  %v14985_v52 = vld [vmem:[#allocation17 + $0x170] ss:$8 sps:$4 sm:$0xff]  }
 0x419   :  { %v14990_v55 = vld [vmem:[#allocation17 + $0x184] ss:$8 sps:$4 sm:$0xff]   ;;  %3068 = vmatpush1.bf16.msra.mxu0 %v13375_v51  ;;  %v14988_v58 = vld [vmem:[#allocation17 + $0x180] ss:$8 sps:$4 sm:$0xff]   ;;  %v15017_v48 = vld [vmem:[#allocation17 + $0x214] ss:$8 sps:$4 sm:$0xff]  }
 0x41a   :  { %3069 = vmatprep.subr.bf16.mxu0 %v13384_v56  ;;  %v2297_v60 = vld [vmem:[#allocation19 + $0x200] sm:$0xff]  ;;  %v15015_v50 = vld [vmem:[#allocation17 + $0x210] ss:$8 sps:$4 sm:$0xff]   ;;  %v15023_v53 = vld [vmem:[#allocation17 + $0x234] ss:$8 sps:$4 sm:$0xff]  }
 0x41b   :  { %v15014_v42 = vld [vmem:[#allocation17 + $0x204] ss:$8 sps:$4 sm:$0xff]   ;;  %v15021_v54 = vld [vmem:[#allocation17 + $0x230] ss:$8 sps:$4 sm:$0xff]   ;;  %v15024_v56 = vld [vmem:[#allocation17 + $0x240] ss:$8 sps:$4 sm:$0xff]  }
 0x41c   :  { %v1406_v6 = vld [vmem:[#allocation2] sm:$0xff] }
 0x41d   :  { %v1407_v63 = vld [vmem:[#allocation2 + $0x8] sm:$0xff]  ;;  %3070 = vmatpush1.bf16.msra.mxu0 %v13383_v57  ;;  %v1413_v35 = vld [vmem:[#allocation2 + $0x18] sm:$0x3]  ;;  %v15020_v51 = vld [vmem:[#allocation17 + $0x224] ss:$8 sps:$4 sm:$0xff]  }
 0x41e   :  { %v1408_v62 = vld [vmem:[#allocation2 + $0x20] sm:$0xff]  ;;  %v1430_v44 = vrot.slane %v1413_v35, 2  ;;  %v15029_v57 = vld [vmem:[#allocation17 + $0x254] ss:$8 sps:$4 sm:$0xff]  }
 0x41f   :  { %v1409_v3 = vld [vmem:[#allocation2 + $0x28] sm:$0xff]  ;;  %v14619_v7 = vpack.c.bf16 %v1408_v62, %v1406_v6  ;;  %v2309_v6 = vld [vmem:[#allocation19 + $0x260] sm:$0xff] }
 0x420   :  { %v14620_v4 = vpack.c.bf16 %v1409_v3, %v1407_v63  ;;  %v14993_v62 = vld [vmem:[#allocation17 + $0x194] ss:$8 sps:$4 sm:$0xff]   ;;  %v1417_v32 = vld [vmem:[#allocation2 + $0x38] sm:$0x3] }
 0x422   :  { %2098 = vmatprep.mubr.bf16.mxu1 %v14620_v4  ;;  %v14991_v4 = vld [vmem:[#allocation17 + $0x190] ss:$8 sps:$4 sm:$0xff]  }
 0x423   :  { %2099 = vmatmul.mubr.bf16.vlgmr.msra.gmra.mrb[8].mxu1 %v14619_v7  ;;  %v14996_v7 = vld [vmem:[#allocation17 + $0x1a4] ss:$8 sps:$4 sm:$0xff]  }
 0x424   :  { %2110 = vmatpush1.bf16.msra.mxu1 %v14964_v5  ;;  %2141 = vmatprep.mubr.bf16.mxu1 %v14622_v61  ;;  %v2301_v61 = vld [vmem:[#allocation19 + $0x220] sm:$0xff] }
 0x425   :  { %2111 = vmatprep.subr.bf16.mxu1 %v14969_v8  ;;  %v13392_v63 = vcombine.high %v2297_v60, %v2301_v61  ;;  %v13391_v3 = vcombine.low %v2297_v60, %v2301_v61  ;;  %v2305_v5 = vld [vmem:[#allocation19 + $0x240] sm:$0xff]  ;;  %v15035_v61 = vld [vmem:[#allocation17 + $0x274] ss:$8 sps:$4 sm:$0xff]  }
 0x426   :  { %v13400_v8 = vcombine.high %v2305_v5, %v2309_v6  ;;  %v13399_v9 = vcombine.low %v2305_v5, %v2309_v6  ;;  %v15030_v60 = vld [vmem:[#allocation17 + $0x260] ss:$8 sps:$4 sm:$0xff]   ;;  %v15039_v5 = vld [vmem:[#allocation17 + $0x290] ss:$8 sps:$4 sm:$0xff]   ;;  %v15044_v6 = vld [vmem:[#allocation17 + $0x2a4] ss:$8 sps:$4 sm:$0xff]  }
 0x427   :  { %3071 = vmatprep.subr.bf16.mxu0 %v13392_v63  ;;  %v15038_v63 = vld [vmem:[#allocation17 + $0x284] ss:$8 sps:$4 sm:$0xff]  }
 0x428   :  { %2112 = vmatpush1.bf16.msra.mxu1 %v14967_v11  ;;  %3072 = vmatpush1.bf16.msra.mxu0 %v13391_v3  ;;  %v2313_v11 = vld [vmem:[#allocation19 + $0x280] sm:$0xff] }
 0x429   :  { %2113 = vmatprep.subr.bf16.mxu1 %v14972_v17  ;;  %3073 = vmatprep.subr.bf16.mxu0 %v13400_v8  ;;  %v13408_v15 = vcombine.high %v2313_v11, %v2317_v12  ;;  %v13407_v16 = vcombine.low %v2313_v11, %v2317_v12  ;;  %v14997_v17 = vld [vmem:[#allocation17 + $0x1b0] ss:$8 sps:$4 sm:$0xff]   ;;  %v15036_v3 = vld [vmem:[#allocation17 + $0x280] ss:$8 sps:$4 sm:$0xff]   ;;  %v15047_v8 = vld [vmem:[#allocation17 + $0x2b4] ss:$8 sps:$4 sm:$0xff]  }
 0x42a   :  { %v15048_v11 = vld [vmem:[#allocation17 + $0x2c0] ss:$8 sps:$4 sm:$0xff]   ;;  %v15053_v12 = vld [vmem:[#allocation17 + $0x2d4] ss:$8 sps:$4 sm:$0xff]  }
 0x42c   :  { %2114 = vmatpush1.bf16.msra.mxu1 %v14970_v20  ;;  %3074 = vmatpush1.bf16.msra.mxu0 %v13399_v9  ;;  %v15002_v20 = vld [vmem:[#allocation17 + $0x1c4] ss:$8 sps:$4 sm:$0xff]   ;;  %v15045_v9 = vld [vmem:[#allocation17 + $0x2b0] ss:$8 sps:$4 sm:$0xff]  }
 0x42d   :  { %2115 = vmatprep.subr.bf16.mxu1 %v14975_v23  ;;  %3075 = vmatprep.subr.bf16.mxu0 %v13408_v15  ;;  %v15000_v23 = vld [vmem:[#allocation17 + $0x1c0] ss:$8 sps:$4 sm:$0xff]   ;;  %v15056_v15 = vld [vmem:[#allocation17 + $0x2e4] ss:$8 sps:$4 sm:$0xff]  }
 0x430   :  { %2116 = vmatpush1.bf16.msra.mxu1 %v14973_v25  ;;  %3076 = vmatpush1.bf16.msra.mxu0 %v13407_v16  ;;  %v15005_v25 = vld [vmem:[#allocation17 + $0x1d4] ss:$8 sps:$4 sm:$0xff]   ;;  %v1414_v16 = vld [vmem:[#allocation2 + $0x20] sm:$0xfc] }
 0x431   :  { %2117 = vmatprep.subr.bf16.mxu1 %v14978_v28  ;;  %3077 = vmatprep.subr.bf16.mxu0 %v13416_v21  ;;  %v15003_v28 = vld [vmem:[#allocation17 + $0x1d0] ss:$8 sps:$4 sm:$0xff]  }
 0x432   :  { %v1412_v21 = vld [vmem:[#allocation2 + $0x10] sm:$0x3] }
 0x434   :  { %2118 = vmatpush1.bf16.msra.mxu1 %v14976_v31  ;;  %3078 = vmatpush1.bf16.msra.mxu0 %v13415_v22  ;;  %v1415_v31 = vld [vmem:[#allocation2 + $0x28] sm:$0xfc]  ;;  %v1432_v22 = vrot.slane %v1414_v16, 2 }
 0x435   :  { %2119 = vmatprep.subr.bf16.mxu1 %v14981_v34  ;;  %3079 = vmatprep.subr.bf16.mxu0 %v13424_v26  ;;  %v1411_v34 = vld [vmem:[#allocation2 + $0x8] sm:$0xfc]  ;;  %v1435_v36 = vrot.slane %v1415_v31, 2 }
 0x436   :  { %v2247_v31 = vld [vmem:[#allocation19 + $0x70] sm:$0xff] }
 0x437   :  { %v2327_v16 = vld [vmem:[#allocation19 + $0x2f0] sm:$0xff] }
 0x438   :  { %2120 = vmatpush1.bf16.msra.mxu1 %v14979_v37  ;;  %3080 = vmatpush1.bf16.msra.mxu0 %v13423_v27  ;;  %v1436_v37 = vrot.slane %v1417_v32, 2  ;;  %v1427_v27 = vrot.slane %v1412_v21, 2 }
 0x439   :  { %2121 = vmatprep.subr.bf16.mxu1 %v14984_v43  ;;  %v1429_v43 = vrot.slane %v1411_v34, 2 }
 0x43a   :  { %v1437_v45 = vsel %vm281_vm2, %v1435_v36, %v1436_v37  ;;  %v2251_v36 = vld [vmem:[#allocation19 + $0x90] sm:$0xff] }
 0x43b   :  { %v1431_v47 = vsel %vm281_vm2, %v1429_v43, %v1430_v44  ;;  %v2255_v37 = vld [vmem:[#allocation19 + $0xb0] sm:$0xff] }
 0x43c   :  { %2122 = vmatpush1.bf16.msra.mxu1 %v14982_v46  ;;  %v15012_v46 = vld [vmem:[#allocation17 + $0x200] ss:$8 sps:$4 sm:$0xff]   ;;  %v2259_v43 = vld [vmem:[#allocation19 + $0xd0] sm:$0xff] }
 0x43d   :  { %2123 = vmatprep.subr.bf16.mxu1 %v14987_v49  ;;  %v14624_v49 = vpack.c.bf16 %v1437_v45, %v1431_v47  ;;  %v2263_v44 = vld [vmem:[#allocation19 + $0xf0] sm:$0xff]  ;;  %v13347_v45 = vcombine.low %v2251_v36, %v2255_v37 }
 0x43e   :  { %v2267_v47 = vld [vmem:[#allocation19 + $0x110] sm:$0xff] }
 0x440   :  { %2124 = vmatpush1.bf16.msra.mxu1 %v14985_v52  ;;  %v15018_v52 = vld [vmem:[#allocation17 + $0x220] ss:$8 sps:$4 sm:$0xff]  }
 0x441   :  { %2125 = vmatprep.subr.bf16.mxu1 %v14990_v55  ;;  %v15026_v55 = vld [vmem:[#allocation17 + $0x244] ss:$8 sps:$4 sm:$0xff]  }
 0x444   :  { %2126 = vmatpush1.bf16.msra.mxu1 %v14988_v58  ;;  %v15027_v58 = vld [vmem:[#allocation17 + $0x250] ss:$8 sps:$4 sm:$0xff]  }
 0x445   :  { %2127 = vmatprep.subr.bf16.mxu1 %v14993_v62  ;;  %v15033_v62 = vld [vmem:[#allocation17 + $0x270] ss:$8 sps:$4 sm:$0xff]  }
 0x448   :  { %2128 = vmatpush1.bf16.msra.mxu1 %v14991_v4  ;;  %v15041_v4 = vld [vmem:[#allocation17 + $0x294] ss:$8 sps:$4 sm:$0xff]  }
 0x449   :  { %2129 = vmatprep.subr.bf16.mxu1 %v14996_v7  ;;  %v15042_v7 = vld [vmem:[#allocation17 + $0x2a0] ss:$8 sps:$4 sm:$0xff]  }
 0x44c   :  { %2130 = vmatpush1.bf16.msra.mxu1 %v14994_v10  ;;  %v15050_v10 = vld [vmem:[#allocation17 + $0x2c4] ss:$8 sps:$4 sm:$0xff]  }
 0x44d   :  { %2131 = vmatprep.subr.bf16.mxu1 %v14999_v13  ;;  %v15051_v13 = vld [vmem:[#allocation17 + $0x2d0] ss:$8 sps:$4 sm:$0xff]  }
 0x450   :  { %2132 = vmatpush1.bf16.msra.mxu1 %v14997_v17  ;;  %v1416_v17 = vld [vmem:[#allocation2 + $0x30] sm:$0x3] }
 0x451   :  { %2133 = vmatprep.subr.bf16.mxu1 %v15002_v20  ;;  %v1410_v20 = vld [vmem:[#allocation2] sm:$0xfc] }
 0x452   :  { %v1426_v26 = vrot.slane %v1410_v20, 2  ;;  %v2335_v20 = vld [vmem:[#allocation19 + $0x330] sm:$0xff] }
 0x454   :  { %2134 = vmatpush1.bf16.msra.mxu1 %v15000_v23  ;;  %v1433_v23 = vrot.slane %v1416_v17, 2  ;;  %v1428_v32 = vsel %vm281_vm2, %v1426_v26, %v1427_v27  ;;  %v2339_v26 = vld [vmem:[#allocation19 + $0x350] sm:$0xff] }
 0x455   :  { %2135 = vmatprep.subr.bf16.mxu1 %v15005_v25  ;;  %v15057_v25 = vld [vmem:[#allocation17 + $0x2f0] ss:$8 sps:$4 sm:$0xff]  }
 0x456   :  { %v2343_v27 = vld [vmem:[#allocation19 + $0x370] sm:$0xff] }
 0x458   :  { %2136 = vmatpush1.bf16.msra.mxu1 %v15003_v28  ;;  %v13332_v28 = vcombine.high %v2235_v24, %v2239_v1 }
 0x459   :  { %2137 = vmatprep.subr.bf16.mxu1 %v15008_v29  ;;  %v1434_v29 = vsel %vm281_vm2, %v1432_v22, %v1433_v23 }
 0x45a   :  { %v14623_v34 = vpack.c.bf16 %v1434_v29, %v1428_v32  ;;  %v13436_v29 = vcombine.high %v2339_v26, %v2343_v27  ;;  %v2349_v32 = vld [vmem:[#allocation19 + $0x3a0] sm:$0xff] }
 0x45c   :  { %2138 = vmatpush1.bf16.msra.mxu1 %v15006_v30  ;;  %v2243_v30 = vld [vmem:[#allocation19 + $0x50] sm:$0xff] }
 0x45d   :  { %2139 = vmatprep.subr.bf16.mxu1 %v15011_v33  ;;  %v13331_v33 = vcombine.low %v2235_v24, %v2239_v1  ;;  %v13340_v35 = vcombine.high %v2243_v30, %v2247_v31  ;;  %v2337_v24 = vld [vmem:[#allocation19 + $0x340] sm:$0xff] }
 0x45e   :  { %v2341_v1 = vld [vmem:[#allocation19 + $0x360] sm:$0xff] }
 0x460   :  { %2140 = vmatpush1.bf16.msra.mxu1 %v15009_v41  ;;  %v13339_v41 = vcombine.low %v2243_v30, %v2247_v31  ;;  %v13435_v30 = vcombine.low %v2339_v26, %v2343_v27  ;;  %v2345_v31 = vld [vmem:[#allocation19 + $0x380] sm:$0xff] }
 0x461   :  { %2152 = vmatprep.subr.bf16.mxu1 %v15014_v42  ;;  %v13348_v42 = vcombine.high %v2251_v36, %v2255_v37  ;;  %v13439_v36 = vcombine.low %v2345_v31, %v2349_v32  ;;  %v3258_v26 = vld [vmem:[#allocation20 + $0x40] sm:$0xff] }
 0x462   :  { %v3262_v27 = vld [vmem:[#allocation20 + $0x60] sm:$0xff] }
 0x463   :  { %2142 = vmatmul.mubr.bf16.vlgmr.msra.gmra.mrb[8].mxu1 %v16199_v59  ;;  %v15032_v59 = vld [vmem:[#allocation17 + $0x264] ss:$8 sps:$4 sm:$0xff]  }
 0x464   :  { %2153 = vmatpush1.bf16.msra.mxu1 %v15012_v46  ;;  %2184 = vmatprep.mubr.bf16.mxu1 %v14624_v49  ;;  %v13356_v46 = vcombine.high %v2259_v43, %v2263_v44  ;;  %v13355_v49 = vcombine.low %v2259_v43, %v2263_v44  ;;  %v2357_v43 = vld [vmem:[#allocation19 + $0x3e0] sm:$0xff] }
 0x465   :  { %2154 = vmatprep.subr.bf16.mxu1 %v15017_v48  ;;  %v2271_v48 = vld [vmem:[#allocation19 + $0x130] sm:$0xff] }
 0x468   :  { %2155 = vmatpush1.bf16.msra.mxu1 %v15015_v50  ;;  %v13364_v50 = vcombine.high %v2267_v47, %v2271_v48 }
 0x469   :  { %2156 = vmatprep.subr.bf16.mxu1 %v15020_v51  ;;  %v2275_v51 = vld [vmem:[#allocation19 + $0x150] sm:$0xff] }
 0x46c   :  { %2157 = vmatpush1.bf16.msra.mxu1 %v15018_v52  ;;  %v2279_v52 = vld [vmem:[#allocation19 + $0x170] sm:$0xff] }
 0x46d   :  { %2158 = vmatprep.subr.bf16.mxu1 %v15023_v53  ;;  %v13363_v53 = vcombine.low %v2267_v47, %v2271_v48 }
 0x470   :  { %2159 = vmatpush1.bf16.msra.mxu1 %v15021_v54  ;;  %v13372_v54 = vcombine.high %v2275_v51, %v2279_v52 }
 0x471   :  { %2160 = vmatprep.subr.bf16.mxu1 %v15026_v55  ;;  %v2283_v55 = vld [vmem:[#allocation19 + $0x190] sm:$0xff] }
 0x474   :  { %2161 = vmatpush1.bf16.msra.mxu1 %v15024_v56  ;;  %v2287_v56 = vld [vmem:[#allocation19 + $0x1b0] sm:$0xff] }
 0x475   :  { %2162 = vmatprep.subr.bf16.mxu1 %v15029_v57  ;;  %v13371_v57 = vcombine.low %v2275_v51, %v2279_v52  ;;  %v2238_v51 = vld [vmem:[#allocation19 + $0x28] sm:$0xff] }
 0x478   :  { %2163 = vmatpush1.bf16.msra.mxu1 %v15027_v58  ;;  %v13380_v58 = vcombine.high %v2283_v55, %v2287_v56 }
 0x479   :  { %2164 = vmatprep.subr.bf16.mxu1 %v15032_v59  ;;  %v2291_v59 = vld [vmem:[#allocation19 + $0x1d0] sm:$0xff] }
 0x47c   :  { %2165 = vmatpush1.bf16.msra.mxu1 %v15030_v60  ;;  %v2295_v60 = vld [vmem:[#allocation19 + $0x1f0] sm:$0xff] }
 0x47d   :  { %2166 = vmatprep.subr.bf16.mxu1 %v15035_v61  ;;  %v13379_v61 = vcombine.low %v2283_v55, %v2287_v56  ;;  %v1385_v56 = vld [vmem:[%s18162_s10] sm:$0x3] }
 0x480   :  { %2167 = vmatpush1.bf16.msra.mxu1 %v15033_v62  ;;  %v13388_v62 = vcombine.high %v2291_v59, %v2295_v60 }
 0x481   :  { %2168 = vmatprep.subr.bf16.mxu1 %v15038_v63  ;;  %v2299_v63 = vld [vmem:[#allocation19 + $0x210] sm:$0xff] }
 0x484   :  { %2169 = vmatpush1.bf16.msra.mxu1 %v15036_v3  ;;  %v2303_v3 = vld [vmem:[#allocation19 + $0x230] sm:$0xff] }
 0x485   :  { %2170 = vmatprep.subr.bf16.mxu1 %v15041_v4  ;;  %v13387_v4 = vcombine.low %v2291_v59, %v2295_v60 }
 0x488   :  { %2171 = vmatpush1.bf16.msra.mxu1 %v15039_v5  ;;  %v13396_v5 = vcombine.high %v2299_v63, %v2303_v3 }
 0x489   :  { %2172 = vmatprep.subr.bf16.mxu1 %v15044_v6  ;;  %v2307_v6 = vld [vmem:[#allocation19 + $0x250] sm:$0xff] }
 0x48c   :  { %2173 = vmatpush1.bf16.msra.mxu1 %v15042_v7  ;;  %v2311_v7 = vld [vmem:[#allocation19 + $0x270] sm:$0xff] }
 0x48d   :  { %2174 = vmatprep.subr.bf16.mxu1 %v15047_v8  ;;  %v13395_v8 = vcombine.low %v2299_v63, %v2303_v3  ;;  %v2218_v3 = vrot.slane %v1385_v56, %v16189_v39 }
 0x490   :  { %2175 = vmatpush1.bf16.msra.mxu1 %v15045_v9  ;;  %v13404_v9 = vcombine.high %v2307_v6, %v2311_v7 }
 0x491   :  { %2176 = vmatprep.subr.bf16.mxu1 %v15050_v10  ;;  %v2315_v10 = vld [vmem:[#allocation19 + $0x290] sm:$0xff] }
 0x494   :  { %2177 = vmatpush1.bf16.msra.mxu1 %v15048_v11  ;;  %v2319_v11 = vld [vmem:[#allocation19 + $0x2b0] sm:$0xff] }
 0x495   :  { %2178 = vmatprep.subr.bf16.mxu1 %v15053_v12  ;;  %v13403_v12 = vcombine.low %v2307_v6, %v2311_v7  ;;  %v13411_v17 = vcombine.low %v2315_v10, %v2319_v11  ;;  %v2222_v7 = vrot.slane %v1385_v56, %v16192_v40 }
 0x498   :  { %2179 = vmatpush1.bf16.msra.mxu1 %v15051_v13  ;;  %v13412_v13 = vcombine.high %v2315_v10, %v2319_v11 }
 0x499   :  { %2180 = vmatprep.subr.bf16.mxu1 %v15056_v15  ;;  %v2323_v15 = vld [vmem:[#allocation19 + $0x2d0] sm:$0xff] }
 0x49a   :  { %v13419_v21 = vcombine.low %v2323_v15, %v2327_v16 }
 0x49c   :  { %2181 = vmatpush1.bf16.msra.mxu1 %v15054_v18  ;;  %v13420_v18 = vcombine.high %v2323_v15, %v2327_v16  ;;  %v2242_v16 = vld [vmem:[#allocation19 + $0x48] sm:$0xff] }
 0x49d   :  { %2182 = vmatprep.subr.bf16.mxu1 %v15059_v19  ;;  %v2331_v19 = vld [vmem:[#allocation19 + $0x310] sm:$0xff] }
 0x49e   :  { %v13428_v22 = vcombine.high %v2331_v19, %v2335_v20  ;;  %v13427_v23 = vcombine.low %v2331_v19, %v2335_v20  ;;  %v3250_v19 = vld [vmem:[#allocation20] sm:$0xff] }
 0x49f   :  { %v3254_v20 = vld [vmem:[#allocation20 + $0x20] sm:$0xff] }
 0x4a0   :  { %2183 = vmatpush1.bf16.msra.mxu1 %v15057_v25  ;;  %v13432_v25 = vcombine.high %v2337_v24, %v2341_v1 }
 0x4a1   :  { %3141 = vmatprep.subr.bf16.mxu1 %v13332_v28  ;;  %v13431_v28 = vcombine.low %v2337_v24, %v2341_v1  ;;  %v2250_v24 = vld [vmem:[#allocation19 + $0x88] sm:$0xff] }
 0x4a2   :  { %3081 = vmatprep.subr.bf16.mxu0 %v13432_v25  ;;  %v2254_v1 = vld [vmem:[#allocation19 + $0xa8] sm:$0xff]  ;;  %v13455_v25 = vcombine.low %v3250_v19, %v3254_v20 }
 0x4a3   :  { %2185 = vmatmul.mubr.bf16.vlgmr.msra.gmra.mrb[8].mxu1 %v14623_v34  ;;  %3082 = vmatpush1.bf16.msra.mxu0 %v13431_v28  ;;  %v2347_v34 = vld [vmem:[#allocation19 + $0x390] sm:$0xff] }
 0x4a4   :  { %3142 = vmatpush1.bf16.msra.mxu1 %v13331_v33  ;;  %v13440_v33 = vcombine.high %v2345_v31, %v2349_v32  ;;  %v3266_v31 = vld [vmem:[#allocation20 + $0x80] sm:$0xff] }
 0x4a5   :  { %3143 = vmatprep.subr.bf16.mxu1 %v13340_v35  ;;  %v2351_v35 = vld [vmem:[#allocation19 + $0x3b0] sm:$0xff]  ;;  %v3270_v32 = vld [vmem:[#allocation20 + $0xa0] sm:$0xff] }
 0x4a6   :  { %v13444_v37 = vcombine.high %v2347_v34, %v2351_v35  ;;  %3083 = vmatprep.subr.bf16.mxu0 %v13440_v33  ;;  %v2258_v33 = vld [vmem:[#allocation19 + $0xc8] sm:$0xff] }
 0x4a7   :  { %3084 = vmatpush1.bf16.msra.mxu0 %v13439_v36  ;;  %v13472_v36 = vcombine.high %v3266_v31, %v3270_v32 }
 0x4a8   :  { %3144 = vmatpush1.bf16.msra.mxu1 %v13339_v41  ;;  %v13443_v41 = vcombine.low %v2347_v34, %v2351_v35  ;;  %v2262_v34 = vld [vmem:[#allocation19 + $0xe8] sm:$0xff]  ;;  %v13463_v35 = vcombine.low %v3258_v26, %v3262_v27 }
 0x4a9   :  { %3145 = vmatprep.subr.bf16.mxu1 %v13348_v42  ;;  %v2353_v42 = vld [vmem:[#allocation19 + $0x3c0] sm:$0xff] }
 0x4aa   :  { %v13448_v44 = vcombine.high %v2353_v42, %v2357_v43  ;;  %v13447_v47 = vcombine.low %v2353_v42, %v2357_v43  ;;  %v3274_v42 = vld [vmem:[#allocation20 + $0xc0] sm:$0xff] }
 0x4ab   :  { %v3278_v43 = vld [vmem:[#allocation20 + $0xe0] sm:$0xff] }
 0x4ac   :  { %3146 = vmatpush1.bf16.msra.mxu1 %v13347_v45  ;;  %v2355_v45 = vld [vmem:[#allocation19 + $0x3d0] sm:$0xff]  ;;  %3085 = vmatprep.subr.bf16.mxu0 %v13448_v44  ;;  %v2266_v44 = vld [vmem:[#allocation19 + $0x108] sm:$0xff] }
 0x4ad   :  { %3147 = vmatprep.subr.bf16.mxu1 %v13356_v46  ;;  %v2359_v46 = vld [vmem:[#allocation19 + $0x3f0] sm:$0xff]  ;;  %3086 = vmatpush1.bf16.msra.mxu0 %v13447_v47  ;;  %v13480_v47 = vcombine.high %v3274_v42, %v3278_v43 }
 0x4ae   :  { %v13451_v48 = vcombine.low %v2355_v45, %v2359_v46 }
 0x4b0   :  { %3148 = vmatpush1.bf16.msra.mxu1 %v13355_v49  ;;  %v13452_v49 = vcombine.high %v2355_v45, %v2359_v46  ;;  %v2270_v45 = vld [vmem:[#allocation19 + $0x128] sm:$0xff]  ;;  %v13471_v46 = vcombine.low %v3266_v31, %v3270_v32  ;;  %v3322_v31 = vld [vmem:[#allocation20 + $0x240] sm:$0xff] }
 0x4b1   :  { %3149 = vmatprep.subr.bf16.mxu1 %v13364_v50  ;;  %v2234_v50 = vld [vmem:[#allocation19 + $0x8] sm:$0xff]  ;;  %v13361_v56 = vcombine.low %v2266_v44, %v2270_v45  ;;  %v3326_v32 = vld [vmem:[#allocation20 + $0x260] sm:$0xff] }
 0x4b2   :  { %v13329_v52 = vcombine.low %v2234_v50, %v2238_v51 }
 0x4b4   :  { %3150 = vmatpush1.bf16.msra.mxu1 %v13363_v53  ;;  %v13330_v53 = vcombine.high %v2234_v50, %v2238_v51  ;;  %v3282_v50 = vld [vmem:[#allocation20 + $0x100] sm:$0xff] }
 0x4b5   :  { %3151 = vmatprep.subr.bf16.mxu1 %v13372_v54  ;;  %v1384_v54 = vld [vmem:[%s18161_s9] sm:$0x3]  ;;  %v3286_v51 = vld [vmem:[#allocation20 + $0x120] sm:$0xff] }
 0x4b6   :  { %3098 = vmatprep.subr.bf16.mxu0 %v13330_v53  ;;  %v2203_v55 = vrot.slane %v1384_v54, %v16189_v39  ;;  %v2278_v53 = vld [vmem:[#allocation19 + $0x168] sm:$0xff] }
 0x4b8   :  { %3152 = vmatpush1.bf16.msra.mxu1 %v13371_v57 }
 0x4b9   :  { %3153 = vmatprep.subr.bf16.mxu1 %v13380_v58  ;;  %v2207_v58 = vrot.slane %v1384_v54, %v16192_v40  ;;  %v13479_v54 = vcombine.low %v3274_v42, %v3278_v43  ;;  %v3330_v42 = vld [vmem:[#allocation20 + $0x280] sm:$0xff] }
 0x4ba   :  { %v3334_v43 = vld [vmem:[#allocation20 + $0x2a0] sm:$0xff] }
 0x4bc   :  { %3154 = vmatpush1.bf16.msra.mxu1 %v13379_v61 }
 0x4bd   :  { %3155 = vmatprep.subr.bf16.mxu1 %v13388_v62 }
 0x4c0   :  { %3156 = vmatpush1.bf16.msra.mxu1 %v13387_v4 }
 0x4c1   :  { %3157 = vmatprep.subr.bf16.mxu1 %v13396_v5 }
 0x4c4   :  { %3158 = vmatpush1.bf16.msra.mxu1 %v13395_v8 }
 0x4c5   :  { %3159 = vmatprep.subr.bf16.mxu1 %v13404_v9 }
 0x4c8   :  { %3160 = vmatpush1.bf16.msra.mxu1 %v13403_v12 }
 0x4c9   :  { %3161 = vmatprep.subr.bf16.mxu1 %v13412_v13 }
 0x4cc   :  { %3162 = vmatpush1.bf16.msra.mxu1 %v13411_v17  ;;  %v2246_v17 = vld [vmem:[#allocation19 + $0x68] sm:$0xff] }
 0x4cd   :  { %3163 = vmatprep.subr.bf16.mxu1 %v13420_v18  ;;  %v13337_v28 = vcombine.low %v2242_v16, %v2246_v17 }
 0x4d0   :  { %3164 = vmatpush1.bf16.msra.mxu1 %v13419_v21 }
 0x4d1   :  { %3165 = vmatprep.subr.bf16.mxu1 %v13428_v22  ;;  %v13338_v22 = vcombine.high %v2242_v16, %v2246_v17  ;;  %v2298_v16 = vld [vmem:[#allocation19 + $0x208] sm:$0xff] }
 0x4d2   :  { %v2302_v17 = vld [vmem:[#allocation19 + $0x228] sm:$0xff] }
 0x4d4   :  { %3166 = vmatpush1.bf16.msra.mxu1 %v13427_v23  ;;  %v13456_v23 = vcombine.high %v3250_v19, %v3254_v20 }
 0x4d5   :  { %3167 = vmatprep.subr.bf16.mxu1 %v13436_v29  ;;  %v13464_v29 = vcombine.high %v3258_v26, %v3262_v27  ;;  %v2310_v26 = vld [vmem:[#allocation19 + $0x268] sm:$0xff] }
 0x4d8   :  { %3168 = vmatpush1.bf16.msra.mxu1 %v13435_v30  ;;  %v13346_v30 = vcombine.high %v2250_v24, %v2254_v1 }
 0x4d9   :  { %3169 = vmatprep.subr.bf16.mxu1 %v13444_v37  ;;  %v13345_v37 = vcombine.low %v2250_v24, %v2254_v1  ;;  %v3314_v24 = vld [vmem:[#allocation20 + $0x200] sm:$0xff] }
 0x4da   :  { %v3318_v1 = vld [vmem:[#allocation20 + $0x220] sm:$0xff] }
 0x4dc   :  { %3170 = vmatpush1.bf16.msra.mxu1 %v13443_v41  ;;  %v13354_v41 = vcombine.high %v2258_v33, %v2262_v34 }
 0x4dd   :  { %3171 = vmatprep.subr.bf16.mxu1 %v13452_v49  ;;  %v13362_v49 = vcombine.high %v2266_v44, %v2270_v45  ;;  %v2322_v44 = vld [vmem:[#allocation19 + $0x2c8] sm:$0xff] }
 0x4de   :  { %v2326_v45 = vld [vmem:[#allocation19 + $0x2e8] sm:$0xff] }
 0x4e0   :  { %3172 = vmatpush1.bf16.msra.mxu1 %v13451_v48  ;;  %v13353_v48 = vcombine.low %v2258_v33, %v2262_v34  ;;  %v2314_v33 = vld [vmem:[#allocation19 + $0x288] sm:$0xff] }
 0x4e1   :  { %4018 = vmatprep.subr.bf16.mxu1 %v13456_v23  ;;  %v13394_v23 = vcombine.high %v2298_v16, %v2302_v17  ;;  %v2318_v34 = vld [vmem:[#allocation19 + $0x2a8] sm:$0xff] }
 0x576   :  { %v2186_v57 = vpop.f32.mrb[8].mxu1 }
 0x577   :  { %v2195_v59 = vmax.f32 %v2186_v57, 0.0  ;;  %v2188_v60 = vpop.f32.mrb[9].mxu1 }
 0x578   :  { %v2196_v61 = vmax.f32 %v2188_v60, 0.0  ;;  %v2190_v62 = vpop.f32.mrb[10].mxu1  ;;  %v2282_v60 = vld [vmem:[#allocation19 + $0x188] sm:$0xff] }
 0x579   :  { %v2210_v63 = vmul.f32 %v2203_v55, %v2195_v59  ;;  %v2197_v4 = vmax.f32 %v2190_v62, 0.0  ;;  %v2192_v5 = vpop.f32.mrb[11].mxu1  ;;  %v3294_v59 = vld [vmem:[#allocation20 + $0x160] sm:$0xff]  ;;  %v13487_v62 = vcombine.low %v3282_v50, %v3286_v51 }
 0x57a   :  { %v2211_v6 = vmul.f32 %v2207_v58, %v2196_v61  ;;  %v2198_v8 = vmax.f32 %v2192_v5, 0.0  ;;  %v2286_v61 = vld [vmem:[#allocation19 + $0x1a8] sm:$0xff]  ;;  %v3298_v5 = vld [vmem:[#allocation20 + $0x180] sm:$0xff] }
 0x57b   :  { %v2212_v9 = vmul.f32 %v2203_v55, %v2197_v4  ;;  %v2225_v11 = vadd.f32 %v2218_v3, %v2210_v63  ;;  %v13488_v55 = vcombine.high %v3282_v50, %v3286_v51  ;;  %v13378_v4 = vcombine.high %v2282_v60, %v2286_v61  ;;  %v3338_v50 = vld [vmem:[#allocation20 + $0x2c0] sm:$0xff] }
 0x57c   :  { %v2213_v10 = vmul.f32 %v2207_v58, %v2198_v8  ;;  %v2226_v13 = vadd.f32 %v2222_v7, %v2211_v6  ;;  %v3290_v58 = vld [vmem:[#allocation20 + $0x140] sm:$0xff]  ;;  %v2294_v8 = vld [vmem:[#allocation19 + $0x1e8] sm:$0xff] }
 0x57d   :  { %v2227_v12 = vadd.f32 %v2218_v3, %v2212_v9  ;;  %v13496_v63 = vcombine.high %v3290_v58, %v3294_v59  ;;  %v3302_v6 = vld [vmem:[#allocation20 + $0x1a0] sm:$0xff]  ;;  %v13495_v9 = vcombine.low %v3290_v58, %v3294_v59 }
 0x57e   :  { %v2228_v15 = vadd.f32 %v2222_v7, %v2213_v10  ;;  %v2290_v7 = vld [vmem:[#allocation19 + $0x1c8] sm:$0xff]  ;;  %v13504_v10 = vcombine.high %v3298_v5, %v3302_v6  ;;  %v13503_v19 = vcombine.low %v3298_v5, %v3302_v6  ;;  %v3342_v51 = vld [vmem:[#allocation20 + $0x2e0] sm:$0xff] }
 0x57f   :  { %v16216_v18 = vpack.c.bf16 %v2227_v12, %v2225_v11  ;;  %v13377_v11 = vcombine.low %v2282_v60, %v2286_v61  ;;  %v13386_v12 = vcombine.high %v2290_v7, %v2294_v8  ;;  %v3346_v58 = vld [vmem:[#allocation20 + $0x300] sm:$0xff]  ;;  %v2338_v60 = vld [vmem:[#allocation19 + $0x348] sm:$0xff] }
 0x580   :  { %v16218_v21 = vpack.c.bf16 %v2228_v15, %v2226_v13  ;;  %v3306_v13 = vld [vmem:[#allocation20 + $0x1c0] sm:$0xff]  ;;  %v2342_v61 = vld [vmem:[#allocation19 + $0x368] sm:$0xff] }
 0x581   :  { %v3310_v15 = vld [vmem:[#allocation20 + $0x1e0] sm:$0xff] }
 0x582   :  { %3087 = vmatprep.mubr.bf16.mxu0 %v16218_v21  ;;  %3173 = vmatprep.mubr.bf16.mxu1 %v16218_v21  ;;  %v13512_v20 = vcombine.high %v3306_v13, %v3310_v15  ;;  %v13511_v27 = vcombine.low %v3306_v13, %v3310_v15  ;;  %v3350_v59 = vld [vmem:[#allocation20 + $0x320] sm:$0xff] }
 0x583   :  { %3088 = vmatmul.mubr.bf16.vlgmr.msra.gmra.mrb[12].mxu0 %v16216_v18  ;;  %3174 = vmatmul.mubr.bf16.vlgmr.msra.gmra.mrb[12].mxu1 %v16216_v18  ;;  %v3354_v5 = vld [vmem:[#allocation20 + $0x340] sm:$0xff] }
 0x584   :  { %3099 = vmatpush1.bf16.msra.mxu0 %v13329_v52  ;;  %3130 = vmatprep.mubr.bf16.mxu0 %v16218_v21  ;;  %v2274_v52 = vld [vmem:[#allocation19 + $0x148] sm:$0xff]  ;;  %v3358_v6 = vld [vmem:[#allocation20 + $0x360] sm:$0xff] }
 0x585   :  { %3100 = vmatprep.subr.bf16.mxu0 %v13338_v22  ;;  %4019 = vmatpush1.bf16.msra.mxu1 %v13455_v25  ;;  %v13370_v57 = vcombine.high %v2274_v52, %v2278_v53  ;;  %v13369_v3 = vcombine.low %v2274_v52, %v2278_v53  ;;  %v13385_v22 = vcombine.low %v2290_v7, %v2294_v8  ;;  %v2306_v25 = vld [vmem:[#allocation19 + $0x248] sm:$0xff]  ;;  %v3362_v13 = vld [vmem:[#allocation20 + $0x380] sm:$0xff] }
 0x586   :  { %4050 = vmatprep.mubr.bf16.mxu1 %v15813_v14  ;;  %4020 = vmatprep.subr.bf16.mxu1 %v13464_v29  ;;  %v13393_v29 = vcombine.low %v2298_v16, %v2302_v17  ;;  %v2330_v52 = vld [vmem:[#allocation19 + $0x308] sm:$0xff]  ;;  %v3366_v15 = vld [vmem:[#allocation20 + $0x3a0] sm:$0xff] }
 0x587   :  { %v2334_v53 = vld [vmem:[#allocation19 + $0x328] sm:$0xff] }
 0x588   :  { %3101 = vmatpush1.bf16.msra.mxu0 %v13337_v28  ;;  %v13520_v28 = vcombine.high %v3314_v24, %v3318_v1  ;;  %v2346_v7 = vld [vmem:[#allocation19 + $0x388] sm:$0xff] }
 0x589   :  { %3102 = vmatprep.subr.bf16.mxu0 %v13346_v30  ;;  %4021 = vmatpush1.bf16.msra.mxu1 %v13463_v35  ;;  %v13402_v30 = vcombine.high %v2306_v25, %v2310_v26  ;;  %v13519_v35 = vcombine.low %v3314_v24, %v3318_v1  ;;  %v2350_v8 = vld [vmem:[#allocation19 + $0x3a8] sm:$0xff]  ;;  %v3370_v24 = vld [vmem:[#allocation20 + $0x3c0] sm:$0xff] }
 0x58a   :  { %4022 = vmatprep.subr.bf16.mxu1 %v13472_v36  ;;  %v13528_v36 = vcombine.high %v3322_v31, %v3326_v32  ;;  %v2354_v16 = vld [vmem:[#allocation19 + $0x3c8] sm:$0xff]  ;;  %v3374_v1 = vld [vmem:[#allocation20 + $0x3e0] sm:$0xff] }
 0x58b   :  { %v2358_v17 = vld [vmem:[#allocation19 + $0x3e8] sm:$0xff] }
 0x58c   :  { %3103 = vmatpush1.bf16.msra.mxu0 %v13345_v37  ;;  %v13401_v37 = vcombine.low %v2306_v25, %v2310_v26  ;;  %v2236_v25 = vld [vmem:[#allocation19 + $0x18] sm:$0xff] }
 0x58d   :  { %3104 = vmatprep.subr.bf16.mxu0 %v13354_v41  ;;  %4023 = vmatpush1.bf16.msra.mxu1 %v13471_v46  ;;  %v13410_v41 = vcombine.high %v2314_v33, %v2318_v34  ;;  %v13527_v46 = vcombine.low %v3322_v31, %v3326_v32  ;;  %v2240_v26 = vld [vmem:[#allocation19 + $0x38] sm:$0xff] }
 0x58e   :  { %4024 = vmatprep.subr.bf16.mxu1 %v13480_v47  ;;  %v13536_v47 = vcombine.high %v3330_v42, %v3334_v43  ;;  %v2244_v31 = vld [vmem:[#allocation19 + $0x58] sm:$0xff] }
 0x58f   :  { %v2248_v32 = vld [vmem:[#allocation19 + $0x78] sm:$0xff] }
 0x590   :  { %3105 = vmatpush1.bf16.msra.mxu0 %v13353_v48  ;;  %v13409_v48 = vcombine.low %v2314_v33, %v2318_v34  ;;  %v13575_v33 = vcombine.low %v3370_v24, %v3374_v1  ;;  %v3252_v34 = vld [vmem:[#allocation20 + $0x10] sm:$0xff] }
 0x591   :  { %3106 = vmatprep.subr.bf16.mxu0 %v13362_v49  ;;  %4025 = vmatpush1.bf16.msra.mxu1 %v13479_v54  ;;  %v13418_v49 = vcombine.high %v2322_v44, %v2326_v45  ;;  %v13535_v54 = vcombine.low %v3330_v42, %v3334_v43  ;;  %v2252_v42 = vld [vmem:[#allocation19 + $0x98] sm:$0xff] }
 0x592   :  { %4026 = vmatprep.subr.bf16.mxu1 %v13488_v55  ;;  %v13544_v55 = vcombine.high %v3338_v50, %v3342_v51  ;;  %v2256_v43 = vld [vmem:[#allocation19 + $0xb8] sm:$0xff] }
 0x594   :  { %3107 = vmatpush1.bf16.msra.mxu0 %v13361_v56  ;;  %v13417_v56 = vcombine.low %v2322_v44, %v2326_v45  ;;  %v3260_v45 = vld [vmem:[#allocation20 + $0x50] sm:$0xff] }
 0x595   :  { %3108 = vmatprep.subr.bf16.mxu0 %v13370_v57  ;;  %4027 = vmatpush1.bf16.msra.mxu1 %v13487_v62  ;;  %v13426_v57 = vcombine.high %v2330_v52, %v2334_v53  ;;  %v13543_v62 = vcombine.low %v3338_v50, %v3342_v51  ;;  %v3268_v50 = vld [vmem:[#allocation20 + $0x90] sm:$0xff] }
 0x596   :  { %4028 = vmatprep.subr.bf16.mxu1 %v13496_v63  ;;  %v13552_v63 = vcombine.high %v3346_v58, %v3350_v59  ;;  %v3272_v51 = vld [vmem:[#allocation20 + $0xb0] sm:$0xff] }
 0x598   :  { %3109 = vmatpush1.bf16.msra.mxu0 %v13369_v3  ;;  %v13425_v3 = vcombine.low %v2330_v52, %v2334_v53  ;;  %v2260_v52 = vld [vmem:[#allocation19 + $0xd8] sm:$0xff] }
 0x599   :  { %3110 = vmatprep.subr.bf16.mxu0 %v13378_v4  ;;  %4029 = vmatpush1.bf16.msra.mxu1 %v13495_v9  ;;  %v13434_v4 = vcombine.high %v2338_v60, %v2342_v61  ;;  %v13551_v9 = vcombine.low %v3346_v58, %v3350_v59  ;;  %v2264_v53 = vld [vmem:[#allocation19 + $0xf8] sm:$0xff]  ;;  %v3280_v58 = vld [vmem:[#allocation20 + $0xf0] sm:$0xff] }
 0x59a   :  { %4030 = vmatprep.subr.bf16.mxu1 %v13504_v10  ;;  %v13560_v10 = vcombine.high %v3354_v5, %v3358_v6  ;;  %v2268_v59 = vld [vmem:[#allocation19 + $0x118] sm:$0xff] }
 0x59c   :  { %3111 = vmatpush1.bf16.msra.mxu0 %v13377_v11  ;;  %v13433_v11 = vcombine.low %v2338_v60, %v2342_v61  ;;  %v2272_v60 = vld [vmem:[#allocation19 + $0x138] sm:$0xff]  ;;  %v13475_v61 = vcombine.low %v3268_v50, %v3272_v51 }
 0x59d   :  { %3112 = vmatprep.subr.bf16.mxu0 %v13386_v12  ;;  %4031 = vmatpush1.bf16.msra.mxu1 %v13503_v19  ;;  %v13442_v12 = vcombine.high %v2346_v7, %v2350_v8  ;;  %v13559_v19 = vcombine.low %v3354_v5, %v3358_v6  ;;  %v3288_v5 = vld [vmem:[#allocation20 + $0x130] sm:$0xff]  ;;  %v2276_v6 = vld [vmem:[#allocation19 + $0x158] sm:$0xff] }
 0x59e   :  { %4032 = vmatprep.subr.bf16.mxu1 %v13512_v20  ;;  %v13568_v20 = vcombine.high %v3362_v13, %v3366_v15 }
 0x5a0   :  { %3113 = vmatpush1.bf16.msra.mxu0 %v13385_v22  ;;  %v13441_v22 = vcombine.low %v2346_v7, %v2350_v8  ;;  %v2280_v7 = vld [vmem:[#allocation19 + $0x178] sm:$0xff] }
 0x5a1   :  { %3114 = vmatprep.subr.bf16.mxu0 %v13394_v23  ;;  %4033 = vmatpush1.bf16.msra.mxu1 %v13511_v27  ;;  %v13450_v23 = vcombine.high %v2354_v16, %v2358_v17  ;;  %v13567_v27 = vcombine.low %v3362_v13, %v3366_v15  ;;  %v3296_v13 = vld [vmem:[#allocation20 + $0x170] sm:$0xff]  ;;  %v2284_v15 = vld [vmem:[#allocation19 + $0x198] sm:$0xff] }
 0x5a2   :  { %4034 = vmatprep.subr.bf16.mxu1 %v13520_v28  ;;  %v13576_v28 = vcombine.high %v3370_v24, %v3374_v1  ;;  %v2296_v24 = vld [vmem:[#allocation19 + $0x1f8] sm:$0xff] }
 0x5a4   :  { %3115 = vmatpush1.bf16.msra.mxu0 %v13393_v29  ;;  %v13449_v29 = vcombine.low %v2354_v16, %v2358_v17  ;;  %v2288_v16 = vld [vmem:[#allocation19 + $0x1b8] sm:$0xff] }
 0x5a5   :  { %3116 = vmatprep.subr.bf16.mxu0 %v13402_v30  ;;  %4035 = vmatpush1.bf16.msra.mxu1 %v13519_v35  ;;  %v13334_v30 = vcombine.high %v2236_v25, %v2240_v26  ;;  %v3256_v35 = vld [vmem:[#allocation20 + $0x30] sm:$0xff] }
 0x5a6   :  { %4036 = vmatprep.subr.bf16.mxu1 %v13528_v36  ;;  %v13333_v36 = vcombine.low %v2236_v25, %v2240_v26  ;;  %v13459_v44 = vcombine.low %v3252_v34, %v3256_v35  ;;  %v3300_v25 = vld [vmem:[#allocation20 + $0x190] sm:$0xff] }
 0x5a7   :  { %v3304_v26 = vld [vmem:[#allocation20 + $0x1b0] sm:$0xff] }
 0x5a8   :  { %3117 = vmatpush1.bf16.msra.mxu0 %v13401_v37  ;;  %v13460_v37 = vcombine.high %v3252_v34, %v3256_v35  ;;  %v3312_v34 = vld [vmem:[#allocation20 + $0x1f0] sm:$0xff] }
 0x5a9   :  { %3118 = vmatprep.subr.bf16.mxu0 %v13410_v41  ;;  %4037 = vmatpush1.bf16.msra.mxu1 %v13527_v46  ;;  %v13342_v41 = vcombine.high %v2244_v31, %v2248_v32  ;;  %v3264_v46 = vld [vmem:[#allocation20 + $0x70] sm:$0xff] }
 0x5aa   :  { %4038 = vmatprep.subr.bf16.mxu1 %v13536_v47  ;;  %v13341_v47 = vcombine.low %v2244_v31, %v2248_v32  ;;  %v2304_v31 = vld [vmem:[#allocation19 + $0x238] sm:$0xff]  ;;  %v13507_v32 = vcombine.low %v3300_v25, %v3304_v26 }
 0x5ac   :  { %3119 = vmatpush1.bf16.msra.mxu0 %v13409_v48  ;;  %v13468_v48 = vcombine.high %v3260_v45, %v3264_v46 }
 0x5ad   :  { %3120 = vmatprep.subr.bf16.mxu0 %v13418_v49  ;;  %4039 = vmatpush1.bf16.msra.mxu1 %v13535_v54  ;;  %v13350_v49 = vcombine.high %v2252_v42, %v2256_v43  ;;  %v13467_v54 = vcombine.low %v3260_v45, %v3264_v46 }
 0x5ae   :  { %4040 = vmatprep.subr.bf16.mxu1 %v13544_v55  ;;  %v13476_v55 = vcombine.high %v3268_v50, %v3272_v51  ;;  %v3328_v50 = vld [vmem:[#allocation20 + $0x270] sm:$0xff]  ;;  %v2316_v51 = vld [vmem:[#allocation19 + $0x298] sm:$0xff] }
 0x5b0   :  { %3121 = vmatpush1.bf16.msra.mxu0 %v13417_v56  ;;  %v13349_v56 = vcombine.low %v2252_v42, %v2256_v43  ;;  %v3320_v42 = vld [vmem:[#allocation20 + $0x230] sm:$0xff]  ;;  %v2308_v43 = vld [vmem:[#allocation19 + $0x258] sm:$0xff] }
 0x5b1   :  { %3122 = vmatprep.subr.bf16.mxu0 %v13426_v57  ;;  %4041 = vmatpush1.bf16.msra.mxu1 %v13543_v62  ;;  %v3276_v57 = vld [vmem:[#allocation20 + $0xd0] sm:$0xff] }
 0x5b2   :  { %4042 = vmatprep.subr.bf16.mxu1 %v13552_v63  ;;  %v13484_v62 = vcombine.high %v3276_v57, %v3280_v58  ;;  %v13357_v63 = vcombine.low %v2260_v52, %v2264_v53  ;;  %v13483_v8 = vcombine.low %v3276_v57, %v3280_v58  ;;  %v3336_v57 = vld [vmem:[#allocation20 + $0x2b0] sm:$0xff]  ;;  %v2324_v58 = vld [vmem:[#allocation19 + $0x2d8] sm:$0xff] }
 0x5b4   :  { %3123 = vmatpush1.bf16.msra.mxu0 %v13425_v3  ;;  %v13366_v3 = vcombine.high %v2268_v59, %v2272_v60 }
 0x5b5   :  { %3124 = vmatprep.subr.bf16.mxu0 %v13434_v4  ;;  %4043 = vmatpush1.bf16.msra.mxu1 %v13551_v9  ;;  %v3284_v4 = vld [vmem:[#allocation20 + $0x110] sm:$0xff] }
 0x5b6   :  { %4044 = vmatprep.subr.bf16.mxu1 %v13560_v10  ;;  %v13492_v9 = vcombine.high %v3284_v4, %v3288_v5  ;;  %v13365_v10 = vcombine.low %v2268_v59, %v2272_v60  ;;  %v13491_v17 = vcombine.low %v3284_v4, %v3288_v5  ;;  %v2328_v59 = vld [vmem:[#allocation19 + $0x2f8] sm:$0xff]  ;;  %v3344_v4 = vld [vmem:[#allocation20 + $0x2f0] sm:$0xff] }
 0x5b7   :  { %v2332_v5 = vld [vmem:[#allocation19 + $0x318] sm:$0xff] }
 0x5b8   :  { %3125 = vmatpush1.bf16.msra.mxu0 %v13433_v11  ;;  %v13374_v11 = vcombine.high %v2276_v6, %v2280_v7 }
 0x5b9   :  { %3126 = vmatprep.subr.bf16.mxu0 %v13442_v12  ;;  %4045 = vmatpush1.bf16.msra.mxu1 %v13559_v19  ;;  %v3292_v12 = vld [vmem:[#allocation20 + $0x150] sm:$0xff] }
 0x5ba   :  { %4046 = vmatprep.subr.bf16.mxu1 %v13568_v20  ;;  %v13500_v19 = vcombine.high %v3292_v12, %v3296_v13  ;;  %v13373_v20 = vcombine.low %v2276_v6, %v2280_v7  ;;  %v13499_v1 = vcombine.low %v3292_v12, %v3296_v13  ;;  %v2336_v6 = vld [vmem:[#allocation19 + $0x338] sm:$0xff]  ;;  %v3352_v12 = vld [vmem:[#allocation20 + $0x330] sm:$0xff] }
 0x5bb   :  { %v2340_v13 = vld [vmem:[#allocation19 + $0x358] sm:$0xff] }
 0x5bc   :  { %3127 = vmatpush1.bf16.msra.mxu0 %v13441_v22  ;;  %v13382_v22 = vcombine.high %v2284_v15, %v2288_v16 }
 0x5bd   :  { %3128 = vmatprep.subr.bf16.mxu0 %v13450_v23  ;;  %4047 = vmatpush1.bf16.msra.mxu1 %v13567_v27  ;;  %v2292_v23 = vld [vmem:[#allocation19 + $0x1d8] sm:$0xff]  ;;  %v13381_v27 = vcombine.low %v2284_v15, %v2288_v16 }
 0x5be   :  { %4048 = vmatprep.subr.bf16.mxu1 %v13576_v28  ;;  %v13508_v28 = vcombine.high %v3300_v25, %v3304_v26  ;;  %v13389_v35 = vcombine.low %v2292_v23, %v2296_v24  ;;  %v2344_v15 = vld [vmem:[#allocation19 + $0x378] sm:$0xff] }
 0x5c0   :  { %3129 = vmatpush1.bf16.msra.mxu0 %v13449_v29  ;;  %v13390_v29 = vcombine.high %v2292_v23, %v2296_v24  ;;  %v3360_v23 = vld [vmem:[#allocation20 + $0x370] sm:$0xff]  ;;  %v2348_v24 = vld [vmem:[#allocation19 + $0x398] sm:$0xff] }
 0x5c1   :  { %3184 = vmatprep.subr.bf16.mxu0 %v13334_v30  ;;  %4049 = vmatpush1.bf16.msra.mxu1 %v13575_v33  ;;  %v2300_v30 = vld [vmem:[#allocation19 + $0x218] sm:$0xff]  ;;  %v3308_v33 = vld [vmem:[#allocation20 + $0x1d0] sm:$0xff] }
 0x5c2   :  { %4100 = vmatprep.subr.bf16.mxu1 %v13460_v37  ;;  %v13398_v37 = vcombine.high %v2300_v30, %v2304_v31  ;;  %v13515_v45 = vcombine.low %v3308_v33, %v3312_v34 }
 0x5c3   :  { %3131 = vmatmul.mubr.bf16.vlgmr.msra.gmra.mrb[16].mxu0 %v16216_v18 }
 0x5c4   :  { %3185 = vmatpush1.bf16.msra.mxu0 %v13333_v36  ;;  %3216 = vmatprep.mubr.bf16.mxu0 %v16218_v21  ;;  %v13358_v21 = vcombine.high %v2260_v52, %v2264_v53  ;;  %v13516_v36 = vcombine.high %v3308_v33, %v3312_v34  ;;  %v2320_v52 = vld [vmem:[#allocation19 + $0x2b8] sm:$0xff] }
 0x5c5   :  { %3186 = vmatprep.subr.bf16.mxu0 %v13342_v41  ;;  %4051 = vmatmul.mubr.bf16.vlgmr.msra.gmra.mrb[16].mxu1 %v15813_v14  ;;  %v3316_v41 = vld [vmem:[#allocation20 + $0x210] sm:$0xff] }
 0x5c6   :  { %4101 = vmatpush1.bf16.msra.mxu1 %v13459_v44  ;;  %4132 = vmatprep.mubr.bf16.mxu1 %v15813_v14  ;;  %v2312_v44 = vld [vmem:[#allocation19 + $0x278] sm:$0xff]  ;;  %v13524_v46 = vcombine.high %v3316_v41, %v3320_v42  ;;  %v13523_v53 = vcombine.low %v3316_v41, %v3320_v42  ;;  %v3376_v41 = vld [vmem:[#allocation20 + $0x3f0] sm:$0xff]  ;;  %v3251_v42 = vld [vmem:[#allocation20 + $0x8] sm:$0xff] }
 0x5c7   :  { %4102 = vmatprep.subr.bf16.mxu1 %v13468_v48  ;;  %v13406_v48 = vcombine.high %v2308_v43, %v2312_v44 }
 0x5c8   :  { %3187 = vmatpush1.bf16.msra.mxu0 %v13341_v47  ;;  %v13397_v47 = vcombine.low %v2300_v30, %v2304_v31  ;;  %v3368_v30 = vld [vmem:[#allocation20 + $0x3b0] sm:$0xff]  ;;  %v2356_v31 = vld [vmem:[#allocation19 + $0x3d8] sm:$0xff] }
 0x5c9   :  { %3188 = vmatprep.subr.bf16.mxu0 %v13350_v49  ;;  %v3324_v49 = vld [vmem:[#allocation20 + $0x250] sm:$0xff] }
 0x5ca   :  { %4103 = vmatpush1.bf16.msra.mxu1 %v13467_v54  ;;  %v13532_v54 = vcombine.high %v3324_v49, %v3328_v50  ;;  %v13531_v60 = vcombine.low %v3324_v49, %v3328_v50  ;;  %v3263_v49 = vld [vmem:[#allocation20 + $0x68] sm:$0xff] }
 0x5cb   :  { %4104 = vmatprep.subr.bf16.mxu1 %v13476_v55  ;;  %v13405_v55 = vcombine.low %v2308_v43, %v2312_v44  ;;  %v3255_v43 = vld [vmem:[#allocation20 + $0x28] sm:$0xff] }
 0x5cc   :  { %3189 = vmatpush1.bf16.msra.mxu0 %v13349_v56  ;;  %v13414_v56 = vcombine.high %v2316_v51, %v2320_v52 }
 0x5cd   :  { %3190 = vmatprep.subr.bf16.mxu0 %v13358_v21  ;;  %v3332_v21 = vld [vmem:[#allocation20 + $0x290] sm:$0xff] }
 0x5ce   :  { %4105 = vmatpush1.bf16.msra.mxu1 %v13475_v61  ;;  %v13540_v61 = vcombine.high %v3332_v21, %v3336_v57  ;;  %v13539_v7 = vcombine.low %v3332_v21, %v3336_v57  ;;  %v3275_v21 = vld [vmem:[#allocation20 + $0xc8] sm:$0xff] }
 0x5cf   :  { %4106 = vmatprep.subr.bf16.mxu1 %v13484_v62  ;;  %v13413_v62 = vcombine.low %v2316_v51, %v2320_v52  ;;  %v13457_v51 = vcombine.low %v3251_v42, %v3255_v43  ;;  %v3279_v57 = vld [vmem:[#allocation20 + $0xe8] sm:$0xff] }
 0x5d0   :  { %3191 = vmatpush1.bf16.msra.mxu0 %v13357_v63  ;;  %v13422_v63 = vcombine.high %v2324_v58, %v2328_v59 }
 0x5d1   :  { %3192 = vmatprep.subr.bf16.mxu0 %v13366_v3  ;;  %v3340_v3 = vld [vmem:[#allocation20 + $0x2d0] sm:$0xff] }
 0x5d2   :  { %4107 = vmatpush1.bf16.msra.mxu1 %v13483_v8  ;;  %v13548_v8 = vcombine.high %v3340_v3, %v3344_v4  ;;  %v13547_v16 = vcombine.low %v3340_v3, %v3344_v4  ;;  %v3295_v3 = vld [vmem:[#allocation20 + $0x168] sm:$0xff] }
 0x5d3   :  { %4108 = vmatprep.subr.bf16.mxu1 %v13492_v9  ;;  %v13421_v9 = vcombine.low %v2324_v58, %v2328_v59  ;;  %v13482_v59 = vcombine.high %v3275_v21, %v3279_v57 }
 0x5d4   :  { %3193 = vmatpush1.bf16.msra.mxu0 %v13365_v10  ;;  %v13430_v10 = vcombine.high %v2332_v5, %v2336_v6 }
 0x5d5   :  { %3194 = vmatprep.subr.bf16.mxu0 %v13374_v11  ;;  %v3348_v11 = vld [vmem:[#allocation20 + $0x310] sm:$0xff] }
 0x5d6   :  { %4109 = vmatpush1.bf16.msra.mxu1 %v13491_v17  ;;  %v13556_v17 = vcombine.high %v3348_v11, %v3352_v12  ;;  %v13555_v25 = vcombine.low %v3348_v11, %v3352_v12  ;;  %v3311_v11 = vld [vmem:[#allocation20 + $0x1e8] sm:$0xff] }
 0x5d7   :  { %4110 = vmatprep.subr.bf16.mxu1 %v13500_v19  ;;  %v13429_v19 = vcombine.low %v2332_v5, %v2336_v6  ;;  %v3299_v6 = vld [vmem:[#allocation20 + $0x188] sm:$0xff] }
 0x5d8   :  { %3195 = vmatpush1.bf16.msra.mxu0 %v13373_v20  ;;  %v13438_v20 = vcombine.high %v2340_v13, %v2344_v15 }
 0x5d9   :  { %3196 = vmatprep.subr.bf16.mxu0 %v13382_v22  ;;  %v3356_v22 = vld [vmem:[#allocation20 + $0x350] sm:$0xff] }
 0x5da   :  { %4111 = vmatpush1.bf16.msra.mxu1 %v13499_v1  ;;  %v2352_v1 = vld [vmem:[#allocation19 + $0x3b8] sm:$0xff]  ;;  %v13564_v26 = vcombine.high %v3356_v22, %v3360_v23  ;;  %v13563_v33 = vcombine.low %v3356_v22, %v3360_v23  ;;  %v3327_v22 = vld [vmem:[#allocation20 + $0x268] sm:$0xff] }
 0x5db   :  { %4112 = vmatprep.subr.bf16.mxu1 %v13508_v28  ;;  %v13446_v28 = vcombine.high %v2348_v24, %v2352_v1 }
 0x5dc   :  { %3197 = vmatpush1.bf16.msra.mxu0 %v13381_v27  ;;  %v13437_v27 = vcombine.low %v2340_v13, %v2344_v15  ;;  %v3315_v15 = vld [vmem:[#allocation20 + $0x208] sm:$0xff] }
 0x5dd   :  { %3198 = vmatprep.subr.bf16.mxu0 %v13390_v29  ;;  %v3364_v29 = vld [vmem:[#allocation20 + $0x390] sm:$0xff] }
 0x5de   :  { %4113 = vmatpush1.bf16.msra.mxu1 %v13507_v32  ;;  %v2360_v32 = vld [vmem:[#allocation19 + $0x3f8] sm:$0xff]  ;;  %v13572_v34 = vcombine.high %v3364_v29, %v3368_v30  ;;  %v13571_v44 = vcombine.low %v3364_v29, %v3368_v30  ;;  %v3343_v29 = vld [vmem:[#allocation20 + $0x2e8] sm:$0xff] }
 0x5df   :  { %4114 = vmatprep.subr.bf16.mxu1 %v13516_v36  ;;  %v13454_v36 = vcombine.high %v2356_v31, %v2360_v32 }
 0x5e0   :  { %3199 = vmatpush1.bf16.msra.mxu0 %v13389_v35  ;;  %v13445_v35 = vcombine.low %v2348_v24, %v2352_v1  ;;  %v3331_v1 = vld [vmem:[#allocation20 + $0x288] sm:$0xff] }
 0x5e1   :  { %3200 = vmatprep.subr.bf16.mxu0 %v13398_v37  ;;  %v3372_v37 = vld [vmem:[#allocation20 + $0x3d0] sm:$0xff] }
 0x5e2   :  { %4115 = vmatpush1.bf16.msra.mxu1 %v13515_v45  ;;  %v13580_v45 = vcombine.high %v3372_v37, %v3376_v41  ;;  %v13579_v50 = vcombine.low %v3372_v37, %v3376_v41  ;;  %v3359_v37 = vld [vmem:[#allocation20 + $0x368] sm:$0xff] }
 0x5e3   :  { %4116 = vmatprep.subr.bf16.mxu1 %v13524_v46  ;;  %v13453_v46 = vcombine.low %v2356_v31, %v2360_v32  ;;  %v3347_v32 = vld [vmem:[#allocation20 + $0x308] sm:$0xff] }
 0x5e4   :  { %3201 = vmatpush1.bf16.msra.mxu0 %v13397_v47  ;;  %v13458_v47 = vcombine.high %v3251_v42, %v3255_v43  ;;  %v3363_v43 = vld [vmem:[#allocation20 + $0x388] sm:$0xff] }
 0x5e5   :  { %3202 = vmatprep.subr.bf16.mxu0 %v13406_v48  ;;  %v3259_v48 = vld [vmem:[#allocation20 + $0x48] sm:$0xff] }
 0x5e6   :  { %4117 = vmatpush1.bf16.msra.mxu1 %v13523_v53  ;;  %v13466_v52 = vcombine.high %v3259_v48, %v3263_v49  ;;  %v3267_v53 = vld [vmem:[#allocation20 + $0x88] sm:$0xff] }
 0x5e7   :  { %4118 = vmatprep.subr.bf16.mxu1 %v13532_v54  ;;  %v3271_v54 = vld [vmem:[#allocation20 + $0xa8] sm:$0xff] }
 0x5e8   :  { %3203 = vmatpush1.bf16.msra.mxu0 %v13405_v55  ;;  %v13465_v55 = vcombine.low %v3259_v48, %v3263_v49  ;;  %v13473_v58 = vcombine.low %v3267_v53, %v3271_v54  ;;  %v3375_v48 = vld [vmem:[#allocation20 + $0x3e8] sm:$0xff] }
 0x5e9   :  { %3204 = vmatprep.subr.bf16.mxu0 %v13414_v56  ;;  %v13474_v56 = vcombine.high %v3267_v53, %v3271_v54 }
 0x5ea   :  { %4119 = vmatpush1.bf16.msra.mxu1 %v13531_v60  ;;  %v3283_v60 = vld [vmem:[#allocation20 + $0x108] sm:$0xff] }
 0x5eb   :  { %4120 = vmatprep.subr.bf16.mxu1 %v13540_v61  ;;  %v3287_v61 = vld [vmem:[#allocation20 + $0x128] sm:$0xff] }
 0x5ec   :  { %3205 = vmatpush1.bf16.msra.mxu0 %v13413_v62  ;;  %v13481_v62 = vcombine.low %v3275_v21, %v3279_v57  ;;  %v13489_v4 = vcombine.low %v3283_v60, %v3287_v61 }
 0x5ed   :  { %3206 = vmatprep.subr.bf16.mxu0 %v13422_v63  ;;  %v3291_v63 = vld [vmem:[#allocation20 + $0x148] sm:$0xff] }
 0x5ee   :  { %4121 = vmatpush1.bf16.msra.mxu1 %v13539_v7  ;;  %v13498_v5 = vcombine.high %v3291_v63, %v3295_v3  ;;  %v3303_v7 = vld [vmem:[#allocation20 + $0x1a8] sm:$0xff] }
 0x5ef   :  { %4122 = vmatprep.subr.bf16.mxu1 %v13548_v8  ;;  %v13497_v8 = vcombine.low %v3291_v63, %v3295_v3  ;;  %v13505_v12 = vcombine.low %v3299_v6, %v3303_v7 }
 0x5f0   :  { %3207 = vmatpush1.bf16.msra.mxu0 %v13421_v9  ;;  %v13506_v9 = vcombine.high %v3299_v6, %v3303_v7 }
 0x5f1   :  { %3208 = vmatprep.subr.bf16.mxu0 %v13430_v10  ;;  %v3307_v10 = vld [vmem:[#allocation20 + $0x1c8] sm:$0xff] }
 0x5f2   :  { %4123 = vmatpush1.bf16.msra.mxu1 %v13547_v16  ;;  %v13514_v13 = vcombine.high %v3307_v10, %v3311_v11  ;;  %v3319_v16 = vld [vmem:[#allocation20 + $0x228] sm:$0xff] }
 0x5f3   :  { %4124 = vmatprep.subr.bf16.mxu1 %v13556_v17  ;;  %v13513_v17 = vcombine.low %v3307_v10, %v3311_v11  ;;  %v13521_v23 = vcombine.low %v3315_v15, %v3319_v16  ;;  %v2381_v10 = vsub.s32 4, %v16186_v38 }
 0x5f4   :  { %3209 = vmatpush1.bf16.msra.mxu0 %v13429_v19  ;;  %v13522_v19 = vcombine.high %v3315_v15, %v3319_v16  ;;  %v3301_v16 = vld [vmem:[#allocation20 + $0x198] sm:$0xff] }
 0x5f5   :  { %3210 = vmatprep.subr.bf16.mxu0 %v13438_v20  ;;  %v3323_v20 = vld [vmem:[#allocation20 + $0x248] sm:$0xff] }
 0x5f6   :  { %4125 = vmatpush1.bf16.msra.mxu1 %v13555_v25  ;;  %v13530_v24 = vcombine.high %v3323_v20, %v3327_v22  ;;  %v3335_v25 = vld [vmem:[#allocation20 + $0x2a8] sm:$0xff] }
 0x5f7   :  { %4126 = vmatprep.subr.bf16.mxu1 %v13564_v26  ;;  %v13529_v26 = vcombine.low %v3323_v20, %v3327_v22  ;;  %v13537_v30 = vcombine.low %v3331_v1, %v3335_v25 }
 0x5f8   :  { %3211 = vmatpush1.bf16.msra.mxu0 %v13437_v27  ;;  %v13538_v27 = vcombine.high %v3331_v1, %v3335_v25 }
 0x5f9   :  { %3212 = vmatprep.subr.bf16.mxu0 %v13446_v28  ;;  %v3339_v28 = vld [vmem:[#allocation20 + $0x2c8] sm:$0xff] }
 0x5fa   :  { %4127 = vmatpush1.bf16.msra.mxu1 %v13563_v33  ;;  %v13546_v31 = vcombine.high %v3339_v28, %v3343_v29  ;;  %v3351_v33 = vld [vmem:[#allocation20 + $0x328] sm:$0xff] }
 0x5fb   :  { %4128 = vmatprep.subr.bf16.mxu1 %v13572_v34  ;;  %v13545_v34 = vcombine.low %v3339_v28, %v3343_v29  ;;  %v13553_v41 = vcombine.low %v3347_v32, %v3351_v33  ;;  %v3313_v28 = vld [vmem:[#allocation20 + $0x1f8] sm:$0xff] }
 0x5fc   :  { %3213 = vmatpush1.bf16.msra.mxu0 %v13445_v35  ;;  %v13554_v35 = vcombine.high %v3347_v32, %v3351_v33 }
 0x5fd   :  { %3214 = vmatprep.subr.bf16.mxu0 %v13454_v36  ;;  %v3355_v36 = vld [vmem:[#allocation20 + $0x348] sm:$0xff] }
 0x5fe   :  { %4129 = vmatpush1.bf16.msra.mxu1 %v13571_v44  ;;  %v13562_v42 = vcombine.high %v3355_v36, %v3359_v37  ;;  %v3367_v44 = vld [vmem:[#allocation20 + $0x3a8] sm:$0xff] }
 0x5ff   :  { %4130 = vmatprep.subr.bf16.mxu1 %v13580_v45  ;;  %v13561_v45 = vcombine.low %v3355_v36, %v3359_v37  ;;  %v13569_v49 = vcombine.low %v3363_v43, %v3367_v44 }
 0x600   :  { %3215 = vmatpush1.bf16.msra.mxu0 %v13453_v46  ;;  %v13570_v46 = vcombine.high %v3363_v43, %v3367_v44 }
 0x601   :  { %4059 = vmatprep.subr.bf16.mxu0 %v13458_v47  ;;  %v3371_v47 = vld [vmem:[#allocation20 + $0x3c8] sm:$0xff] }
 0x602   :  { %4131 = vmatpush1.bf16.msra.mxu1 %v13579_v50  ;;  %v13578_v50 = vcombine.high %v3371_v47, %v3375_v48  ;;  %v13577_v53 = vcombine.low %v3371_v47, %v3375_v48  ;;  %v3317_v48 = vld [vmem:[#allocation20 + $0x218] sm:$0xff] }
 0x603   :  { %3217 = vmatmul.mubr.bf16.vlgmr.msra.gmra.mrb[20].mxu0 %v16216_v18  ;;  %v13490_v18 = vcombine.high %v3283_v60, %v3287_v61 }
 0x604   :  { %4060 = vmatpush1.bf16.msra.mxu0 %v13457_v51  ;;  %4091 = vmatprep.mubr.bf16.mxu0 %v15813_v14  ;;  %v3253_v51 = vld [vmem:[#allocation20 + $0x18] sm:$0xff] }
 0x605   :  { %4061 = vmatprep.subr.bf16.mxu0 %v13466_v52  ;;  %4133 = vmatmul.mubr.bf16.vlgmr.msra.gmra.mrb[20].mxu1 %v15813_v14  ;;  %v3257_v52 = vld [vmem:[#allocation20 + $0x38] sm:$0xff] }
 0x606   :  { %v13462_v54 = vcombine.high %v3253_v51, %v3257_v52  ;;  %v13461_v21 = vcombine.low %v3253_v51, %v3257_v52  ;;  %v3325_v52 = vld [vmem:[#allocation20 + $0x258] sm:$0xff] }
 0x608   :  { %4062 = vmatpush1.bf16.msra.mxu0 %v13465_v55  ;;  %v3261_v55 = vld [vmem:[#allocation20 + $0x58] sm:$0xff] }
 0x609   :  { %4063 = vmatprep.subr.bf16.mxu0 %v13474_v56  ;;  %v3265_v56 = vld [vmem:[#allocation20 + $0x78] sm:$0xff] }
 0x60a   :  { %v13470_v57 = vcombine.high %v3261_v55, %v3265_v56  ;;  %v13469_v60 = vcombine.low %v3261_v55, %v3265_v56  ;;  %v3333_v56 = vld [vmem:[#allocation20 + $0x298] sm:$0xff] }
 0x60c   :  { %4064 = vmatpush1.bf16.msra.mxu0 %v13473_v58  ;;  %v3269_v58 = vld [vmem:[#allocation20 + $0x98] sm:$0xff] }
 0x60d   :  { %4065 = vmatprep.subr.bf16.mxu0 %v13482_v59  ;;  %v3273_v59 = vld [vmem:[#allocation20 + $0xb8] sm:$0xff] }
 0x60e   :  { %v13478_v61 = vcombine.high %v3269_v58, %v3273_v59  ;;  %v13477_v63 = vcombine.low %v3269_v58, %v3273_v59  ;;  %v3341_v59 = vld [vmem:[#allocation20 + $0x2d8] sm:$0xff] }
 0x610   :  { %4066 = vmatpush1.bf16.msra.mxu0 %v13481_v62  ;;  %v3277_v62 = vld [vmem:[#allocation20 + $0xd8] sm:$0xff] }
 0x611   :  { %4067 = vmatprep.subr.bf16.mxu0 %v13490_v18  ;;  %v3281_v18 = vld [vmem:[#allocation20 + $0xf8] sm:$0xff] }
 0x612   :  { %v13486_v3 = vcombine.high %v3277_v62, %v3281_v18  ;;  %v13485_v6 = vcombine.low %v3277_v62, %v3281_v18  ;;  %v3349_v18 = vld [vmem:[#allocation20 + $0x318] sm:$0xff] }
 0x614   :  { %4068 = vmatpush1.bf16.msra.mxu0 %v13489_v4  ;;  %v3285_v4 = vld [vmem:[#allocation20 + $0x118] sm:$0xff] }
 0x615   :  { %4069 = vmatprep.subr.bf16.mxu0 %v13498_v5  ;;  %v3289_v5 = vld [vmem:[#allocation20 + $0x138] sm:$0xff] }
 0x616   :  { %v13494_v7 = vcombine.high %v3285_v4, %v3289_v5  ;;  %v13493_v11 = vcombine.low %v3285_v4, %v3289_v5  ;;  %v3357_v5 = vld [vmem:[#allocation20 + $0x358] sm:$0xff] }
 0x618   :  { %4070 = vmatpush1.bf16.msra.mxu0 %v13497_v8  ;;  %v3293_v8 = vld [vmem:[#allocation20 + $0x158] sm:$0xff] }
 0x619   :  { %4071 = vmatprep.subr.bf16.mxu0 %v13506_v9  ;;  %v3297_v9 = vld [vmem:[#allocation20 + $0x178] sm:$0xff] }
 0x61a   :  { %v13502_v15 = vcombine.high %v3293_v8, %v3297_v9  ;;  %v13501_v22 = vcombine.low %v3293_v8, %v3297_v9  ;;  %v3365_v9 = vld [vmem:[#allocation20 + $0x398] sm:$0xff] }
 0x61c   :  { %4072 = vmatpush1.bf16.msra.mxu0 %v13505_v12  ;;  %v16239_v12 = vld [vmem:[%s18165_s13] sm:$0xff] }
 0x61d   :  { %4073 = vmatprep.subr.bf16.mxu0 %v13514_v13  ;;  %v2385_v13 = vsub.s32 5, %v16186_v38  ;;  %v2382_v20 = vrot.slane %v16239_v12, %v2381_v10  ;;  %v3369_v10 = vld [vmem:[#allocation20 + $0x3b8] sm:$0xff] }
 0x620   :  { %4074 = vmatpush1.bf16.msra.mxu0 %v13513_v17  ;;  %v3305_v17 = vld [vmem:[#allocation20 + $0x1b8] sm:$0xff] }
 0x621   :  { %4075 = vmatprep.subr.bf16.mxu0 %v13522_v19  ;;  %v2366_v19 = vrot.slane %v16239_v12, %v16189_v39  ;;  %v13510_v1 = vcombine.high %v3301_v16, %v3305_v17  ;;  %v13509_v37 = vcombine.low %v3301_v16, %v3305_v17  ;;  %v3377_v16 = vld [vmem:[#allocation20 + $0x3f8] sm:$0xff]  ;;  %v13573_v17 = vcombine.low %v3365_v9, %v3369_v10 }
 0x624   :  { %4076 = vmatpush1.bf16.msra.mxu0 %v13521_v23  ;;  %v2370_v23 = vrot.slane %v16239_v12, %v16192_v40 }
 0x625   :  { %4077 = vmatprep.subr.bf16.mxu0 %v13530_v24  ;;  %v2386_v24 = vrot.slane %v16239_v12, %v2385_v13  ;;  %v13574_v13 = vcombine.high %v3365_v9, %v3369_v10  ;;  %v4377_v9 = vld [vmem:[#allocation20 + $0x80] sm:$0xff] }
 0x626   :  { %v4381_v10 = vld [vmem:[#allocation20 + $0xa0] sm:$0xff] }
 0x628   :  { %4078 = vmatpush1.bf16.msra.mxu0 %v13529_v26 }
 0x629   :  { %4079 = vmatprep.subr.bf16.mxu0 %v13538_v27  ;;  %v3309_v27 = vld [vmem:[#allocation20 + $0x1d8] sm:$0xff] }
 0x62c   :  { %4080 = vmatpush1.bf16.msra.mxu0 %v13537_v30 }
 0x62d   :  { %4081 = vmatprep.subr.bf16.mxu0 %v13546_v31 }
 0x630   :  { %4082 = vmatpush1.bf16.msra.mxu0 %v13545_v34 }
 0x631   :  { %4083 = vmatprep.subr.bf16.mxu0 %v13554_v35 }
 0x634   :  { %4084 = vmatpush1.bf16.msra.mxu0 %v13553_v41 }
 0x635   :  { %4085 = vmatprep.subr.bf16.mxu0 %v13562_v42 }
 0x638   :  { %4086 = vmatpush1.bf16.msra.mxu0 %v13561_v45  ;;  %v13518_v45 = vcombine.high %v3309_v27, %v3313_v28 }
 0x639   :  { %4087 = vmatprep.subr.bf16.mxu0 %v13570_v46 }
 0x63c   :  { %4088 = vmatpush1.bf16.msra.mxu0 %v13569_v49  ;;  %v3321_v49 = vld [vmem:[#allocation20 + $0x238] sm:$0xff] }
 0x63d   :  { %4089 = vmatprep.subr.bf16.mxu0 %v13578_v50  ;;  %v13517_v50 = vcombine.low %v3309_v27, %v3313_v28  ;;  %v13526_v51 = vcombine.high %v3317_v48, %v3321_v49 }
 0x640   :  { %4090 = vmatpush1.bf16.msra.mxu0 %v13577_v53  ;;  %v3329_v53 = vld [vmem:[#allocation20 + $0x278] sm:$0xff] }
 0x641   :  { %4141 = vmatprep.subr.bf16.mxu0 %v13462_v54  ;;  %v13525_v54 = vcombine.low %v3317_v48, %v3321_v49  ;;  %v13534_v55 = vcombine.high %v3325_v52, %v3329_v53 }
 0x643   :  { %4092 = vmatmul.mubr.bf16.vlgmr.msra.gmra.mrb[24].mxu0 %v15813_v14 }
 0x644   :  { %4142 = vmatpush1.bf16.msra.mxu0 %v13461_v21  ;;  %4173 = vmatprep.mubr.bf16.mxu0 %v15813_v14  ;;  %v3337_v21 = vld [vmem:[#allocation20 + $0x2b8] sm:$0xff] }
 0x645   :  { %4143 = vmatprep.subr.bf16.mxu0 %v13470_v57  ;;  %v13533_v57 = vcombine.low %v3325_v52, %v3329_v53  ;;  %v13542_v58 = vcombine.high %v3333_v56, %v3337_v21 }
 0x648   :  { %4144 = vmatpush1.bf16.msra.mxu0 %v13469_v60  ;;  %v3345_v60 = vld [vmem:[#allocation20 + $0x2f8] sm:$0xff] }
 0x649   :  { %4145 = vmatprep.subr.bf16.mxu0 %v13478_v61  ;;  %v13541_v61 = vcombine.low %v3333_v56, %v3337_v21  ;;  %v13550_v62 = vcombine.high %v3341_v59, %v3345_v60  ;;  %v4361_v56 = vld [vmem:[#allocation20] sm:$0xff] }
 0x64a   :  { %v4365_v21 = vld [vmem:[#allocation20 + $0x20] sm:$0xff] }
 0x64c   :  { %4146 = vmatpush1.bf16.msra.mxu0 %v13477_v63  ;;  %v3353_v63 = vld [vmem:[#allocation20 + $0x338] sm:$0xff] }
 0x64d   :  { %4147 = vmatprep.subr.bf16.mxu0 %v13486_v3  ;;  %v13549_v3 = vcombine.low %v3341_v59, %v3345_v60  ;;  %v13558_v4 = vcombine.high %v3349_v18, %v3353_v63  ;;  %v4366_v59 = vld [vmem:[#allocation20 + $0x28] sm:$0xff]  ;;  %v16271_v60 = vcombine.low %v4361_v56, %v4365_v21 }
 0x650   :  { %4148 = vmatpush1.bf16.msra.mxu0 %v13485_v6  ;;  %v3361_v6 = vld [vmem:[#allocation20 + $0x378] sm:$0xff] }
 0x651   :  { %4149 = vmatprep.subr.bf16.mxu0 %v13494_v7  ;;  %v13557_v7 = vcombine.low %v3349_v18, %v3353_v63  ;;  %v13566_v8 = vcombine.high %v3357_v5, %v3361_v6  ;;  %v4369_v18 = vld [vmem:[#allocation20 + $0x40] sm:$0xff] }
 0x652   :  { %v4373_v63 = vld [vmem:[#allocation20 + $0x60] sm:$0xff] }
 0x654   :  { %4150 = vmatpush1.bf16.msra.mxu0 %v13493_v11  ;;  %v13565_v11 = vcombine.low %v3357_v5, %v3361_v6  ;;  %v4374_v5 = vld [vmem:[#allocation20 + $0x68] sm:$0xff]  ;;  %v16283_v6 = vcombine.low %v4369_v18, %v4373_v63 }
 0x655   :  { %4151 = vmatprep.subr.bf16.mxu0 %v13502_v15  ;;  %v3373_v15 = vld [vmem:[#allocation20 + $0x3d8] sm:$0xff] }
 0x656   :  { %v3089_v25 = vpop.f32.mrb[12].mxu0  ;;  %v3175_v26 = vpop.f32.mrb[12].mxu1 }
 0x657   :  { %v3090_v29 = vadd.f32 %v3089_v25, %v2366_v19  ;;  %v3176_v30 = vadd.f32 %v3175_v26, %v2382_v20  ;;  %v3091_v31 = vpop.f32.mrb[13].mxu0  ;;  %v3177_v32 = vpop.f32.mrb[13].mxu1 }
 0x658   :  { %v3092_v33 = vadd.f32 %v3091_v31, %v2370_v23  ;;  %v3178_v34 = vadd.f32 %v3177_v32, %v2386_v24  ;;  %4152 = vmatpush1.bf16.msra.mxu0 %v13501_v22  ;;  %v3093_v35 = vpop.f32.mrb[14].mxu0  ;;  %v3179_v36 = vpop.f32.mrb[14].mxu1  ;;  %v2373_v22 = vsub.s32 2, %v16186_v38 }
 0x659   :  { %3227 = vst [vmem:[#allocation3] sm:$0xff] %v3090_v29  ;;  %3231 = vst [vmem:[#allocation3 + $0x20] sm:$0xff] %v3176_v30  ;;  %v3094_v41 = vadd.f32 %v3093_v35, %v2366_v19  ;;  %v3180_v42 = vadd.f32 %v3179_v36, %v2382_v20  ;;  %v3095_v43 = vpop.f32.mrb[15].mxu0  ;;  %v3181_v44 = vpop.f32.mrb[15].mxu1  ;;  %4153 = vmatprep.subr.bf16.mxu0 %v13510_v1  ;;  %v13582_v19 = vcombine.high %v3373_v15, %v3377_v16 }
 0x65a   :  { %3228 = vst [vmem:[#allocation3 + $0x8] sm:$0xff] %v3092_v33  ;;  %3232 = vst [vmem:[#allocation3 + $0x28] sm:$0xff] %v3178_v34  ;;  %v3096_v46 = vadd.f32 %v3095_v43, %v2370_v23  ;;  %v3182_v47 = vadd.f32 %v3181_v44, %v2386_v24  ;;  %v13581_v20 = vcombine.low %v3373_v15, %v3377_v16  ;;  %v2377_v23 = vsub.s32 3, %v16186_v38  ;;  %v4382_v15 = vld [vmem:[#allocation20 + $0xa8] sm:$0xff]  ;;  %v4461_v34 = vld [vmem:[#allocation20 + $0x320] sm:$0xff] }
 0x65b   :  { %3235 = vst [vmem:[#allocation3 + $0x40] sm:$0xff] %v3094_v41  ;;  %3239 = vst [vmem:[#allocation3 + $0x60] sm:$0xff] %v3180_v42  ;;  %v2374_v24 = vrot.slane %v16239_v12, %v2373_v22  ;;  %v2393_v41 = vsub.s32 7, %v16186_v38  ;;  %v16295_v16 = vcombine.low %v4377_v9, %v4381_v10  ;;  %v4389_v22 = vld [vmem:[#allocation20 + $0xe0] sm:$0xff] }
 0x65c   :  { %3236 = vst [vmem:[#allocation3 + $0x48] sm:$0xff] %v3096_v46  ;;  %3240 = vst [vmem:[#allocation3 + $0x68] sm:$0xff] %v3182_v47  ;;  %4154 = vmatpush1.bf16.msra.mxu0 %v13509_v37  ;;  %v2378_v1 = vrot.slane %v16239_v12, %v2377_v23  ;;  %v2389_v37 = vsub.s32 6, %v16186_v38  ;;  %v4386_v23 = vld [vmem:[#allocation20 + $0xc8] sm:$0xff] }
 0x65d   :  { %4155 = vmatprep.subr.bf16.mxu0 %v13518_v45  ;;  %v2394_v43 = vrot.slane %v16239_v12, %v2393_v41  ;;  %v4401_v41 = vld [vmem:[#allocation20 + $0x140] sm:$0xff] }
 0x65e   :  { %v2390_v42 = vrot.slane %v16239_v12, %v2389_v37 }
 0x660   :  { %4156 = vmatpush1.bf16.msra.mxu0 %v13517_v50 }
 0x661   :  { %4157 = vmatprep.subr.bf16.mxu0 %v13526_v51 }
 0x664   :  { %4158 = vmatpush1.bf16.msra.mxu0 %v13525_v54  ;;  %v4457_v54 = vld [vmem:[#allocation20 + $0x300] sm:$0xff] }
 0x665   :  { %4159 = vmatprep.subr.bf16.mxu0 %v13534_v55 }
 0x668   :  { %4160 = vmatpush1.bf16.msra.mxu0 %v13533_v57  ;;  %v4362_v57 = vld [vmem:[#allocation20 + $0x8] sm:$0xff] }
 0x669   :  { %4161 = vmatprep.subr.bf16.mxu0 %v13542_v58  ;;  %v16269_v58 = vcombine.high %v4361_v56, %v4365_v21 }
 0x66b   :  { %5146 = vmatprep.subr.bf16.mxu1 %v16269_v58 }
 0x66c   :  { %4162 = vmatpush1.bf16.msra.mxu0 %v13541_v61  ;;  %v16273_v61 = vcombine.low %v4362_v57, %v4366_v59  ;;  %5147 = vmatpush1.bf16.msra.mxu1 %v16271_v60 }
 0x66d   :  { %4163 = vmatprep.subr.bf16.mxu0 %v13550_v62  ;;  %v16275_v62 = vcombine.high %v4362_v57, %v4366_v59  ;;  %v4417_v59 = vld [vmem:[#allocation20 + $0x1c0] sm:$0xff] }
 0x670   :  { %4164 = vmatpush1.bf16.msra.mxu0 %v13549_v3  ;;  %v4370_v3 = vld [vmem:[#allocation20 + $0x48] sm:$0xff] }
 0x671   :  { %4165 = vmatprep.subr.bf16.mxu0 %v13558_v4  ;;  %v16281_v4 = vcombine.high %v4369_v18, %v4373_v63  ;;  %v4421_v18 = vld [vmem:[#allocation20 + $0x1e0] sm:$0xff]  ;;  %v4418_v63 = vld [vmem:[#allocation20 + $0x1c8] sm:$0xff] }
 0x673   :  { %5148 = vmatprep.subr.bf16.mxu1 %v16281_v4 }
 0x674   :  { %4166 = vmatpush1.bf16.msra.mxu0 %v13557_v7  ;;  %v16285_v7 = vcombine.low %v4370_v3, %v4374_v5  ;;  %5149 = vmatpush1.bf16.msra.mxu1 %v16283_v6 }
 0x675   :  { %4167 = vmatprep.subr.bf16.mxu0 %v13566_v8  ;;  %v16287_v8 = vcombine.high %v4370_v3, %v4374_v5  ;;  %v16353_v3 = vcombine.high %v4417_v59, %v4421_v18  ;;  %v4422_v5 = vld [vmem:[#allocation20 + $0x1e8] sm:$0xff] }
 0x678   :  { %4168 = vmatpush1.bf16.msra.mxu0 %v13565_v11  ;;  %v4378_v11 = vld [vmem:[#allocation20 + $0x88] sm:$0xff] }
 0x679   :  { %4169 = vmatprep.subr.bf16.mxu0 %v13574_v13  ;;  %v16293_v13 = vcombine.high %v4377_v9, %v4381_v10  ;;  %v16355_v9 = vcombine.low %v4417_v59, %v4421_v18  ;;  %v16357_v10 = vcombine.low %v4418_v63, %v4422_v5 }
 0x67b   :  { %5150 = vmatprep.subr.bf16.mxu1 %v16293_v13 }
 0x67c   :  { %4170 = vmatpush1.bf16.msra.mxu0 %v13573_v17  ;;  %v16297_v17 = vcombine.low %v4378_v11, %v4382_v15  ;;  %5151 = vmatpush1.bf16.msra.mxu1 %v16295_v16 }
 0x67d   :  { %4171 = vmatprep.subr.bf16.mxu0 %v13582_v19  ;;  %v16299_v19 = vcombine.high %v4378_v11, %v4382_v15  ;;  %v16359_v11 = vcombine.high %v4418_v63, %v4422_v5  ;;  %v4425_v15 = vld [vmem:[#allocation20 + $0x200] sm:$0xff]  ;;  %v4442_v63 = vld [vmem:[#allocation20 + $0x288] sm:$0xff] }
 0x67e   :  { %v4446_v5 = vld [vmem:[#allocation20 + $0x2a8] sm:$0xff] }
 0x680   :  { %4172 = vmatpush1.bf16.msra.mxu0 %v13581_v20  ;;  %v4385_v20 = vld [vmem:[#allocation20 + $0xc0] sm:$0xff] }
 0x681   :  { %5187 = vmatprep.subr.bf16.mxu0 %v16275_v62 }
 0x683   :  { %4174 = vmatmul.mubr.bf16.vlgmr.msra.gmra.mrb[28].mxu0 %v15813_v14 }
 0x684   :  { %5188 = vmatpush1.bf16.msra.mxu0 %v16273_v61 }
 0x685   :  { %5189 = vmatprep.subr.bf16.mxu0 %v16287_v8 }
 0x688   :  { %5190 = vmatpush1.bf16.msra.mxu0 %v16285_v7 }
 0x689   :  { %5191 = vmatprep.subr.bf16.mxu0 %v16299_v19 }
 0x68c   :  { %5192 = vmatpush1.bf16.msra.mxu0 %v16297_v17 }
 0x696   :  { %v3132_v25 = vpop.f32.mrb[16].mxu0 }
 0x697   :  { %v3133_v26 = vadd.f32 %v3132_v25, %v2374_v24  ;;  %v3134_v27 = vpop.f32.mrb[17].mxu0  ;;  %v16307_v25 = vcombine.low %v4385_v20, %v4389_v22 }
 0x698   :  { %v3135_v28 = vadd.f32 %v3134_v27, %v2378_v1  ;;  %v3136_v29 = vpop.f32.mrb[18].mxu0  ;;  %v16253_v30 = vpop.f32.mrb[16].mxu1 }
 0x699   :  { %3229 = vst [vmem:[#allocation3 + $0x10] sm:$0xff] %v3133_v26  ;;  %v3137_v31 = vadd.f32 %v3136_v29, %v2374_v24  ;;  %v3138_v32 = vpop.f32.mrb[19].mxu0  ;;  %v16255_v33 = vpop.f32.mrb[17].mxu1  ;;  %v16305_v24 = vcombine.high %v4385_v20, %v4389_v22  ;;  %v4397_v29 = vld [vmem:[#allocation20 + $0x120] sm:$0xff]  ;;  %v4426_v22 = vld [vmem:[#allocation20 + $0x208] sm:$0xff] }
 0x69a   :  { %3230 = vst [vmem:[#allocation3 + $0x18] sm:$0xff] %v3135_v28  ;;  %v3139_v14 = vadd.f32 %v3138_v32, %v2378_v1  ;;  %v4056_v35 = vpop.f32.mrb[18].mxu1  ;;  %v4390_v1 = vld [vmem:[#allocation20 + $0xe8] sm:$0xff]  ;;  %v4393_v28 = vld [vmem:[#allocation20 + $0x100] sm:$0xff] }
 0x69b   :  { %3237 = vst [vmem:[#allocation3 + $0x50] sm:$0xff] %v3137_v31  ;;  %v4057_v36 = vpop.f32.mrb[19].mxu1  ;;  %v16309_v26 = vcombine.low %v4386_v23, %v4390_v1  ;;  %v16311_v27 = vcombine.high %v4386_v23, %v4390_v1  ;;  %5152 = vmatprep.subr.bf16.mxu1 %v16305_v24  ;;  %v4394_v31 = vld [vmem:[#allocation20 + $0x108] sm:$0xff]  ;;  %v16317_v32 = vcombine.high %v4393_v28, %v4397_v29  ;;  %v4429_v20 = vld [vmem:[#allocation20 + $0x220] sm:$0xff] }
 0x69c   :  { %3238 = vst [vmem:[#allocation3 + $0x58] sm:$0xff] %v3139_v14  ;;  %5153 = vmatpush1.bf16.msra.mxu1 %v16307_v25  ;;  %v4398_v14 = vld [vmem:[#allocation20 + $0x128] sm:$0xff]  ;;  %v16319_v35 = vcombine.low %v4393_v28, %v4397_v29  ;;  %v16365_v23 = vcombine.high %v4425_v15, %v4429_v20  ;;  %v16367_v28 = vcombine.low %v4425_v15, %v4429_v20  ;;  %v4449_v15 = vld [vmem:[#allocation20 + $0x2c0] sm:$0xff] }
 0x69d   :  { %5193 = vmatprep.subr.bf16.mxu0 %v16311_v27  ;;  %v16321_v36 = vcombine.low %v4394_v31, %v4398_v14  ;;  %v16323_v37 = vcombine.high %v4394_v31, %v4398_v14  ;;  %5154 = vmatprep.subr.bf16.mxu1 %v16317_v32  ;;  %v4430_v1 = vld [vmem:[#allocation20 + $0x228] sm:$0xff]  ;;  %v4433_v14 = vld [vmem:[#allocation20 + $0x240] sm:$0xff]  ;;  %v16388_v20 = vcombine.high %v4442_v63, %v4446_v5 }
 0x69e   :  { %5194 = vmatpush1.bf16.msra.mxu0 %v16309_v26  ;;  %18446 = vst [vmem:[#allocation39_spill] sm:$0xff] %v16367_v28  ;;  %v16369_v29 = vcombine.low %v4426_v22, %v4430_v1  ;;  %v16371_v31 = vcombine.high %v4426_v22, %v4430_v1  ;;  %v4453_v22 = vld [vmem:[#allocation20 + $0x2e0] sm:$0xff]  ;;  %v4450_v1 = vld [vmem:[#allocation20 + $0x2c8] sm:$0xff] }
 0x69f   :  { %5195 = vmatprep.subr.bf16.mxu0 %v16323_v37  ;;  %18453 = vst [vmem:[#allocation46_spill] sm:$0xff] %v16388_v20 }
 0x6a0   :  { %5155 = vmatpush1.bf16.msra.mxu1 %v16319_v35  ;;  %18447 = vst [vmem:[#allocation40_spill] sm:$0xff] %v16369_v29 }
 0x6a2   :  { %5196 = vmatpush1.bf16.msra.mxu0 %v16321_v36 }
 0x6d6   :  { %v3218_v44 = vpop.f32.mrb[20].mxu0 }
 0x6d7   :  { %v3219_v45 = vadd.f32 %v3218_v44, %v2390_v42  ;;  %v3220_v46 = vpop.f32.mrb[21].mxu0 }
 0x6d8   :  { %v3221_v47 = vadd.f32 %v3220_v46, %v2394_v43  ;;  %v3222_v48 = vpop.f32.mrb[22].mxu0  ;;  %v16263_v49 = vpop.f32.mrb[20].mxu1 }
 0x6d9   :  { %3233 = vst [vmem:[#allocation3 + $0x30] sm:$0xff] %v3219_v45  ;;  %v3223_v50 = vadd.f32 %v3222_v48, %v2390_v42  ;;  %v3224_v51 = vpop.f32.mrb[23].mxu0  ;;  %v16265_v52 = vpop.f32.mrb[21].mxu1  ;;  %v4405_v42 = vld [vmem:[#allocation20 + $0x160] sm:$0xff]  ;;  %v4406_v45 = vld [vmem:[#allocation20 + $0x168] sm:$0xff] }
 0x6da   :  { %3234 = vst [vmem:[#allocation3 + $0x38] sm:$0xff] %v3221_v47  ;;  %v3225_v53 = vadd.f32 %v3224_v51, %v2394_v43  ;;  %v4138_v55 = vpop.f32.mrb[22].mxu1  ;;  %v4402_v43 = vld [vmem:[#allocation20 + $0x148] sm:$0xff]  ;;  %v16329_v44 = vcombine.high %v4401_v41, %v4405_v42  ;;  %v16331_v46 = vcombine.low %v4401_v41, %v4405_v42  ;;  %v4413_v51 = vld [vmem:[#allocation20 + $0x1a0] sm:$0xff] }
 0x6db   :  { %3241 = vst [vmem:[#allocation3 + $0x70] sm:$0xff] %v3223_v50  ;;  %v4139_v12 = vpop.f32.mrb[23].mxu1  ;;  %v16333_v47 = vcombine.low %v4402_v43, %v4406_v45  ;;  %v16335_v48 = vcombine.high %v4402_v43, %v4406_v45  ;;  %v4409_v50 = vld [vmem:[#allocation20 + $0x180] sm:$0xff]  ;;  %v4434_v42 = vld [vmem:[#allocation20 + $0x248] sm:$0xff] }
 0x6dc   :  { %3242 = vst [vmem:[#allocation3 + $0x78] sm:$0xff] %v3225_v53  ;;  %5156 = vmatprep.subr.bf16.mxu1 %v16329_v44  ;;  %v4410_v53 = vld [vmem:[#allocation20 + $0x188] sm:$0xff]  ;;  %v16341_v55 = vcombine.high %v4409_v50, %v4413_v51  ;;  %v16343_v56 = vcombine.low %v4409_v50, %v4413_v51  ;;  %v4437_v41 = vld [vmem:[#allocation20 + $0x260] sm:$0xff] }
 0x6dd   :  { %5197 = vmatprep.subr.bf16.mxu0 %v16335_v48  ;;  %5157 = vmatpush1.bf16.msra.mxu1 %v16331_v46  ;;  %v4414_v12 = vld [vmem:[#allocation20 + $0x1a8] sm:$0xff]  ;;  %v16377_v43 = vcombine.low %v4433_v14, %v4437_v41  ;;  %v16379_v45 = vcombine.high %v4433_v14, %v4437_v41  ;;  %v4441_v51 = vld [vmem:[#allocation20 + $0x280] sm:$0xff] }
 0x6de   :  { %5198 = vmatpush1.bf16.msra.mxu0 %v16333_v47  ;;  %v16345_v21 = vcombine.low %v4410_v53, %v4414_v12  ;;  %v16347_v57 = vcombine.high %v4410_v53, %v4414_v12  ;;  %5158 = vmatprep.subr.bf16.mxu1 %v16341_v55  ;;  %v4438_v50 = vld [vmem:[#allocation20 + $0x268] sm:$0xff]  ;;  %v4445_v53 = vld [vmem:[#allocation20 + $0x2a0] sm:$0xff] }
 0x6df   :  { %18448 = vst [vmem:[#allocation41_spill] sm:$0xff] %v16377_v43  ;;  %18449 = vst [vmem:[#allocation42_spill] sm:$0xff] %v16379_v45  ;;  %v16381_v12 = vcombine.low %v4434_v42, %v4438_v50  ;;  %v16383_v59 = vcombine.high %v4434_v42, %v4438_v50  ;;  %v16385_v18 = vcombine.high %v4441_v51, %v4445_v53  ;;  %v4454_v14 = vld [vmem:[#allocation20 + $0x2e8] sm:$0xff] }
 0x6e0   :  { %5199 = vmatprep.subr.bf16.mxu0 %v16347_v57  ;;  %v16392_v41 = vcombine.low %v4441_v51, %v4445_v53  ;;  %v16396_v42 = vcombine.low %v4442_v63, %v4446_v5  ;;  %v16398_v50 = vcombine.high %v4449_v15, %v4453_v22  ;;  %v16401_v0 = vcombine.high %v4450_v1, %v4454_v14 }
 0x6e1   :  { %5159 = vmatpush1.bf16.msra.mxu1 %v16343_v56  ;;  %18450 = vst [vmem:[#allocation43_spill] sm:$0xff] %v16381_v12  ;;  %18451 = vst [vmem:[#allocation44_spill] sm:$0xff] %v16383_v59  ;;  %v16404_v51 = vcombine.low %v4449_v15, %v4453_v22  ;;  %v16408_v53 = vcombine.low %v4450_v1, %v4454_v14  ;;  %v16410_v63 = vcombine.high %v4457_v54, %v4461_v34  ;;  %v15814_v5 = vmov 1966171168  }
 0x6e2   :  { %5200 = vmatpush1.bf16.msra.mxu0 %v16345_v21  ;;  %5160 = vmatprep.subr.bf16.mxu1 %v16353_v3  ;;  %18452 = vst [vmem:[#allocation45_spill] sm:$0xff] %v16385_v18  ;;  %18454 = vst [vmem:[#allocation47_spill] sm:$0xff] %v16392_v41  ;;  %v16416_v15 = vcombine.low %v4457_v54, %v4461_v34 }
 0x6e3   :  { %5201 = vmatprep.subr.bf16.mxu0 %v16359_v11  ;;  %18455 = vst [vmem:[#allocation48_spill] sm:$0xff] %v16396_v42  ;;  %18456 = vst [vmem:[#allocation49_spill] sm:$0xff] %v16398_v50 }
 0x6e4   :  { %18457 = vst [vmem:[#allocation50_spill] sm:$0xff] %v16401_v0  ;;  %18458 = vst [vmem:[#allocation51_spill] sm:$0xff] %v16408_v53 }
 0x6e5   :  { %5161 = vmatpush1.bf16.msra.mxu1 %v16355_v9  ;;  %18459 = vst [vmem:[#allocation52_spill] sm:$0xff] %v16410_v63  ;;  %18461 = vst [vmem:[#allocation54_spill] sm:$0xff] %v16416_v15 }
 0x6e6   :  { %5202 = vmatpush1.bf16.msra.mxu0 %v16357_v10  ;;  %5162 = vmatprep.subr.bf16.mxu1 %v16365_v23 }
 0x6e7   :  { %5203 = vmatprep.subr.bf16.mxu0 %v16371_v31 }
 0x6e9   :  { %5163 = vmatpush1.bf16.msra.mxu1 %v16367_v28  ;;  %v4478_v28 = vld [vmem:[#allocation20 + $0x3a8] sm:$0xff] }
 0x6ea   :  { %5204 = vmatpush1.bf16.msra.mxu0 %v16369_v29  ;;  %5164 = vmatprep.subr.bf16.mxu1 %v16379_v45  ;;  %v4458_v45 = vld [vmem:[#allocation20 + $0x308] sm:$0xff] }
 0x6eb   :  { %5205 = vmatprep.subr.bf16.mxu0 %v16383_v59  ;;  %v4462_v59 = vld [vmem:[#allocation20 + $0x328] sm:$0xff] }
 0x6ec   :  { %v4466_v29 = vld [vmem:[#allocation20 + $0x348] sm:$0xff]  ;;  %v16420_v22 = vcombine.low %v4458_v45, %v4462_v59 }
 0x6ed   :  { %5165 = vmatpush1.bf16.msra.mxu1 %v16377_v43  ;;  %v4469_v43 = vld [vmem:[#allocation20 + $0x360] sm:$0xff] }
 0x6ee   :  { %5206 = vmatpush1.bf16.msra.mxu0 %v16381_v12  ;;  %5166 = vmatprep.subr.bf16.mxu1 %v16385_v18  ;;  %v16413_v18 = vcombine.high %v4458_v45, %v4462_v59  ;;  %v4465_v12 = vld [vmem:[#allocation20 + $0x340] sm:$0xff]  ;;  %18462 = vst [vmem:[#allocation55_spill] sm:$0xff] %v16420_v22 }
 0x6ef   :  { %5207 = vmatprep.subr.bf16.mxu0 %v16388_v20  ;;  %v4195_v20 = vunpack.c.l.s4 %v15814_v5  ;;  %v16422_v1 = vcombine.high %v4465_v12, %v4469_v43  ;;  %v16428_v34 = vcombine.low %v4465_v12, %v4469_v43  ;;  %v4486_v43 = vld [vmem:[#allocation20 + $0x3e8] sm:$0xff] }
 0x6f0   :  { %18460 = vst [vmem:[#allocation53_spill] sm:$0xff] %v16413_v18 }
 0x6f1   :  { %5167 = vmatpush1.bf16.msra.mxu1 %v16392_v41  ;;  %v4470_v41 = vld [vmem:[#allocation20 + $0x368] sm:$0xff]  ;;  %18463 = vst [vmem:[#allocation56_spill] sm:$0xff] %v16422_v1  ;;  %v4196_v14 = vunpack.c.0.s8 %v4195_v20  ;;  %18465 = vst [vmem:[#allocation58_spill] sm:$0xff] %v16428_v34 }
 0x6f2   :  { %5208 = vmatpush1.bf16.msra.mxu0 %v16396_v42  ;;  %5168 = vmatprep.subr.bf16.mxu1 %v16398_v50  ;;  %v16425_v5 = vcombine.high %v4466_v29, %v4470_v41  ;;  %v4477_v50 = vld [vmem:[#allocation20 + $0x3a0] sm:$0xff]  ;;  %v4474_v42 = vld [vmem:[#allocation20 + $0x388] sm:$0xff]  ;;  %v16432_v54 = vcombine.low %v4466_v29, %v4470_v41 }
 0x6f3   :  { %5209 = vmatprep.subr.bf16.mxu0 %v16401_v0  ;;  %v4473_v0 = vld [vmem:[#allocation20 + $0x380] sm:$0xff]  ;;  %v16437_v59 = vsub.s32 %v4196_v14, %v16186_v38  ;;  %v16440_v20 = vcombine.high %v4474_v42, %v4478_v28  ;;  %v16447_v41 = vcombine.low %v4474_v42, %v4478_v28  ;;  %v18473_v38 = vcombine.low %v16253_v30, %v16255_v33  ;;  %v4363_v33 = vld [vmem:[#allocation20 + $0x10] sm:$0xff] }
 0x6f4   :  { %18464 = vst [vmem:[#allocation57_spill] sm:$0xff] %v16425_v5  ;;  %18466 = vst [vmem:[#allocation59_spill] sm:$0xff] %v16432_v54  ;;  %v16434_v45 = vcombine.high %v4473_v0, %v4477_v50 }
 0x6f5   :  { %5169 = vmatpush1.bf16.msra.mxu1 %v16404_v51  ;;  %18468 = vst [vmem:[#allocation61_spill] sm:$0xff] %v16437_v59  ;;  %18469 = vst [vmem:[#allocation62_spill] sm:$0xff] %v16440_v20 }
 0x6f6   :  { %5210 = vmatpush1.bf16.msra.mxu0 %v16408_v53  ;;  %5170 = vmatprep.subr.bf16.mxu1 %v16410_v63  ;;  %18467 = vst [vmem:[#allocation60_spill] sm:$0xff] %v16434_v45  ;;  %v4485_v63 = vld [vmem:[#allocation20 + $0x3e0] sm:$0xff]  ;;  %18471 = vst [vmem:[#allocation64_spill] sm:$0xff] %v16447_v41 }
 0x6f7   :  { %5211 = vmatprep.subr.bf16.mxu0 %v16413_v18  ;;  %v4481_v18 = vld [vmem:[#allocation20 + $0x3c0] sm:$0xff] }
 0x6f8   :  { %v16449_v14 = vcombine.high %v4481_v18, %v4485_v63  ;;  %v16460_v28 = vcombine.low %v4481_v18, %v4485_v63  ;;  %v4368_v18 = vld [vmem:[#allocation20 + $0x38] sm:$0xff] }
 0x6f9   :  { %5171 = vmatpush1.bf16.msra.mxu1 %v16416_v15  ;;  %v4482_v15 = vld [vmem:[#allocation20 + $0x3c8] sm:$0xff] }
 0x6fa   :  { %5212 = vmatpush1.bf16.msra.mxu0 %v16420_v22  ;;  %5172 = vmatprep.subr.bf16.mxu1 %v16422_v1  ;;  %v16443_v22 = vcombine.low %v4473_v0, %v4477_v50  ;;  %18472 = vst [vmem:[#allocation65_spill] sm:$0xff] %v16449_v14  ;;  %v16456_v0 = vcombine.high %v4482_v15, %v4486_v43  ;;  %18475 = vst [vmem:[#allocation67_spill] sm:$0xff] %v16460_v28 }
 0x6fb   :  { %5213 = vmatprep.subr.bf16.mxu0 %v16425_v5  ;;  %v4200_v5 = vrot.slane %v18473_v38, %v16437_v59  ;;  %v16464_v42 = vcombine.low %v4482_v15, %v4486_v43  ;;  %v18479_v43 = vcombine.low %v16263_v49, %v16265_v52  ;;  %v3247_v49 = vld [vmem:[#allocation3 + $0x40] ss:$8 sm:$0xf] }
 0x6fc   :  { %18470 = vst [vmem:[#allocation63_spill] sm:$0xff] %v16443_v22  ;;  %18474 = vst [vmem:[#allocation66_spill] sm:$0xff] %v16456_v0 }
 0x6fd   :  { %5173 = vmatpush1.bf16.msra.mxu1 %v16428_v34  ;;  %18476 = vst [vmem:[#allocation68_spill] sm:$0xff] %v16464_v42 }
 0x6fe   :  { %5214 = vmatpush1.bf16.msra.mxu0 %v16432_v54  ;;  %5174 = vmatprep.subr.bf16.mxu1 %v16434_v45 }
 0x6ff   :  { %5215 = vmatprep.subr.bf16.mxu0 %v16440_v20  ;;  %v3243_v20 = vld [vmem:[#allocation3] ss:$8 sm:$0xf] }
 0x701   :  { %5175 = vmatpush1.bf16.msra.mxu1 %v16443_v22 }
 0x702   :  { %5216 = vmatpush1.bf16.msra.mxu0 %v16447_v41  ;;  %5176 = vmatprep.subr.bf16.mxu1 %v16449_v14 }
 0x703   :  { %5217 = vmatprep.subr.bf16.mxu0 %v16456_v0 }
 0x705   :  { %5177 = vmatpush1.bf16.msra.mxu1 %v16460_v28 }
 0x706   :  { %5218 = vmatpush1.bf16.msra.mxu0 %v16464_v42 }
 0x716   :  { %v4093_v12 = vpop.f32.mrb[24].mxu0 }
 0x717   :  { %v4095_v29 = vpop.f32.mrb[25].mxu0 }
 0x718   :  { %v4191_v1 = vcombine.low %v4093_v12, %v4095_v29  ;;  %v4097_v53 = vpop.f32.mrb[26].mxu0  ;;  %v4364_v12 = vld [vmem:[#allocation20 + $0x18] sm:$0xff] }
 0x719   :  { %v4098_v50 = vpop.f32.mrb[27].mxu0  ;;  %v4367_v53 = vld [vmem:[#allocation20 + $0x30] sm:$0xff]  ;;  %v16473_v63 = vcombine.low %v4364_v12, %v4368_v18  ;;  %v16475_v15 = vcombine.high %v4364_v12, %v4368_v18 }
 0x71a   :  { %v4207_v54 = vrot.slane %v4191_v1, %v16437_v59  ;;  %v16468_v1 = vcombine.low %v4363_v33, %v4367_v53  ;;  %v16470_v29 = vcombine.high %v4363_v33, %v4367_v53  ;;  %v4214_v50 = vrot.slane %v18479_v43, %v16437_v59  ;;  %v3244_v12 = vld [vmem:[#allocation3] ss:$8 sm:$0xf0] }
 0x71b   :  { %18478 = vst [vmem:[#allocation70_spill] sm:$0xff] %v16475_v15  ;;  %5269 = vmatprep.subr.bf16.mxu0 %v16475_v15  ;;  %v3248_v18 = vld [vmem:[#allocation3 + $0x40] ss:$8 sm:$0xf0]  ;;  %v3245_v52 = vor.u32 %v3244_v12, %v3243_v20 }
 0x71c   :  { %v4222_v38 = vcombine.low %v4200_v5, %v4207_v54  ;;  %v4223_v30 = vcombine.high %v4200_v5, %v4207_v54  ;;  %18477 = vst [vmem:[#allocation69_spill] sm:$0xff] %v16470_v29  ;;  %5228 = vmatprep.subr.bf16.mxu1 %v16470_v29 }
 0x71e   :  { %v4232_v29 = vrot.slane %v4222_v38, %v16437_v59  ;;  %v4239_v15 = vrot.slane %v4223_v30, %v16437_v59 }
 0x756   :  { %v4175_v5 = vpop.f32.mrb[28].mxu0 }
 0x757   :  { %v4177_v54 = vpop.f32.mrb[29].mxu0 }
 0x758   :  { %v4193_v33 = vcombine.low %v4175_v5, %v4177_v54  ;;  %v4179_v53 = vpop.f32.mrb[30].mxu0  ;;  %v3249_v5 = vor.u32 %v3248_v18, %v3247_v49 }
 0x759   :  { %v4180_v28 = vpop.f32.mrb[31].mxu0 }
 0x75a   :  { %v4221_v42 = vrot.slane %v4193_v33, %v16437_v59 }
 0x75c   :  { %v4224_v0 = vcombine.low %v4214_v50, %v4221_v42  ;;  %v4225_v14 = vcombine.high %v4214_v50, %v4221_v42 }
 0x75e   :  { %v4246_v41 = vrot.slane %v4224_v0, %v16437_v59  ;;  %v4253_v22 = vrot.slane %v4225_v14, %v16437_v59 }
 0x760   :  { %v4254_v54 = vcombine.low %v4232_v29, %v4246_v41  ;;  %v4255_v28 = vcombine.low %v4239_v15, %v4253_v22 }
 0x762   :  { %v4258_v43 = vadd.f32 %v4254_v54, %v3245_v52  ;;  %v4259_v33 = vadd.f32 %v4255_v28, %v3249_v5 }
 0x764   :  { %v13583_v53 = vmul.f32 -1.442695, %v4258_v43  ;;  %v13584_v42 = vmul.f32 -1.442695, %v4259_v33  ;;  %v4274_v50 = vrot.slane %v4258_v43, 2  ;;  %v4275_v45 = vrot.slane %v4259_v33, 2 }
 0x765   :  { %v4296_v0 = vrot.slane %v4258_v43, 6  ;;  %v4297_v14 = vrot.slane %v4259_v33, 6  ;;  %v4290_v30 = vrot.slane %v4258_v43, 4  ;;  %v4291_v59 = vrot.slane %v4259_v33, 4 }
 0x766   :  { %15172 = vpow2.f32 %v13583_v53  ;;  %v13585_v38 = vmul.f32 -1.442695, %v4274_v50  ;;  %v13586_v34 = vmul.f32 -1.442695, %v4275_v45 }
 0x767   :  { %15174 = vpow2.f32 %v13584_v42  ;;  %v13587_v20 = vmul.f32 -1.442695, %v4296_v0  ;;  %v13588_v12 = vmul.f32 -1.442695, %v4297_v14 }
 0x768   :  { %15176 = vpow2.f32 %v13585_v38 }
 0x769   :  { %15178 = vpow2.f32 %v13586_v34 }
 0x76a   :  { %15180 = vtanh.f32 %v4290_v30 }
 0x76b   :  { %15182 = vtanh.f32 %v4291_v59 }
 0x76c   :  { %15184 = vpow2.f32 %v13587_v20 }
 0x76d   :  { %15186 = vpow2.f32 %v13588_v12 }
 0x770   :  { %v15173_v22 = vpop.eup %15172 }
 0x771   :  { %v15175_v41 = vpop.eup %15174  ;;  %v4266_v29 = vadd.f32 1.0, %v15173_v22 }
 0x772   :  { %v15177_v15 = vpop.eup %15176  ;;  %v4267_v18 = vadd.f32 1.0, %v15175_v41 }
 0x773   :  { %v15179_v49 = vpop.eup %15178  ;;  %15188 = vrcp.f32 %v4266_v29  ;;  %v4284_v45 = vadd.f32 1.0, %v15177_v15 }
 0x774   :  { %15190 = vrcp.f32 %v4267_v18  ;;  %v4285_v34 = vadd.f32 1.0, %v15179_v49  ;;  %v15181_v52 = vpop.eup %15180 }
 0x775   :  { %15192 = vrcp.f32 %v4284_v45  ;;  %v15183_v5 = vpop.eup %15182 }
 0x776   :  { %15194 = vrcp.f32 %v4285_v34  ;;  %v15185_v54 = vpop.eup %15184 }
 0x777   :  { %v15187_v28 = vpop.eup %15186  ;;  %v4306_v59 = vadd.f32 1.0, %v15185_v54 }
 0x778   :  { %v4307_v42 = vadd.f32 1.0, %v15187_v28 }
 0x779   :  { %15196 = vrcp.f32 %v4306_v59 }
 0x77a   :  { %15198 = vrcp.f32 %v4307_v42 }
 0x77d   :  { %v15189_v43 = vpop.eup %15188 }
 0x77e   :  { %v15191_v33 = vpop.eup %15190  ;;  %v4314_v0 = vmul.f32 %v15189_v43, %v15181_v52 }
 0x77f   :  { %v15193_v53 = vpop.eup %15192  ;;  %v4315_v30 = vmul.f32 %v15191_v33, %v15183_v5 }
 0x780   :  { %v15195_v50 = vpop.eup %15194  ;;  %v4312_v38 = vmul.f32 0.0, %v15193_v53 }
 0x781   :  { %v4313_v14 = vmul.f32 0.0, %v15195_v50 }
 0x782   :  { %v16488_v20 = vadd.f32 %v4314_v0, %v4312_v38 }
 0x783   :  { %v16490_v12 = vadd.f32 %v4315_v30, %v4313_v14  ;;  %v15197_v22 = vpop.eup %15196  ;;  %v4371_v14 = vld [vmem:[#allocation20 + $0x50] sm:$0xff] }
 0x784   :  { %15200 = vtanh.f32 %v16488_v20  ;;  %v15199_v41 = vpop.eup %15198 }
 0x785   :  { %15202 = vtanh.f32 %v16490_v12 }
 0x78e   :  { %v15201_v29 = vpop.eup %15200 }
 0x78f   :  { %v15203_v15 = vpop.eup %15202  ;;  %v4320_v18 = vmul.f32 %v15201_v29, %v15197_v22  ;;  %v4372_v29 = vld [vmem:[#allocation20 + $0x58] sm:$0xff] }
 0x790   :  { %v4321_v49 = vmul.f32 %v15203_v15, %v15199_v41  ;;  %v4375_v41 = vld [vmem:[#allocation20 + $0x70] sm:$0xff]  ;;  %v4376_v15 = vld [vmem:[#allocation20 + $0x78] sm:$0xff] }
 0x791   :  { %4322 = vst.msk [vmem:[#allocation4] ss:$8 sm:$0x3] %vm16143_vm1, %v4320_v18  ;;  %v4344_v45 = vrot.slane %v4320_v18, %v16192_v40  ;;  %v4340_v34 = vrot.slane %v4320_v18, %v16189_v39 }
 0x792   :  { %4325 = vst.msk [vmem:[#allocation4 + $0x10] ss:$8 sm:$0x3] %vm16143_vm1, %v4321_v49  ;;  %v4352_v52 = vrot.slane %v4321_v49, %v16192_v40  ;;  %v4348_v5 = vrot.slane %v4321_v49, %v16189_v39 }
 0x793   :  { %v4358_v54 = vpack.c.bf16 %v4344_v45, %v4344_v45  ;;  %v4357_v43 = vpack.c.bf16 %v4340_v34, %v4340_v34  ;;  %v4379_v45 = vld [vmem:[#allocation20 + $0x90] sm:$0xff]  ;;  %v16506_v34 = vcombine.high %v4371_v14, %v4375_v41 }
 0x794   :  { %v4360_v28 = vpack.c.bf16 %v4352_v52, %v4352_v52  ;;  %v4359_v33 = vpack.c.bf16 %v4348_v5, %v4348_v5  ;;  %v16508_v52 = vcombine.high %v4372_v29, %v4376_v15  ;;  %v4383_v5 = vld [vmem:[#allocation20 + $0xb0] sm:$0xff] }
 0x795   :  { %v4494_v42 = vunpack.c.l.b16 %v4358_v54  ;;  %v4493_v38 = vunpack.c.l.b16 %v4357_v43  ;;  %v4380_v54 = vld [vmem:[#allocation20 + $0x98] sm:$0xff]  ;;  %v16514_v43 = vcombine.low %v4371_v14, %v4375_v41  ;;  %v16526_v14 = vcombine.low %v4379_v45, %v4383_v5 }
 0x796   :  { %v4496_v59 = vunpack.c.l.b16 %v4360_v28  ;;  %v4495_v53 = vunpack.c.l.b16 %v4359_v33  ;;  %18480 = vst [vmem:[#allocation71_spill] sm:$0xff] %v16508_v52  ;;  %v4384_v28 = vld [vmem:[#allocation20 + $0xb8] sm:$0xff]  ;;  %v16516_v33 = vcombine.low %v4372_v29, %v4376_v15  ;;  %v4395_v29 = vld [vmem:[#allocation20 + $0x110] sm:$0xff] }
 0x797   :  { %18481 = vst [vmem:[#allocation72_spill] sm:$0xff] %v16514_v43  ;;  %18485 = vst [vmem:[#allocation76_spill] sm:$0xff] %v16526_v14  ;;  %v4399_v15 = vld [vmem:[#allocation20 + $0x130] sm:$0xff] }
 0x798   :  { %v4500_v50 = vrot.slane %v4496_v59, 7  ;;  %v4497_v0 = vrot.slane %v4495_v53, 7  ;;  %18482 = vst [vmem:[#allocation73_spill] sm:$0xff] %v16516_v33  ;;  %v16518_v59 = vcombine.high %v4379_v45, %v4383_v5  ;;  %v16520_v53 = vcombine.high %v4380_v54, %v4384_v28 }
 0x79a   :  { %v4501_v30 = vsel %vm4498_vm3, %v4500_v50, %v4494_v42  ;;  %v4499_v22 = vsel %vm4498_vm3, %v4497_v0, %v4493_v38  ;;  %18483 = vst [vmem:[#allocation74_spill] sm:$0xff] %v16518_v59  ;;  %18484 = vst [vmem:[#allocation75_spill] sm:$0xff] %v16520_v53  ;;  %v4387_v42 = vld [vmem:[#allocation20 + $0xd0] sm:$0xff]  ;;  %v4388_v38 = vld [vmem:[#allocation20 + $0xd8] sm:$0xff] }
 0x79b   :  { %v4503_v18 = vpack.c.b16 %v4501_v30, %v4501_v30  ;;  %v16504_v49 = vpack.c.b16 %v4499_v22, %v4499_v22  ;;  %v4391_v50 = vld [vmem:[#allocation20 + $0xf0] sm:$0xff]  ;;  %v4392_v0 = vld [vmem:[#allocation20 + $0xf8] sm:$0xff]  ;;  %v16528_v30 = vcombine.low %v4380_v54, %v4384_v28  ;;  %v16544_v54 = vcombine.high %v4395_v29, %v4399_v15 }
 0x79c   :  { %v16532_v22 = vcombine.high %v4387_v42, %v4391_v50  ;;  %v16534_v41 = vcombine.high %v4388_v38, %v4392_v0  ;;  %v16538_v45 = vcombine.low %v4387_v42, %v4391_v50  ;;  %v16540_v5 = vcombine.low %v4388_v38, %v4392_v0 }
 0x79d   :  { %5178 = vmatprep.mubr.bf16.mxu1 %v4503_v18  ;;  %5219 = vmatprep.mubr.bf16.mxu0 %v4503_v18  ;;  %18486 = vst [vmem:[#allocation77_spill] sm:$0xff] %v16528_v30  ;;  %18491 = vst [vmem:[#allocation82_spill] sm:$0xff] %v16544_v54  ;;  %v16550_v42 = vcombine.low %v4395_v29, %v4399_v15 }
 0x79e   :  { %5179 = vmatmul.mubr.bf16.vlgmr.msra.gmra.mrb[24].mxu1 %v16504_v49  ;;  %5220 = vmatmul.mubr.bf16.vlgmr.msra.gmra.mrb[32].mxu0 %v16504_v49  ;;  %18487 = vst [vmem:[#allocation78_spill] sm:$0xff] %v16532_v22  ;;  %18488 = vst [vmem:[#allocation79_spill] sm:$0xff] %v16534_v41 }
 0x79f   :  { %5229 = vmatpush1.bf16.msra.mxu1 %v16468_v1  ;;  %5270 = vmatpush1.bf16.msra.mxu0 %v16473_v63  ;;  %18489 = vst [vmem:[#allocation80_spill] sm:$0xff] %v16538_v45  ;;  %18490 = vst [vmem:[#allocation81_spill] sm:$0xff] %v16540_v5 }
 0x7a0   :  { %5260 = vmatprep.mubr.bf16.mxu1 %v4503_v18  ;;  %5301 = vmatprep.mubr.bf16.mxu0 %v4503_v18  ;;  %v4396_v18 = vld [vmem:[#allocation20 + $0x118] sm:$0xff]  ;;  %18493 = vst [vmem:[#allocation84_spill] sm:$0xff] %v16550_v42 }
 0x7a1   :  { %5230 = vmatprep.subr.bf16.mxu1 %v16506_v34  ;;  %5271 = vmatprep.subr.bf16.mxu0 %v16508_v52  ;;  %v4400_v52 = vld [vmem:[#allocation20 + $0x138] sm:$0xff] }
 0x7a2   :  { %v16546_v28 = vcombine.high %v4396_v18, %v4400_v52  ;;  %v16552_v50 = vcombine.low %v4396_v18, %v4400_v52 }
 0x7a3   :  { %5231 = vmatpush1.bf16.msra.mxu1 %v16514_v43  ;;  %5272 = vmatpush1.bf16.msra.mxu0 %v16516_v33  ;;  %v4404_v33 = vld [vmem:[#allocation20 + $0x158] sm:$0xff] }
 0x7a4   :  { %5232 = vmatprep.subr.bf16.mxu1 %v16518_v59  ;;  %5273 = vmatprep.subr.bf16.mxu0 %v16520_v53  ;;  %18492 = vst [vmem:[#allocation83_spill] sm:$0xff] %v16546_v28  ;;  %v4403_v53 = vld [vmem:[#allocation20 + $0x150] sm:$0xff]  ;;  %v4408_v43 = vld [vmem:[#allocation20 + $0x178] sm:$0xff]  ;;  %18494 = vst [vmem:[#allocation85_spill] sm:$0xff] %v16552_v50 }
 0x7a5   :  { %v4407_v59 = vld [vmem:[#allocation20 + $0x170] sm:$0xff]  ;;  %v16558_v0 = vcombine.high %v4404_v33, %v4408_v43  ;;  %v16564_v52 = vcombine.low %v4404_v33, %v4408_v43 }
 0x7a6   :  { %v16556_v38 = vcombine.high %v4403_v53, %v4407_v59  ;;  %v16562_v29 = vcombine.low %v4403_v53, %v4407_v59 }
 0x7a7   :  { %5233 = vmatpush1.bf16.msra.mxu1 %v16526_v14  ;;  %5274 = vmatpush1.bf16.msra.mxu0 %v16528_v30  ;;  %18496 = vst [vmem:[#allocation87_spill] sm:$0xff] %v16558_v0  ;;  %v4412_v30 = vld [vmem:[#allocation20 + $0x198] sm:$0xff]  ;;  %18498 = vst [vmem:[#allocation89_spill] sm:$0xff] %v16564_v52 }
 0x7a8   :  { %5234 = vmatprep.subr.bf16.mxu1 %v16532_v22  ;;  %5275 = vmatprep.subr.bf16.mxu0 %v16534_v41  ;;  %18495 = vst [vmem:[#allocation86_spill] sm:$0xff] %v16556_v38  ;;  %v4411_v41 = vld [vmem:[#allocation20 + $0x190] sm:$0xff]  ;;  %v4416_v14 = vld [vmem:[#allocation20 + $0x1b8] sm:$0xff]  ;;  %18497 = vst [vmem:[#allocation88_spill] sm:$0xff] %v16562_v29 }
 0x7a9   :  { %v4415_v22 = vld [vmem:[#allocation20 + $0x1b0] sm:$0xff]  ;;  %v16570_v18 = vcombine.high %v4412_v30, %v4416_v14  ;;  %v16576_v43 = vcombine.low %v4412_v30, %v4416_v14 }
 0x7aa   :  { %v16568_v15 = vcombine.high %v4411_v41, %v4415_v22  ;;  %v16574_v59 = vcombine.low %v4411_v41, %v4415_v22 }
 0x7ab   :  { %5235 = vmatpush1.bf16.msra.mxu1 %v16538_v45  ;;  %5276 = vmatpush1.bf16.msra.mxu0 %v16540_v5  ;;  %18500 = vst [vmem:[#allocation91_spill] sm:$0xff] %v16570_v18  ;;  %v4420_v5 = vld [vmem:[#allocation20 + $0x1d8] sm:$0xff]  ;;  %18502 = vst [vmem:[#allocation93_spill] sm:$0xff] %v16576_v43 }
 0x7ac   :  { %5236 = vmatprep.subr.bf16.mxu1 %v16544_v54  ;;  %5277 = vmatprep.subr.bf16.mxu0 %v16546_v28  ;;  %18499 = vst [vmem:[#allocation90_spill] sm:$0xff] %v16568_v15  ;;  %v4419_v28 = vld [vmem:[#allocation20 + $0x1d0] sm:$0xff]  ;;  %v4424_v45 = vld [vmem:[#allocation20 + $0x1f8] sm:$0xff]  ;;  %18501 = vst [vmem:[#allocation92_spill] sm:$0xff] %v16574_v59 }
 0x7ad   :  { %v4423_v54 = vld [vmem:[#allocation20 + $0x1f0] sm:$0xff]  ;;  %v16582_v53 = vcombine.high %v4420_v5, %v4424_v45  ;;  %v16588_v14 = vcombine.low %v4420_v5, %v4424_v45 }
 0x7ae   :  { %v16580_v33 = vcombine.high %v4419_v28, %v4423_v54  ;;  %v16586_v22 = vcombine.low %v4419_v28, %v4423_v54 }
 0x7af   :  { %5237 = vmatpush1.bf16.msra.mxu1 %v16550_v42  ;;  %5278 = vmatpush1.bf16.msra.mxu0 %v16552_v50  ;;  %18504 = vst [vmem:[#allocation95_spill] sm:$0xff] %v16582_v53  ;;  %v4428_v50 = vld [vmem:[#allocation20 + $0x218] sm:$0xff]  ;;  %18506 = vst [vmem:[#allocation97_spill] sm:$0xff] %v16588_v14 }
 0x7b0   :  { %5238 = vmatprep.subr.bf16.mxu1 %v16556_v38  ;;  %5279 = vmatprep.subr.bf16.mxu0 %v16558_v0  ;;  %18503 = vst [vmem:[#allocation94_spill] sm:$0xff] %v16580_v33  ;;  %v4427_v0 = vld [vmem:[#allocation20 + $0x210] sm:$0xff]  ;;  %v4432_v42 = vld [vmem:[#allocation20 + $0x238] sm:$0xff]  ;;  %18505 = vst [vmem:[#allocation96_spill] sm:$0xff] %v16586_v22 }
 0x7b1   :  { %v4431_v38 = vld [vmem:[#allocation20 + $0x230] sm:$0xff]  ;;  %v16594_v41 = vcombine.high %v4428_v50, %v4432_v42  ;;  %v16600_v45 = vcombine.low %v4428_v50, %v4432_v42 }
 0x7b2   :  { %v16592_v30 = vcombine.high %v4427_v0, %v4431_v38  ;;  %v16598_v54 = vcombine.low %v4427_v0, %v4431_v38 }
 0x7b3   :  { %5239 = vmatpush1.bf16.msra.mxu1 %v16562_v29  ;;  %5280 = vmatpush1.bf16.msra.mxu0 %v16564_v52  ;;  %18508 = vst [vmem:[#allocation99_spill] sm:$0xff] %v16594_v41  ;;  %v4436_v52 = vld [vmem:[#allocation20 + $0x258] sm:$0xff]  ;;  %18510 = vst [vmem:[#allocation101_spill] sm:$0xff] %v16600_v45 }
 0x7b4   :  { %5240 = vmatprep.subr.bf16.mxu1 %v16568_v15  ;;  %5281 = vmatprep.subr.bf16.mxu0 %v16570_v18  ;;  %18507 = vst [vmem:[#allocation98_spill] sm:$0xff] %v16592_v30  ;;  %v4435_v18 = vld [vmem:[#allocation20 + $0x250] sm:$0xff]  ;;  %v4440_v29 = vld [vmem:[#allocation20 + $0x278] sm:$0xff]  ;;  %18509 = vst [vmem:[#allocation100_spill] sm:$0xff] %v16598_v54 }
 0x7b5   :  { %v4439_v15 = vld [vmem:[#allocation20 + $0x270] sm:$0xff]  ;;  %v16606_v28 = vcombine.high %v4436_v52, %v4440_v29  ;;  %v16612_v42 = vcombine.low %v4436_v52, %v4440_v29 }
 0x7b6   :  { %v16604_v5 = vcombine.high %v4435_v18, %v4439_v15  ;;  %v16610_v38 = vcombine.low %v4435_v18, %v4439_v15 }
 0x7b7   :  { %5241 = vmatpush1.bf16.msra.mxu1 %v16574_v59  ;;  %5282 = vmatpush1.bf16.msra.mxu0 %v16576_v43  ;;  %18512 = vst [vmem:[#allocation103_spill] sm:$0xff] %v16606_v28  ;;  %v4444_v43 = vld [vmem:[#allocation20 + $0x298] sm:$0xff]  ;;  %18514 = vst [vmem:[#allocation105_spill] sm:$0xff] %v16612_v42 }
 0x7b8   :  { %5242 = vmatprep.subr.bf16.mxu1 %v16580_v33  ;;  %5283 = vmatprep.subr.bf16.mxu0 %v16582_v53  ;;  %18511 = vst [vmem:[#allocation102_spill] sm:$0xff] %v16604_v5  ;;  %v4443_v53 = vld [vmem:[#allocation20 + $0x290] sm:$0xff]  ;;  %v4448_v59 = vld [vmem:[#allocation20 + $0x2b8] sm:$0xff]  ;;  %18513 = vst [vmem:[#allocation104_spill] sm:$0xff] %v16610_v38 }
 0x7b9   :  { %v4447_v33 = vld [vmem:[#allocation20 + $0x2b0] sm:$0xff]  ;;  %v16618_v0 = vcombine.high %v4444_v43, %v4448_v59  ;;  %v16624_v29 = vcombine.low %v4444_v43, %v4448_v59 }
 0x7ba   :  { %v16616_v50 = vcombine.high %v4443_v53, %v4447_v33  ;;  %v16622_v15 = vcombine.low %v4443_v53, %v4447_v33 }
 0x7bb   :  { %5243 = vmatpush1.bf16.msra.mxu1 %v16586_v22  ;;  %5284 = vmatpush1.bf16.msra.mxu0 %v16588_v14  ;;  %18516 = vst [vmem:[#allocation107_spill] sm:$0xff] %v16618_v0  ;;  %v4452_v14 = vld [vmem:[#allocation20 + $0x2d8] sm:$0xff]  ;;  %18518 = vst [vmem:[#allocation109_spill] sm:$0xff] %v16624_v29 }
 0x7bc   :  { %5244 = vmatprep.subr.bf16.mxu1 %v16592_v30  ;;  %5285 = vmatprep.subr.bf16.mxu0 %v16594_v41  ;;  %18515 = vst [vmem:[#allocation106_spill] sm:$0xff] %v16616_v50  ;;  %v4451_v41 = vld [vmem:[#allocation20 + $0x2d0] sm:$0xff]  ;;  %v4456_v22 = vld [vmem:[#allocation20 + $0x2f8] sm:$0xff]  ;;  %18517 = vst [vmem:[#allocation108_spill] sm:$0xff] %v16622_v15 }
 0x7bd   :  { %v4455_v30 = vld [vmem:[#allocation20 + $0x2f0] sm:$0xff]  ;;  %v16630_v18 = vcombine.high %v4452_v14, %v4456_v22  ;;  %v16636_v59 = vcombine.low %v4452_v14, %v4456_v22 }
 0x7be   :  { %v16628_v52 = vcombine.high %v4451_v41, %v4455_v30  ;;  %v16634_v33 = vcombine.low %v4451_v41, %v4455_v30 }
 0x7bf   :  { %5245 = vmatpush1.bf16.msra.mxu1 %v16598_v54  ;;  %5286 = vmatpush1.bf16.msra.mxu0 %v16600_v45  ;;  %18520 = vst [vmem:[#allocation111_spill] sm:$0xff] %v16630_v18  ;;  %v4460_v45 = vld [vmem:[#allocation20 + $0x318] sm:$0xff]  ;;  %18522 = vst [vmem:[#allocation113_spill] sm:$0xff] %v16636_v59 }
 0x7c0   :  { %5246 = vmatprep.subr.bf16.mxu1 %v16604_v5  ;;  %5287 = vmatprep.subr.bf16.mxu0 %v16606_v28  ;;  %18519 = vst [vmem:[#allocation110_spill] sm:$0xff] %v16628_v52  ;;  %v4459_v28 = vld [vmem:[#allocation20 + $0x310] sm:$0xff]  ;;  %v4464_v54 = vld [vmem:[#allocation20 + $0x338] sm:$0xff]  ;;  %18521 = vst [vmem:[#allocation112_spill] sm:$0xff] %v16634_v33 }
 0x7c1   :  { %v4463_v5 = vld [vmem:[#allocation20 + $0x330] sm:$0xff]  ;;  %v16642_v53 = vcombine.high %v4460_v45, %v4464_v54  ;;  %v16648_v22 = vcombine.low %v4460_v45, %v4464_v54 }
 0x7c2   :  { %v16640_v43 = vcombine.high %v4459_v28, %v4463_v5  ;;  %v16646_v30 = vcombine.low %v4459_v28, %v4463_v5 }
 0x7c3   :  { %5247 = vmatpush1.bf16.msra.mxu1 %v16610_v38  ;;  %5288 = vmatpush1.bf16.msra.mxu0 %v16612_v42  ;;  %18524 = vst [vmem:[#allocation115_spill] sm:$0xff] %v16642_v53  ;;  %v4468_v42 = vld [vmem:[#allocation20 + $0x358] sm:$0xff] }
 0x7c4   :  { %5248 = vmatprep.subr.bf16.mxu1 %v16616_v50  ;;  %5289 = vmatprep.subr.bf16.mxu0 %v16618_v0  ;;  %18523 = vst [vmem:[#allocation114_spill] sm:$0xff] %v16640_v43  ;;  %v4467_v0 = vld [vmem:[#allocation20 + $0x350] sm:$0xff]  ;;  %v4472_v38 = vld [vmem:[#allocation20 + $0x378] sm:$0xff] }
 0x7c5   :  { %v4471_v50 = vld [vmem:[#allocation20 + $0x370] sm:$0xff]  ;;  %v16654_v41 = vcombine.high %v4468_v42, %v4472_v38  ;;  %v16660_v54 = vcombine.low %v4468_v42, %v4472_v38 }
 0x7c6   :  { %v16652_v14 = vcombine.high %v4467_v0, %v4471_v50  ;;  %v16658_v5 = vcombine.low %v4467_v0, %v4471_v50 }
 0x7c7   :  { %5249 = vmatpush1.bf16.msra.mxu1 %v16622_v15  ;;  %5290 = vmatpush1.bf16.msra.mxu0 %v16624_v29  ;;  %18525 = vst [vmem:[#allocation116_spill] sm:$0xff] %v16654_v41  ;;  %v4476_v29 = vld [vmem:[#allocation20 + $0x398] sm:$0xff] }
 0x7c8   :  { %5250 = vmatprep.subr.bf16.mxu1 %v16628_v52  ;;  %5291 = vmatprep.subr.bf16.mxu0 %v16630_v18  ;;  %v4475_v18 = vld [vmem:[#allocation20 + $0x390] sm:$0xff]  ;;  %v4480_v15 = vld [vmem:[#allocation20 + $0x3b8] sm:$0xff]  ;;  %18526 = vst [vmem:[#allocation117_spill] sm:$0xff] %v16658_v5 }
 0x7c9   :  { %v4479_v52 = vld [vmem:[#allocation20 + $0x3b0] sm:$0xff]  ;;  %v16666_v28 = vcombine.high %v4476_v29, %v4480_v15  ;;  %v16672_v38 = vcombine.low %v4476_v29, %v4480_v15 }
 0x7ca   :  { %v16664_v45 = vcombine.high %v4475_v18, %v4479_v52  ;;  %v16670_v50 = vcombine.low %v4475_v18, %v4479_v52 }
 0x7cb   :  { %5251 = vmatpush1.bf16.msra.mxu1 %v16634_v33  ;;  %5292 = vmatpush1.bf16.msra.mxu0 %v16636_v59  ;;  %v4484_v59 = vld [vmem:[#allocation20 + $0x3d8] sm:$0xff] }
 0x7cc   :  { %5252 = vmatprep.subr.bf16.mxu1 %v16640_v43  ;;  %5293 = vmatprep.subr.bf16.mxu0 %v16642_v53  ;;  %v4483_v53 = vld [vmem:[#allocation20 + $0x3d0] sm:$0xff]  ;;  %v4488_v33 = vld [vmem:[#allocation20 + $0x3f8] sm:$0xff] }
 0x7cd   :  { %v4487_v43 = vld [vmem:[#allocation20 + $0x3f0] sm:$0xff]  ;;  %v16678_v0 = vcombine.high %v4484_v59, %v4488_v33 }
 0x7ce   :  { %v16676_v42 = vcombine.high %v4483_v53, %v4487_v43 }
 0x7cf   :  { %5253 = vmatpush1.bf16.msra.mxu1 %v16646_v30  ;;  %5294 = vmatpush1.bf16.msra.mxu0 %v16648_v22 }
 0x7d0   :  { %5254 = vmatprep.subr.bf16.mxu1 %v16652_v14  ;;  %5295 = vmatprep.subr.bf16.mxu0 %v16654_v41  ;;  %v16682_v41 = vcombine.low %v4483_v53, %v4487_v43 }
 0x7d3   :  { %5255 = vmatpush1.bf16.msra.mxu1 %v16658_v5  ;;  %5296 = vmatpush1.bf16.msra.mxu0 %v16660_v54  ;;  %v16684_v5 = vcombine.low %v4484_v59, %v4488_v33  ;;  %v18558_v59 = vld [vmem:[#allocation61_spill] sm:$0xff] }
 0x7d4   :  { %5256 = vmatprep.subr.bf16.mxu1 %v16664_v45  ;;  %5297 = vmatprep.subr.bf16.mxu0 %v16666_v28 }
 0x7d7   :  { %5257 = vmatpush1.bf16.msra.mxu1 %v16670_v50  ;;  %5298 = vmatpush1.bf16.msra.mxu0 %v16672_v38 }
 0x7d8   :  { %5258 = vmatprep.subr.bf16.mxu1 %v16676_v42  ;;  %5299 = vmatprep.subr.bf16.mxu0 %v16678_v0 }
 0x7db   :  { %5259 = vmatpush1.bf16.msra.mxu1 %v16682_v41  ;;  %5300 = vmatpush1.bf16.msra.mxu0 %v16684_v5 }
 0x7dc   :  { %6274 = vmatprep.subr.bf16.mxu1 %v16269_v58  ;;  %6315 = vmatprep.subr.bf16.mxu0 %v16275_v62  ;;  %v18527_v58 = vld [vmem:[#allocation39_spill] sm:$0xff]  ;;  %v18530_v62 = vld [vmem:[#allocation44_spill] sm:$0xff] }
 0x7de   :  { %5261 = vmatmul.mubr.bf16.vlgmr.msra.gmra.mrb[28].mxu1 %v16504_v49  ;;  %5302 = vmatmul.mubr.bf16.vlgmr.msra.gmra.mrb[36].mxu0 %v16504_v49 }
 0x7df   :  { %6275 = vmatpush1.bf16.msra.mxu1 %v16271_v60  ;;  %6316 = vmatpush1.bf16.msra.mxu0 %v16273_v61  ;;  %v18528_v60 = vld [vmem:[#allocation40_spill] sm:$0xff]  ;;  %v18529_v61 = vld [vmem:[#allocation42_spill] sm:$0xff] }
 0x7e0   :  { %6276 = vmatprep.subr.bf16.mxu1 %v16281_v4  ;;  %6317 = vmatprep.subr.bf16.mxu0 %v16287_v8  ;;  %v18531_v4 = vld [vmem:[#allocation41_spill] sm:$0xff]  ;;  %v18534_v8 = vld [vmem:[#allocation46_spill] sm:$0xff] }
 0x7e3   :  { %6277 = vmatpush1.bf16.msra.mxu1 %v16283_v6  ;;  %6318 = vmatpush1.bf16.msra.mxu0 %v16285_v7  ;;  %v18532_v6 = vld [vmem:[#allocation43_spill] sm:$0xff]  ;;  %v18533_v7 = vld [vmem:[#allocation45_spill] sm:$0xff] }
 0x7e4   :  { %6278 = vmatprep.subr.bf16.mxu1 %v16293_v13  ;;  %6319 = vmatprep.subr.bf16.mxu0 %v16299_v19  ;;  %v18535_v13 = vld [vmem:[#allocation47_spill] sm:$0xff]  ;;  %v18538_v19 = vld [vmem:[#allocation50_spill] sm:$0xff] }
 0x7e7   :  { %6279 = vmatpush1.bf16.msra.mxu1 %v16295_v16  ;;  %6320 = vmatpush1.bf16.msra.mxu0 %v16297_v17  ;;  %v18536_v16 = vld [vmem:[#allocation48_spill] sm:$0xff]  ;;  %v18537_v17 = vld [vmem:[#allocation49_spill] sm:$0xff] }
 0x7e8   :  { %6280 = vmatprep.subr.bf16.mxu1 %v16305_v24  ;;  %6321 = vmatprep.subr.bf16.mxu0 %v16311_v27  ;;  %v18539_v24 = vld [vmem:[#allocation51_spill] sm:$0xff]  ;;  %v18542_v27 = vld [vmem:[#allocation54_spill] sm:$0xff] }
 0x7eb   :  { %6281 = vmatpush1.bf16.msra.mxu1 %v16307_v25  ;;  %6322 = vmatpush1.bf16.msra.mxu0 %v16309_v26  ;;  %v18540_v25 = vld [vmem:[#allocation52_spill] sm:$0xff]  ;;  %v18541_v26 = vld [vmem:[#allocation53_spill] sm:$0xff] }
 0x7ec   :  { %6282 = vmatprep.subr.bf16.mxu1 %v16317_v32  ;;  %6323 = vmatprep.subr.bf16.mxu0 %v16323_v37  ;;  %v18543_v32 = vld [vmem:[#allocation55_spill] sm:$0xff]  ;;  %v18546_v37 = vld [vmem:[#allocation58_spill] sm:$0xff] }
 0x7ef   :  { %6283 = vmatpush1.bf16.msra.mxu1 %v16319_v35  ;;  %6324 = vmatpush1.bf16.msra.mxu0 %v16321_v36  ;;  %v18544_v35 = vld [vmem:[#allocation56_spill] sm:$0xff]  ;;  %v18545_v36 = vld [vmem:[#allocation57_spill] sm:$0xff] }
 0x7f0   :  { %6284 = vmatprep.subr.bf16.mxu1 %v16329_v44  ;;  %6325 = vmatprep.subr.bf16.mxu0 %v16335_v48  ;;  %v18547_v44 = vld [vmem:[#allocation59_spill] sm:$0xff] }
 0x7f1   :  { %v18550_v48 = vld [vmem:[#allocation63_spill] sm:$0xff] }
 0x7f3   :  { %6285 = vmatpush1.bf16.msra.mxu1 %v16331_v46  ;;  %6326 = vmatpush1.bf16.msra.mxu0 %v16333_v47  ;;  %v18548_v46 = vld [vmem:[#allocation60_spill] sm:$0xff]  ;;  %v18549_v47 = vld [vmem:[#allocation62_spill] sm:$0xff] }
 0x7f4   :  { %6286 = vmatprep.subr.bf16.mxu1 %v16341_v55  ;;  %6327 = vmatprep.subr.bf16.mxu0 %v16347_v57  ;;  %v18551_v55 = vld [vmem:[#allocation64_spill] sm:$0xff]  ;;  %v18554_v57 = vld [vmem:[#allocation67_spill] sm:$0xff] }
 0x7f7   :  { %6287 = vmatpush1.bf16.msra.mxu1 %v16343_v56  ;;  %6328 = vmatpush1.bf16.msra.mxu0 %v16345_v21  ;;  %v18552_v56 = vld [vmem:[#allocation65_spill] sm:$0xff]  ;;  %v18553_v21 = vld [vmem:[#allocation66_spill] sm:$0xff] }
 0x7f8   :  { %6288 = vmatprep.subr.bf16.mxu1 %v16353_v3  ;;  %6329 = vmatprep.subr.bf16.mxu0 %v16359_v11  ;;  %v18555_v3 = vld [vmem:[#allocation68_spill] sm:$0xff] }
 0x7fb   :  { %6289 = vmatpush1.bf16.msra.mxu1 %v16355_v9  ;;  %6330 = vmatpush1.bf16.msra.mxu0 %v16357_v10  ;;  %v18556_v9 = vld [vmem:[#allocation69_spill] sm:$0xff]  ;;  %v18557_v10 = vld [vmem:[#allocation70_spill] sm:$0xff] }
 0x7fc   :  { %6290 = vmatprep.subr.bf16.mxu1 %v16365_v23  ;;  %6331 = vmatprep.subr.bf16.mxu0 %v16371_v31 }
 0x7ff   :  { %6291 = vmatpush1.bf16.msra.mxu1 %v18527_v58  ;;  %6332 = vmatpush1.bf16.msra.mxu0 %v18528_v60 }
 0x800   :  { %6292 = vmatprep.subr.bf16.mxu1 %v18529_v61  ;;  %6333 = vmatprep.subr.bf16.mxu0 %v18530_v62 }
 0x803   :  { %6293 = vmatpush1.bf16.msra.mxu1 %v18531_v4  ;;  %6334 = vmatpush1.bf16.msra.mxu0 %v18532_v6 }
 0x804   :  { %6294 = vmatprep.subr.bf16.mxu1 %v18533_v7  ;;  %6335 = vmatprep.subr.bf16.mxu0 %v18534_v8 }
 0x807   :  { %6295 = vmatpush1.bf16.msra.mxu1 %v18535_v13  ;;  %6336 = vmatpush1.bf16.msra.mxu0 %v18536_v16 }
 0x808   :  { %6296 = vmatprep.subr.bf16.mxu1 %v18537_v17  ;;  %6337 = vmatprep.subr.bf16.mxu0 %v18538_v19 }
 0x80b   :  { %6297 = vmatpush1.bf16.msra.mxu1 %v16404_v51  ;;  %6338 = vmatpush1.bf16.msra.mxu0 %v18539_v24 }
 0x80c   :  { %6298 = vmatprep.subr.bf16.mxu1 %v18540_v25  ;;  %6339 = vmatprep.subr.bf16.mxu0 %v18541_v26 }
 0x80f   :  { %6299 = vmatpush1.bf16.msra.mxu1 %v18542_v27  ;;  %6340 = vmatpush1.bf16.msra.mxu0 %v18543_v32  ;;  %v4329_v32 = vld [vmem:[#allocation3 + $0x1] ss:$8 sm:$0xf0] }
 0x810   :  { %6300 = vmatprep.subr.bf16.mxu1 %v18544_v35  ;;  %6341 = vmatprep.subr.bf16.mxu0 %v18545_v36  ;;  %v4333_v35 = vld [vmem:[#allocation3 + $0x41] ss:$8 sm:$0xf0] }
 0x813   :  { %6301 = vmatpush1.bf16.msra.mxu1 %v18546_v37  ;;  %6342 = vmatpush1.bf16.msra.mxu0 %v18547_v44 }
 0x814   :  { %6302 = vmatprep.subr.bf16.mxu1 %v18548_v46  ;;  %6343 = vmatprep.subr.bf16.mxu0 %v18549_v47  ;;  %v4328_v47 = vld [vmem:[#allocation3 + $0x1] ss:$8 sm:$0xf] }
 0x817   :  { %6303 = vmatpush1.bf16.msra.mxu1 %v18550_v48  ;;  %6344 = vmatpush1.bf16.msra.mxu0 %v18551_v55  ;;  %v4332_v48 = vld [vmem:[#allocation3 + $0x41] ss:$8 sm:$0xf]  ;;  %v4330_v55 = vor.u32 %v4329_v32, %v4328_v47 }
 0x818   :  { %6304 = vmatprep.subr.bf16.mxu1 %v18552_v56  ;;  %6345 = vmatprep.subr.bf16.mxu0 %v18553_v21  ;;  %v4334_v56 = vor.u32 %v4333_v35, %v4332_v48 }
 0x81b   :  { %6305 = vmatpush1.bf16.msra.mxu1 %v18554_v57  ;;  %6346 = vmatpush1.bf16.msra.mxu0 %v18555_v3 }
 0x81c   :  { %6356 = vmatprep.subr.bf16.mxu1 %v18556_v9  ;;  %6397 = vmatprep.subr.bf16.mxu0 %v18557_v10 }
 0x871   :  { %v5180_v11 = vpop.f32.mrb[24].mxu1  ;;  %v5221_v23 = vpop.f32.mrb[32].mxu0 }
 0x872   :  { %v5182_v31 = vpop.f32.mrb[25].mxu1  ;;  %v5223_v51 = vpop.f32.mrb[33].mxu0 }
 0x873   :  { %v5318_v49 = vcombine.low %v5180_v11, %v5182_v31  ;;  %v5319_v15 = vcombine.low %v5221_v23, %v5223_v51  ;;  %v5184_v29 = vpop.f32.mrb[26].mxu1  ;;  %v5225_v52 = vpop.f32.mrb[34].mxu0 }
 0x874   :  { %v5185_v18 = vpop.f32.mrb[27].mxu1  ;;  %v5226_v33 = vpop.f32.mrb[35].mxu0 }
 0x875   :  { %v5328_v43 = vrot.slane %v5318_v49, %v18558_v59  ;;  %v5335_v53 = vrot.slane %v5319_v15, %v18558_v59 }
 0x877   :  { %v5350_v58 = vcombine.low %v5328_v43, %v5335_v53  ;;  %v5351_v60 = vcombine.high %v5328_v43, %v5335_v53 }
 0x879   :  { %v5360_v36 = vrot.slane %v5350_v58, %v18558_v59  ;;  %v5367_v37 = vrot.slane %v5351_v60, %v18558_v59 }
 0x8b1   :  { %v5262_v61 = vpop.f32.mrb[28].mxu1  ;;  %v5303_v62 = vpop.f32.mrb[36].mxu0 }
 0x8b2   :  { %v5264_v4 = vpop.f32.mrb[29].mxu1  ;;  %v5305_v6 = vpop.f32.mrb[37].mxu0 }
 0x8b3   :  { %v5320_v7 = vcombine.low %v5262_v61, %v5264_v4  ;;  %v5321_v8 = vcombine.low %v5303_v62, %v5305_v6  ;;  %v5266_v13 = vpop.f32.mrb[30].mxu1  ;;  %v5307_v16 = vpop.f32.mrb[38].mxu0 }
 0x8b4   :  { %v5267_v17 = vpop.f32.mrb[31].mxu1  ;;  %v5308_v19 = vpop.f32.mrb[39].mxu0 }
 0x8b5   :  { %v5342_v24 = vrot.slane %v5320_v7, %v18558_v59  ;;  %v5349_v25 = vrot.slane %v5321_v8, %v18558_v59 }
 0x8b7   :  { %v5352_v26 = vcombine.low %v5342_v24, %v5349_v25  ;;  %v5353_v27 = vcombine.high %v5342_v24, %v5349_v25 }
 0x8b9   :  { %v5374_v44 = vrot.slane %v5352_v26, %v18558_v59  ;;  %v5381_v46 = vrot.slane %v5353_v27, %v18558_v59 }
 0x8bb   :  { %v5382_v21 = vcombine.low %v5360_v36, %v5374_v44  ;;  %v5383_v57 = vcombine.low %v5367_v37, %v5381_v46 }
 0x8bd   :  { %v5386_v3 = vadd.f32 %v5382_v21, %v4330_v55  ;;  %v5387_v9 = vadd.f32 %v5383_v57, %v4334_v56 }
 0x8bf   :  { %v13717_v10 = vmul.f32 -1.442695, %v5386_v3  ;;  %v13718_v11 = vmul.f32 -1.442695, %v5387_v9  ;;  %v5402_v23 = vrot.slane %v5386_v3, 2  ;;  %v5403_v31 = vrot.slane %v5387_v9, 2 }
 0x8c0   :  { %v5424_v15 = vrot.slane %v5386_v3, 6  ;;  %v5425_v29 = vrot.slane %v5387_v9, 6  ;;  %v5418_v52 = vrot.slane %v5386_v3, 4  ;;  %v5419_v18 = vrot.slane %v5387_v9, 4 }
 0x8c1   :  { %15204 = vpow2.f32 %v13717_v10  ;;  %v13719_v51 = vmul.f32 -1.442695, %v5402_v23  ;;  %v13720_v49 = vmul.f32 -1.442695, %v5403_v31 }
 0x8c2   :  { %15206 = vpow2.f32 %v13718_v11  ;;  %v13721_v33 = vmul.f32 -1.442695, %v5424_v15  ;;  %v13722_v43 = vmul.f32 -1.442695, %v5425_v29 }
 0x8c3   :  { %15208 = vpow2.f32 %v13719_v51 }
 0x8c4   :  { %15210 = vpow2.f32 %v13720_v49 }
 0x8c5   :  { %15212 = vtanh.f32 %v5418_v52 }
 0x8c6   :  { %15214 = vtanh.f32 %v5419_v18 }
 0x8c7   :  { %15216 = vpow2.f32 %v13721_v33 }
 0x8c8   :  { %15218 = vpow2.f32 %v13722_v43 }
 0x8cb   :  { %v15205_v53 = vpop.eup %15204 }
 0x8cc   :  { %v15207_v58 = vpop.eup %15206  ;;  %v5394_v60 = vadd.f32 1.0, %v15205_v53 }
 0x8cd   :  { %v15209_v61 = vpop.eup %15208  ;;  %v5395_v62 = vadd.f32 1.0, %v15207_v58 }
 0x8ce   :  { %v15211_v4 = vpop.eup %15210  ;;  %15220 = vrcp.f32 %v5394_v60  ;;  %v5412_v6 = vadd.f32 1.0, %v15209_v61  ;;  %v18559_v61 = vld [vmem:[#allocation71_spill] sm:$0xff] }
 0x8cf   :  { %15222 = vrcp.f32 %v5395_v62  ;;  %v5413_v7 = vadd.f32 1.0, %v15211_v4  ;;  %v15213_v8 = vpop.eup %15212  ;;  %v18560_v62 = vld [vmem:[#allocation72_spill] sm:$0xff]  ;;  %v18561_v4 = vld [vmem:[#allocation73_spill] sm:$0xff] }
 0x8d0   :  { %15224 = vrcp.f32 %v5412_v6  ;;  %v15215_v13 = vpop.eup %15214  ;;  %v18562_v6 = vld [vmem:[#allocation74_spill] sm:$0xff] }
 0x8d1   :  { %15226 = vrcp.f32 %v5413_v7  ;;  %v15217_v16 = vpop.eup %15216  ;;  %v18563_v7 = vld [vmem:[#allocation75_spill] sm:$0xff] }
 0x8d2   :  { %v15219_v17 = vpop.eup %15218  ;;  %v5434_v25 = vadd.f32 1.0, %v15217_v16  ;;  %v18568_v16 = vld [vmem:[#allocation80_spill] sm:$0xff] }
 0x8d3   :  { %v5435_v27 = vadd.f32 1.0, %v15219_v17  ;;  %v18570_v17 = vld [vmem:[#allocation82_spill] sm:$0xff] }
 0x8d4   :  { %15228 = vrcp.f32 %v5434_v25  ;;  %v18573_v25 = vld [vmem:[#allocation85_spill] sm:$0xff] }
 0x8d5   :  { %15230 = vrcp.f32 %v5435_v27  ;;  %v18575_v27 = vld [vmem:[#allocation87_spill] sm:$0xff] }
 0x8d8   :  { %v15221_v19 = vpop.eup %15220 }
 0x8d9   :  { %v15223_v24 = vpop.eup %15222  ;;  %v5442_v35 = vmul.f32 %v15221_v19, %v15213_v8  ;;  %v18564_v8 = vld [vmem:[#allocation76_spill] sm:$0xff]  ;;  %v18571_v19 = vld [vmem:[#allocation83_spill] sm:$0xff] }
 0x8da   :  { %v15225_v26 = vpop.eup %15224  ;;  %v5443_v37 = vmul.f32 %v15223_v24, %v15215_v13  ;;  %v18565_v13 = vld [vmem:[#allocation77_spill] sm:$0xff]  ;;  %v18572_v24 = vld [vmem:[#allocation84_spill] sm:$0xff] }
 0x8db   :  { %v15227_v32 = vpop.eup %15226  ;;  %v5440_v36 = vmul.f32 %v15225_v26, %v16488_v20  ;;  %v18574_v26 = vld [vmem:[#allocation86_spill] sm:$0xff] }
 0x8dc   :  { %v5441_v44 = vmul.f32 %v15227_v32, %v16490_v12  ;;  %v18576_v32 = vld [vmem:[#allocation88_spill] sm:$0xff] }
 0x8dd   :  { %v16768_v46 = vadd.f32 %v5442_v35, %v5440_v36  ;;  %v18577_v35 = vld [vmem:[#allocation89_spill] sm:$0xff]  ;;  %v18578_v36 = vld [vmem:[#allocation90_spill] sm:$0xff] }
 0x8de   :  { %v16770_v47 = vadd.f32 %v5443_v37, %v5441_v44  ;;  %v15229_v48 = vpop.eup %15228  ;;  %v18579_v37 = vld [vmem:[#allocation91_spill] sm:$0xff]  ;;  %v18580_v44 = vld [vmem:[#allocation92_spill] sm:$0xff] }
 0x8df   :  { %15232 = vtanh.f32 %v16768_v46  ;;  %v15231_v55 = vpop.eup %15230 }
 0x8e0   :  { %15234 = vtanh.f32 %v16770_v47 }
 0x8e9   :  { %v15233_v56 = vpop.eup %15232 }
 0x8ea   :  { %v15235_v21 = vpop.eup %15234  ;;  %v5448_v57 = vmul.f32 %v15233_v56, %v15229_v48  ;;  %v18581_v48 = vld [vmem:[#allocation93_spill] sm:$0xff]  ;;  %v18583_v56 = vld [vmem:[#allocation95_spill] sm:$0xff] }
 0x8eb   :  { %v5449_v3 = vmul.f32 %v15235_v21, %v15231_v55  ;;  %v18582_v55 = vld [vmem:[#allocation94_spill] sm:$0xff]  ;;  %v18584_v21 = vld [vmem:[#allocation96_spill] sm:$0xff] }
 0x8ec   :  { %5451 = vst.msk [vmem:[#allocation4 + $0x1] ss:$8 sm:$0x3] %vm16143_vm1, %v5448_v57  ;;  %v5473_v20 = vrot.slane %v5448_v57, %v16192_v40  ;;  %v5469_v12 = vrot.slane %v5448_v57, %v16189_v39  ;;  %v18585_v57 = vld [vmem:[#allocation97_spill] sm:$0xff] }
 0x8ed   :  { %5454 = vst.msk [vmem:[#allocation4 + $0x11] ss:$8 sm:$0x3] %vm16143_vm1, %v5449_v3  ;;  %v5481_v9 = vrot.slane %v5449_v3, %v16192_v40  ;;  %v5477_v10 = vrot.slane %v5449_v3, %v16189_v39  ;;  %v18586_v3 = vld [vmem:[#allocation98_spill] sm:$0xff] }
 0x8ee   :  { %v5487_v11 = vpack.c.bf16 %v5473_v20, %v5473_v20  ;;  %v5486_v31 = vpack.c.bf16 %v5469_v12, %v5469_v12  ;;  %v18587_v20 = vld [vmem:[#allocation99_spill] sm:$0xff]  ;;  %v18588_v12 = vld [vmem:[#allocation100_spill] sm:$0xff] }
 0x8ef   :  { %v5489_v23 = vpack.c.bf16 %v5481_v9, %v5481_v9  ;;  %v5488_v51 = vpack.c.bf16 %v5477_v10, %v5477_v10  ;;  %v18589_v9 = vld [vmem:[#allocation101_spill] sm:$0xff]  ;;  %v18590_v10 = vld [vmem:[#allocation102_spill] sm:$0xff] }
 0x8f0   :  { %v5623_v29 = vunpack.c.l.b16 %v5487_v11  ;;  %v5622_v18 = vunpack.c.l.b16 %v5486_v31  ;;  %v18591_v11 = vld [vmem:[#allocation103_spill] sm:$0xff]  ;;  %v18593_v31 = vld [vmem:[#allocation105_spill] sm:$0xff] }
 0x8f1   :  { %v5625_v49 = vunpack.c.l.b16 %v5489_v23  ;;  %v5624_v15 = vunpack.c.l.b16 %v5488_v51  ;;  %v18592_v23 = vld [vmem:[#allocation104_spill] sm:$0xff]  ;;  %v18594_v51 = vld [vmem:[#allocation106_spill] sm:$0xff] }
 0x8f3   :  { %v5628_v52 = vrot.slane %v5625_v49, 7  ;;  %v5626_v33 = vrot.slane %v5624_v15, 7  ;;  %v18595_v49 = vld [vmem:[#allocation107_spill] sm:$0xff]  ;;  %v18596_v15 = vld [vmem:[#allocation108_spill] sm:$0xff] }
 0x8f5   :  { %v5629_v43 = vsel %vm4498_vm3, %v5628_v52, %v5623_v29  ;;  %v5627_v53 = vsel %vm4498_vm3, %v5626_v33, %v5622_v18  ;;  %v18597_v29 = vld [vmem:[#allocation109_spill] sm:$0xff]  ;;  %v18598_v52 = vld [vmem:[#allocation110_spill] sm:$0xff]  ;;  %v18599_v18 = vld [vmem:[#allocation111_spill] sm:$0xff] }
 0x8f6   :  { %v5631_v58 = vpack.c.b16 %v5629_v43, %v5629_v43  ;;  %v16784_v60 = vpack.c.b16 %v5627_v53, %v5627_v53  ;;  %v18600_v33 = vld [vmem:[#allocation112_spill] sm:$0xff]  ;;  %v18601_v43 = vld [vmem:[#allocation113_spill] sm:$0xff]  ;;  %v18602_v53 = vld [vmem:[#allocation114_spill] sm:$0xff] }
 0x8f8   :  { %6306 = vmatprep.mubr.bf16.mxu1 %v5631_v58  ;;  %6347 = vmatprep.mubr.bf16.mxu0 %v5631_v58 }
 0x8f9   :  { %6307 = vmatmul.mubr.bf16.vlgmr.msra.gmra.mrb[32].mxu1 %v16784_v60  ;;  %6348 = vmatmul.mubr.bf16.vlgmr.msra.gmra.mrb[40].mxu0 %v16784_v60 }
 0x8fa   :  { %6357 = vmatpush1.bf16.msra.mxu1 %v16468_v1  ;;  %6398 = vmatpush1.bf16.msra.mxu0 %v16473_v63  ;;  %v18566_v1 = vld [vmem:[#allocation78_spill] sm:$0xff]  ;;  %v18567_v63 = vld [vmem:[#allocation79_spill] sm:$0xff] }
 0x8fb   :  { %6388 = vmatprep.mubr.bf16.mxu1 %v5631_v58  ;;  %6429 = vmatprep.mubr.bf16.mxu0 %v5631_v58  ;;  %v18603_v58 = vld [vmem:[#allocation115_spill] sm:$0xff] }
 0x8fc   :  { %6358 = vmatprep.subr.bf16.mxu1 %v16506_v34  ;;  %6399 = vmatprep.subr.bf16.mxu0 %v18559_v61  ;;  %v18569_v34 = vld [vmem:[#allocation81_spill] sm:$0xff]  ;;  %v18604_v61 = vld [vmem:[#allocation116_spill] sm:$0xff] }
 0x8fe   :  { %6359 = vmatpush1.bf16.msra.mxu1 %v18560_v62  ;;  %6400 = vmatpush1.bf16.msra.mxu0 %v18561_v4  ;;  %v18605_v62 = vld [vmem:[#allocation117_spill] sm:$0xff] }
 0x8ff   :  { %6360 = vmatprep.subr.bf16.mxu1 %v18562_v6  ;;  %6401 = vmatprep.subr.bf16.mxu0 %v18563_v7 }
 0x902   :  { %6361 = vmatpush1.bf16.msra.mxu1 %v18564_v8  ;;  %6402 = vmatpush1.bf16.msra.mxu0 %v18565_v13  ;;  %v6634_v8 = vld [vmem:[#allocation20 + $0x80] sm:$0xff] }
 0x903   :  { %6362 = vmatprep.subr.bf16.mxu1 %v18566_v1  ;;  %6403 = vmatprep.subr.bf16.mxu0 %v18567_v63  ;;  %v6638_v13 = vld [vmem:[#allocation20 + $0xa0] sm:$0xff]  ;;  %v6635_v1 = vld [vmem:[#allocation20 + $0x88] sm:$0xff] }
 0x904   :  { %v16876_v63 = vcombine.high %v6634_v8, %v6638_v13 }
 0x906   :  { %6363 = vmatpush1.bf16.msra.mxu1 %v18568_v16  ;;  %6404 = vmatpush1.bf16.msra.mxu0 %v18569_v34  ;;  %v6639_v16 = vld [vmem:[#allocation20 + $0xa8] sm:$0xff]  ;;  %v16878_v34 = vcombine.low %v6634_v8, %v6638_v13 }
 0x907   :  { %6364 = vmatprep.subr.bf16.mxu1 %v18570_v17  ;;  %6405 = vmatprep.subr.bf16.mxu0 %v18571_v19  ;;  %v16880_v17 = vcombine.low %v6635_v1, %v6639_v16  ;;  %v16882_v19 = vcombine.high %v6635_v1, %v6639_v16  ;;  %v6683_v8 = vld [vmem:[#allocation20 + $0x208] sm:$0xff] }
 0x908   :  { %v6687_v16 = vld [vmem:[#allocation20 + $0x228] sm:$0xff] }
 0x90a   :  { %6365 = vmatpush1.bf16.msra.mxu1 %v18572_v24  ;;  %6406 = vmatpush1.bf16.msra.mxu0 %v18573_v25  ;;  %v6642_v24 = vld [vmem:[#allocation20 + $0xc0] sm:$0xff] }
 0x90b   :  { %6366 = vmatprep.subr.bf16.mxu1 %v18574_v26  ;;  %6407 = vmatprep.subr.bf16.mxu0 %v18575_v27  ;;  %v6646_v25 = vld [vmem:[#allocation20 + $0xe0] sm:$0xff]  ;;  %v6643_v26 = vld [vmem:[#allocation20 + $0xc8] sm:$0xff] }
 0x90c   :  { %v16888_v27 = vcombine.high %v6642_v24, %v6646_v25 }
 0x90e   :  { %6367 = vmatpush1.bf16.msra.mxu1 %v18576_v32  ;;  %6408 = vmatpush1.bf16.msra.mxu0 %v18577_v35  ;;  %v6647_v32 = vld [vmem:[#allocation20 + $0xe8] sm:$0xff]  ;;  %v16890_v35 = vcombine.low %v6642_v24, %v6646_v25  ;;  %v6690_v24 = vld [vmem:[#allocation20 + $0x240] sm:$0xff] }
 0x90f   :  { %6368 = vmatprep.subr.bf16.mxu1 %v18578_v36  ;;  %6409 = vmatprep.subr.bf16.mxu0 %v18579_v37  ;;  %v16892_v36 = vcombine.low %v6643_v26, %v6647_v32  ;;  %v16894_v37 = vcombine.high %v6643_v26, %v6647_v32  ;;  %v6694_v25 = vld [vmem:[#allocation20 + $0x260] sm:$0xff]  ;;  %v16952_v26 = vcombine.low %v6683_v8, %v6687_v16 }
 0x910   :  { %v16954_v32 = vcombine.high %v6683_v8, %v6687_v16 }
 0x911   :  { %18607 = vst [vmem:[#allocation40_spill] sm:$0xff] %v16952_v26 }
 0x912   :  { %6369 = vmatpush1.bf16.msra.mxu1 %v18580_v44  ;;  %6410 = vmatpush1.bf16.msra.mxu0 %v18581_v48  ;;  %v6650_v44 = vld [vmem:[#allocation20 + $0x100] sm:$0xff]  ;;  %18608 = vst [vmem:[#allocation42_spill] sm:$0xff] %v16954_v32 }
 0x913   :  { %6370 = vmatprep.subr.bf16.mxu1 %v18582_v55  ;;  %6411 = vmatprep.subr.bf16.mxu0 %v18583_v56  ;;  %v6654_v48 = vld [vmem:[#allocation20 + $0x120] sm:$0xff]  ;;  %v6651_v55 = vld [vmem:[#allocation20 + $0x108] sm:$0xff] }
 0x914   :  { %v16900_v56 = vcombine.high %v6650_v44, %v6654_v48 }
 0x916   :  { %6371 = vmatpush1.bf16.msra.mxu1 %v18584_v21  ;;  %6412 = vmatpush1.bf16.msra.mxu0 %v18585_v57  ;;  %v6655_v21 = vld [vmem:[#allocation20 + $0x128] sm:$0xff]  ;;  %v16902_v57 = vcombine.low %v6650_v44, %v6654_v48  ;;  %v16956_v44 = vcombine.high %v6690_v24, %v6694_v25 }
 0x917   :  { %6372 = vmatprep.subr.bf16.mxu1 %v18586_v3  ;;  %6413 = vmatprep.subr.bf16.mxu0 %v18587_v20  ;;  %v16904_v3 = vcombine.low %v6651_v55, %v6655_v21  ;;  %v16906_v20 = vcombine.high %v6651_v55, %v6655_v21  ;;  %v6691_v48 = vld [vmem:[#allocation20 + $0x248] sm:$0xff]  ;;  %v6698_v21 = vld [vmem:[#allocation20 + $0x280] sm:$0xff] }
 0x918   :  { %18609 = vst [vmem:[#allocation44_spill] sm:$0xff] %v16956_v44  ;;  %v6695_v55 = vld [vmem:[#allocation20 + $0x268] sm:$0xff] }
 0x91a   :  { %6373 = vmatpush1.bf16.msra.mxu1 %v18588_v12  ;;  %6414 = vmatpush1.bf16.msra.mxu0 %v18589_v9  ;;  %v6658_v12 = vld [vmem:[#allocation20 + $0x140] sm:$0xff] }
 0x91b   :  { %6374 = vmatprep.subr.bf16.mxu1 %v18590_v10  ;;  %6415 = vmatprep.subr.bf16.mxu0 %v18591_v11  ;;  %v6662_v9 = vld [vmem:[#allocation20 + $0x160] sm:$0xff]  ;;  %v6659_v10 = vld [vmem:[#allocation20 + $0x148] sm:$0xff] }
 0x91c   :  { %v16912_v11 = vcombine.high %v6658_v12, %v6662_v9 }
 0x91e   :  { %6375 = vmatpush1.bf16.msra.mxu1 %v18592_v23  ;;  %6416 = vmatpush1.bf16.msra.mxu0 %v18593_v31  ;;  %v6663_v23 = vld [vmem:[#allocation20 + $0x168] sm:$0xff]  ;;  %v16914_v31 = vcombine.low %v6658_v12, %v6662_v9  ;;  %v16959_v12 = vcombine.high %v6691_v48, %v6695_v55  ;;  %v6702_v9 = vld [vmem:[#allocation20 + $0x2a0] sm:$0xff] }
 0x91f   :  { %6376 = vmatprep.subr.bf16.mxu1 %v18594_v51  ;;  %6417 = vmatprep.subr.bf16.mxu0 %v18595_v49  ;;  %v16916_v51 = vcombine.low %v6659_v10, %v6663_v23  ;;  %v16918_v49 = vcombine.high %v6659_v10, %v6663_v23  ;;  %v6699_v10 = vld [vmem:[#allocation20 + $0x288] sm:$0xff] }
 0x920   :  { %18610 = vst [vmem:[#allocation41_spill] sm:$0xff] %v16959_v12  ;;  %v6703_v23 = vld [vmem:[#allocation20 + $0x2a8] sm:$0xff] }
 0x922   :  { %6377 = vmatpush1.bf16.msra.mxu1 %v18596_v15  ;;  %6418 = vmatpush1.bf16.msra.mxu0 %v18597_v29  ;;  %v6666_v15 = vld [vmem:[#allocation20 + $0x180] sm:$0xff] }
 0x923   :  { %6378 = vmatprep.subr.bf16.mxu1 %v18598_v52  ;;  %6419 = vmatprep.subr.bf16.mxu0 %v18599_v18  ;;  %v6670_v29 = vld [vmem:[#allocation20 + $0x1a0] sm:$0xff]  ;;  %v6667_v52 = vld [vmem:[#allocation20 + $0x188] sm:$0xff] }
 0x924   :  { %v16924_v18 = vcombine.high %v6666_v15, %v6670_v29 }
 0x926   :  { %6379 = vmatpush1.bf16.msra.mxu1 %v18600_v33  ;;  %6420 = vmatpush1.bf16.msra.mxu0 %v18601_v43  ;;  %v6671_v33 = vld [vmem:[#allocation20 + $0x1a8] sm:$0xff]  ;;  %v16926_v43 = vcombine.low %v6666_v15, %v6670_v29  ;;  %v16963_v15 = vcombine.low %v6690_v24, %v6694_v25  ;;  %v16967_v29 = vcombine.low %v6691_v48, %v6695_v55  ;;  %v6714_v24 = vld [vmem:[#allocation20 + $0x300] sm:$0xff] }
 0x927   :  { %6380 = vmatprep.subr.bf16.mxu1 %v18602_v53  ;;  %6421 = vmatprep.subr.bf16.mxu0 %v18603_v58  ;;  %v16928_v53 = vcombine.low %v6667_v52, %v6671_v33  ;;  %v16930_v58 = vcombine.high %v6667_v52, %v6671_v33  ;;  %v16969_v52 = vcombine.high %v6698_v21, %v6702_v9  ;;  %v6718_v25 = vld [vmem:[#allocation20 + $0x320] sm:$0xff]  ;;  %v6715_v48 = vld [vmem:[#allocation20 + $0x308] sm:$0xff] }
 0x928   :  { %18611 = vst [vmem:[#allocation43_spill] sm:$0xff] %v16963_v15  ;;  %18612 = vst [vmem:[#allocation45_spill] sm:$0xff] %v16967_v29  ;;  %v16972_v33 = vcombine.high %v6699_v10, %v6703_v23  ;;  %v6719_v55 = vld [vmem:[#allocation20 + $0x328] sm:$0xff] }
 0x929   :  { %18613 = vst [vmem:[#allocation46_spill] sm:$0xff] %v16969_v52 }
 0x92a   :  { %6381 = vmatpush1.bf16.msra.mxu1 %v16646_v30  ;;  %6422 = vmatpush1.bf16.msra.mxu0 %v16648_v22  ;;  %v6618_v30 = vld [vmem:[#allocation20] sm:$0xff]  ;;  %18614 = vst [vmem:[#allocation47_spill] sm:$0xff] %v16972_v33 }
 0x92b   :  { %6382 = vmatprep.subr.bf16.mxu1 %v16652_v14  ;;  %6423 = vmatprep.subr.bf16.mxu0 %v18604_v61  ;;  %v6622_v22 = vld [vmem:[#allocation20 + $0x20] sm:$0xff]  ;;  %v6619_v14 = vld [vmem:[#allocation20 + $0x8] sm:$0xff] }
 0x92c   :  { %v6674_v61 = vld [vmem:[#allocation20 + $0x1c0] sm:$0xff] }
 0x92e   :  { %6383 = vmatpush1.bf16.msra.mxu1 %v18605_v62  ;;  %6424 = vmatpush1.bf16.msra.mxu0 %v16660_v54  ;;  %v16852_v54 = vcombine.high %v6618_v30, %v6622_v22  ;;  %v6678_v62 = vld [vmem:[#allocation20 + $0x1e0] sm:$0xff] }
 0x92f   :  { %6384 = vmatprep.subr.bf16.mxu1 %v16664_v45  ;;  %6425 = vmatprep.subr.bf16.mxu0 %v16666_v28  ;;  %v6623_v45 = vld [vmem:[#allocation20 + $0x28] sm:$0xff]  ;;  %v16854_v28 = vcombine.low %v6618_v30, %v6622_v22  ;;  %v16936_v22 = vcombine.high %v6674_v61, %v6678_v62 }
 0x930   :  { %v6675_v30 = vld [vmem:[#allocation20 + $0x1c8] sm:$0xff] }
 0x932   :  { %6385 = vmatpush1.bf16.msra.mxu1 %v16670_v50  ;;  %6426 = vmatpush1.bf16.msra.mxu0 %v16672_v38  ;;  %v16856_v50 = vcombine.low %v6619_v14, %v6623_v45  ;;  %v16858_v38 = vcombine.high %v6619_v14, %v6623_v45  ;;  %v6679_v14 = vld [vmem:[#allocation20 + $0x1e8] sm:$0xff]  ;;  %v16938_v45 = vcombine.low %v6674_v61, %v6678_v62  ;;  %v6706_v61 = vld [vmem:[#allocation20 + $0x2c0] sm:$0xff] }
 0x933   :  { %6386 = vmatprep.subr.bf16.mxu1 %v16676_v42  ;;  %6427 = vmatprep.subr.bf16.mxu0 %v16678_v0  ;;  %v6627_v42 = vld [vmem:[#allocation20 + $0x48] sm:$0xff]  ;;  %v6710_v62 = vld [vmem:[#allocation20 + $0x2e0] sm:$0xff] }
 0x934   :  { %v16981_v8 = vcombine.high %v6706_v61, %v6710_v62 }
 0x936   :  { %6387 = vmatpush1.bf16.msra.mxu1 %v16682_v41  ;;  %6428 = vmatpush1.bf16.msra.mxu0 %v16684_v5  ;;  %v6626_v41 = vld [vmem:[#allocation20 + $0x40] sm:$0xff]  ;;  %18617 = vst [vmem:[#allocation50_spill] sm:$0xff] %v16981_v8 }
 0x937   :  { %7402 = vmatprep.subr.bf16.mxu1 %v16852_v54  ;;  %7443 = vmatprep.subr.bf16.mxu0 %v16858_v38  ;;  %v6630_v5 = vld [vmem:[#allocation20 + $0x60] sm:$0xff] }
 0x938   :  { %v16864_v0 = vcombine.high %v6626_v41, %v6630_v5  ;;  %v16866_v4 = vcombine.low %v6626_v41, %v6630_v5  ;;  %v16940_v41 = vcombine.low %v6675_v30, %v6679_v14  ;;  %v16942_v5 = vcombine.high %v6675_v30, %v6679_v14  ;;  %v6707_v30 = vld [vmem:[#allocation20 + $0x2c8] sm:$0xff] }
 0x939   :  { %6389 = vmatmul.mubr.bf16.vlgmr.msra.gmra.mrb[36].mxu1 %v16784_v60  ;;  %6430 = vmatmul.mubr.bf16.vlgmr.msra.gmra.mrb[44].mxu0 %v16784_v60  ;;  %v6631_v60 = vld [vmem:[#allocation20 + $0x68] sm:$0xff] }
 0x93a   :  { %7403 = vmatpush1.bf16.msra.mxu1 %v16854_v28  ;;  %7444 = vmatpush1.bf16.msra.mxu0 %v16856_v50  ;;  %v16868_v6 = vcombine.low %v6627_v42, %v6631_v60  ;;  %v16870_v7 = vcombine.high %v6627_v42, %v6631_v60  ;;  %v6682_v42 = vld [vmem:[#allocation20 + $0x200] sm:$0xff]  ;;  %v6711_v14 = vld [vmem:[#allocation20 + $0x2e8] sm:$0xff] }
 0x93b   :  { %7404 = vmatprep.subr.bf16.mxu1 %v16864_v0  ;;  %v6686_v60 = vld [vmem:[#allocation20 + $0x220] sm:$0xff]  ;;  %v16984_v16 = vcombine.high %v6707_v30, %v6711_v14 }
 0x93c   :  { %7445 = vmatprep.subr.bf16.mxu0 %v16870_v7  ;;  %v16948_v13 = vcombine.low %v6682_v42, %v6686_v60  ;;  %v16950_v1 = vcombine.high %v6682_v42, %v6686_v60  ;;  %v16975_v42 = vcombine.low %v6698_v21, %v6702_v9  ;;  %v16979_v60 = vcombine.low %v6699_v10, %v6703_v23 }
 0x93d   :  { %18618 = vst [vmem:[#allocation51_spill] sm:$0xff] %v16984_v16  ;;  %v16987_v21 = vcombine.low %v6706_v61, %v6710_v62  ;;  %v16991_v9 = vcombine.low %v6707_v30, %v6711_v14  ;;  %v16993_v10 = vcombine.high %v6714_v24, %v6718_v25  ;;  %v16996_v23 = vcombine.high %v6715_v48, %v6719_v55 }
 0x93e   :  { %7405 = vmatpush1.bf16.msra.mxu1 %v16866_v4  ;;  %7446 = vmatpush1.bf16.msra.mxu0 %v16868_v6  ;;  %18606 = vst [vmem:[#allocation39_spill] sm:$0xff] %v16948_v13  ;;  %18615 = vst [vmem:[#allocation48_spill] sm:$0xff] %v16975_v42  ;;  %v16999_v61 = vcombine.low %v6714_v24, %v6718_v25  ;;  %v17003_v62 = vcombine.low %v6715_v48, %v6719_v55 }
 0x93f   :  { %7406 = vmatprep.subr.bf16.mxu1 %v16876_v63  ;;  %7447 = vmatprep.subr.bf16.mxu0 %v16882_v19  ;;  %18616 = vst [vmem:[#allocation49_spill] sm:$0xff] %v16979_v60  ;;  %18619 = vst [vmem:[#allocation52_spill] sm:$0xff] %v16987_v21 }
 0x940   :  { %18620 = vst [vmem:[#allocation53_spill] sm:$0xff] %v16991_v9  ;;  %18621 = vst [vmem:[#allocation54_spill] sm:$0xff] %v16993_v10 }
 0x941   :  { %18622 = vst [vmem:[#allocation55_spill] sm:$0xff] %v16996_v23  ;;  %18623 = vst [vmem:[#allocation56_spill] sm:$0xff] %v16999_v61 }
 0x942   :  { %7407 = vmatpush1.bf16.msra.mxu1 %v16878_v34  ;;  %7448 = vmatpush1.bf16.msra.mxu0 %v16880_v17  ;;  %18624 = vst [vmem:[#allocation57_spill] sm:$0xff] %v17003_v62 }
 0x943   :  { %7408 = vmatprep.subr.bf16.mxu1 %v16888_v27  ;;  %7449 = vmatprep.subr.bf16.mxu0 %v16894_v37 }
 0x946   :  { %7409 = vmatpush1.bf16.msra.mxu1 %v16890_v35  ;;  %7450 = vmatpush1.bf16.msra.mxu0 %v16892_v36 }
 0x947   :  { %7410 = vmatprep.subr.bf16.mxu1 %v16900_v56  ;;  %7451 = vmatprep.subr.bf16.mxu0 %v16906_v20 }
 0x94a   :  { %7411 = vmatpush1.bf16.msra.mxu1 %v16902_v57  ;;  %7452 = vmatpush1.bf16.msra.mxu0 %v16904_v3 }
 0x94b   :  { %7412 = vmatprep.subr.bf16.mxu1 %v16912_v11  ;;  %7453 = vmatprep.subr.bf16.mxu0 %v16918_v49 }
 0x94e   :  { %7413 = vmatpush1.bf16.msra.mxu1 %v16914_v31  ;;  %7454 = vmatpush1.bf16.msra.mxu0 %v16916_v51 }
 0x94f   :  { %7414 = vmatprep.subr.bf16.mxu1 %v16924_v18  ;;  %7455 = vmatprep.subr.bf16.mxu0 %v16930_v58 }
 0x952   :  { %7415 = vmatpush1.bf16.msra.mxu1 %v16926_v43  ;;  %7456 = vmatpush1.bf16.msra.mxu0 %v16928_v53 }
 0x953   :  { %7416 = vmatprep.subr.bf16.mxu1 %v16936_v22  ;;  %7457 = vmatprep.subr.bf16.mxu0 %v16942_v5 }
 0x956   :  { %7417 = vmatpush1.bf16.msra.mxu1 %v16938_v45  ;;  %7458 = vmatpush1.bf16.msra.mxu0 %v16940_v41 }
 0x957   :  { %7418 = vmatprep.subr.bf16.mxu1 %v16950_v1  ;;  %7459 = vmatprep.subr.bf16.mxu0 %v16954_v32 }
 0x95a   :  { %7419 = vmatpush1.bf16.msra.mxu1 %v16948_v13  ;;  %7460 = vmatpush1.bf16.msra.mxu0 %v16952_v26 }
 0x95b   :  { %7420 = vmatprep.subr.bf16.mxu1 %v16956_v44  ;;  %7461 = vmatprep.subr.bf16.mxu0 %v16959_v12 }
 0x95e   :  { %7421 = vmatpush1.bf16.msra.mxu1 %v16963_v15  ;;  %7462 = vmatpush1.bf16.msra.mxu0 %v16967_v29  ;;  %v6723_v29 = vld [vmem:[#allocation20 + $0x348] sm:$0xff] }
 0x95f   :  { %7422 = vmatprep.subr.bf16.mxu1 %v16969_v52  ;;  %7463 = vmatprep.subr.bf16.mxu0 %v16972_v33  ;;  %v6722_v33 = vld [vmem:[#allocation20 + $0x340] sm:$0xff]  ;;  %v6727_v15 = vld [vmem:[#allocation20 + $0x368] sm:$0xff] }
 0x960   :  { %v6726_v52 = vld [vmem:[#allocation20 + $0x360] sm:$0xff]  ;;  %v17008_v14 = vcombine.high %v6723_v29, %v6727_v15  ;;  %v17015_v25 = vcombine.low %v6723_v29, %v6727_v15 }
 0x961   :  { %v17005_v30 = vcombine.high %v6722_v33, %v6726_v52  ;;  %v17011_v24 = vcombine.low %v6722_v33, %v6726_v52 }
 0x962   :  { %7423 = vmatpush1.bf16.msra.mxu1 %v16975_v42  ;;  %7464 = vmatpush1.bf16.msra.mxu0 %v16979_v60  ;;  %18626 = vst [vmem:[#allocation59_spill] sm:$0xff] %v17008_v14  ;;  %v6731_v60 = vld [vmem:[#allocation20 + $0x388] sm:$0xff]  ;;  %18628 = vst [vmem:[#allocation62_spill] sm:$0xff] %v17015_v25 }
 0x963   :  { %7424 = vmatprep.subr.bf16.mxu1 %v16981_v8  ;;  %7465 = vmatprep.subr.bf16.mxu0 %v16984_v16  ;;  %18625 = vst [vmem:[#allocation58_spill] sm:$0xff] %v17005_v30  ;;  %v6730_v16 = vld [vmem:[#allocation20 + $0x380] sm:$0xff]  ;;  %v6735_v42 = vld [vmem:[#allocation20 + $0x3a8] sm:$0xff]  ;;  %18627 = vst [vmem:[#allocation60_spill] sm:$0xff] %v17011_v24 }
 0x964   :  { %v6734_v8 = vld [vmem:[#allocation20 + $0x3a0] sm:$0xff]  ;;  %v17020_v55 = vcombine.high %v6731_v60, %v6735_v42  ;;  %v17027_v15 = vcombine.low %v6731_v60, %v6735_v42  ;;  %v6620_v60 = vld [vmem:[#allocation20 + $0x10] sm:$0xff] }
 0x965   :  { %v17017_v48 = vcombine.high %v6730_v16, %v6734_v8  ;;  %v17023_v52 = vcombine.low %v6730_v16, %v6734_v8 }
 0x966   :  { %7425 = vmatpush1.bf16.msra.mxu1 %v16987_v21  ;;  %7466 = vmatpush1.bf16.msra.mxu0 %v16991_v9  ;;  %18630 = vst [vmem:[#allocation64_spill] sm:$0xff] %v17020_v55  ;;  %v6739_v9 = vld [vmem:[#allocation20 + $0x3c8] sm:$0xff]  ;;  %18632 = vst [vmem:[#allocation66_spill] sm:$0xff] %v17027_v15 }
 0x967   :  { %7426 = vmatprep.subr.bf16.mxu1 %v16993_v10  ;;  %7467 = vmatprep.subr.bf16.mxu0 %v16996_v23  ;;  %18629 = vst [vmem:[#allocation63_spill] sm:$0xff] %v17017_v48  ;;  %v6738_v23 = vld [vmem:[#allocation20 + $0x3c0] sm:$0xff]  ;;  %v6743_v21 = vld [vmem:[#allocation20 + $0x3e8] sm:$0xff]  ;;  %18631 = vst [vmem:[#allocation65_spill] sm:$0xff] %v17023_v52 }
 0x968   :  { %v6742_v10 = vld [vmem:[#allocation20 + $0x3e0] sm:$0xff]  ;;  %v17032_v13 = vcombine.high %v6739_v9, %v6743_v21 }
 0x969   :  { %v17029_v29 = vcombine.high %v6738_v23, %v6742_v10  ;;  %v17037_v42 = vcombine.low %v6738_v23, %v6742_v10  ;;  %v6625_v10 = vld [vmem:[#allocation20 + $0x38] sm:$0xff] }
 0x96a   :  { %7427 = vmatpush1.bf16.msra.mxu1 %v16999_v61  ;;  %7468 = vmatpush1.bf16.msra.mxu0 %v17003_v62  ;;  %18634 = vst [vmem:[#allocation68_spill] sm:$0xff] %v17032_v13 }
 0x96b   :  { %7428 = vmatprep.subr.bf16.mxu1 %v17005_v30  ;;  %7469 = vmatprep.subr.bf16.mxu0 %v17008_v14  ;;  %18633 = vst [vmem:[#allocation67_spill] sm:$0xff] %v17029_v29  ;;  %18635 = vst [vmem:[#allocation69_spill] sm:$0xff] %v17037_v42 }
 0x96e   :  { %7429 = vmatpush1.bf16.msra.mxu1 %v17011_v24  ;;  %7470 = vmatpush1.bf16.msra.mxu0 %v17015_v25 }
 0x96f   :  { %7430 = vmatprep.subr.bf16.mxu1 %v17017_v48  ;;  %7471 = vmatprep.subr.bf16.mxu0 %v17020_v55 }
 0x972   :  { %7431 = vmatpush1.bf16.msra.mxu1 %v17023_v52  ;;  %7472 = vmatpush1.bf16.msra.mxu0 %v17027_v15  ;;  %v5458_v15 = vld [vmem:[#allocation3 + $0x2] ss:$8 sm:$0xf0] }
 0x973   :  { %7432 = vmatprep.subr.bf16.mxu1 %v17029_v29  ;;  %7473 = vmatprep.subr.bf16.mxu0 %v17032_v13 }
 0x976   :  { %7433 = vmatpush1.bf16.msra.mxu1 %v17037_v42 }
 0x9cc   :  { %v6308_v12 = vpop.f32.mrb[32].mxu1  ;;  %v6349_v61 = vpop.f32.mrb[40].mxu0 }
 0x9cd   :  { %v6310_v33 = vpop.f32.mrb[33].mxu1  ;;  %v6351_v30 = vpop.f32.mrb[41].mxu0 }
 0x9ce   :  { %v6446_v14 = vcombine.low %v6308_v12, %v6310_v33  ;;  %v6447_v62 = vcombine.low %v6349_v61, %v6351_v30  ;;  %v6312_v44 = vpop.f32.mrb[34].mxu1  ;;  %v6353_v26 = vpop.f32.mrb[42].mxu0  ;;  %v6624_v61 = vld [vmem:[#allocation20 + $0x30] sm:$0xff]  ;;  %v6621_v30 = vld [vmem:[#allocation20 + $0x18] sm:$0xff] }
 0x9cf   :  { %v6313_v8 = vpop.f32.mrb[35].mxu1  ;;  %v6354_v16 = vpop.f32.mrb[43].mxu0  ;;  %v17041_v44 = vcombine.low %v6739_v9, %v6743_v21  ;;  %v17050_v23 = vcombine.low %v6621_v30, %v6625_v10  ;;  %v17052_v21 = vcombine.high %v6621_v30, %v6625_v10 }
 0x9d0   :  { %v6456_v24 = vrot.slane %v6446_v14, %v18558_v59  ;;  %v6463_v25 = vrot.slane %v6447_v62, %v18558_v59  ;;  %v17045_v62 = vcombine.low %v6620_v60, %v6624_v61  ;;  %v17047_v14 = vcombine.high %v6620_v60, %v6624_v61 }
 0x9d1   :  { %18636 = vst [vmem:[#allocation70_spill] sm:$0xff] %v17041_v44  ;;  %7474 = vmatpush1.bf16.msra.mxu0 %v17041_v44  ;;  %18638 = vst [vmem:[#allocation72_spill] sm:$0xff] %v17052_v21 }
 0x9d2   :  { %v6478_v26 = vcombine.low %v6456_v24, %v6463_v25  ;;  %v6479_v12 = vcombine.high %v6456_v24, %v6463_v25  ;;  %18637 = vst [vmem:[#allocation71_spill] sm:$0xff] %v17047_v14  ;;  %7484 = vmatprep.subr.bf16.mxu1 %v17047_v14  ;;  %7525 = vmatprep.subr.bf16.mxu0 %v17052_v21  ;;  %v5462_v14 = vld [vmem:[#allocation3 + $0x42] ss:$8 sm:$0xf0] }
 0x9d4   :  { %v6488_v21 = vrot.slane %v6478_v26, %v18558_v59  ;;  %v6495_v52 = vrot.slane %v6479_v12, %v18558_v59 }
 0xa0c   :  { %v6390_v9 = vpop.f32.mrb[36].mxu1  ;;  %v6431_v24 = vpop.f32.mrb[44].mxu0 }
 0xa0d   :  { %v6392_v25 = vpop.f32.mrb[37].mxu1  ;;  %v6433_v33 = vpop.f32.mrb[45].mxu0 }
 0xa0e   :  { %v6448_v8 = vcombine.low %v6390_v9, %v6392_v25  ;;  %v6449_v16 = vcombine.low %v6431_v24, %v6433_v33  ;;  %v6394_v42 = vpop.f32.mrb[38].mxu1  ;;  %v6435_v60 = vpop.f32.mrb[46].mxu0  ;;  %v5461_v24 = vld [vmem:[#allocation3 + $0x42] ss:$8 sm:$0xf] }
 0xa0f   :  { %v6395_v61 = vpop.f32.mrb[39].mxu1  ;;  %v6436_v13 = vpop.f32.mrb[47].mxu0  ;;  %v5457_v42 = vld [vmem:[#allocation3 + $0x2] ss:$8 sm:$0xf] }
 0xa10   :  { %v6470_v44 = vrot.slane %v6448_v8, %v18558_v59  ;;  %v6477_v29 = vrot.slane %v6449_v16, %v18558_v59  ;;  %v5459_v25 = vor.u32 %v5458_v15, %v5457_v42  ;;  %v5463_v13 = vor.u32 %v5462_v14, %v5461_v24 }
 0xa12   :  { %v6480_v30 = vcombine.low %v6470_v44, %v6477_v29  ;;  %v6481_v10 = vcombine.high %v6470_v44, %v6477_v29 }
 0xa14   :  { %v6502_v55 = vrot.slane %v6480_v30, %v18558_v59  ;;  %v6509_v9 = vrot.slane %v6481_v10, %v18558_v59 }
 0xa16   :  { %v6510_v33 = vcombine.low %v6488_v21, %v6502_v55  ;;  %v6511_v8 = vcombine.low %v6495_v52, %v6509_v9 }
 0xa18   :  { %v6514_v60 = vadd.f32 %v6510_v33, %v5459_v25  ;;  %v6515_v16 = vadd.f32 %v6511_v8, %v5463_v13 }
 0xa1a   :  { %v13851_v61 = vmul.f32 -1.442695, %v6514_v60  ;;  %v13852_v29 = vmul.f32 -1.442695, %v6515_v16  ;;  %v6530_v44 = vrot.slane %v6514_v60, 2  ;;  %v6531_v48 = vrot.slane %v6515_v16, 2 }
 0xa1b   :  { %v6552_v12 = vrot.slane %v6514_v60, 6  ;;  %v6553_v30 = vrot.slane %v6515_v16, 6  ;;  %v6546_v10 = vrot.slane %v6514_v60, 4  ;;  %v6547_v59 = vrot.slane %v6515_v16, 4 }
 0xa1c   :  { %15236 = vpow2.f32 %v13851_v61  ;;  %v13853_v26 = vmul.f32 -1.442695, %v6530_v44  ;;  %v13854_v32 = vmul.f32 -1.442695, %v6531_v48 }
 0xa1d   :  { %15238 = vpow2.f32 %v13852_v29  ;;  %v13855_v15 = vmul.f32 -1.442695, %v6552_v12  ;;  %v13856_v14 = vmul.f32 -1.442695, %v6553_v30 }
 0xa1e   :  { %15240 = vpow2.f32 %v13853_v26 }
 0xa1f   :  { %15242 = vpow2.f32 %v13854_v32 }
 0xa20   :  { %15244 = vtanh.f32 %v6546_v10 }
 0xa21   :  { %15246 = vtanh.f32 %v6547_v59 }
 0xa22   :  { %15248 = vpow2.f32 %v13855_v15 }
 0xa23   :  { %15250 = vpow2.f32 %v13856_v14 }
 0xa26   :  { %v15237_v55 = vpop.eup %15236 }
 0xa27   :  { %v15239_v52 = vpop.eup %15238  ;;  %v6522_v21 = vadd.f32 1.0, %v15237_v55 }
 0xa28   :  { %v15241_v9 = vpop.eup %15240  ;;  %v6523_v42 = vadd.f32 1.0, %v15239_v52 }
 0xa29   :  { %v15243_v24 = vpop.eup %15242  ;;  %15252 = vrcp.f32 %v6522_v21  ;;  %v6540_v48 = vadd.f32 1.0, %v15241_v9 }
 0xa2a   :  { %15254 = vrcp.f32 %v6523_v42  ;;  %v6541_v32 = vadd.f32 1.0, %v15243_v24  ;;  %v15245_v25 = vpop.eup %15244 }
 0xa2b   :  { %15256 = vrcp.f32 %v6540_v48  ;;  %v15247_v13 = vpop.eup %15246 }
 0xa2c   :  { %15258 = vrcp.f32 %v6541_v32  ;;  %v15249_v33 = vpop.eup %15248 }
 0xa2d   :  { %v15251_v8 = vpop.eup %15250  ;;  %v6562_v59 = vadd.f32 1.0, %v15249_v33 }
 0xa2e   :  { %v6563_v29 = vadd.f32 1.0, %v15251_v8 }
 0xa2f   :  { %15260 = vrcp.f32 %v6562_v59 }
 0xa30   :  { %15262 = vrcp.f32 %v6563_v29 }
 0xa33   :  { %v15253_v60 = vpop.eup %15252 }
 0xa34   :  { %v15255_v16 = vpop.eup %15254  ;;  %v6570_v26 = vmul.f32 %v15253_v60, %v15245_v25 }
 0xa35   :  { %v15257_v61 = vpop.eup %15256  ;;  %v6571_v30 = vmul.f32 %v15255_v16, %v15247_v13 }
 0xa36   :  { %v15259_v44 = vpop.eup %15258  ;;  %v6568_v12 = vmul.f32 %v15257_v61, %v16768_v46 }
 0xa37   :  { %v6569_v10 = vmul.f32 %v15259_v44, %v16770_v47 }
 0xa38   :  { %v17064_v15 = vadd.f32 %v6570_v26, %v6568_v12  ;;  %v6628_v26 = vld [vmem:[#allocation20 + $0x50] sm:$0xff] }
 0xa39   :  { %v17066_v14 = vadd.f32 %v6571_v30, %v6569_v10  ;;  %v15261_v55 = vpop.eup %15260  ;;  %v6632_v10 = vld [vmem:[#allocation20 + $0x70] sm:$0xff] }
 0xa3a   :  { %15264 = vtanh.f32 %v17064_v15  ;;  %v15263_v52 = vpop.eup %15262 }
 0xa3b   :  { %15266 = vtanh.f32 %v17066_v14 }
 0xa44   :  { %v15265_v21 = vpop.eup %15264 }
 0xa45   :  { %v15267_v9 = vpop.eup %15266  ;;  %v6576_v42 = vmul.f32 %v15265_v21, %v15261_v55  ;;  %v6629_v55 = vld [vmem:[#allocation20 + $0x58] sm:$0xff] }
 0xa46   :  { %v6577_v24 = vmul.f32 %v15267_v9, %v15263_v52  ;;  %v6633_v52 = vld [vmem:[#allocation20 + $0x78] sm:$0xff] }
 0xa47   :  { %6579 = vst.msk [vmem:[#allocation4 + $0x2] ss:$8 sm:$0x3] %vm16143_vm1, %v6576_v42  ;;  %v6601_v46 = vrot.slane %v6576_v42, %v16192_v40  ;;  %v6597_v47 = vrot.slane %v6576_v42, %v16189_v39  ;;  %v6636_v42 = vld [vmem:[#allocation20 + $0x90] sm:$0xff] }
 0xa48   :  { %6582 = vst.msk [vmem:[#allocation4 + $0x12] ss:$8 sm:$0x3] %vm16143_vm1, %v6577_v24  ;;  %v6609_v48 = vrot.slane %v6577_v24, %v16192_v40  ;;  %v6605_v32 = vrot.slane %v6577_v24, %v16189_v39  ;;  %v17082_v24 = vcombine.high %v6628_v26, %v6632_v10 }
 0xa49   :  { %v6615_v25 = vpack.c.bf16 %v6601_v46, %v6601_v46  ;;  %v6614_v33 = vpack.c.bf16 %v6597_v47, %v6597_v47  ;;  %v17084_v46 = vcombine.high %v6629_v55, %v6633_v52  ;;  %v6640_v47 = vld [vmem:[#allocation20 + $0xb0] sm:$0xff] }
 0xa4a   :  { %v6617_v13 = vpack.c.bf16 %v6609_v48, %v6609_v48  ;;  %v6616_v8 = vpack.c.bf16 %v6605_v32, %v6605_v32  ;;  %v6637_v48 = vld [vmem:[#allocation20 + $0x98] sm:$0xff] }
 0xa4b   :  { %v6751_v59 = vunpack.c.l.b16 %v6615_v25  ;;  %v6750_v29 = vunpack.c.l.b16 %v6614_v33  ;;  %v6641_v32 = vld [vmem:[#allocation20 + $0xb8] sm:$0xff]  ;;  %v17090_v25 = vcombine.low %v6628_v26, %v6632_v10  ;;  %v17094_v33 = vcombine.high %v6636_v42, %v6640_v47  ;;  %v6656_v10 = vld [vmem:[#allocation20 + $0x130] sm:$0xff] }
 0xa4c   :  { %v6753_v60 = vunpack.c.l.b16 %v6617_v13  ;;  %v6752_v16 = vunpack.c.l.b16 %v6616_v8  ;;  %v17092_v13 = vcombine.low %v6629_v55, %v6633_v52  ;;  %v17096_v8 = vcombine.high %v6637_v48, %v6641_v32  ;;  %v6653_v55 = vld [vmem:[#allocation20 + $0x118] sm:$0xff] }
 0xa4d   :  { %18640 = vst [vmem:[#allocation74_spill] sm:$0xff] %v17094_v33  ;;  %v6657_v52 = vld [vmem:[#allocation20 + $0x138] sm:$0xff] }
 0xa4e   :  { %v6756_v61 = vrot.slane %v6753_v60, 7  ;;  %v6754_v44 = vrot.slane %v6752_v16, 7  ;;  %18639 = vst [vmem:[#allocation73_spill] sm:$0xff] %v17092_v13  ;;  %18641 = vst [vmem:[#allocation75_spill] sm:$0xff] %v17096_v8  ;;  %v6644_v60 = vld [vmem:[#allocation20 + $0xd0] sm:$0xff] }
 0xa4f   :  { %v6648_v16 = vld [vmem:[#allocation20 + $0xf0] sm:$0xff] }
 0xa50   :  { %v6757_v12 = vsel %vm4498_vm3, %v6756_v61, %v6751_v59  ;;  %v6755_v30 = vsel %vm4498_vm3, %v6754_v44, %v6750_v29  ;;  %v6645_v59 = vld [vmem:[#allocation20 + $0xd8] sm:$0xff]  ;;  %v17102_v29 = vcombine.low %v6636_v42, %v6640_v47  ;;  %v17104_v44 = vcombine.low %v6637_v48, %v6641_v32  ;;  %v6660_v32 = vld [vmem:[#allocation20 + $0x150] sm:$0xff] }
 0xa51   :  { %v6759_v21 = vpack.c.b16 %v6757_v12, %v6757_v12  ;;  %v17080_v9 = vpack.c.b16 %v6755_v30, %v6755_v30  ;;  %v6649_v61 = vld [vmem:[#allocation20 + $0xf8] sm:$0xff]  ;;  %v17108_v26 = vcombine.high %v6644_v60, %v6648_v16  ;;  %v6652_v30 = vld [vmem:[#allocation20 + $0x110] sm:$0xff]  ;;  %v17122_v48 = vcombine.high %v6653_v55, %v6657_v52 }
 0xa52   :  { %18642 = vst [vmem:[#allocation76_spill] sm:$0xff] %v17102_v29  ;;  %18643 = vst [vmem:[#allocation77_spill] sm:$0xff] %v17104_v44  ;;  %v17110_v12 = vcombine.high %v6645_v59, %v6649_v61  ;;  %v17116_v42 = vcombine.low %v6645_v59, %v6649_v61  ;;  %v17120_v47 = vcombine.high %v6652_v30, %v6656_v10 }
 0xa53   :  { %7434 = vmatprep.mubr.bf16.mxu1 %v6759_v21  ;;  %7475 = vmatprep.mubr.bf16.mxu0 %v6759_v21  ;;  %18644 = vst [vmem:[#allocation78_spill] sm:$0xff] %v17108_v26  ;;  %18649 = vst [vmem:[#allocation83_spill] sm:$0xff] %v17122_v48 }
 0xa54   :  { %7435 = vmatmul.mubr.bf16.vlgmr.msra.gmra.mrb[40].mxu1 %v17080_v9  ;;  %7476 = vmatmul.mubr.bf16.vlgmr.msra.gmra.mrb[48].mxu0 %v17080_v9  ;;  %18645 = vst [vmem:[#allocation79_spill] sm:$0xff] %v17110_v12  ;;  %18647 = vst [vmem:[#allocation81_spill] sm:$0xff] %v17116_v42 }
 0xa55   :  { %7485 = vmatpush1.bf16.msra.mxu1 %v17045_v62  ;;  %7526 = vmatpush1.bf16.msra.mxu0 %v17050_v23  ;;  %18648 = vst [vmem:[#allocation82_spill] sm:$0xff] %v17120_v47 }
 0xa56   :  { %7516 = vmatprep.mubr.bf16.mxu1 %v6759_v21  ;;  %7557 = vmatprep.mubr.bf16.mxu0 %v6759_v21  ;;  %v17114_v21 = vcombine.low %v6644_v60, %v6648_v16  ;;  %v17126_v60 = vcombine.low %v6652_v30, %v6656_v10  ;;  %v17128_v16 = vcombine.low %v6653_v55, %v6657_v52 }
 0xa57   :  { %7486 = vmatprep.subr.bf16.mxu1 %v17082_v24  ;;  %7527 = vmatprep.subr.bf16.mxu0 %v17084_v46 }
 0xa58   :  { %18646 = vst [vmem:[#allocation80_spill] sm:$0xff] %v17114_v21  ;;  %18650 = vst [vmem:[#allocation84_spill] sm:$0xff] %v17126_v60 }
 0xa59   :  { %7487 = vmatpush1.bf16.msra.mxu1 %v17090_v25  ;;  %7528 = vmatpush1.bf16.msra.mxu0 %v17092_v13  ;;  %v6665_v13 = vld [vmem:[#allocation20 + $0x178] sm:$0xff]  ;;  %18651 = vst [vmem:[#allocation85_spill] sm:$0xff] %v17128_v16 }
 0xa5a   :  { %7488 = vmatprep.subr.bf16.mxu1 %v17094_v33  ;;  %7529 = vmatprep.subr.bf16.mxu0 %v17096_v8  ;;  %v6664_v8 = vld [vmem:[#allocation20 + $0x170] sm:$0xff]  ;;  %v6661_v33 = vld [vmem:[#allocation20 + $0x158] sm:$0xff] }
 0xa5b   :  { %v17132_v59 = vcombine.high %v6660_v32, %v6664_v8  ;;  %v17134_v61 = vcombine.high %v6661_v33, %v6665_v13  ;;  %v17138_v30 = vcombine.low %v6660_v32, %v6664_v8  ;;  %v17140_v10 = vcombine.low %v6661_v33, %v6665_v13 }
 0xa5d   :  { %7489 = vmatpush1.bf16.msra.mxu1 %v17102_v29  ;;  %7530 = vmatpush1.bf16.msra.mxu0 %v17104_v44  ;;  %18652 = vst [vmem:[#allocation86_spill] sm:$0xff] %v17132_v59  ;;  %18653 = vst [vmem:[#allocation87_spill] sm:$0xff] %v17134_v61  ;;  %v6669_v44 = vld [vmem:[#allocation20 + $0x198] sm:$0xff] }
 0xa5e   :  { %7490 = vmatprep.subr.bf16.mxu1 %v17108_v26  ;;  %7531 = vmatprep.subr.bf16.mxu0 %v17110_v12  ;;  %v6668_v12 = vld [vmem:[#allocation20 + $0x190] sm:$0xff]  ;;  %v6673_v29 = vld [vmem:[#allocation20 + $0x1b8] sm:$0xff]  ;;  %18654 = vst [vmem:[#allocation88_spill] sm:$0xff] %v17138_v30  ;;  %18655 = vst [vmem:[#allocation89_spill] sm:$0xff] %v17140_v10 }
 0xa5f   :  { %v6672_v26 = vld [vmem:[#allocation20 + $0x1b0] sm:$0xff]  ;;  %v17146_v52 = vcombine.high %v6669_v44, %v6673_v29  ;;  %v17152_v13 = vcombine.low %v6669_v44, %v6673_v29 }
 0xa60   :  { %v17144_v55 = vcombine.high %v6668_v12, %v6672_v26  ;;  %v17150_v8 = vcombine.low %v6668_v12, %v6672_v26 }
 0xa61   :  { %7491 = vmatpush1.bf16.msra.mxu1 %v17114_v21  ;;  %7532 = vmatpush1.bf16.msra.mxu0 %v17116_v42  ;;  %18657 = vst [vmem:[#allocation91_spill] sm:$0xff] %v17146_v52  ;;  %v6677_v42 = vld [vmem:[#allocation20 + $0x1d8] sm:$0xff]  ;;  %18659 = vst [vmem:[#allocation93_spill] sm:$0xff] %v17152_v13 }
 0xa62   :  { %7492 = vmatprep.subr.bf16.mxu1 %v17120_v47  ;;  %7533 = vmatprep.subr.bf16.mxu0 %v17122_v48  ;;  %18656 = vst [vmem:[#allocation90_spill] sm:$0xff] %v17144_v55  ;;  %v6676_v48 = vld [vmem:[#allocation20 + $0x1d0] sm:$0xff]  ;;  %v6681_v21 = vld [vmem:[#allocation20 + $0x1f8] sm:$0xff]  ;;  %18658 = vst [vmem:[#allocation92_spill] sm:$0xff] %v17150_v8 }
 0xa63   :  { %v6680_v47 = vld [vmem:[#allocation20 + $0x1f0] sm:$0xff]  ;;  %v17158_v32 = vcombine.high %v6677_v42, %v6681_v21  ;;  %v17164_v29 = vcombine.low %v6677_v42, %v6681_v21 }
 0xa64   :  { %v17156_v33 = vcombine.high %v6676_v48, %v6680_v47  ;;  %v17162_v26 = vcombine.low %v6676_v48, %v6680_v47 }
 0xa65   :  { %7493 = vmatpush1.bf16.msra.mxu1 %v17126_v60  ;;  %7534 = vmatpush1.bf16.msra.mxu0 %v17128_v16  ;;  %18661 = vst [vmem:[#allocation95_spill] sm:$0xff] %v17158_v32  ;;  %v6685_v16 = vld [vmem:[#allocation20 + $0x218] sm:$0xff]  ;;  %18663 = vst [vmem:[#allocation97_spill] sm:$0xff] %v17164_v29 }
 0xa66   :  { %7494 = vmatprep.subr.bf16.mxu1 %v17132_v59  ;;  %7535 = vmatprep.subr.bf16.mxu0 %v17134_v61  ;;  %18660 = vst [vmem:[#allocation94_spill] sm:$0xff] %v17156_v33  ;;  %v6684_v61 = vld [vmem:[#allocation20 + $0x210] sm:$0xff]  ;;  %v6689_v60 = vld [vmem:[#allocation20 + $0x238] sm:$0xff]  ;;  %18662 = vst [vmem:[#allocation96_spill] sm:$0xff] %v17162_v26 }
 0xa67   :  { %v6688_v59 = vld [vmem:[#allocation20 + $0x230] sm:$0xff]  ;;  %v17170_v12 = vcombine.high %v6685_v16, %v6689_v60  ;;  %v17176_v21 = vcombine.low %v6685_v16, %v6689_v60 }
 0xa68   :  { %v17168_v44 = vcombine.high %v6684_v61, %v6688_v59  ;;  %v17174_v47 = vcombine.low %v6684_v61, %v6688_v59 }
 0xa69   :  { %7495 = vmatpush1.bf16.msra.mxu1 %v17138_v30  ;;  %7536 = vmatpush1.bf16.msra.mxu0 %v17140_v10  ;;  %18665 = vst [vmem:[#allocation99_spill] sm:$0xff] %v17170_v12  ;;  %v6693_v10 = vld [vmem:[#allocation20 + $0x258] sm:$0xff]  ;;  %18667 = vst [vmem:[#allocation101_spill] sm:$0xff] %v17176_v21 }
 0xa6a   :  { %7496 = vmatprep.subr.bf16.mxu1 %v17144_v55  ;;  %7537 = vmatprep.subr.bf16.mxu0 %v17146_v52  ;;  %18664 = vst [vmem:[#allocation98_spill] sm:$0xff] %v17168_v44  ;;  %v6692_v52 = vld [vmem:[#allocation20 + $0x250] sm:$0xff]  ;;  %v6697_v30 = vld [vmem:[#allocation20 + $0x278] sm:$0xff]  ;;  %18666 = vst [vmem:[#allocation100_spill] sm:$0xff] %v17174_v47 }
 0xa6b   :  { %v6696_v55 = vld [vmem:[#allocation20 + $0x270] sm:$0xff]  ;;  %v17182_v48 = vcombine.high %v6693_v10, %v6697_v30  ;;  %v17188_v60 = vcombine.low %v6693_v10, %v6697_v30 }
 0xa6c   :  { %v17180_v42 = vcombine.high %v6692_v52, %v6696_v55  ;;  %v17186_v59 = vcombine.low %v6692_v52, %v6696_v55 }
 0xa6d   :  { %7497 = vmatpush1.bf16.msra.mxu1 %v17150_v8  ;;  %7538 = vmatpush1.bf16.msra.mxu0 %v17152_v13  ;;  %18669 = vst [vmem:[#allocation103_spill] sm:$0xff] %v17182_v48  ;;  %v6701_v13 = vld [vmem:[#allocation20 + $0x298] sm:$0xff]  ;;  %18671 = vst [vmem:[#allocation105_spill] sm:$0xff] %v17188_v60 }
 0xa6e   :  { %7498 = vmatprep.subr.bf16.mxu1 %v17156_v33  ;;  %7539 = vmatprep.subr.bf16.mxu0 %v17158_v32  ;;  %18668 = vst [vmem:[#allocation102_spill] sm:$0xff] %v17180_v42  ;;  %v6700_v32 = vld [vmem:[#allocation20 + $0x290] sm:$0xff]  ;;  %v6705_v8 = vld [vmem:[#allocation20 + $0x2b8] sm:$0xff]  ;;  %18670 = vst [vmem:[#allocation104_spill] sm:$0xff] %v17186_v59 }
 0xa6f   :  { %v6704_v33 = vld [vmem:[#allocation20 + $0x2b0] sm:$0xff]  ;;  %v17194_v61 = vcombine.high %v6701_v13, %v6705_v8  ;;  %v17200_v30 = vcombine.low %v6701_v13, %v6705_v8 }
 0xa70   :  { %v17192_v16 = vcombine.high %v6700_v32, %v6704_v33  ;;  %v17198_v55 = vcombine.low %v6700_v32, %v6704_v33 }
 0xa71   :  { %7499 = vmatpush1.bf16.msra.mxu1 %v17162_v26  ;;  %7540 = vmatpush1.bf16.msra.mxu0 %v17164_v29  ;;  %18673 = vst [vmem:[#allocation107_spill] sm:$0xff] %v17194_v61  ;;  %v6709_v29 = vld [vmem:[#allocation20 + $0x2d8] sm:$0xff]  ;;  %18675 = vst [vmem:[#allocation109_spill] sm:$0xff] %v17200_v30 }
 0xa72   :  { %7500 = vmatprep.subr.bf16.mxu1 %v17168_v44  ;;  %7541 = vmatprep.subr.bf16.mxu0 %v17170_v12  ;;  %18672 = vst [vmem:[#allocation106_spill] sm:$0xff] %v17192_v16  ;;  %v6708_v12 = vld [vmem:[#allocation20 + $0x2d0] sm:$0xff]  ;;  %v6713_v26 = vld [vmem:[#allocation20 + $0x2f8] sm:$0xff]  ;;  %18674 = vst [vmem:[#allocation108_spill] sm:$0xff] %v17198_v55 }
 0xa73   :  { %v6712_v44 = vld [vmem:[#allocation20 + $0x2f0] sm:$0xff]  ;;  %v17206_v52 = vcombine.high %v6709_v29, %v6713_v26  ;;  %v17212_v8 = vcombine.low %v6709_v29, %v6713_v26 }
 0xa74   :  { %v17204_v10 = vcombine.high %v6708_v12, %v6712_v44  ;;  %v17210_v33 = vcombine.low %v6708_v12, %v6712_v44 }
 0xa75   :  { %7501 = vmatpush1.bf16.msra.mxu1 %v17174_v47  ;;  %7542 = vmatpush1.bf16.msra.mxu0 %v17176_v21  ;;  %18677 = vst [vmem:[#allocation111_spill] sm:$0xff] %v17206_v52  ;;  %v6717_v21 = vld [vmem:[#allocation20 + $0x318] sm:$0xff]  ;;  %18679 = vst [vmem:[#allocation113_spill] sm:$0xff] %v17212_v8 }
 0xa76   :  { %7502 = vmatprep.subr.bf16.mxu1 %v17180_v42  ;;  %7543 = vmatprep.subr.bf16.mxu0 %v17182_v48  ;;  %18676 = vst [vmem:[#allocation110_spill] sm:$0xff] %v17204_v10  ;;  %v6716_v48 = vld [vmem:[#allocation20 + $0x310] sm:$0xff]  ;;  %v6721_v47 = vld [vmem:[#allocation20 + $0x338] sm:$0xff]  ;;  %18678 = vst [vmem:[#allocation112_spill] sm:$0xff] %v17210_v33 }
 0xa77   :  { %v6720_v42 = vld [vmem:[#allocation20 + $0x330] sm:$0xff]  ;;  %v17218_v32 = vcombine.high %v6717_v21, %v6721_v47  ;;  %v17224_v26 = vcombine.low %v6717_v21, %v6721_v47 }
 0xa78   :  { %v17216_v13 = vcombine.high %v6716_v48, %v6720_v42  ;;  %v17222_v44 = vcombine.low %v6716_v48, %v6720_v42 }
 0xa79   :  { %7503 = vmatpush1.bf16.msra.mxu1 %v17186_v59  ;;  %7544 = vmatpush1.bf16.msra.mxu0 %v17188_v60  ;;  %18681 = vst [vmem:[#allocation115_spill] sm:$0xff] %v17218_v32  ;;  %v6725_v60 = vld [vmem:[#allocation20 + $0x358] sm:$0xff] }
 0xa7a   :  { %7504 = vmatprep.subr.bf16.mxu1 %v17192_v16  ;;  %7545 = vmatprep.subr.bf16.mxu0 %v17194_v61  ;;  %18680 = vst [vmem:[#allocation114_spill] sm:$0xff] %v17216_v13  ;;  %v6724_v61 = vld [vmem:[#allocation20 + $0x350] sm:$0xff]  ;;  %v6729_v59 = vld [vmem:[#allocation20 + $0x378] sm:$0xff] }
 0xa7b   :  { %v6728_v16 = vld [vmem:[#allocation20 + $0x370] sm:$0xff]  ;;  %v17230_v12 = vcombine.high %v6725_v60, %v6729_v59  ;;  %v17236_v47 = vcombine.low %v6725_v60, %v6729_v59 }
 0xa7c   :  { %v17228_v29 = vcombine.high %v6724_v61, %v6728_v16  ;;  %v17234_v42 = vcombine.low %v6724_v61, %v6728_v16 }
 0xa7d   :  { %7505 = vmatpush1.bf16.msra.mxu1 %v17198_v55  ;;  %7546 = vmatpush1.bf16.msra.mxu0 %v17200_v30  ;;  %18682 = vst [vmem:[#allocation116_spill] sm:$0xff] %v17230_v12  ;;  %v6733_v30 = vld [vmem:[#allocation20 + $0x398] sm:$0xff] }
 0xa7e   :  { %7506 = vmatprep.subr.bf16.mxu1 %v17204_v10  ;;  %7547 = vmatprep.subr.bf16.mxu0 %v17206_v52  ;;  %v6732_v52 = vld [vmem:[#allocation20 + $0x390] sm:$0xff]  ;;  %v6737_v55 = vld [vmem:[#allocation20 + $0x3b8] sm:$0xff]  ;;  %18683 = vst [vmem:[#allocation117_spill] sm:$0xff] %v17234_v42 }
 0xa7f   :  { %v6736_v10 = vld [vmem:[#allocation20 + $0x3b0] sm:$0xff]  ;;  %v17242_v48 = vcombine.high %v6733_v30, %v6737_v55  ;;  %v17248_v59 = vcombine.low %v6733_v30, %v6737_v55 }
 0xa80   :  { %v17240_v21 = vcombine.high %v6732_v52, %v6736_v10  ;;  %v17246_v16 = vcombine.low %v6732_v52, %v6736_v10 }
 0xa81   :  { %7507 = vmatpush1.bf16.msra.mxu1 %v17210_v33  ;;  %7548 = vmatpush1.bf16.msra.mxu0 %v17212_v8  ;;  %v6741_v8 = vld [vmem:[#allocation20 + $0x3d8] sm:$0xff] }
 0xa82   :  { %7508 = vmatprep.subr.bf16.mxu1 %v17216_v13  ;;  %7549 = vmatprep.subr.bf16.mxu0 %v17218_v32  ;;  %v6740_v32 = vld [vmem:[#allocation20 + $0x3d0] sm:$0xff]  ;;  %v6745_v33 = vld [vmem:[#allocation20 + $0x3f8] sm:$0xff] }
 0xa83   :  { %v6744_v13 = vld [vmem:[#allocation20 + $0x3f0] sm:$0xff]  ;;  %v17254_v61 = vcombine.high %v6741_v8, %v6745_v33 }
 0xa84   :  { %v17252_v60 = vcombine.high %v6740_v32, %v6744_v13 }
 0xa85   :  { %7509 = vmatpush1.bf16.msra.mxu1 %v17222_v44  ;;  %7550 = vmatpush1.bf16.msra.mxu0 %v17224_v26 }
 0xa86   :  { %7510 = vmatprep.subr.bf16.mxu1 %v17228_v29  ;;  %7551 = vmatprep.subr.bf16.mxu0 %v17230_v12  ;;  %v17258_v12 = vcombine.low %v6740_v32, %v6744_v13 }
 0xa89   :  { %7511 = vmatpush1.bf16.msra.mxu1 %v17234_v42  ;;  %7552 = vmatpush1.bf16.msra.mxu0 %v17236_v47  ;;  %v17260_v42 = vcombine.low %v6741_v8, %v6745_v33 }
 0xa8a   :  { %7512 = vmatprep.subr.bf16.mxu1 %v17240_v21  ;;  %7553 = vmatprep.subr.bf16.mxu0 %v17242_v48 }
 0xa8d   :  { %7513 = vmatpush1.bf16.msra.mxu1 %v17246_v16  ;;  %7554 = vmatpush1.bf16.msra.mxu0 %v17248_v59 }
 0xa8e   :  { %7514 = vmatprep.subr.bf16.mxu1 %v17252_v60  ;;  %7555 = vmatprep.subr.bf16.mxu0 %v17254_v61 }
 0xa91   :  { %7515 = vmatpush1.bf16.msra.mxu1 %v17258_v12  ;;  %7556 = vmatpush1.bf16.msra.mxu0 %v17260_v42 }
 0xa92   :  { %8530 = vmatprep.subr.bf16.mxu1 %v16852_v54  ;;  %8571 = vmatprep.subr.bf16.mxu0 %v16858_v38  ;;  %v18684_v54 = vld [vmem:[#allocation42_spill] sm:$0xff]  ;;  %v18687_v38 = vld [vmem:[#allocation44_spill] sm:$0xff] }
 0xa94   :  { %7517 = vmatmul.mubr.bf16.vlgmr.msra.gmra.mrb[44].mxu1 %v17080_v9  ;;  %7558 = vmatmul.mubr.bf16.vlgmr.msra.gmra.mrb[52].mxu0 %v17080_v9 }
 0xa95   :  { %8531 = vmatpush1.bf16.msra.mxu1 %v16854_v28  ;;  %8572 = vmatpush1.bf16.msra.mxu0 %v16856_v50  ;;  %v18685_v28 = vld [vmem:[#allocation39_spill] sm:$0xff]  ;;  %v18686_v50 = vld [vmem:[#allocation40_spill] sm:$0xff] }
 0xa96   :  { %8532 = vmatprep.subr.bf16.mxu1 %v16864_v0  ;;  %8573 = vmatprep.subr.bf16.mxu0 %v16870_v7  ;;  %v18688_v0 = vld [vmem:[#allocation41_spill] sm:$0xff]  ;;  %v18691_v7 = vld [vmem:[#allocation46_spill] sm:$0xff] }
 0xa99   :  { %8533 = vmatpush1.bf16.msra.mxu1 %v16866_v4  ;;  %8574 = vmatpush1.bf16.msra.mxu0 %v16868_v6  ;;  %v18689_v4 = vld [vmem:[#allocation43_spill] sm:$0xff]  ;;  %v18690_v6 = vld [vmem:[#allocation45_spill] sm:$0xff] }
 0xa9a   :  { %8534 = vmatprep.subr.bf16.mxu1 %v16876_v63  ;;  %8575 = vmatprep.subr.bf16.mxu0 %v16882_v19  ;;  %v18692_v63 = vld [vmem:[#allocation47_spill] sm:$0xff]  ;;  %v18695_v19 = vld [vmem:[#allocation50_spill] sm:$0xff] }
 0xa9d   :  { %8535 = vmatpush1.bf16.msra.mxu1 %v16878_v34  ;;  %8576 = vmatpush1.bf16.msra.mxu0 %v16880_v17  ;;  %v18693_v34 = vld [vmem:[#allocation48_spill] sm:$0xff]  ;;  %v18694_v17 = vld [vmem:[#allocation49_spill] sm:$0xff] }
 0xa9e   :  { %8536 = vmatprep.subr.bf16.mxu1 %v16888_v27  ;;  %8577 = vmatprep.subr.bf16.mxu0 %v16894_v37  ;;  %v18696_v27 = vld [vmem:[#allocation51_spill] sm:$0xff]  ;;  %v18699_v37 = vld [vmem:[#allocation54_spill] sm:$0xff] }
 0xaa1   :  { %8537 = vmatpush1.bf16.msra.mxu1 %v16890_v35  ;;  %8578 = vmatpush1.bf16.msra.mxu0 %v16892_v36  ;;  %v18697_v35 = vld [vmem:[#allocation52_spill] sm:$0xff]  ;;  %v18698_v36 = vld [vmem:[#allocation53_spill] sm:$0xff] }
 0xaa2   :  { %8538 = vmatprep.subr.bf16.mxu1 %v16900_v56  ;;  %8579 = vmatprep.subr.bf16.mxu0 %v16906_v20  ;;  %v18700_v56 = vld [vmem:[#allocation55_spill] sm:$0xff]  ;;  %v18703_v20 = vld [vmem:[#allocation58_spill] sm:$0xff] }
 0xaa5   :  { %8539 = vmatpush1.bf16.msra.mxu1 %v16902_v57  ;;  %8580 = vmatpush1.bf16.msra.mxu0 %v16904_v3  ;;  %v18701_v57 = vld [vmem:[#allocation56_spill] sm:$0xff]  ;;  %v18702_v3 = vld [vmem:[#allocation57_spill] sm:$0xff] }
 0xaa6   :  { %8540 = vmatprep.subr.bf16.mxu1 %v16912_v11  ;;  %8581 = vmatprep.subr.bf16.mxu0 %v16918_v49  ;;  %v18704_v11 = vld [vmem:[#allocation59_spill] sm:$0xff] }
 0xaa7   :  { %v18707_v49 = vld [vmem:[#allocation63_spill] sm:$0xff] }
 0xaa9   :  { %8541 = vmatpush1.bf16.msra.mxu1 %v16914_v31  ;;  %8582 = vmatpush1.bf16.msra.mxu0 %v16916_v51  ;;  %v18705_v31 = vld [vmem:[#allocation60_spill] sm:$0xff]  ;;  %v18706_v51 = vld [vmem:[#allocation62_spill] sm:$0xff] }
 0xaaa   :  { %8542 = vmatprep.subr.bf16.mxu1 %v16924_v18  ;;  %8583 = vmatprep.subr.bf16.mxu0 %v16930_v58  ;;  %v18708_v18 = vld [vmem:[#allocation64_spill] sm:$0xff]  ;;  %v18711_v58 = vld [vmem:[#allocation67_spill] sm:$0xff] }
 0xaad   :  { %8543 = vmatpush1.bf16.msra.mxu1 %v16926_v43  ;;  %8584 = vmatpush1.bf16.msra.mxu0 %v16928_v53  ;;  %v18709_v43 = vld [vmem:[#allocation65_spill] sm:$0xff]  ;;  %v18710_v53 = vld [vmem:[#allocation66_spill] sm:$0xff] }
 0xaae   :  { %8544 = vmatprep.subr.bf16.mxu1 %v16936_v22  ;;  %8585 = vmatprep.subr.bf16.mxu0 %v16942_v5  ;;  %v18712_v22 = vld [vmem:[#allocation68_spill] sm:$0xff]  ;;  %v18715_v5 = vld [vmem:[#allocation71_spill] sm:$0xff] }
 0xab1   :  { %8545 = vmatpush1.bf16.msra.mxu1 %v16938_v45  ;;  %8586 = vmatpush1.bf16.msra.mxu0 %v16940_v41  ;;  %v18713_v45 = vld [vmem:[#allocation69_spill] sm:$0xff]  ;;  %v18714_v41 = vld [vmem:[#allocation70_spill] sm:$0xff] }
 0xab2   :  { %8546 = vmatprep.subr.bf16.mxu1 %v16950_v1  ;;  %8587 = vmatprep.subr.bf16.mxu0 %v18684_v54  ;;  %v18716_v1 = vld [vmem:[#allocation72_spill] sm:$0xff] }
 0xab5   :  { %8547 = vmatpush1.bf16.msra.mxu1 %v18685_v28  ;;  %8588 = vmatpush1.bf16.msra.mxu0 %v18686_v50  ;;  %v18717_v28 = vld [vmem:[#allocation61_spill] sm:$0xff] }
 0xab6   :  { %8548 = vmatprep.subr.bf16.mxu1 %v18687_v38  ;;  %8589 = vmatprep.subr.bf16.mxu0 %v18688_v0 }
 0xab9   :  { %8549 = vmatpush1.bf16.msra.mxu1 %v18689_v4  ;;  %8590 = vmatpush1.bf16.msra.mxu0 %v18690_v6 }
 0xaba   :  { %8550 = vmatprep.subr.bf16.mxu1 %v18691_v7  ;;  %8591 = vmatprep.subr.bf16.mxu0 %v18692_v63 }
 0xabd   :  { %8551 = vmatpush1.bf16.msra.mxu1 %v18693_v34  ;;  %8592 = vmatpush1.bf16.msra.mxu0 %v18694_v17 }
 0xabe   :  { %8552 = vmatprep.subr.bf16.mxu1 %v18695_v19  ;;  %8593 = vmatprep.subr.bf16.mxu0 %v18696_v27 }
 0xac1   :  { %8553 = vmatpush1.bf16.msra.mxu1 %v18697_v35  ;;  %8594 = vmatpush1.bf16.msra.mxu0 %v18698_v36 }
 0xac2   :  { %8554 = vmatprep.subr.bf16.mxu1 %v18699_v37  ;;  %8595 = vmatprep.subr.bf16.mxu0 %v18700_v56 }
 0xac5   :  { %8555 = vmatpush1.bf16.msra.mxu1 %v18701_v57  ;;  %8596 = vmatpush1.bf16.msra.mxu0 %v18702_v3 }
 0xac6   :  { %8556 = vmatprep.subr.bf16.mxu1 %v18703_v20  ;;  %8597 = vmatprep.subr.bf16.mxu0 %v18704_v11  ;;  %v6586_v11 = vld [vmem:[#allocation3 + $0x3] ss:$8 sm:$0xf0] }
 0xac9   :  { %8557 = vmatpush1.bf16.msra.mxu1 %v18705_v31  ;;  %8598 = vmatpush1.bf16.msra.mxu0 %v18706_v51  ;;  %v6590_v31 = vld [vmem:[#allocation3 + $0x43] ss:$8 sm:$0xf0] }
 0xaca   :  { %8558 = vmatprep.subr.bf16.mxu1 %v18707_v49  ;;  %8599 = vmatprep.subr.bf16.mxu0 %v18708_v18 }
 0xacd   :  { %8559 = vmatpush1.bf16.msra.mxu1 %v18709_v43  ;;  %8600 = vmatpush1.bf16.msra.mxu0 %v18710_v53  ;;  %v6585_v53 = vld [vmem:[#allocation3 + $0x3] ss:$8 sm:$0xf] }
 0xace   :  { %8560 = vmatprep.subr.bf16.mxu1 %v18711_v58  ;;  %8601 = vmatprep.subr.bf16.mxu0 %v18712_v22  ;;  %v6589_v58 = vld [vmem:[#allocation3 + $0x43] ss:$8 sm:$0xf]  ;;  %v6587_v22 = vor.u32 %v6586_v11, %v6585_v53 }
 0xad1   :  { %8561 = vmatpush1.bf16.msra.mxu1 %v18713_v45  ;;  %8602 = vmatpush1.bf16.msra.mxu0 %v18714_v41  ;;  %v6591_v45 = vor.u32 %v6590_v31, %v6589_v58 }
 0xad2   :  { %8612 = vmatprep.subr.bf16.mxu1 %v18715_v5  ;;  %8653 = vmatprep.subr.bf16.mxu0 %v18716_v1 }
 0xb27   :  { %v7436_v9 = vpop.f32.mrb[40].mxu1  ;;  %v7477_v55 = vpop.f32.mrb[48].mxu0 }
 0xb28   :  { %v7438_v30 = vpop.f32.mrb[41].mxu1  ;;  %v7479_v10 = vpop.f32.mrb[49].mxu0 }
 0xb29   :  { %v7574_v52 = vcombine.low %v7436_v9, %v7438_v30  ;;  %v7575_v33 = vcombine.low %v7477_v55, %v7479_v10  ;;  %v7440_v8 = vpop.f32.mrb[42].mxu1  ;;  %v7481_v13 = vpop.f32.mrb[50].mxu0 }
 0xb2a   :  { %v7441_v32 = vpop.f32.mrb[43].mxu1  ;;  %v7482_v54 = vpop.f32.mrb[51].mxu0 }
 0xb2b   :  { %v7584_v50 = vrot.slane %v7574_v52, %v18717_v28  ;;  %v7591_v38 = vrot.slane %v7575_v33, %v18717_v28 }
 0xb2d   :  { %v7606_v0 = vcombine.low %v7584_v50, %v7591_v38  ;;  %v7607_v4 = vcombine.high %v7584_v50, %v7591_v38 }
 0xb2f   :  { %v7616_v51 = vrot.slane %v7606_v0, %v18717_v28  ;;  %v7623_v49 = vrot.slane %v7607_v4, %v18717_v28 }
 0xb67   :  { %v7518_v6 = vpop.f32.mrb[44].mxu1  ;;  %v7559_v7 = vpop.f32.mrb[52].mxu0 }
 0xb68   :  { %v7520_v63 = vpop.f32.mrb[45].mxu1  ;;  %v7561_v34 = vpop.f32.mrb[53].mxu0 }
 0xb69   :  { %v7576_v17 = vcombine.low %v7518_v6, %v7520_v63  ;;  %v7577_v19 = vcombine.low %v7559_v7, %v7561_v34  ;;  %v7522_v27 = vpop.f32.mrb[46].mxu1  ;;  %v7563_v35 = vpop.f32.mrb[54].mxu0 }
 0xb6a   :  { %v7523_v36 = vpop.f32.mrb[47].mxu1  ;;  %v7564_v37 = vpop.f32.mrb[55].mxu0 }
 0xb6b   :  { %v7598_v56 = vrot.slane %v7576_v17, %v18717_v28  ;;  %v7605_v57 = vrot.slane %v7577_v19, %v18717_v28 }
 0xb6d   :  { %v7608_v3 = vcombine.low %v7598_v56, %v7605_v57  ;;  %v7609_v20 = vcombine.high %v7598_v56, %v7605_v57 }
 0xb6f   :  { %v7630_v18 = vrot.slane %v7608_v3, %v18717_v28  ;;  %v7637_v43 = vrot.slane %v7609_v20, %v18717_v28 }
 0xb71   :  { %v7638_v41 = vcombine.low %v7616_v51, %v7630_v18  ;;  %v7639_v5 = vcombine.low %v7623_v49, %v7637_v43 }
 0xb73   :  { %v7642_v1 = vadd.f32 %v7638_v41, %v6587_v22  ;;  %v7643_v9 = vadd.f32 %v7639_v5, %v6591_v45 }
 0xb75   :  { %v13985_v55 = vmul.f32 -1.442695, %v7642_v1  ;;  %v13986_v30 = vmul.f32 -1.442695, %v7643_v9  ;;  %v7658_v10 = vrot.slane %v7642_v1, 2  ;;  %v7659_v52 = vrot.slane %v7643_v9, 2 }
 0xb76   :  { %v7680_v13 = vrot.slane %v7642_v1, 6  ;;  %v7681_v32 = vrot.slane %v7643_v9, 6  ;;  %v7674_v54 = vrot.slane %v7642_v1, 4  ;;  %v7675_v50 = vrot.slane %v7643_v9, 4 }
 0xb77   :  { %15268 = vpow2.f32 %v13985_v55  ;;  %v13987_v33 = vmul.f32 -1.442695, %v7658_v10  ;;  %v13988_v8 = vmul.f32 -1.442695, %v7659_v52 }
 0xb78   :  { %15270 = vpow2.f32 %v13986_v30  ;;  %v13989_v38 = vmul.f32 -1.442695, %v7680_v13  ;;  %v13990_v0 = vmul.f32 -1.442695, %v7681_v32 }
 0xb79   :  { %15272 = vpow2.f32 %v13987_v33 }
 0xb7a   :  { %15274 = vpow2.f32 %v13988_v8 }
 0xb7b   :  { %15276 = vtanh.f32 %v7674_v54 }
 0xb7c   :  { %15278 = vtanh.f32 %v7675_v50 }
 0xb7d   :  { %15280 = vpow2.f32 %v13989_v38 }
 0xb7e   :  { %15282 = vpow2.f32 %v13990_v0 }
 0xb81   :  { %v15269_v4 = vpop.eup %15268 }
 0xb82   :  { %v15271_v6 = vpop.eup %15270  ;;  %v7650_v7 = vadd.f32 1.0, %v15269_v4 }
 0xb83   :  { %v15273_v63 = vpop.eup %15272  ;;  %v7651_v34 = vadd.f32 1.0, %v15271_v6 }
 0xb84   :  { %v15275_v17 = vpop.eup %15274  ;;  %15284 = vrcp.f32 %v7650_v7  ;;  %v7668_v19 = vadd.f32 1.0, %v15273_v63 }
 0xb85   :  { %15286 = vrcp.f32 %v7651_v34  ;;  %v7669_v27 = vadd.f32 1.0, %v15275_v17  ;;  %v15277_v35 = vpop.eup %15276  ;;  %v18718_v17 = vld [vmem:[#allocation73_spill] sm:$0xff] }
 0xb86   :  { %15288 = vrcp.f32 %v7668_v19  ;;  %v15279_v36 = vpop.eup %15278  ;;  %v18719_v19 = vld [vmem:[#allocation74_spill] sm:$0xff] }
 0xb87   :  { %15290 = vrcp.f32 %v7669_v27  ;;  %v15281_v37 = vpop.eup %15280  ;;  %v18720_v27 = vld [vmem:[#allocation75_spill] sm:$0xff] }
 0xb88   :  { %v15283_v56 = vpop.eup %15282  ;;  %v7690_v20 = vadd.f32 1.0, %v15281_v37  ;;  %v18725_v37 = vld [vmem:[#allocation80_spill] sm:$0xff] }
 0xb89   :  { %v7691_v31 = vadd.f32 1.0, %v15283_v56  ;;  %v18729_v56 = vld [vmem:[#allocation84_spill] sm:$0xff] }
 0xb8a   :  { %15292 = vrcp.f32 %v7690_v20  ;;  %v18732_v20 = vld [vmem:[#allocation87_spill] sm:$0xff] }
 0xb8b   :  { %15294 = vrcp.f32 %v7691_v31  ;;  %v18734_v31 = vld [vmem:[#allocation89_spill] sm:$0xff] }
 0xb8e   :  { %v15285_v57 = vpop.eup %15284 }
 0xb8f   :  { %v15287_v3 = vpop.eup %15286  ;;  %v7698_v49 = vmul.f32 %v15285_v57, %v15277_v35  ;;  %v18721_v35 = vld [vmem:[#allocation76_spill] sm:$0xff]  ;;  %v18730_v57 = vld [vmem:[#allocation85_spill] sm:$0xff] }
 0xb90   :  { %v15289_v11 = vpop.eup %15288  ;;  %v7699_v43 = vmul.f32 %v15287_v3, %v15279_v36  ;;  %v18722_v36 = vld [vmem:[#allocation77_spill] sm:$0xff]  ;;  %v18731_v3 = vld [vmem:[#allocation86_spill] sm:$0xff] }
 0xb91   :  { %v15291_v51 = vpop.eup %15290  ;;  %v7696_v18 = vmul.f32 %v15289_v11, %v17064_v15  ;;  %v18733_v11 = vld [vmem:[#allocation88_spill] sm:$0xff] }
 0xb92   :  { %v7697_v53 = vmul.f32 %v15291_v51, %v17066_v14  ;;  %v18735_v51 = vld [vmem:[#allocation90_spill] sm:$0xff] }
 0xb93   :  { %v17344_v58 = vadd.f32 %v7698_v49, %v7696_v18  ;;  %v18736_v49 = vld [vmem:[#allocation91_spill] sm:$0xff]  ;;  %v18737_v18 = vld [vmem:[#allocation92_spill] sm:$0xff] }
 0xb94   :  { %v17346_v22 = vadd.f32 %v7699_v43, %v7697_v53  ;;  %v15293_v45 = vpop.eup %15292  ;;  %v18738_v43 = vld [vmem:[#allocation93_spill] sm:$0xff]  ;;  %v18739_v53 = vld [vmem:[#allocation94_spill] sm:$0xff] }
 0xb95   :  { %15296 = vtanh.f32 %v17344_v58  ;;  %v15295_v41 = vpop.eup %15294 }
 0xb96   :  { %15298 = vtanh.f32 %v17346_v22 }
 0xb9f   :  { %v15297_v5 = vpop.eup %15296 }
 0xba0   :  { %v15299_v1 = vpop.eup %15298  ;;  %v7704_v9 = vmul.f32 %v15297_v5, %v15293_v45  ;;  %v18740_v45 = vld [vmem:[#allocation95_spill] sm:$0xff]  ;;  %v18742_v5 = vld [vmem:[#allocation97_spill] sm:$0xff] }
 0xba1   :  { %v7705_v55 = vmul.f32 %v15299_v1, %v15295_v41  ;;  %v18741_v41 = vld [vmem:[#allocation96_spill] sm:$0xff]  ;;  %v18743_v1 = vld [vmem:[#allocation98_spill] sm:$0xff] }
 0xba2   :  { %7707 = vst.msk [vmem:[#allocation4 + $0x3] ss:$8 sm:$0x3] %vm16143_vm1, %v7704_v9  ;;  %v7729_v15 = vrot.slane %v7704_v9, %v16192_v40  ;;  %v7725_v14 = vrot.slane %v7704_v9, %v16189_v39  ;;  %v18744_v9 = vld [vmem:[#allocation99_spill] sm:$0xff] }
 0xba3   :  { %7710 = vst.msk [vmem:[#allocation4 + $0x13] ss:$8 sm:$0x3] %vm16143_vm1, %v7705_v55  ;;  %v7737_v30 = vrot.slane %v7705_v55, %v16192_v40  ;;  %v7733_v10 = vrot.slane %v7705_v55, %v16189_v39  ;;  %v18745_v55 = vld [vmem:[#allocation100_spill] sm:$0xff] }
 0xba4   :  { %v7743_v52 = vpack.c.bf16 %v7729_v15, %v7729_v15  ;;  %v7742_v8 = vpack.c.bf16 %v7725_v14, %v7725_v14  ;;  %v18746_v15 = vld [vmem:[#allocation101_spill] sm:$0xff]  ;;  %v18747_v14 = vld [vmem:[#allocation102_spill] sm:$0xff] }
 0xba5   :  { %v7745_v33 = vpack.c.bf16 %v7737_v30, %v7737_v30  ;;  %v7744_v13 = vpack.c.bf16 %v7733_v10, %v7733_v10  ;;  %v18748_v30 = vld [vmem:[#allocation103_spill] sm:$0xff]  ;;  %v18749_v10 = vld [vmem:[#allocation104_spill] sm:$0xff] }
 0xba6   :  { %v7879_v50 = vunpack.c.l.b16 %v7743_v52  ;;  %v7878_v0 = vunpack.c.l.b16 %v7742_v8  ;;  %v18750_v52 = vld [vmem:[#allocation105_spill] sm:$0xff]  ;;  %v18752_v8 = vld [vmem:[#allocation107_spill] sm:$0xff] }
 0xba7   :  { %v7881_v32 = vunpack.c.l.b16 %v7745_v33  ;;  %v7880_v54 = vunpack.c.l.b16 %v7744_v13  ;;  %v18751_v33 = vld [vmem:[#allocation106_spill] sm:$0xff]  ;;  %v18753_v13 = vld [vmem:[#allocation108_spill] sm:$0xff] }
 0xba9   :  { %v7884_v38 = vrot.slane %v7881_v32, 7  ;;  %v7882_v4 = vrot.slane %v7880_v54, 7  ;;  %v18754_v32 = vld [vmem:[#allocation109_spill] sm:$0xff]  ;;  %v18755_v54 = vld [vmem:[#allocation110_spill] sm:$0xff] }
 0xbab   :  { %v7885_v6 = vsel %vm4498_vm3, %v7884_v38, %v7879_v50  ;;  %v7883_v7 = vsel %vm4498_vm3, %v7882_v4, %v7878_v0  ;;  %v18756_v50 = vld [vmem:[#allocation111_spill] sm:$0xff]  ;;  %v18757_v38 = vld [vmem:[#allocation112_spill] sm:$0xff]  ;;  %v18758_v0 = vld [vmem:[#allocation113_spill] sm:$0xff] }
 0xbac   :  { %v7887_v63 = vpack.c.b16 %v7885_v6, %v7885_v6  ;;  %v17360_v34 = vpack.c.b16 %v7883_v7, %v7883_v7  ;;  %v18759_v4 = vld [vmem:[#allocation114_spill] sm:$0xff]  ;;  %v18760_v6 = vld [vmem:[#allocation115_spill] sm:$0xff]  ;;  %v18761_v7 = vld [vmem:[#allocation116_spill] sm:$0xff] }
 0xbae   :  { %8562 = vmatprep.mubr.bf16.mxu1 %v7887_v63  ;;  %8603 = vmatprep.mubr.bf16.mxu0 %v7887_v63 }
 0xbaf   :  { %8563 = vmatmul.mubr.bf16.vlgmr.msra.gmra.mrb[48].mxu1 %v17360_v34  ;;  %8604 = vmatmul.mubr.bf16.vlgmr.msra.gmra.mrb[56].mxu0 %v17360_v34 }
 0xbb0   :  { %8613 = vmatpush1.bf16.msra.mxu1 %v17045_v62  ;;  %8654 = vmatpush1.bf16.msra.mxu0 %v17050_v23  ;;  %v18723_v62 = vld [vmem:[#allocation78_spill] sm:$0xff]  ;;  %v18724_v23 = vld [vmem:[#allocation79_spill] sm:$0xff] }
 0xbb1   :  { %8644 = vmatprep.mubr.bf16.mxu1 %v7887_v63  ;;  %8685 = vmatprep.mubr.bf16.mxu0 %v7887_v63  ;;  %v18762_v63 = vld [vmem:[#allocation117_spill] sm:$0xff] }
 0xbb2   :  { %8614 = vmatprep.subr.bf16.mxu1 %v17082_v24  ;;  %8655 = vmatprep.subr.bf16.mxu0 %v17084_v46  ;;  %v18726_v24 = vld [vmem:[#allocation81_spill] sm:$0xff]  ;;  %v18727_v46 = vld [vmem:[#allocation82_spill] sm:$0xff] }
 0xbb4   :  { %8615 = vmatpush1.bf16.msra.mxu1 %v17090_v25  ;;  %8656 = vmatpush1.bf16.msra.mxu0 %v18718_v17  ;;  %v18728_v25 = vld [vmem:[#allocation83_spill] sm:$0xff] }
 0xbb5   :  { %8616 = vmatprep.subr.bf16.mxu1 %v18719_v19  ;;  %8657 = vmatprep.subr.bf16.mxu0 %v18720_v27 }
 0xbb8   :  { %8617 = vmatpush1.bf16.msra.mxu1 %v18721_v35  ;;  %8658 = vmatpush1.bf16.msra.mxu0 %v18722_v36  ;;  %v8890_v35 = vld [vmem:[#allocation20 + $0x80] sm:$0xff] }
 0xbb9   :  { %8618 = vmatprep.subr.bf16.mxu1 %v18723_v62  ;;  %8659 = vmatprep.subr.bf16.mxu0 %v18724_v23  ;;  %v8894_v36 = vld [vmem:[#allocation20 + $0xa0] sm:$0xff]  ;;  %v8891_v62 = vld [vmem:[#allocation20 + $0x88] sm:$0xff] }
 0xbba   :  { %v17452_v23 = vcombine.high %v8890_v35, %v8894_v36 }
 0xbbc   :  { %8619 = vmatpush1.bf16.msra.mxu1 %v18725_v37  ;;  %8660 = vmatpush1.bf16.msra.mxu0 %v18726_v24  ;;  %v8895_v37 = vld [vmem:[#allocation20 + $0xa8] sm:$0xff]  ;;  %v17454_v24 = vcombine.low %v8890_v35, %v8894_v36 }
 0xbbd   :  { %8620 = vmatprep.subr.bf16.mxu1 %v18727_v46  ;;  %8661 = vmatprep.subr.bf16.mxu0 %v18728_v25  ;;  %v17456_v46 = vcombine.low %v8891_v62, %v8895_v37  ;;  %v17458_v25 = vcombine.high %v8891_v62, %v8895_v37  ;;  %v8939_v35 = vld [vmem:[#allocation20 + $0x208] sm:$0xff] }
 0xbbe   :  { %v8943_v37 = vld [vmem:[#allocation20 + $0x228] sm:$0xff] }
 0xbc0   :  { %8621 = vmatpush1.bf16.msra.mxu1 %v18729_v56  ;;  %8662 = vmatpush1.bf16.msra.mxu0 %v18730_v57  ;;  %v8898_v56 = vld [vmem:[#allocation20 + $0xc0] sm:$0xff] }
 0xbc1   :  { %8622 = vmatprep.subr.bf16.mxu1 %v18731_v3  ;;  %8663 = vmatprep.subr.bf16.mxu0 %v18732_v20  ;;  %v8902_v57 = vld [vmem:[#allocation20 + $0xe0] sm:$0xff]  ;;  %v8899_v3 = vld [vmem:[#allocation20 + $0xc8] sm:$0xff] }
 0xbc2   :  { %v17464_v20 = vcombine.high %v8898_v56, %v8902_v57 }
 0xbc4   :  { %8623 = vmatpush1.bf16.msra.mxu1 %v18733_v11  ;;  %8664 = vmatpush1.bf16.msra.mxu0 %v18734_v31  ;;  %v8903_v11 = vld [vmem:[#allocation20 + $0xe8] sm:$0xff]  ;;  %v17466_v31 = vcombine.low %v8898_v56, %v8902_v57  ;;  %v8946_v56 = vld [vmem:[#allocation20 + $0x240] sm:$0xff] }
 0xbc5   :  { %8624 = vmatprep.subr.bf16.mxu1 %v18735_v51  ;;  %8665 = vmatprep.subr.bf16.mxu0 %v18736_v49  ;;  %v17468_v51 = vcombine.low %v8899_v3, %v8903_v11  ;;  %v17470_v49 = vcombine.high %v8899_v3, %v8903_v11  ;;  %v8950_v57 = vld [vmem:[#allocation20 + $0x260] sm:$0xff]  ;;  %v17528_v3 = vcombine.low %v8939_v35, %v8943_v37 }
 0xbc6   :  { %v17530_v11 = vcombine.high %v8939_v35, %v8943_v37 }
 0xbc7   :  { %18764 = vst [vmem:[#allocation39_spill] sm:$0xff] %v17528_v3 }
 0xbc8   :  { %8625 = vmatpush1.bf16.msra.mxu1 %v18737_v18  ;;  %8666 = vmatpush1.bf16.msra.mxu0 %v18738_v43  ;;  %v8906_v18 = vld [vmem:[#allocation20 + $0x100] sm:$0xff]  ;;  %18765 = vst [vmem:[#allocation40_spill] sm:$0xff] %v17530_v11 }
 0xbc9   :  { %8626 = vmatprep.subr.bf16.mxu1 %v18739_v53  ;;  %8667 = vmatprep.subr.bf16.mxu0 %v18740_v45  ;;  %v8910_v43 = vld [vmem:[#allocation20 + $0x120] sm:$0xff]  ;;  %v8907_v53 = vld [vmem:[#allocation20 + $0x108] sm:$0xff] }
 0xbca   :  { %v17476_v45 = vcombine.high %v8906_v18, %v8910_v43 }
 0xbcc   :  { %8627 = vmatpush1.bf16.msra.mxu1 %v18741_v41  ;;  %8668 = vmatpush1.bf16.msra.mxu0 %v18742_v5  ;;  %v8911_v41 = vld [vmem:[#allocation20 + $0x128] sm:$0xff]  ;;  %v17478_v5 = vcombine.low %v8906_v18, %v8910_v43  ;;  %v17532_v18 = vcombine.high %v8946_v56, %v8950_v57 }
 0xbcd   :  { %8628 = vmatprep.subr.bf16.mxu1 %v18743_v1  ;;  %8669 = vmatprep.subr.bf16.mxu0 %v18744_v9  ;;  %v17480_v1 = vcombine.low %v8907_v53, %v8911_v41  ;;  %v17482_v9 = vcombine.high %v8907_v53, %v8911_v41  ;;  %v8947_v43 = vld [vmem:[#allocation20 + $0x248] sm:$0xff]  ;;  %v8954_v41 = vld [vmem:[#allocation20 + $0x280] sm:$0xff] }
 0xbce   :  { %18766 = vst [vmem:[#allocation44_spill] sm:$0xff] %v17532_v18  ;;  %v8951_v53 = vld [vmem:[#allocation20 + $0x268] sm:$0xff] }
 0xbd0   :  { %8629 = vmatpush1.bf16.msra.mxu1 %v18745_v55  ;;  %8670 = vmatpush1.bf16.msra.mxu0 %v18746_v15  ;;  %v8914_v55 = vld [vmem:[#allocation20 + $0x140] sm:$0xff] }
 0xbd1   :  { %8630 = vmatprep.subr.bf16.mxu1 %v18747_v14  ;;  %8671 = vmatprep.subr.bf16.mxu0 %v18748_v30  ;;  %v8918_v15 = vld [vmem:[#allocation20 + $0x160] sm:$0xff]  ;;  %v8915_v14 = vld [vmem:[#allocation20 + $0x148] sm:$0xff] }
 0xbd2   :  { %v17488_v30 = vcombine.high %v8914_v55, %v8918_v15 }
 0xbd4   :  { %8631 = vmatpush1.bf16.msra.mxu1 %v18749_v10  ;;  %8672 = vmatpush1.bf16.msra.mxu0 %v18750_v52  ;;  %v8919_v10 = vld [vmem:[#allocation20 + $0x168] sm:$0xff]  ;;  %v17490_v52 = vcombine.low %v8914_v55, %v8918_v15  ;;  %v17535_v55 = vcombine.high %v8947_v43, %v8951_v53  ;;  %v8958_v15 = vld [vmem:[#allocation20 + $0x2a0] sm:$0xff] }
 0xbd5   :  { %8632 = vmatprep.subr.bf16.mxu1 %v18751_v33  ;;  %8673 = vmatprep.subr.bf16.mxu0 %v18752_v8  ;;  %v17492_v33 = vcombine.low %v8915_v14, %v8919_v10  ;;  %v17494_v8 = vcombine.high %v8915_v14, %v8919_v10  ;;  %v8955_v14 = vld [vmem:[#allocation20 + $0x288] sm:$0xff] }
 0xbd6   :  { %18767 = vst [vmem:[#allocation41_spill] sm:$0xff] %v17535_v55  ;;  %v8959_v10 = vld [vmem:[#allocation20 + $0x2a8] sm:$0xff] }
 0xbd8   :  { %8633 = vmatpush1.bf16.msra.mxu1 %v18753_v13  ;;  %8674 = vmatpush1.bf16.msra.mxu0 %v18754_v32  ;;  %v8922_v13 = vld [vmem:[#allocation20 + $0x180] sm:$0xff] }
 0xbd9   :  { %8634 = vmatprep.subr.bf16.mxu1 %v18755_v54  ;;  %8675 = vmatprep.subr.bf16.mxu0 %v18756_v50  ;;  %v8926_v32 = vld [vmem:[#allocation20 + $0x1a0] sm:$0xff]  ;;  %v8923_v54 = vld [vmem:[#allocation20 + $0x188] sm:$0xff] }
 0xbda   :  { %v17500_v50 = vcombine.high %v8922_v13, %v8926_v32 }
 0xbdc   :  { %8635 = vmatpush1.bf16.msra.mxu1 %v18757_v38  ;;  %8676 = vmatpush1.bf16.msra.mxu0 %v18758_v0  ;;  %v8927_v38 = vld [vmem:[#allocation20 + $0x1a8] sm:$0xff]  ;;  %v17502_v0 = vcombine.low %v8922_v13, %v8926_v32  ;;  %v17539_v13 = vcombine.low %v8946_v56, %v8950_v57  ;;  %v17543_v32 = vcombine.low %v8947_v43, %v8951_v53  ;;  %v8970_v56 = vld [vmem:[#allocation20 + $0x300] sm:$0xff] }
 0xbdd   :  { %8636 = vmatprep.subr.bf16.mxu1 %v18759_v4  ;;  %8677 = vmatprep.subr.bf16.mxu0 %v18760_v6  ;;  %v17504_v4 = vcombine.low %v8923_v54, %v8927_v38  ;;  %v17506_v6 = vcombine.high %v8923_v54, %v8927_v38  ;;  %v17545_v54 = vcombine.high %v8954_v41, %v8958_v15  ;;  %v8974_v57 = vld [vmem:[#allocation20 + $0x320] sm:$0xff]  ;;  %v8971_v43 = vld [vmem:[#allocation20 + $0x308] sm:$0xff] }
 0xbde   :  { %18768 = vst [vmem:[#allocation43_spill] sm:$0xff] %v17539_v13  ;;  %18769 = vst [vmem:[#allocation45_spill] sm:$0xff] %v17543_v32  ;;  %v17548_v38 = vcombine.high %v8955_v14, %v8959_v10  ;;  %v8975_v53 = vld [vmem:[#allocation20 + $0x328] sm:$0xff] }
 0xbdf   :  { %18770 = vst [vmem:[#allocation46_spill] sm:$0xff] %v17545_v54 }
 0xbe0   :  { %8637 = vmatpush1.bf16.msra.mxu1 %v17222_v44  ;;  %8678 = vmatpush1.bf16.msra.mxu0 %v17224_v26  ;;  %v8874_v44 = vld [vmem:[#allocation20] sm:$0xff]  ;;  %18771 = vst [vmem:[#allocation47_spill] sm:$0xff] %v17548_v38 }
 0xbe1   :  { %8638 = vmatprep.subr.bf16.mxu1 %v17228_v29  ;;  %8679 = vmatprep.subr.bf16.mxu0 %v18761_v7  ;;  %v8878_v26 = vld [vmem:[#allocation20 + $0x20] sm:$0xff]  ;;  %v8875_v29 = vld [vmem:[#allocation20 + $0x8] sm:$0xff] }
 0xbe2   :  { %v8930_v7 = vld [vmem:[#allocation20 + $0x1c0] sm:$0xff] }
 0xbe4   :  { %8639 = vmatpush1.bf16.msra.mxu1 %v18762_v63  ;;  %8680 = vmatpush1.bf16.msra.mxu0 %v17236_v47  ;;  %v17428_v47 = vcombine.high %v8874_v44, %v8878_v26  ;;  %v8934_v63 = vld [vmem:[#allocation20 + $0x1e0] sm:$0xff] }
 0xbe5   :  { %8640 = vmatprep.subr.bf16.mxu1 %v17240_v21  ;;  %8681 = vmatprep.subr.bf16.mxu0 %v17242_v48  ;;  %v8879_v21 = vld [vmem:[#allocation20 + $0x28] sm:$0xff]  ;;  %v17430_v48 = vcombine.low %v8874_v44, %v8878_v26  ;;  %v17512_v26 = vcombine.high %v8930_v7, %v8934_v63 }
 0xbe6   :  { %v8931_v44 = vld [vmem:[#allocation20 + $0x1c8] sm:$0xff] }
 0xbe8   :  { %8641 = vmatpush1.bf16.msra.mxu1 %v17246_v16  ;;  %8682 = vmatpush1.bf16.msra.mxu0 %v17248_v59  ;;  %v17432_v16 = vcombine.low %v8875_v29, %v8879_v21  ;;  %v17434_v59 = vcombine.high %v8875_v29, %v8879_v21  ;;  %v8935_v29 = vld [vmem:[#allocation20 + $0x1e8] sm:$0xff]  ;;  %v17514_v21 = vcombine.low %v8930_v7, %v8934_v63  ;;  %v8962_v7 = vld [vmem:[#allocation20 + $0x2c0] sm:$0xff] }
 0xbe9   :  { %8642 = vmatprep.subr.bf16.mxu1 %v17252_v60  ;;  %8683 = vmatprep.subr.bf16.mxu0 %v17254_v61  ;;  %v8883_v60 = vld [vmem:[#allocation20 + $0x48] sm:$0xff]  ;;  %v8966_v63 = vld [vmem:[#allocation20 + $0x2e0] sm:$0xff] }
 0xbea   :  { %v17557_v35 = vcombine.high %v8962_v7, %v8966_v63 }
 0xbec   :  { %8643 = vmatpush1.bf16.msra.mxu1 %v17258_v12  ;;  %8684 = vmatpush1.bf16.msra.mxu0 %v17260_v42  ;;  %v8882_v12 = vld [vmem:[#allocation20 + $0x40] sm:$0xff]  ;;  %18774 = vst [vmem:[#allocation50_spill] sm:$0xff] %v17557_v35 }
 0xbed   :  { %9658 = vmatprep.subr.bf16.mxu1 %v17428_v47  ;;  %9699 = vmatprep.subr.bf16.mxu0 %v17434_v59  ;;  %v8886_v42 = vld [vmem:[#allocation20 + $0x60] sm:$0xff] }
 0xbee   :  { %v17440_v61 = vcombine.high %v8882_v12, %v8886_v42  ;;  %v17442_v17 = vcombine.low %v8882_v12, %v8886_v42  ;;  %v17516_v12 = vcombine.low %v8931_v44, %v8935_v29  ;;  %v17518_v42 = vcombine.high %v8931_v44, %v8935_v29  ;;  %v8963_v44 = vld [vmem:[#allocation20 + $0x2c8] sm:$0xff] }
 0xbef   :  { %8645 = vmatmul.mubr.bf16.vlgmr.msra.gmra.mrb[52].mxu1 %v17360_v34  ;;  %8686 = vmatmul.mubr.bf16.vlgmr.msra.gmra.mrb[60].mxu0 %v17360_v34  ;;  %v8887_v34 = vld [vmem:[#allocation20 + $0x68] sm:$0xff] }
 0xbf0   :  { %9659 = vmatpush1.bf16.msra.mxu1 %v17430_v48  ;;  %9700 = vmatpush1.bf16.msra.mxu0 %v17432_v16  ;;  %v17444_v19 = vcombine.low %v8883_v60, %v8887_v34  ;;  %v17446_v27 = vcombine.high %v8883_v60, %v8887_v34  ;;  %v8938_v60 = vld [vmem:[#allocation20 + $0x200] sm:$0xff]  ;;  %v8967_v29 = vld [vmem:[#allocation20 + $0x2e8] sm:$0xff] }
 0xbf1   :  { %9660 = vmatprep.subr.bf16.mxu1 %v17440_v61  ;;  %v8942_v34 = vld [vmem:[#allocation20 + $0x220] sm:$0xff]  ;;  %v17560_v37 = vcombine.high %v8963_v44, %v8967_v29 }
 0xbf2   :  { %9701 = vmatprep.subr.bf16.mxu0 %v17446_v27  ;;  %v17524_v36 = vcombine.low %v8938_v60, %v8942_v34  ;;  %v17526_v62 = vcombine.high %v8938_v60, %v8942_v34  ;;  %v17551_v60 = vcombine.low %v8954_v41, %v8958_v15  ;;  %v17555_v34 = vcombine.low %v8955_v14, %v8959_v10 }
 0xbf3   :  { %18775 = vst [vmem:[#allocation51_spill] sm:$0xff] %v17560_v37  ;;  %v17563_v41 = vcombine.low %v8962_v7, %v8966_v63  ;;  %v17567_v15 = vcombine.low %v8963_v44, %v8967_v29  ;;  %v17569_v14 = vcombine.high %v8970_v56, %v8974_v57  ;;  %v17572_v10 = vcombine.high %v8971_v43, %v8975_v53 }
 0xbf4   :  { %9661 = vmatpush1.bf16.msra.mxu1 %v17442_v17  ;;  %9702 = vmatpush1.bf16.msra.mxu0 %v17444_v19  ;;  %18763 = vst [vmem:[#allocation42_spill] sm:$0xff] %v17524_v36  ;;  %18772 = vst [vmem:[#allocation48_spill] sm:$0xff] %v17551_v60  ;;  %v17575_v7 = vcombine.low %v8970_v56, %v8974_v57  ;;  %v17579_v63 = vcombine.low %v8971_v43, %v8975_v53 }
 0xbf5   :  { %9662 = vmatprep.subr.bf16.mxu1 %v17452_v23  ;;  %9703 = vmatprep.subr.bf16.mxu0 %v17458_v25  ;;  %18773 = vst [vmem:[#allocation49_spill] sm:$0xff] %v17555_v34  ;;  %18776 = vst [vmem:[#allocation52_spill] sm:$0xff] %v17563_v41 }
 0xbf6   :  { %18777 = vst [vmem:[#allocation53_spill] sm:$0xff] %v17567_v15  ;;  %18778 = vst [vmem:[#allocation54_spill] sm:$0xff] %v17569_v14 }
 0xbf7   :  { %18779 = vst [vmem:[#allocation55_spill] sm:$0xff] %v17572_v10  ;;  %18780 = vst [vmem:[#allocation56_spill] sm:$0xff] %v17575_v7 }
 0xbf8   :  { %9663 = vmatpush1.bf16.msra.mxu1 %v17454_v24  ;;  %9704 = vmatpush1.bf16.msra.mxu0 %v17456_v46  ;;  %18781 = vst [vmem:[#allocation57_spill] sm:$0xff] %v17579_v63 }
 0xbf9   :  { %9664 = vmatprep.subr.bf16.mxu1 %v17464_v20  ;;  %9705 = vmatprep.subr.bf16.mxu0 %v17470_v49 }
 0xbfc   :  { %9665 = vmatpush1.bf16.msra.mxu1 %v17466_v31  ;;  %9706 = vmatpush1.bf16.msra.mxu0 %v17468_v51 }
 0xbfd   :  { %9666 = vmatprep.subr.bf16.mxu1 %v17476_v45  ;;  %9707 = vmatprep.subr.bf16.mxu0 %v17482_v9 }
 0xc00   :  { %9667 = vmatpush1.bf16.msra.mxu1 %v17478_v5  ;;  %9708 = vmatpush1.bf16.msra.mxu0 %v17480_v1 }
 0xc01   :  { %9668 = vmatprep.subr.bf16.mxu1 %v17488_v30  ;;  %9709 = vmatprep.subr.bf16.mxu0 %v17494_v8 }
 0xc04   :  { %9669 = vmatpush1.bf16.msra.mxu1 %v17490_v52  ;;  %9710 = vmatpush1.bf16.msra.mxu0 %v17492_v33 }
 0xc05   :  { %9670 = vmatprep.subr.bf16.mxu1 %v17500_v50  ;;  %9711 = vmatprep.subr.bf16.mxu0 %v17506_v6 }
 0xc08   :  { %9671 = vmatpush1.bf16.msra.mxu1 %v17502_v0  ;;  %9712 = vmatpush1.bf16.msra.mxu0 %v17504_v4 }
 0xc09   :  { %9672 = vmatprep.subr.bf16.mxu1 %v17512_v26  ;;  %9713 = vmatprep.subr.bf16.mxu0 %v17518_v42 }
 0xc0c   :  { %9673 = vmatpush1.bf16.msra.mxu1 %v17514_v21  ;;  %9714 = vmatpush1.bf16.msra.mxu0 %v17516_v12 }
 0xc0d   :  { %9674 = vmatprep.subr.bf16.mxu1 %v17526_v62  ;;  %9715 = vmatprep.subr.bf16.mxu0 %v17530_v11 }
 0xc10   :  { %9675 = vmatpush1.bf16.msra.mxu1 %v17524_v36  ;;  %9716 = vmatpush1.bf16.msra.mxu0 %v17528_v3 }
 0xc11   :  { %9676 = vmatprep.subr.bf16.mxu1 %v17532_v18  ;;  %9717 = vmatprep.subr.bf16.mxu0 %v17535_v55 }
 0xc14   :  { %9677 = vmatpush1.bf16.msra.mxu1 %v17539_v13  ;;  %9718 = vmatpush1.bf16.msra.mxu0 %v17543_v32  ;;  %v8979_v32 = vld [vmem:[#allocation20 + $0x348] sm:$0xff] }
 0xc15   :  { %9678 = vmatprep.subr.bf16.mxu1 %v17545_v54  ;;  %9719 = vmatprep.subr.bf16.mxu0 %v17548_v38  ;;  %v8978_v38 = vld [vmem:[#allocation20 + $0x340] sm:$0xff]  ;;  %v8983_v13 = vld [vmem:[#allocation20 + $0x368] sm:$0xff] }
 0xc16   :  { %v8982_v54 = vld [vmem:[#allocation20 + $0x360] sm:$0xff]  ;;  %v17584_v29 = vcombine.high %v8979_v32, %v8983_v13  ;;  %v17591_v57 = vcombine.low %v8979_v32, %v8983_v13 }
 0xc17   :  { %v17581_v44 = vcombine.high %v8978_v38, %v8982_v54  ;;  %v17587_v56 = vcombine.low %v8978_v38, %v8982_v54 }
 0xc18   :  { %9679 = vmatpush1.bf16.msra.mxu1 %v17551_v60  ;;  %9720 = vmatpush1.bf16.msra.mxu0 %v17555_v34  ;;  %18783 = vst [vmem:[#allocation59_spill] sm:$0xff] %v17584_v29  ;;  %v8987_v34 = vld [vmem:[#allocation20 + $0x388] sm:$0xff]  ;;  %18785 = vst [vmem:[#allocation62_spill] sm:$0xff] %v17591_v57 }
 0xc19   :  { %9680 = vmatprep.subr.bf16.mxu1 %v17557_v35  ;;  %9721 = vmatprep.subr.bf16.mxu0 %v17560_v37  ;;  %18782 = vst [vmem:[#allocation58_spill] sm:$0xff] %v17581_v44  ;;  %v8986_v37 = vld [vmem:[#allocation20 + $0x380] sm:$0xff]  ;;  %v8991_v60 = vld [vmem:[#allocation20 + $0x3a8] sm:$0xff]  ;;  %18784 = vst [vmem:[#allocation60_spill] sm:$0xff] %v17587_v56 }
 0xc1a   :  { %v8990_v35 = vld [vmem:[#allocation20 + $0x3a0] sm:$0xff]  ;;  %v17596_v53 = vcombine.high %v8987_v34, %v8991_v60  ;;  %v17603_v13 = vcombine.low %v8987_v34, %v8991_v60  ;;  %v8876_v34 = vld [vmem:[#allocation20 + $0x10] sm:$0xff] }
 0xc1b   :  { %v17593_v43 = vcombine.high %v8986_v37, %v8990_v35  ;;  %v17599_v54 = vcombine.low %v8986_v37, %v8990_v35 }
 0xc1c   :  { %9681 = vmatpush1.bf16.msra.mxu1 %v17563_v41  ;;  %9722 = vmatpush1.bf16.msra.mxu0 %v17567_v15  ;;  %18787 = vst [vmem:[#allocation64_spill] sm:$0xff] %v17596_v53  ;;  %v8995_v15 = vld [vmem:[#allocation20 + $0x3c8] sm:$0xff]  ;;  %18789 = vst [vmem:[#allocation66_spill] sm:$0xff] %v17603_v13 }
 0xc1d   :  { %9682 = vmatprep.subr.bf16.mxu1 %v17569_v14  ;;  %9723 = vmatprep.subr.bf16.mxu0 %v17572_v10  ;;  %18786 = vst [vmem:[#allocation63_spill] sm:$0xff] %v17593_v43  ;;  %v8994_v10 = vld [vmem:[#allocation20 + $0x3c0] sm:$0xff]  ;;  %v8999_v41 = vld [vmem:[#allocation20 + $0x3e8] sm:$0xff]  ;;  %18788 = vst [vmem:[#allocation65_spill] sm:$0xff] %v17599_v54 }
 0xc1e   :  { %v8998_v14 = vld [vmem:[#allocation20 + $0x3e0] sm:$0xff]  ;;  %v17608_v36 = vcombine.high %v8995_v15, %v8999_v41 }
 0xc1f   :  { %v17605_v32 = vcombine.high %v8994_v10, %v8998_v14  ;;  %v17613_v60 = vcombine.low %v8994_v10, %v8998_v14  ;;  %v8881_v14 = vld [vmem:[#allocation20 + $0x38] sm:$0xff] }
 0xc20   :  { %9683 = vmatpush1.bf16.msra.mxu1 %v17575_v7  ;;  %9724 = vmatpush1.bf16.msra.mxu0 %v17579_v63  ;;  %18791 = vst [vmem:[#allocation68_spill] sm:$0xff] %v17608_v36 }
 0xc21   :  { %9684 = vmatprep.subr.bf16.mxu1 %v17581_v44  ;;  %9725 = vmatprep.subr.bf16.mxu0 %v17584_v29  ;;  %18790 = vst [vmem:[#allocation67_spill] sm:$0xff] %v17605_v32  ;;  %18792 = vst [vmem:[#allocation69_spill] sm:$0xff] %v17613_v60 }
 0xc24   :  { %9685 = vmatpush1.bf16.msra.mxu1 %v17587_v56  ;;  %9726 = vmatpush1.bf16.msra.mxu0 %v17591_v57 }
 0xc25   :  { %9686 = vmatprep.subr.bf16.mxu1 %v17593_v43  ;;  %9727 = vmatprep.subr.bf16.mxu0 %v17596_v53 }
 0xc28   :  { %9687 = vmatpush1.bf16.msra.mxu1 %v17599_v54  ;;  %9728 = vmatpush1.bf16.msra.mxu0 %v17603_v13  ;;  %v7714_v13 = vld [vmem:[#allocation3 + $0x4] ss:$8 sm:$0xf0] }
 0xc29   :  { %9688 = vmatprep.subr.bf16.mxu1 %v17605_v32  ;;  %9729 = vmatprep.subr.bf16.mxu0 %v17608_v36 }
 0xc2c   :  { %9689 = vmatpush1.bf16.msra.mxu1 %v17613_v60 }
 0xc82   :  { %v8564_v55 = vpop.f32.mrb[48].mxu1  ;;  %v8605_v7 = vpop.f32.mrb[56].mxu0 }
 0xc83   :  { %v8566_v38 = vpop.f32.mrb[49].mxu1  ;;  %v8607_v44 = vpop.f32.mrb[57].mxu0 }
 0xc84   :  { %v8702_v29 = vcombine.low %v8564_v55, %v8566_v38  ;;  %v8703_v63 = vcombine.low %v8605_v7, %v8607_v44  ;;  %v8568_v18 = vpop.f32.mrb[50].mxu1  ;;  %v8609_v3 = vpop.f32.mrb[58].mxu0  ;;  %v8880_v7 = vld [vmem:[#allocation20 + $0x30] sm:$0xff]  ;;  %v8877_v44 = vld [vmem:[#allocation20 + $0x18] sm:$0xff] }
 0xc85   :  { %v8569_v35 = vpop.f32.mrb[51].mxu1  ;;  %v8610_v37 = vpop.f32.mrb[59].mxu0  ;;  %v17617_v18 = vcombine.low %v8995_v15, %v8999_v41  ;;  %v17626_v10 = vcombine.low %v8877_v44, %v8881_v14  ;;  %v17628_v41 = vcombine.high %v8877_v44, %v8881_v14 }
 0xc86   :  { %v8712_v56 = vrot.slane %v8702_v29, %v18717_v28  ;;  %v8719_v57 = vrot.slane %v8703_v63, %v18717_v28  ;;  %v17621_v63 = vcombine.low %v8876_v34, %v8880_v7  ;;  %v17623_v29 = vcombine.high %v8876_v34, %v8880_v7 }
 0xc87   :  { %18793 = vst [vmem:[#allocation70_spill] sm:$0xff] %v17617_v18  ;;  %9730 = vmatpush1.bf16.msra.mxu0 %v17617_v18  ;;  %18795 = vst [vmem:[#allocation72_spill] sm:$0xff] %v17628_v41 }
 0xc88   :  { %v8734_v3 = vcombine.low %v8712_v56, %v8719_v57  ;;  %v8735_v55 = vcombine.high %v8712_v56, %v8719_v57  ;;  %18794 = vst [vmem:[#allocation71_spill] sm:$0xff] %v17623_v29  ;;  %9740 = vmatprep.subr.bf16.mxu1 %v17623_v29  ;;  %9781 = vmatprep.subr.bf16.mxu0 %v17628_v41  ;;  %v7718_v29 = vld [vmem:[#allocation3 + $0x44] ss:$8 sm:$0xf0] }
 0xc8a   :  { %v8744_v41 = vrot.slane %v8734_v3, %v18717_v28  ;;  %v8751_v54 = vrot.slane %v8735_v55, %v18717_v28 }
 0xcc2   :  { %v8646_v15 = vpop.f32.mrb[52].mxu1  ;;  %v8687_v56 = vpop.f32.mrb[60].mxu0 }
 0xcc3   :  { %v8648_v57 = vpop.f32.mrb[53].mxu1  ;;  %v8689_v38 = vpop.f32.mrb[61].mxu0 }
 0xcc4   :  { %v8704_v35 = vcombine.low %v8646_v15, %v8648_v57  ;;  %v8705_v37 = vcombine.low %v8687_v56, %v8689_v38  ;;  %v8650_v60 = vpop.f32.mrb[54].mxu1  ;;  %v8691_v34 = vpop.f32.mrb[62].mxu0  ;;  %v7717_v56 = vld [vmem:[#allocation3 + $0x44] ss:$8 sm:$0xf] }
 0xcc5   :  { %v8651_v7 = vpop.f32.mrb[55].mxu1  ;;  %v8692_v36 = vpop.f32.mrb[63].mxu0  ;;  %v7713_v60 = vld [vmem:[#allocation3 + $0x4] ss:$8 sm:$0xf] }
 0xcc6   :  { %v8726_v18 = vrot.slane %v8704_v35, %v18717_v28  ;;  %v8733_v32 = vrot.slane %v8705_v37, %v18717_v28  ;;  %v7715_v57 = vor.u32 %v7714_v13, %v7713_v60  ;;  %v7719_v36 = vor.u32 %v7718_v29, %v7717_v56 }
 0xcc8   :  { %v8736_v44 = vcombine.low %v8726_v18, %v8733_v32  ;;  %v8737_v14 = vcombine.high %v8726_v18, %v8733_v32 }
 0xcca   :  { %v8758_v53 = vrot.slane %v8736_v44, %v18717_v28  ;;  %v8765_v15 = vrot.slane %v8737_v14, %v18717_v28 }
 0xccc   :  { %v8766_v38 = vcombine.low %v8744_v41, %v8758_v53  ;;  %v8767_v35 = vcombine.low %v8751_v54, %v8765_v15 }
 0xcce   :  { %v8770_v34 = vadd.f32 %v8766_v38, %v7715_v57  ;;  %v8771_v37 = vadd.f32 %v8767_v35, %v7719_v36 }
 0xcd0   :  { %v14119_v7 = vmul.f32 -1.442695, %v8770_v34  ;;  %v14120_v32 = vmul.f32 -1.442695, %v8771_v37  ;;  %v8786_v18 = vrot.slane %v8770_v34, 2  ;;  %v8787_v43 = vrot.slane %v8771_v37, 2 }
 0xcd1   :  { %v8808_v55 = vrot.slane %v8770_v34, 6  ;;  %v8809_v44 = vrot.slane %v8771_v37, 6  ;;  %v8802_v14 = vrot.slane %v8770_v34, 4  ;;  %v8803_v28 = vrot.slane %v8771_v37, 4 }
 0xcd2   :  { %15300 = vpow2.f32 %v14119_v7  ;;  %v14121_v3 = vmul.f32 -1.442695, %v8786_v18  ;;  %v14122_v11 = vmul.f32 -1.442695, %v8787_v43 }
 0xcd3   :  { %15302 = vpow2.f32 %v14120_v32  ;;  %v14123_v13 = vmul.f32 -1.442695, %v8808_v55  ;;  %v14124_v29 = vmul.f32 -1.442695, %v8809_v44 }
 0xcd4   :  { %15304 = vpow2.f32 %v14121_v3 }
 0xcd5   :  { %15306 = vpow2.f32 %v14122_v11 }
 0xcd6   :  { %15308 = vtanh.f32 %v8802_v14 }
 0xcd7   :  { %15310 = vtanh.f32 %v8803_v28 }
 0xcd8   :  { %15312 = vpow2.f32 %v14123_v13 }
 0xcd9   :  { %15314 = vpow2.f32 %v14124_v29 }
 0xcdc   :  { %v15301_v53 = vpop.eup %15300 }
 0xcdd   :  { %v15303_v54 = vpop.eup %15302  ;;  %v8778_v41 = vadd.f32 1.0, %v15301_v53 }
 0xcde   :  { %v15305_v15 = vpop.eup %15304  ;;  %v8779_v60 = vadd.f32 1.0, %v15303_v54 }
 0xcdf   :  { %v15307_v56 = vpop.eup %15306  ;;  %15316 = vrcp.f32 %v8778_v41  ;;  %v8796_v43 = vadd.f32 1.0, %v15305_v15 }
 0xce0   :  { %15318 = vrcp.f32 %v8779_v60  ;;  %v8797_v11 = vadd.f32 1.0, %v15307_v56  ;;  %v15309_v57 = vpop.eup %15308 }
 0xce1   :  { %15320 = vrcp.f32 %v8796_v43  ;;  %v15311_v36 = vpop.eup %15310 }
 0xce2   :  { %15322 = vrcp.f32 %v8797_v11  ;;  %v15313_v38 = vpop.eup %15312 }
 0xce3   :  { %v15315_v35 = vpop.eup %15314  ;;  %v8818_v28 = vadd.f32 1.0, %v15313_v38 }
 0xce4   :  { %v8819_v32 = vadd.f32 1.0, %v15315_v35 }
 0xce5   :  { %15324 = vrcp.f32 %v8818_v28 }
 0xce6   :  { %15326 = vrcp.f32 %v8819_v32 }
 0xce9   :  { %v15317_v34 = vpop.eup %15316 }
 0xcea   :  { %v15319_v37 = vpop.eup %15318  ;;  %v8826_v3 = vmul.f32 %v15317_v34, %v15309_v57 }
 0xceb   :  { %v15321_v7 = vpop.eup %15320  ;;  %v8827_v44 = vmul.f32 %v15319_v37, %v15311_v36 }
 0xcec   :  { %v15323_v18 = vpop.eup %15322  ;;  %v8824_v55 = vmul.f32 %v15321_v7, %v17344_v58 }
 0xced   :  { %v8825_v14 = vmul.f32 %v15323_v18, %v17346_v22 }
 0xcee   :  { %v17640_v13 = vadd.f32 %v8826_v3, %v8824_v55  ;;  %v8884_v3 = vld [vmem:[#allocation20 + $0x50] sm:$0xff] }
 0xcef   :  { %v17642_v29 = vadd.f32 %v8827_v44, %v8825_v14  ;;  %v15325_v53 = vpop.eup %15324  ;;  %v8888_v14 = vld [vmem:[#allocation20 + $0x70] sm:$0xff] }
 0xcf0   :  { %15328 = vtanh.f32 %v17640_v13  ;;  %v15327_v54 = vpop.eup %15326 }
 0xcf1   :  { %15330 = vtanh.f32 %v17642_v29 }
 0xcfa   :  { %v15329_v41 = vpop.eup %15328 }
 0xcfb   :  { %v15331_v15 = vpop.eup %15330  ;;  %v8832_v60 = vmul.f32 %v15329_v41, %v15325_v53  ;;  %v8885_v53 = vld [vmem:[#allocation20 + $0x58] sm:$0xff] }
 0xcfc   :  { %v8833_v56 = vmul.f32 %v15331_v15, %v15327_v54  ;;  %v8889_v54 = vld [vmem:[#allocation20 + $0x78] sm:$0xff] }
 0xcfd   :  { %8835 = vst.msk [vmem:[#allocation4 + $0x4] ss:$8 sm:$0x3] %vm16143_vm1, %v8832_v60  ;;  %v8857_v58 = vrot.slane %v8832_v60, %v16192_v40  ;;  %v8853_v22 = vrot.slane %v8832_v60, %v16189_v39  ;;  %v8892_v60 = vld [vmem:[#allocation20 + $0x90] sm:$0xff] }
 0xcfe   :  { %8838 = vst.msk [vmem:[#allocation4 + $0x14] ss:$8 sm:$0x3] %vm16143_vm1, %v8833_v56  ;;  %v8865_v43 = vrot.slane %v8833_v56, %v16192_v40  ;;  %v8861_v11 = vrot.slane %v8833_v56, %v16189_v39  ;;  %v17658_v56 = vcombine.high %v8884_v3, %v8888_v14 }
 0xcff   :  { %v8871_v57 = vpack.c.bf16 %v8857_v58, %v8857_v58  ;;  %v8870_v38 = vpack.c.bf16 %v8853_v22, %v8853_v22  ;;  %v17660_v58 = vcombine.high %v8885_v53, %v8889_v54  ;;  %v8896_v22 = vld [vmem:[#allocation20 + $0xb0] sm:$0xff] }
 0xd00   :  { %v8873_v36 = vpack.c.bf16 %v8865_v43, %v8865_v43  ;;  %v8872_v35 = vpack.c.bf16 %v8861_v11, %v8861_v11  ;;  %v8893_v43 = vld [vmem:[#allocation20 + $0x98] sm:$0xff] }
 0xd01   :  { %v9007_v28 = vunpack.c.l.b16 %v8871_v57  ;;  %v9006_v32 = vunpack.c.l.b16 %v8870_v38  ;;  %v8897_v11 = vld [vmem:[#allocation20 + $0xb8] sm:$0xff]  ;;  %v17666_v57 = vcombine.low %v8884_v3, %v8888_v14  ;;  %v17670_v38 = vcombine.high %v8892_v60, %v8896_v22  ;;  %v8912_v14 = vld [vmem:[#allocation20 + $0x130] sm:$0xff] }
 0xd02   :  { %v9009_v34 = vunpack.c.l.b16 %v8873_v36  ;;  %v9008_v37 = vunpack.c.l.b16 %v8872_v35  ;;  %v17668_v36 = vcombine.low %v8885_v53, %v8889_v54  ;;  %v17672_v35 = vcombine.high %v8893_v43, %v8897_v11  ;;  %v8909_v53 = vld [vmem:[#allocation20 + $0x118] sm:$0xff] }
 0xd03   :  { %18797 = vst [vmem:[#allocation74_spill] sm:$0xff] %v17670_v38  ;;  %v8913_v54 = vld [vmem:[#allocation20 + $0x138] sm:$0xff] }
 0xd04   :  { %v9012_v7 = vrot.slane %v9009_v34, 7  ;;  %v9010_v18 = vrot.slane %v9008_v37, 7  ;;  %18796 = vst [vmem:[#allocation73_spill] sm:$0xff] %v17668_v36  ;;  %18798 = vst [vmem:[#allocation75_spill] sm:$0xff] %v17672_v35  ;;  %v8900_v34 = vld [vmem:[#allocation20 + $0xd0] sm:$0xff] }
 0xd05   :  { %v8904_v37 = vld [vmem:[#allocation20 + $0xf0] sm:$0xff] }
 0xd06   :  { %v9013_v55 = vsel %vm4498_vm3, %v9012_v7, %v9007_v28  ;;  %v9011_v44 = vsel %vm4498_vm3, %v9010_v18, %v9006_v32  ;;  %v8901_v28 = vld [vmem:[#allocation20 + $0xd8] sm:$0xff]  ;;  %v17678_v32 = vcombine.low %v8892_v60, %v8896_v22  ;;  %v17680_v18 = vcombine.low %v8893_v43, %v8897_v11  ;;  %v8916_v11 = vld [vmem:[#allocation20 + $0x150] sm:$0xff] }
 0xd07   :  { %v9015_v41 = vpack.c.b16 %v9013_v55, %v9013_v55  ;;  %v17656_v15 = vpack.c.b16 %v9011_v44, %v9011_v44  ;;  %v8905_v7 = vld [vmem:[#allocation20 + $0xf8] sm:$0xff]  ;;  %v17684_v3 = vcombine.high %v8900_v34, %v8904_v37  ;;  %v8908_v44 = vld [vmem:[#allocation20 + $0x110] sm:$0xff]  ;;  %v17698_v43 = vcombine.high %v8909_v53, %v8913_v54 }
 0xd08   :  { %18799 = vst [vmem:[#allocation76_spill] sm:$0xff] %v17678_v32  ;;  %18800 = vst [vmem:[#allocation77_spill] sm:$0xff] %v17680_v18  ;;  %v17686_v55 = vcombine.high %v8901_v28, %v8905_v7  ;;  %v17692_v60 = vcombine.low %v8901_v28, %v8905_v7  ;;  %v17696_v22 = vcombine.high %v8908_v44, %v8912_v14 }
 0xd09   :  { %9690 = vmatprep.mubr.bf16.mxu1 %v9015_v41  ;;  %9731 = vmatprep.mubr.bf16.mxu0 %v9015_v41  ;;  %18801 = vst [vmem:[#allocation78_spill] sm:$0xff] %v17684_v3  ;;  %18806 = vst [vmem:[#allocation83_spill] sm:$0xff] %v17698_v43 }
 0xd0a   :  { %9691 = vmatmul.mubr.bf16.vlgmr.msra.gmra.mrb[56].mxu1 %v17656_v15  ;;  %9732 = vmatmul.mubr.bf16.vlgmr.msra.gmra.mrb[64].mxu0 %v17656_v15  ;;  %18802 = vst [vmem:[#allocation79_spill] sm:$0xff] %v17686_v55  ;;  %18804 = vst [vmem:[#allocation81_spill] sm:$0xff] %v17692_v60 }
 0xd0b   :  { %9741 = vmatpush1.bf16.msra.mxu1 %v17621_v63  ;;  %9782 = vmatpush1.bf16.msra.mxu0 %v17626_v10  ;;  %18805 = vst [vmem:[#allocation82_spill] sm:$0xff] %v17696_v22 }
 0xd0c   :  { %9772 = vmatprep.mubr.bf16.mxu1 %v9015_v41  ;;  %9813 = vmatprep.mubr.bf16.mxu0 %v9015_v41  ;;  %v17690_v41 = vcombine.low %v8900_v34, %v8904_v37  ;;  %v17702_v34 = vcombine.low %v8908_v44, %v8912_v14  ;;  %v17704_v37 = vcombine.low %v8909_v53, %v8913_v54 }
 0xd0d   :  { %9742 = vmatprep.subr.bf16.mxu1 %v17658_v56  ;;  %9783 = vmatprep.subr.bf16.mxu0 %v17660_v58 }
 0xd0e   :  { %18803 = vst [vmem:[#allocation80_spill] sm:$0xff] %v17690_v41  ;;  %18807 = vst [vmem:[#allocation84_spill] sm:$0xff] %v17702_v34 }
 0xd0f   :  { %9743 = vmatpush1.bf16.msra.mxu1 %v17666_v57  ;;  %9784 = vmatpush1.bf16.msra.mxu0 %v17668_v36  ;;  %v8921_v36 = vld [vmem:[#allocation20 + $0x178] sm:$0xff]  ;;  %18808 = vst [vmem:[#allocation85_spill] sm:$0xff] %v17704_v37 }
 0xd10   :  { %9744 = vmatprep.subr.bf16.mxu1 %v17670_v38  ;;  %9785 = vmatprep.subr.bf16.mxu0 %v17672_v35  ;;  %v8920_v35 = vld [vmem:[#allocation20 + $0x170] sm:$0xff]  ;;  %v8917_v38 = vld [vmem:[#allocation20 + $0x158] sm:$0xff] }
 0xd11   :  { %v17708_v28 = vcombine.high %v8916_v11, %v8920_v35  ;;  %v17710_v7 = vcombine.high %v8917_v38, %v8921_v36  ;;  %v17714_v44 = vcombine.low %v8916_v11, %v8920_v35  ;;  %v17716_v14 = vcombine.low %v8917_v38, %v8921_v36 }
 0xd13   :  { %9745 = vmatpush1.bf16.msra.mxu1 %v17678_v32  ;;  %9786 = vmatpush1.bf16.msra.mxu0 %v17680_v18  ;;  %18809 = vst [vmem:[#allocation86_spill] sm:$0xff] %v17708_v28  ;;  %18810 = vst [vmem:[#allocation87_spill] sm:$0xff] %v17710_v7  ;;  %v8925_v18 = vld [vmem:[#allocation20 + $0x198] sm:$0xff] }
 0xd14   :  { %9746 = vmatprep.subr.bf16.mxu1 %v17684_v3  ;;  %9787 = vmatprep.subr.bf16.mxu0 %v17686_v55  ;;  %v8924_v55 = vld [vmem:[#allocation20 + $0x190] sm:$0xff]  ;;  %v8929_v32 = vld [vmem:[#allocation20 + $0x1b8] sm:$0xff]  ;;  %18811 = vst [vmem:[#allocation88_spill] sm:$0xff] %v17714_v44  ;;  %18812 = vst [vmem:[#allocation89_spill] sm:$0xff] %v17716_v14 }
 0xd15   :  { %v8928_v3 = vld [vmem:[#allocation20 + $0x1b0] sm:$0xff]  ;;  %v17722_v54 = vcombine.high %v8925_v18, %v8929_v32  ;;  %v17728_v36 = vcombine.low %v8925_v18, %v8929_v32 }
 0xd16   :  { %v17720_v53 = vcombine.high %v8924_v55, %v8928_v3  ;;  %v17726_v35 = vcombine.low %v8924_v55, %v8928_v3 }
 0xd17   :  { %9747 = vmatpush1.bf16.msra.mxu1 %v17690_v41  ;;  %9788 = vmatpush1.bf16.msra.mxu0 %v17692_v60  ;;  %18814 = vst [vmem:[#allocation91_spill] sm:$0xff] %v17722_v54  ;;  %v8933_v60 = vld [vmem:[#allocation20 + $0x1d8] sm:$0xff]  ;;  %18816 = vst [vmem:[#allocation93_spill] sm:$0xff] %v17728_v36 }
 0xd18   :  { %9748 = vmatprep.subr.bf16.mxu1 %v17696_v22  ;;  %9789 = vmatprep.subr.bf16.mxu0 %v17698_v43  ;;  %18813 = vst [vmem:[#allocation90_spill] sm:$0xff] %v17720_v53  ;;  %v8932_v43 = vld [vmem:[#allocation20 + $0x1d0] sm:$0xff]  ;;  %v8937_v41 = vld [vmem:[#allocation20 + $0x1f8] sm:$0xff]  ;;  %18815 = vst [vmem:[#allocation92_spill] sm:$0xff] %v17726_v35 }
 0xd19   :  { %v8936_v22 = vld [vmem:[#allocation20 + $0x1f0] sm:$0xff]  ;;  %v17734_v11 = vcombine.high %v8933_v60, %v8937_v41  ;;  %v17740_v32 = vcombine.low %v8933_v60, %v8937_v41 }
 0xd1a   :  { %v17732_v38 = vcombine.high %v8932_v43, %v8936_v22  ;;  %v17738_v3 = vcombine.low %v8932_v43, %v8936_v22 }
 0xd1b   :  { %9749 = vmatpush1.bf16.msra.mxu1 %v17702_v34  ;;  %9790 = vmatpush1.bf16.msra.mxu0 %v17704_v37  ;;  %18818 = vst [vmem:[#allocation95_spill] sm:$0xff] %v17734_v11  ;;  %v8941_v37 = vld [vmem:[#allocation20 + $0x218] sm:$0xff]  ;;  %18820 = vst [vmem:[#allocation97_spill] sm:$0xff] %v17740_v32 }
 0xd1c   :  { %9750 = vmatprep.subr.bf16.mxu1 %v17708_v28  ;;  %9791 = vmatprep.subr.bf16.mxu0 %v17710_v7  ;;  %18817 = vst [vmem:[#allocation94_spill] sm:$0xff] %v17732_v38  ;;  %v8940_v7 = vld [vmem:[#allocation20 + $0x210] sm:$0xff]  ;;  %v8945_v34 = vld [vmem:[#allocation20 + $0x238] sm:$0xff]  ;;  %18819 = vst [vmem:[#allocation96_spill] sm:$0xff] %v17738_v3 }
 0xd1d   :  { %v8944_v28 = vld [vmem:[#allocation20 + $0x230] sm:$0xff]  ;;  %v17746_v55 = vcombine.high %v8941_v37, %v8945_v34  ;;  %v17752_v41 = vcombine.low %v8941_v37, %v8945_v34 }
 0xd1e   :  { %v17744_v18 = vcombine.high %v8940_v7, %v8944_v28  ;;  %v17750_v22 = vcombine.low %v8940_v7, %v8944_v28 }
 0xd1f   :  { %9751 = vmatpush1.bf16.msra.mxu1 %v17714_v44  ;;  %9792 = vmatpush1.bf16.msra.mxu0 %v17716_v14  ;;  %18822 = vst [vmem:[#allocation99_spill] sm:$0xff] %v17746_v55  ;;  %v8949_v14 = vld [vmem:[#allocation20 + $0x258] sm:$0xff]  ;;  %18824 = vst [vmem:[#allocation101_spill] sm:$0xff] %v17752_v41 }
 0xd20   :  { %9752 = vmatprep.subr.bf16.mxu1 %v17720_v53  ;;  %9793 = vmatprep.subr.bf16.mxu0 %v17722_v54  ;;  %18821 = vst [vmem:[#allocation98_spill] sm:$0xff] %v17744_v18  ;;  %v8948_v54 = vld [vmem:[#allocation20 + $0x250] sm:$0xff]  ;;  %v8953_v44 = vld [vmem:[#allocation20 + $0x278] sm:$0xff]  ;;  %18823 = vst [vmem:[#allocation100_spill] sm:$0xff] %v17750_v22 }
 0xd21   :  { %v8952_v53 = vld [vmem:[#allocation20 + $0x270] sm:$0xff]  ;;  %v17758_v43 = vcombine.high %v8949_v14, %v8953_v44  ;;  %v17764_v34 = vcombine.low %v8949_v14, %v8953_v44 }
 0xd22   :  { %v17756_v60 = vcombine.high %v8948_v54, %v8952_v53  ;;  %v17762_v28 = vcombine.low %v8948_v54, %v8952_v53 }
 0xd23   :  { %9753 = vmatpush1.bf16.msra.mxu1 %v17726_v35  ;;  %9794 = vmatpush1.bf16.msra.mxu0 %v17728_v36  ;;  %18826 = vst [vmem:[#allocation103_spill] sm:$0xff] %v17758_v43  ;;  %v8957_v36 = vld [vmem:[#allocation20 + $0x298] sm:$0xff]  ;;  %18828 = vst [vmem:[#allocation105_spill] sm:$0xff] %v17764_v34 }
 0xd24   :  { %9754 = vmatprep.subr.bf16.mxu1 %v17732_v38  ;;  %9795 = vmatprep.subr.bf16.mxu0 %v17734_v11  ;;  %18825 = vst [vmem:[#allocation102_spill] sm:$0xff] %v17756_v60  ;;  %v8956_v11 = vld [vmem:[#allocation20 + $0x290] sm:$0xff]  ;;  %v8961_v35 = vld [vmem:[#allocation20 + $0x2b8] sm:$0xff]  ;;  %18827 = vst [vmem:[#allocation104_spill] sm:$0xff] %v17762_v28 }
 0xd25   :  { %v8960_v38 = vld [vmem:[#allocation20 + $0x2b0] sm:$0xff]  ;;  %v17770_v7 = vcombine.high %v8957_v36, %v8961_v35  ;;  %v17776_v44 = vcombine.low %v8957_v36, %v8961_v35 }
 0xd26   :  { %v17768_v37 = vcombine.high %v8956_v11, %v8960_v38  ;;  %v17774_v53 = vcombine.low %v8956_v11, %v8960_v38 }
 0xd27   :  { %9755 = vmatpush1.bf16.msra.mxu1 %v17738_v3  ;;  %9796 = vmatpush1.bf16.msra.mxu0 %v17740_v32  ;;  %18830 = vst [vmem:[#allocation107_spill] sm:$0xff] %v17770_v7  ;;  %v8965_v32 = vld [vmem:[#allocation20 + $0x2d8] sm:$0xff]  ;;  %18832 = vst [vmem:[#allocation109_spill] sm:$0xff] %v17776_v44 }
 0xd28   :  { %9756 = vmatprep.subr.bf16.mxu1 %v17744_v18  ;;  %9797 = vmatprep.subr.bf16.mxu0 %v17746_v55  ;;  %18829 = vst [vmem:[#allocation106_spill] sm:$0xff] %v17768_v37  ;;  %v8964_v55 = vld [vmem:[#allocation20 + $0x2d0] sm:$0xff]  ;;  %v8969_v3 = vld [vmem:[#allocation20 + $0x2f8] sm:$0xff]  ;;  %18831 = vst [vmem:[#allocation108_spill] sm:$0xff] %v17774_v53 }
 0xd29   :  { %v8968_v18 = vld [vmem:[#allocation20 + $0x2f0] sm:$0xff]  ;;  %v17782_v54 = vcombine.high %v8965_v32, %v8969_v3  ;;  %v17788_v35 = vcombine.low %v8965_v32, %v8969_v3 }
 0xd2a   :  { %v17780_v14 = vcombine.high %v8964_v55, %v8968_v18  ;;  %v17786_v38 = vcombine.low %v8964_v55, %v8968_v18 }
 0xd2b   :  { %9757 = vmatpush1.bf16.msra.mxu1 %v17750_v22  ;;  %9798 = vmatpush1.bf16.msra.mxu0 %v17752_v41  ;;  %18834 = vst [vmem:[#allocation111_spill] sm:$0xff] %v17782_v54  ;;  %v8973_v41 = vld [vmem:[#allocation20 + $0x318] sm:$0xff]  ;;  %18836 = vst [vmem:[#allocation113_spill] sm:$0xff] %v17788_v35 }
 0xd2c   :  { %9758 = vmatprep.subr.bf16.mxu1 %v17756_v60  ;;  %9799 = vmatprep.subr.bf16.mxu0 %v17758_v43  ;;  %18833 = vst [vmem:[#allocation110_spill] sm:$0xff] %v17780_v14  ;;  %v8972_v43 = vld [vmem:[#allocation20 + $0x310] sm:$0xff]  ;;  %v8977_v22 = vld [vmem:[#allocation20 + $0x338] sm:$0xff]  ;;  %18835 = vst [vmem:[#allocation112_spill] sm:$0xff] %v17786_v38 }
 0xd2d   :  { %v8976_v60 = vld [vmem:[#allocation20 + $0x330] sm:$0xff]  ;;  %v17794_v11 = vcombine.high %v8973_v41, %v8977_v22  ;;  %v17800_v3 = vcombine.low %v8973_v41, %v8977_v22 }
 0xd2e   :  { %v17792_v36 = vcombine.high %v8972_v43, %v8976_v60  ;;  %v17798_v18 = vcombine.low %v8972_v43, %v8976_v60 }
 0xd2f   :  { %9759 = vmatpush1.bf16.msra.mxu1 %v17762_v28  ;;  %9800 = vmatpush1.bf16.msra.mxu0 %v17764_v34  ;;  %18838 = vst [vmem:[#allocation115_spill] sm:$0xff] %v17794_v11  ;;  %v8981_v34 = vld [vmem:[#allocation20 + $0x358] sm:$0xff] }
 0xd30   :  { %9760 = vmatprep.subr.bf16.mxu1 %v17768_v37  ;;  %9801 = vmatprep.subr.bf16.mxu0 %v17770_v7  ;;  %18837 = vst [vmem:[#allocation114_spill] sm:$0xff] %v17792_v36  ;;  %v8980_v7 = vld [vmem:[#allocation20 + $0x350] sm:$0xff]  ;;  %v8985_v28 = vld [vmem:[#allocation20 + $0x378] sm:$0xff] }
 0xd31   :  { %v8984_v37 = vld [vmem:[#allocation20 + $0x370] sm:$0xff]  ;;  %v17806_v55 = vcombine.high %v8981_v34, %v8985_v28  ;;  %v17812_v22 = vcombine.low %v8981_v34, %v8985_v28 }
 0xd32   :  { %v17804_v32 = vcombine.high %v8980_v7, %v8984_v37  ;;  %v17810_v60 = vcombine.low %v8980_v7, %v8984_v37 }
 0xd33   :  { %9761 = vmatpush1.bf16.msra.mxu1 %v17774_v53  ;;  %9802 = vmatpush1.bf16.msra.mxu0 %v17776_v44  ;;  %18839 = vst [vmem:[#allocation116_spill] sm:$0xff] %v17806_v55  ;;  %v8989_v44 = vld [vmem:[#allocation20 + $0x398] sm:$0xff] }
 0xd34   :  { %9762 = vmatprep.subr.bf16.mxu1 %v17780_v14  ;;  %9803 = vmatprep.subr.bf16.mxu0 %v17782_v54  ;;  %v8988_v54 = vld [vmem:[#allocation20 + $0x390] sm:$0xff]  ;;  %v8993_v53 = vld [vmem:[#allocation20 + $0x3b8] sm:$0xff]  ;;  %18840 = vst [vmem:[#allocation117_spill] sm:$0xff] %v17810_v60 }
 0xd35   :  { %v8992_v14 = vld [vmem:[#allocation20 + $0x3b0] sm:$0xff]  ;;  %v17818_v43 = vcombine.high %v8989_v44, %v8993_v53  ;;  %v17824_v28 = vcombine.low %v8989_v44, %v8993_v53 }
 0xd36   :  { %v17816_v41 = vcombine.high %v8988_v54, %v8992_v14  ;;  %v17822_v37 = vcombine.low %v8988_v54, %v8992_v14 }
 0xd37   :  { %9763 = vmatpush1.bf16.msra.mxu1 %v17786_v38  ;;  %9804 = vmatpush1.bf16.msra.mxu0 %v17788_v35  ;;  %v8997_v35 = vld [vmem:[#allocation20 + $0x3d8] sm:$0xff] }
 0xd38   :  { %9764 = vmatprep.subr.bf16.mxu1 %v17792_v36  ;;  %9805 = vmatprep.subr.bf16.mxu0 %v17794_v11  ;;  %v8996_v11 = vld [vmem:[#allocation20 + $0x3d0] sm:$0xff]  ;;  %v9001_v38 = vld [vmem:[#allocation20 + $0x3f8] sm:$0xff] }
 0xd39   :  { %v9000_v36 = vld [vmem:[#allocation20 + $0x3f0] sm:$0xff]  ;;  %v17830_v7 = vcombine.high %v8997_v35, %v9001_v38 }
 0xd3a   :  { %v17828_v34 = vcombine.high %v8996_v11, %v9000_v36 }
 0xd3b   :  { %9765 = vmatpush1.bf16.msra.mxu1 %v17798_v18  ;;  %9806 = vmatpush1.bf16.msra.mxu0 %v17800_v3 }
 0xd3c   :  { %9766 = vmatprep.subr.bf16.mxu1 %v17804_v32  ;;  %9807 = vmatprep.subr.bf16.mxu0 %v17806_v55  ;;  %v17834_v55 = vcombine.low %v8996_v11, %v9000_v36 }
 0xd3f   :  { %9767 = vmatpush1.bf16.msra.mxu1 %v17810_v60  ;;  %9808 = vmatpush1.bf16.msra.mxu0 %v17812_v22  ;;  %v17836_v60 = vcombine.low %v8997_v35, %v9001_v38 }
 0xd40   :  { %9768 = vmatprep.subr.bf16.mxu1 %v17816_v41  ;;  %9809 = vmatprep.subr.bf16.mxu0 %v17818_v43 }
 0xd43   :  { %9769 = vmatpush1.bf16.msra.mxu1 %v17822_v37  ;;  %9810 = vmatpush1.bf16.msra.mxu0 %v17824_v28 }
 0xd44   :  { %9770 = vmatprep.subr.bf16.mxu1 %v17828_v34  ;;  %9811 = vmatprep.subr.bf16.mxu0 %v17830_v7 }
 0xd47   :  { %9771 = vmatpush1.bf16.msra.mxu1 %v17834_v55  ;;  %9812 = vmatpush1.bf16.msra.mxu0 %v17836_v60 }
 0xd48   :  { %10786 = vmatprep.subr.bf16.mxu1 %v17428_v47  ;;  %10827 = vmatprep.subr.bf16.mxu0 %v17434_v59  ;;  %v18841_v47 = vld [vmem:[#allocation40_spill] sm:$0xff] }
 0xd49   :  { %v18844_v59 = vld [vmem:[#allocation44_spill] sm:$0xff] }
 0xd4a   :  { %9773 = vmatmul.mubr.bf16.vlgmr.msra.gmra.mrb[60].mxu1 %v17656_v15  ;;  %9814 = vmatmul.mubr.bf16.vlgmr.msra.gmra.mrb[68].mxu0 %v17656_v15 }
 0xd4b   :  { %10787 = vmatpush1.bf16.msra.mxu1 %v17430_v48  ;;  %10828 = vmatpush1.bf16.msra.mxu0 %v17432_v16  ;;  %v18842_v48 = vld [vmem:[#allocation42_spill] sm:$0xff]  ;;  %v18843_v16 = vld [vmem:[#allocation39_spill] sm:$0xff] }
 0xd4c   :  { %10788 = vmatprep.subr.bf16.mxu1 %v17440_v61  ;;  %10829 = vmatprep.subr.bf16.mxu0 %v17446_v27  ;;  %v18845_v61 = vld [vmem:[#allocation41_spill] sm:$0xff]  ;;  %v18848_v27 = vld [vmem:[#allocation46_spill] sm:$0xff] }
 0xd4f   :  { %10789 = vmatpush1.bf16.msra.mxu1 %v17442_v17  ;;  %10830 = vmatpush1.bf16.msra.mxu0 %v17444_v19  ;;  %v18846_v17 = vld [vmem:[#allocation43_spill] sm:$0xff]  ;;  %v18847_v19 = vld [vmem:[#allocation45_spill] sm:$0xff] }
 0xd50   :  { %10790 = vmatprep.subr.bf16.mxu1 %v17452_v23  ;;  %10831 = vmatprep.subr.bf16.mxu0 %v17458_v25  ;;  %v18849_v23 = vld [vmem:[#allocation47_spill] sm:$0xff]  ;;  %v18852_v25 = vld [vmem:[#allocation50_spill] sm:$0xff] }
 0xd53   :  { %10791 = vmatpush1.bf16.msra.mxu1 %v17454_v24  ;;  %10832 = vmatpush1.bf16.msra.mxu0 %v17456_v46  ;;  %v18850_v24 = vld [vmem:[#allocation48_spill] sm:$0xff]  ;;  %v18851_v46 = vld [vmem:[#allocation49_spill] sm:$0xff] }
 0xd54   :  { %10792 = vmatprep.subr.bf16.mxu1 %v17464_v20  ;;  %10833 = vmatprep.subr.bf16.mxu0 %v17470_v49  ;;  %v18853_v20 = vld [vmem:[#allocation51_spill] sm:$0xff]  ;;  %v18856_v49 = vld [vmem:[#allocation54_spill] sm:$0xff] }
 0xd57   :  { %10793 = vmatpush1.bf16.msra.mxu1 %v17466_v31  ;;  %10834 = vmatpush1.bf16.msra.mxu0 %v17468_v51  ;;  %v18854_v31 = vld [vmem:[#allocation52_spill] sm:$0xff]  ;;  %v18855_v51 = vld [vmem:[#allocation53_spill] sm:$0xff] }
 0xd58   :  { %10794 = vmatprep.subr.bf16.mxu1 %v17476_v45  ;;  %10835 = vmatprep.subr.bf16.mxu0 %v17482_v9  ;;  %v18857_v45 = vld [vmem:[#allocation55_spill] sm:$0xff]  ;;  %v18860_v9 = vld [vmem:[#allocation58_spill] sm:$0xff] }
 0xd5b   :  { %10795 = vmatpush1.bf16.msra.mxu1 %v17478_v5  ;;  %10836 = vmatpush1.bf16.msra.mxu0 %v17480_v1  ;;  %v18858_v5 = vld [vmem:[#allocation56_spill] sm:$0xff]  ;;  %v18859_v1 = vld [vmem:[#allocation57_spill] sm:$0xff] }
 0xd5c   :  { %10796 = vmatprep.subr.bf16.mxu1 %v17488_v30  ;;  %10837 = vmatprep.subr.bf16.mxu0 %v17494_v8  ;;  %v18861_v30 = vld [vmem:[#allocation59_spill] sm:$0xff] }
 0xd5d   :  { %v18864_v8 = vld [vmem:[#allocation63_spill] sm:$0xff] }
 0xd5f   :  { %10797 = vmatpush1.bf16.msra.mxu1 %v17490_v52  ;;  %10838 = vmatpush1.bf16.msra.mxu0 %v17492_v33  ;;  %v18862_v52 = vld [vmem:[#allocation60_spill] sm:$0xff]  ;;  %v18863_v33 = vld [vmem:[#allocation62_spill] sm:$0xff] }
 0xd60   :  { %10798 = vmatprep.subr.bf16.mxu1 %v17500_v50  ;;  %10839 = vmatprep.subr.bf16.mxu0 %v17506_v6  ;;  %v18865_v50 = vld [vmem:[#allocation64_spill] sm:$0xff]  ;;  %v18868_v6 = vld [vmem:[#allocation67_spill] sm:$0xff] }
 0xd63   :  { %10799 = vmatpush1.bf16.msra.mxu1 %v17502_v0  ;;  %10840 = vmatpush1.bf16.msra.mxu0 %v17504_v4  ;;  %v18866_v0 = vld [vmem:[#allocation65_spill] sm:$0xff]  ;;  %v18867_v4 = vld [vmem:[#allocation66_spill] sm:$0xff] }
 0xd64   :  { %10800 = vmatprep.subr.bf16.mxu1 %v17512_v26  ;;  %10841 = vmatprep.subr.bf16.mxu0 %v17518_v42  ;;  %v18869_v26 = vld [vmem:[#allocation68_spill] sm:$0xff]  ;;  %v18872_v42 = vld [vmem:[#allocation71_spill] sm:$0xff] }
 0xd67   :  { %10801 = vmatpush1.bf16.msra.mxu1 %v17514_v21  ;;  %10842 = vmatpush1.bf16.msra.mxu0 %v17516_v12  ;;  %v18870_v21 = vld [vmem:[#allocation69_spill] sm:$0xff]  ;;  %v18871_v12 = vld [vmem:[#allocation70_spill] sm:$0xff] }
 0xd68   :  { %10802 = vmatprep.subr.bf16.mxu1 %v17526_v62  ;;  %10843 = vmatprep.subr.bf16.mxu0 %v18841_v47  ;;  %v18873_v62 = vld [vmem:[#allocation72_spill] sm:$0xff] }
 0xd6b   :  { %10803 = vmatpush1.bf16.msra.mxu1 %v18842_v48  ;;  %10844 = vmatpush1.bf16.msra.mxu0 %v18843_v16  ;;  %v18874_v48 = vld [vmem:[#allocation61_spill] sm:$0xff] }
 0xd6c   :  { %10804 = vmatprep.subr.bf16.mxu1 %v18844_v59  ;;  %10845 = vmatprep.subr.bf16.mxu0 %v18845_v61 }
 0xd6f   :  { %10805 = vmatpush1.bf16.msra.mxu1 %v18846_v17  ;;  %10846 = vmatpush1.bf16.msra.mxu0 %v18847_v19 }
 0xd70   :  { %10806 = vmatprep.subr.bf16.mxu1 %v18848_v27  ;;  %10847 = vmatprep.subr.bf16.mxu0 %v18849_v23 }
 0xd73   :  { %10807 = vmatpush1.bf16.msra.mxu1 %v18850_v24  ;;  %10848 = vmatpush1.bf16.msra.mxu0 %v18851_v46 }
 0xd74   :  { %10808 = vmatprep.subr.bf16.mxu1 %v18852_v25  ;;  %10849 = vmatprep.subr.bf16.mxu0 %v18853_v20 }
 0xd77   :  { %10809 = vmatpush1.bf16.msra.mxu1 %v18854_v31  ;;  %10850 = vmatpush1.bf16.msra.mxu0 %v18855_v51 }
 0xd78   :  { %10810 = vmatprep.subr.bf16.mxu1 %v18856_v49  ;;  %10851 = vmatprep.subr.bf16.mxu0 %v18857_v45 }
 0xd7b   :  { %10811 = vmatpush1.bf16.msra.mxu1 %v18858_v5  ;;  %10852 = vmatpush1.bf16.msra.mxu0 %v18859_v1 }
 0xd7c   :  { %10812 = vmatprep.subr.bf16.mxu1 %v18860_v9  ;;  %10853 = vmatprep.subr.bf16.mxu0 %v18861_v30  ;;  %v8842_v30 = vld [vmem:[#allocation3 + $0x5] ss:$8 sm:$0xf0] }
 0xd7f   :  { %10813 = vmatpush1.bf16.msra.mxu1 %v18862_v52  ;;  %10854 = vmatpush1.bf16.msra.mxu0 %v18863_v33  ;;  %v8846_v52 = vld [vmem:[#allocation3 + $0x45] ss:$8 sm:$0xf0] }
 0xd80   :  { %10814 = vmatprep.subr.bf16.mxu1 %v18864_v8  ;;  %10855 = vmatprep.subr.bf16.mxu0 %v18865_v50 }
 0xd83   :  { %10815 = vmatpush1.bf16.msra.mxu1 %v18866_v0  ;;  %10856 = vmatpush1.bf16.msra.mxu0 %v18867_v4  ;;  %v8841_v4 = vld [vmem:[#allocation3 + $0x5] ss:$8 sm:$0xf] }
 0xd84   :  { %10816 = vmatprep.subr.bf16.mxu1 %v18868_v6  ;;  %10857 = vmatprep.subr.bf16.mxu0 %v18869_v26  ;;  %v8845_v6 = vld [vmem:[#allocation3 + $0x45] ss:$8 sm:$0xf]  ;;  %v8843_v26 = vor.u32 %v8842_v30, %v8841_v4 }
 0xd87   :  { %10817 = vmatpush1.bf16.msra.mxu1 %v18870_v21  ;;  %10858 = vmatpush1.bf16.msra.mxu0 %v18871_v12  ;;  %v8847_v21 = vor.u32 %v8846_v52, %v8845_v6 }
 0xd88   :  { %10868 = vmatprep.subr.bf16.mxu1 %v18872_v42  ;;  %10909 = vmatprep.subr.bf16.mxu0 %v18873_v62 }
 0xddd   :  { %v9692_v15 = vpop.f32.mrb[56].mxu1  ;;  %v9733_v53 = vpop.f32.mrb[64].mxu0 }
 0xdde   :  { %v9694_v44 = vpop.f32.mrb[57].mxu1  ;;  %v9735_v14 = vpop.f32.mrb[65].mxu0 }
 0xddf   :  { %v9830_v54 = vcombine.low %v9692_v15, %v9694_v44  ;;  %v9831_v38 = vcombine.low %v9733_v53, %v9735_v14  ;;  %v9696_v35 = vpop.f32.mrb[58].mxu1  ;;  %v9737_v36 = vpop.f32.mrb[66].mxu0 }
 0xde0   :  { %v9697_v11 = vpop.f32.mrb[59].mxu1  ;;  %v9738_v47 = vpop.f32.mrb[67].mxu0 }
 0xde1   :  { %v9840_v16 = vrot.slane %v9830_v54, %v18874_v48  ;;  %v9847_v59 = vrot.slane %v9831_v38, %v18874_v48 }
 0xde3   :  { %v9862_v61 = vcombine.low %v9840_v16, %v9847_v59  ;;  %v9863_v17 = vcombine.high %v9840_v16, %v9847_v59 }
 0xde5   :  { %v9872_v33 = vrot.slane %v9862_v61, %v18874_v48  ;;  %v9879_v8 = vrot.slane %v9863_v17, %v18874_v48 }
 0xe1d   :  { %v9774_v19 = vpop.f32.mrb[60].mxu1  ;;  %v9815_v27 = vpop.f32.mrb[68].mxu0 }
 0xe1e   :  { %v9776_v23 = vpop.f32.mrb[61].mxu1  ;;  %v9817_v24 = vpop.f32.mrb[69].mxu0 }
 0xe1f   :  { %v9832_v46 = vcombine.low %v9774_v19, %v9776_v23  ;;  %v9833_v25 = vcombine.low %v9815_v27, %v9817_v24  ;;  %v9778_v20 = vpop.f32.mrb[62].mxu1  ;;  %v9819_v31 = vpop.f32.mrb[70].mxu0 }
 0xe20   :  { %v9779_v51 = vpop.f32.mrb[63].mxu1  ;;  %v9820_v49 = vpop.f32.mrb[71].mxu0 }
 0xe21   :  { %v9854_v45 = vrot.slane %v9832_v46, %v18874_v48  ;;  %v9861_v5 = vrot.slane %v9833_v25, %v18874_v48 }
 0xe23   :  { %v9864_v1 = vcombine.low %v9854_v45, %v9861_v5  ;;  %v9865_v9 = vcombine.high %v9854_v45, %v9861_v5 }
 0xe25   :  { %v9886_v50 = vrot.slane %v9864_v1, %v18874_v48  ;;  %v9893_v0 = vrot.slane %v9865_v9, %v18874_v48 }
 0xe27   :  { %v9894_v12 = vcombine.low %v9872_v33, %v9886_v50  ;;  %v9895_v42 = vcombine.low %v9879_v8, %v9893_v0 }
 0xe29   :  { %v9898_v62 = vadd.f32 %v9894_v12, %v8843_v26  ;;  %v9899_v15 = vadd.f32 %v9895_v42, %v8847_v21 }
 0xe2b   :  { %v14253_v53 = vmul.f32 -1.442695, %v9898_v62  ;;  %v14254_v44 = vmul.f32 -1.442695, %v9899_v15  ;;  %v9914_v14 = vrot.slane %v9898_v62, 2  ;;  %v9915_v54 = vrot.slane %v9899_v15, 2 }
 0xe2c   :  { %v9936_v36 = vrot.slane %v9898_v62, 6  ;;  %v9937_v11 = vrot.slane %v9899_v15, 6  ;;  %v9930_v47 = vrot.slane %v9898_v62, 4  ;;  %v9931_v16 = vrot.slane %v9899_v15, 4 }
 0xe2d   :  { %15332 = vpow2.f32 %v14253_v53  ;;  %v14255_v38 = vmul.f32 -1.442695, %v9914_v14  ;;  %v14256_v35 = vmul.f32 -1.442695, %v9915_v54 }
 0xe2e   :  { %15334 = vpow2.f32 %v14254_v44  ;;  %v14257_v59 = vmul.f32 -1.442695, %v9936_v36  ;;  %v14258_v61 = vmul.f32 -1.442695, %v9937_v11 }
 0xe2f   :  { %15336 = vpow2.f32 %v14255_v38 }
 0xe30   :  { %15338 = vpow2.f32 %v14256_v35 }
 0xe31   :  { %15340 = vtanh.f32 %v9930_v47 }
 0xe32   :  { %15342 = vtanh.f32 %v9931_v16 }
 0xe33   :  { %15344 = vpow2.f32 %v14257_v59 }
 0xe34   :  { %15346 = vpow2.f32 %v14258_v61 }
 0xe37   :  { %v15333_v17 = vpop.eup %15332 }
 0xe38   :  { %v15335_v19 = vpop.eup %15334  ;;  %v9906_v27 = vadd.f32 1.0, %v15333_v17 }
 0xe39   :  { %v15337_v23 = vpop.eup %15336  ;;  %v9907_v24 = vadd.f32 1.0, %v15335_v19 }
 0xe3a   :  { %v15339_v46 = vpop.eup %15338  ;;  %15348 = vrcp.f32 %v9906_v27  ;;  %v9924_v25 = vadd.f32 1.0, %v15337_v23 }
 0xe3b   :  { %15350 = vrcp.f32 %v9907_v24  ;;  %v9925_v20 = vadd.f32 1.0, %v15339_v46  ;;  %v15341_v31 = vpop.eup %15340  ;;  %v18875_v46 = vld [vmem:[#allocation73_spill] sm:$0xff] }
 0xe3c   :  { %15352 = vrcp.f32 %v9924_v25  ;;  %v15343_v51 = vpop.eup %15342  ;;  %v18876_v25 = vld [vmem:[#allocation74_spill] sm:$0xff] }
 0xe3d   :  { %15354 = vrcp.f32 %v9925_v20  ;;  %v15345_v49 = vpop.eup %15344  ;;  %v18877_v20 = vld [vmem:[#allocation75_spill] sm:$0xff] }
 0xe3e   :  { %v15347_v45 = vpop.eup %15346  ;;  %v9946_v9 = vadd.f32 1.0, %v15345_v49  ;;  %v18882_v49 = vld [vmem:[#allocation80_spill] sm:$0xff] }
 0xe3f   :  { %v9947_v52 = vadd.f32 1.0, %v15347_v45  ;;  %v18886_v45 = vld [vmem:[#allocation84_spill] sm:$0xff] }
 0xe40   :  { %15356 = vrcp.f32 %v9946_v9  ;;  %v18889_v9 = vld [vmem:[#allocation87_spill] sm:$0xff] }
 0xe41   :  { %15358 = vrcp.f32 %v9947_v52  ;;  %v18891_v52 = vld [vmem:[#allocation89_spill] sm:$0xff] }
 0xe44   :  { %v15349_v5 = vpop.eup %15348 }
 0xe45   :  { %v15351_v1 = vpop.eup %15350  ;;  %v9954_v8 = vmul.f32 %v15349_v5, %v15341_v31  ;;  %v18878_v31 = vld [vmem:[#allocation76_spill] sm:$0xff]  ;;  %v18887_v5 = vld [vmem:[#allocation85_spill] sm:$0xff] }
 0xe46   :  { %v15353_v30 = vpop.eup %15352  ;;  %v9955_v0 = vmul.f32 %v15351_v1, %v15343_v51  ;;  %v18879_v51 = vld [vmem:[#allocation77_spill] sm:$0xff]  ;;  %v18888_v1 = vld [vmem:[#allocation86_spill] sm:$0xff] }
 0xe47   :  { %v15355_v33 = vpop.eup %15354  ;;  %v9952_v50 = vmul.f32 %v15353_v30, %v17640_v13  ;;  %v18890_v30 = vld [vmem:[#allocation88_spill] sm:$0xff] }
 0xe48   :  { %v9953_v4 = vmul.f32 %v15355_v33, %v17642_v29  ;;  %v18892_v33 = vld [vmem:[#allocation90_spill] sm:$0xff] }
 0xe49   :  { %v17920_v6 = vadd.f32 %v9954_v8, %v9952_v50  ;;  %v18893_v8 = vld [vmem:[#allocation91_spill] sm:$0xff]  ;;  %v18894_v50 = vld [vmem:[#allocation92_spill] sm:$0xff] }
 0xe4a   :  { %v17922_v26 = vadd.f32 %v9955_v0, %v9953_v4  ;;  %v15357_v21 = vpop.eup %15356  ;;  %v18895_v0 = vld [vmem:[#allocation93_spill] sm:$0xff]  ;;  %v18896_v4 = vld [vmem:[#allocation94_spill] sm:$0xff] }
 0xe4b   :  { %15360 = vtanh.f32 %v17920_v6  ;;  %v15359_v12 = vpop.eup %15358 }
 0xe4c   :  { %15362 = vtanh.f32 %v17922_v26 }
 0xe55   :  { %v15361_v42 = vpop.eup %15360 }
 0xe56   :  { %v15363_v62 = vpop.eup %15362  ;;  %v9960_v15 = vmul.f32 %v15361_v42, %v15357_v21  ;;  %v18897_v21 = vld [vmem:[#allocation95_spill] sm:$0xff]  ;;  %v18899_v42 = vld [vmem:[#allocation97_spill] sm:$0xff] }
 0xe57   :  { %v9961_v53 = vmul.f32 %v15363_v62, %v15359_v12  ;;  %v18898_v12 = vld [vmem:[#allocation96_spill] sm:$0xff]  ;;  %v18900_v62 = vld [vmem:[#allocation98_spill] sm:$0xff] }
 0xe58   :  { %9963 = vst.msk [vmem:[#allocation4 + $0x5] ss:$8 sm:$0x3] %vm16143_vm1, %v9960_v15  ;;  %v9985_v13 = vrot.slane %v9960_v15, %v16192_v40  ;;  %v9981_v29 = vrot.slane %v9960_v15, %v16189_v39  ;;  %v18901_v15 = vld [vmem:[#allocation99_spill] sm:$0xff] }
 0xe59   :  { %9966 = vst.msk [vmem:[#allocation4 + $0x15] ss:$8 sm:$0x3] %vm16143_vm1, %v9961_v53  ;;  %v9993_v44 = vrot.slane %v9961_v53, %v16192_v40  ;;  %v9989_v14 = vrot.slane %v9961_v53, %v16189_v39  ;;  %v18902_v53 = vld [vmem:[#allocation100_spill] sm:$0xff] }
 0xe5a   :  { %v9999_v54 = vpack.c.bf16 %v9985_v13, %v9985_v13  ;;  %v9998_v35 = vpack.c.bf16 %v9981_v29, %v9981_v29  ;;  %v18903_v13 = vld [vmem:[#allocation101_spill] sm:$0xff]  ;;  %v18904_v29 = vld [vmem:[#allocation102_spill] sm:$0xff] }
 0xe5b   :  { %v10001_v38 = vpack.c.bf16 %v9993_v44, %v9993_v44  ;;  %v10000_v36 = vpack.c.bf16 %v9989_v14, %v9989_v14  ;;  %v18905_v44 = vld [vmem:[#allocation103_spill] sm:$0xff]  ;;  %v18906_v14 = vld [vmem:[#allocation104_spill] sm:$0xff] }
 0xe5c   :  { %v10135_v16 = vunpack.c.l.b16 %v9999_v54  ;;  %v10134_v61 = vunpack.c.l.b16 %v9998_v35  ;;  %v18907_v54 = vld [vmem:[#allocation105_spill] sm:$0xff]  ;;  %v18909_v35 = vld [vmem:[#allocation107_spill] sm:$0xff] }
 0xe5d   :  { %v10137_v11 = vunpack.c.l.b16 %v10001_v38  ;;  %v10136_v47 = vunpack.c.l.b16 %v10000_v36  ;;  %v18908_v38 = vld [vmem:[#allocation106_spill] sm:$0xff]  ;;  %v18910_v36 = vld [vmem:[#allocation108_spill] sm:$0xff] }
 0xe5f   :  { %v10140_v59 = vrot.slane %v10137_v11, 7  ;;  %v10138_v17 = vrot.slane %v10136_v47, 7  ;;  %v18911_v11 = vld [vmem:[#allocation109_spill] sm:$0xff]  ;;  %v18912_v47 = vld [vmem:[#allocation110_spill] sm:$0xff] }
 0xe61   :  { %v10141_v19 = vsel %vm4498_vm3, %v10140_v59, %v10135_v16  ;;  %v10139_v27 = vsel %vm4498_vm3, %v10138_v17, %v10134_v61  ;;  %v18913_v16 = vld [vmem:[#allocation111_spill] sm:$0xff]  ;;  %v18914_v59 = vld [vmem:[#allocation112_spill] sm:$0xff]  ;;  %v18915_v61 = vld [vmem:[#allocation113_spill] sm:$0xff] }
 0xe62   :  { %v10143_v23 = vpack.c.b16 %v10141_v19, %v10141_v19  ;;  %v17936_v24 = vpack.c.b16 %v10139_v27, %v10139_v27  ;;  %v18916_v17 = vld [vmem:[#allocation114_spill] sm:$0xff]  ;;  %v18917_v19 = vld [vmem:[#allocation115_spill] sm:$0xff]  ;;  %v18918_v27 = vld [vmem:[#allocation116_spill] sm:$0xff] }
 0xe64   :  { %10818 = vmatprep.mubr.bf16.mxu1 %v10143_v23  ;;  %10859 = vmatprep.mubr.bf16.mxu0 %v10143_v23 }
 0xe65   :  { %10819 = vmatmul.mubr.bf16.vlgmr.msra.gmra.mrb[64].mxu1 %v17936_v24  ;;  %10860 = vmatmul.mubr.bf16.vlgmr.msra.gmra.mrb[72].mxu0 %v17936_v24 }
 0xe66   :  { %10869 = vmatpush1.bf16.msra.mxu1 %v17621_v63  ;;  %10910 = vmatpush1.bf16.msra.mxu0 %v17626_v10  ;;  %v18880_v63 = vld [vmem:[#allocation78_spill] sm:$0xff]  ;;  %v18881_v10 = vld [vmem:[#allocation79_spill] sm:$0xff] }
 0xe67   :  { %10900 = vmatprep.mubr.bf16.mxu1 %v10143_v23  ;;  %10941 = vmatprep.mubr.bf16.mxu0 %v10143_v23  ;;  %v18919_v23 = vld [vmem:[#allocation117_spill] sm:$0xff] }
 0xe68   :  { %10870 = vmatprep.subr.bf16.mxu1 %v17658_v56  ;;  %10911 = vmatprep.subr.bf16.mxu0 %v17660_v58  ;;  %v18883_v56 = vld [vmem:[#allocation81_spill] sm:$0xff]  ;;  %v18884_v58 = vld [vmem:[#allocation82_spill] sm:$0xff] }
 0xe6a   :  { %10871 = vmatpush1.bf16.msra.mxu1 %v17666_v57  ;;  %10912 = vmatpush1.bf16.msra.mxu0 %v18875_v46  ;;  %v18885_v57 = vld [vmem:[#allocation83_spill] sm:$0xff] }
 0xe6b   :  { %10872 = vmatprep.subr.bf16.mxu1 %v18876_v25  ;;  %10913 = vmatprep.subr.bf16.mxu0 %v18877_v20  ;;  %v11143_v46 = vld [vmem:[#allocation20 + $0x68] sm:$0xff] }
 0xe6e   :  { %10873 = vmatpush1.bf16.msra.mxu1 %v18878_v31  ;;  %10914 = vmatpush1.bf16.msra.mxu0 %v18879_v51  ;;  %v11146_v31 = vld [vmem:[#allocation20 + $0x80] sm:$0xff] }
 0xe6f   :  { %10874 = vmatprep.subr.bf16.mxu1 %v18880_v63  ;;  %10915 = vmatprep.subr.bf16.mxu0 %v18881_v10  ;;  %v11150_v51 = vld [vmem:[#allocation20 + $0xa0] sm:$0xff]  ;;  %v11147_v63 = vld [vmem:[#allocation20 + $0x88] sm:$0xff] }
 0xe70   :  { %v14410_v10 = vcombine.high %v11146_v31, %v11150_v51 }
 0xe72   :  { %10875 = vmatpush1.bf16.msra.mxu1 %v18882_v49  ;;  %10916 = vmatpush1.bf16.msra.mxu0 %v18883_v56  ;;  %v11151_v49 = vld [vmem:[#allocation20 + $0xa8] sm:$0xff]  ;;  %v14409_v56 = vcombine.low %v11146_v31, %v11150_v51 }
 0xe73   :  { %10876 = vmatprep.subr.bf16.mxu1 %v18884_v58  ;;  %10917 = vmatprep.subr.bf16.mxu0 %v18885_v57  ;;  %v14411_v58 = vcombine.low %v11147_v63, %v11151_v49  ;;  %v14412_v57 = vcombine.high %v11147_v63, %v11151_v49  ;;  %v11203_v51 = vld [vmem:[#allocation20 + $0x248] sm:$0xff] }
 0xe74   :  { %v11207_v63 = vld [vmem:[#allocation20 + $0x268] sm:$0xff] }
 0xe75   :  { %v14468_v49 = vcombine.high %v11203_v51, %v11207_v63 }
 0xe76   :  { %10877 = vmatpush1.bf16.msra.mxu1 %v18886_v45  ;;  %10918 = vmatpush1.bf16.msra.mxu0 %v18887_v5  ;;  %v11154_v45 = vld [vmem:[#allocation20 + $0xc0] sm:$0xff] }
 0xe77   :  { %10878 = vmatprep.subr.bf16.mxu1 %v18888_v1  ;;  %10919 = vmatprep.subr.bf16.mxu0 %v18889_v9  ;;  %v11158_v5 = vld [vmem:[#allocation20 + $0xe0] sm:$0xff]  ;;  %v11155_v1 = vld [vmem:[#allocation20 + $0xc8] sm:$0xff] }
 0xe78   :  { %v14418_v9 = vcombine.high %v11154_v45, %v11158_v5 }
 0xe7a   :  { %10879 = vmatpush1.bf16.msra.mxu1 %v18890_v30  ;;  %10920 = vmatpush1.bf16.msra.mxu0 %v18891_v52  ;;  %v11159_v30 = vld [vmem:[#allocation20 + $0xe8] sm:$0xff]  ;;  %v14417_v52 = vcombine.low %v11154_v45, %v11158_v5  ;;  %v14467_v5 = vcombine.low %v11203_v51, %v11207_v63 }
 0xe7b   :  { %10880 = vmatprep.subr.bf16.mxu1 %v18892_v33  ;;  %10921 = vmatprep.subr.bf16.mxu0 %v18893_v8  ;;  %v14419_v33 = vcombine.low %v11155_v1, %v11159_v30  ;;  %v14420_v8 = vcombine.high %v11155_v1, %v11159_v30  ;;  %v11218_v30 = vld [vmem:[#allocation20 + $0x2c0] sm:$0xff] }
 0xe7e   :  { %10881 = vmatpush1.bf16.msra.mxu1 %v18894_v50  ;;  %10922 = vmatpush1.bf16.msra.mxu0 %v18895_v0  ;;  %v11162_v50 = vld [vmem:[#allocation20 + $0x100] sm:$0xff] }
 0xe7f   :  { %10882 = vmatprep.subr.bf16.mxu1 %v18896_v4  ;;  %10923 = vmatprep.subr.bf16.mxu0 %v18897_v21  ;;  %v11166_v0 = vld [vmem:[#allocation20 + $0x120] sm:$0xff]  ;;  %v11163_v4 = vld [vmem:[#allocation20 + $0x108] sm:$0xff] }
 0xe80   :  { %v14426_v21 = vcombine.high %v11162_v50, %v11166_v0 }
 0xe82   :  { %10883 = vmatpush1.bf16.msra.mxu1 %v18898_v12  ;;  %10924 = vmatpush1.bf16.msra.mxu0 %v18899_v42  ;;  %v11167_v12 = vld [vmem:[#allocation20 + $0x128] sm:$0xff]  ;;  %v14425_v42 = vcombine.low %v11162_v50, %v11166_v0 }
 0xe83   :  { %10884 = vmatprep.subr.bf16.mxu1 %v18900_v62  ;;  %10925 = vmatprep.subr.bf16.mxu0 %v18901_v15  ;;  %v14427_v62 = vcombine.low %v11163_v4, %v11167_v12  ;;  %v14428_v15 = vcombine.high %v11163_v4, %v11167_v12  ;;  %v11226_v12 = vld [vmem:[#allocation20 + $0x300] sm:$0xff] }
 0xe86   :  { %10885 = vmatpush1.bf16.msra.mxu1 %v18902_v53  ;;  %10926 = vmatpush1.bf16.msra.mxu0 %v18903_v13  ;;  %v11170_v53 = vld [vmem:[#allocation20 + $0x140] sm:$0xff] }
 0xe87   :  { %10886 = vmatprep.subr.bf16.mxu1 %v18904_v29  ;;  %10927 = vmatprep.subr.bf16.mxu0 %v18905_v44  ;;  %v11174_v13 = vld [vmem:[#allocation20 + $0x160] sm:$0xff]  ;;  %v11171_v29 = vld [vmem:[#allocation20 + $0x148] sm:$0xff] }
 0xe88   :  { %v14434_v44 = vcombine.high %v11170_v53, %v11174_v13 }
 0xe8a   :  { %10887 = vmatpush1.bf16.msra.mxu1 %v18906_v14  ;;  %10928 = vmatpush1.bf16.msra.mxu0 %v18907_v54  ;;  %v11175_v14 = vld [vmem:[#allocation20 + $0x168] sm:$0xff]  ;;  %v14433_v54 = vcombine.low %v11170_v53, %v11174_v13 }
 0xe8b   :  { %10888 = vmatprep.subr.bf16.mxu1 %v18908_v38  ;;  %10929 = vmatprep.subr.bf16.mxu0 %v18909_v35  ;;  %v14435_v38 = vcombine.low %v11171_v29, %v11175_v14  ;;  %v14436_v35 = vcombine.high %v11171_v29, %v11175_v14  ;;  %v11234_v14 = vld [vmem:[#allocation20 + $0x340] sm:$0xff] }
 0xe8e   :  { %10889 = vmatpush1.bf16.msra.mxu1 %v18910_v36  ;;  %10930 = vmatpush1.bf16.msra.mxu0 %v18911_v11  ;;  %v11178_v36 = vld [vmem:[#allocation20 + $0x180] sm:$0xff] }
 0xe8f   :  { %10890 = vmatprep.subr.bf16.mxu1 %v18912_v47  ;;  %10931 = vmatprep.subr.bf16.mxu0 %v18913_v16  ;;  %v11182_v11 = vld [vmem:[#allocation20 + $0x1a0] sm:$0xff]  ;;  %v11179_v47 = vld [vmem:[#allocation20 + $0x188] sm:$0xff] }
 0xe90   :  { %v14442_v16 = vcombine.high %v11178_v36, %v11182_v11 }
 0xe92   :  { %10891 = vmatpush1.bf16.msra.mxu1 %v18914_v59  ;;  %10932 = vmatpush1.bf16.msra.mxu0 %v18915_v61  ;;  %v11183_v59 = vld [vmem:[#allocation20 + $0x1a8] sm:$0xff]  ;;  %v14441_v61 = vcombine.low %v11178_v36, %v11182_v11 }
 0xe93   :  { %10892 = vmatprep.subr.bf16.mxu1 %v18916_v17  ;;  %10933 = vmatprep.subr.bf16.mxu0 %v18917_v19  ;;  %v14443_v17 = vcombine.low %v11179_v47, %v11183_v59  ;;  %v14444_v19 = vcombine.high %v11179_v47, %v11183_v59  ;;  %v11242_v59 = vld [vmem:[#allocation20 + $0x380] sm:$0xff] }
 0xe96   :  { %10893 = vmatpush1.bf16.msra.mxu1 %v17798_v18  ;;  %10934 = vmatpush1.bf16.msra.mxu0 %v17800_v3  ;;  %v11130_v18 = vld [vmem:[#allocation20] sm:$0xff] }
 0xe97   :  { %10894 = vmatprep.subr.bf16.mxu1 %v17804_v32  ;;  %10935 = vmatprep.subr.bf16.mxu0 %v18918_v27  ;;  %v11134_v3 = vld [vmem:[#allocation20 + $0x20] sm:$0xff]  ;;  %v11131_v32 = vld [vmem:[#allocation20 + $0x8] sm:$0xff] }
 0xe98   :  { %v11186_v27 = vld [vmem:[#allocation20 + $0x1c0] sm:$0xff] }
 0xe9a   :  { %10895 = vmatpush1.bf16.msra.mxu1 %v18919_v23  ;;  %10936 = vmatpush1.bf16.msra.mxu0 %v17812_v22  ;;  %v14394_v22 = vcombine.high %v11130_v18, %v11134_v3  ;;  %v11190_v23 = vld [vmem:[#allocation20 + $0x1e0] sm:$0xff] }
 0xe9b   :  { %10896 = vmatprep.subr.bf16.mxu1 %v17816_v41  ;;  %10937 = vmatprep.subr.bf16.mxu0 %v17818_v43  ;;  %v11135_v41 = vld [vmem:[#allocation20 + $0x28] sm:$0xff]  ;;  %v14393_v43 = vcombine.low %v11130_v18, %v11134_v3  ;;  %v14450_v3 = vcombine.high %v11186_v27, %v11190_v23 }
 0xe9c   :  { %v11187_v18 = vld [vmem:[#allocation20 + $0x1c8] sm:$0xff] }
 0xe9e   :  { %10897 = vmatpush1.bf16.msra.mxu1 %v17822_v37  ;;  %10938 = vmatpush1.bf16.msra.mxu0 %v17824_v28  ;;  %v14395_v37 = vcombine.low %v11131_v32, %v11135_v41  ;;  %v14396_v28 = vcombine.high %v11131_v32, %v11135_v41  ;;  %v11191_v32 = vld [vmem:[#allocation20 + $0x1e8] sm:$0xff] }
 0xe9f   :  { %10898 = vmatprep.subr.bf16.mxu1 %v17828_v34  ;;  %10939 = vmatprep.subr.bf16.mxu0 %v17830_v7  ;;  %v11138_v34 = vld [vmem:[#allocation20 + $0x40] sm:$0xff]  ;;  %v14451_v41 = vcombine.low %v11187_v18, %v11191_v32 }
 0xea0   :  { %v11142_v7 = vld [vmem:[#allocation20 + $0x60] sm:$0xff] }
 0xea1   :  { %v14401_v25 = vcombine.low %v11138_v34, %v11142_v7 }
 0xea2   :  { %10899 = vmatpush1.bf16.msra.mxu1 %v17834_v55  ;;  %10940 = vmatpush1.bf16.msra.mxu0 %v17836_v60  ;;  %v11139_v55 = vld [vmem:[#allocation20 + $0x48] sm:$0xff]  ;;  %v14402_v60 = vcombine.high %v11138_v34, %v11142_v7 }
 0xea3   :  { %11914 = vmatprep.subr.bf16.mxu1 %v14394_v22  ;;  %11955 = vmatprep.subr.bf16.mxu0 %v14396_v28  ;;  %v14403_v20 = vcombine.low %v11139_v55, %v11143_v46  ;;  %v14449_v22 = vcombine.low %v11186_v27, %v11190_v23  ;;  %v11198_v28 = vld [vmem:[#allocation20 + $0x220] sm:$0xff]  ;;  %v11195_v34 = vld [vmem:[#allocation20 + $0x208] sm:$0xff] }
 0xea5   :  { %10901 = vmatmul.mubr.bf16.vlgmr.msra.gmra.mrb[68].mxu1 %v17936_v24  ;;  %10942 = vmatmul.mubr.bf16.vlgmr.msra.gmra.mrb[76].mxu0 %v17936_v24  ;;  %v14404_v24 = vcombine.high %v11139_v55, %v11143_v46  ;;  %v11202_v46 = vld [vmem:[#allocation20 + $0x240] sm:$0xff] }
 0xea6   :  { %11915 = vmatpush1.bf16.msra.mxu1 %v14393_v43  ;;  %11956 = vmatpush1.bf16.msra.mxu0 %v14395_v37  ;;  %v14452_v43 = vcombine.high %v11187_v18, %v11191_v32  ;;  %v11194_v37 = vld [vmem:[#allocation20 + $0x200] sm:$0xff] }
 0xea7   :  { %11916 = vmatprep.subr.bf16.mxu1 %v14402_v60  ;;  %11957 = vmatprep.subr.bf16.mxu0 %v14404_v24  ;;  %v14457_v7 = vcombine.low %v11194_v37, %v11198_v28  ;;  %v14458_v55 = vcombine.high %v11194_v37, %v11198_v28  ;;  %v11199_v60 = vld [vmem:[#allocation20 + $0x228] sm:$0xff]  ;;  %v11250_v32 = vld [vmem:[#allocation20 + $0x3c0] sm:$0xff] }
 0xea8   :  { %v14460_v24 = vcombine.high %v11195_v34, %v11199_v60 }
 0xeaa   :  { %11917 = vmatpush1.bf16.msra.mxu1 %v14401_v25  ;;  %11958 = vmatpush1.bf16.msra.mxu0 %v14403_v20  ;;  %v11206_v25 = vld [vmem:[#allocation20 + $0x260] sm:$0xff]  ;;  %v14459_v20 = vcombine.low %v11195_v34, %v11199_v60 }
 0xeab   :  { %11918 = vmatprep.subr.bf16.mxu1 %v14410_v10  ;;  %11959 = vmatprep.subr.bf16.mxu0 %v14412_v57  ;;  %v14466_v31 = vcombine.high %v11202_v46, %v11206_v25  ;;  %v11210_v10 = vld [vmem:[#allocation20 + $0x280] sm:$0xff]  ;;  %v11215_v57 = vld [vmem:[#allocation20 + $0x2a8] sm:$0xff]  ;;  %v14465_v45 = vcombine.low %v11202_v46, %v11206_v25 }
 0xeae   :  { %11919 = vmatpush1.bf16.msra.mxu1 %v14409_v56  ;;  %11960 = vmatpush1.bf16.msra.mxu0 %v14411_v58  ;;  %v11214_v56 = vld [vmem:[#allocation20 + $0x2a0] sm:$0xff]  ;;  %v11211_v58 = vld [vmem:[#allocation20 + $0x288] sm:$0xff] }
 0xeaf   :  { %11920 = vmatprep.subr.bf16.mxu1 %v14418_v9  ;;  %11961 = vmatprep.subr.bf16.mxu0 %v14420_v8  ;;  %v14474_v1 = vcombine.high %v11210_v10, %v11214_v56  ;;  %v14476_v9 = vcombine.high %v11211_v58, %v11215_v57  ;;  %v11223_v8 = vld [vmem:[#allocation20 + $0x2e8] sm:$0xff]  ;;  %v14473_v50 = vcombine.low %v11210_v10, %v11214_v56 }
 0xeb0   :  { %v14475_v0 = vcombine.low %v11211_v58, %v11215_v57 }
 0xeb2   :  { %11921 = vmatpush1.bf16.msra.mxu1 %v14417_v52  ;;  %11962 = vmatpush1.bf16.msra.mxu0 %v14419_v33  ;;  %v11222_v52 = vld [vmem:[#allocation20 + $0x2e0] sm:$0xff]  ;;  %v11219_v33 = vld [vmem:[#allocation20 + $0x2c8] sm:$0xff] }
 0xeb3   :  { %11922 = vmatprep.subr.bf16.mxu1 %v14426_v21  ;;  %11963 = vmatprep.subr.bf16.mxu0 %v14428_v15  ;;  %v14482_v4 = vcombine.high %v11218_v30, %v11222_v52  ;;  %v14484_v21 = vcombine.high %v11219_v33, %v11223_v8  ;;  %v11231_v15 = vld [vmem:[#allocation20 + $0x328] sm:$0xff]  ;;  %v14481_v53 = vcombine.low %v11218_v30, %v11222_v52  ;;  %v18010_v30 = vld [vmem:[#allocation20 + $0x18] sm:$0xff] }
 0xeb4   :  { %v14483_v13 = vcombine.low %v11219_v33, %v11223_v8  ;;  %v18016_v8 = vld [vmem:[#allocation20 + $0x38] sm:$0xff] }
 0xeb6   :  { %11923 = vmatpush1.bf16.msra.mxu1 %v14425_v42  ;;  %11964 = vmatpush1.bf16.msra.mxu0 %v14427_v62  ;;  %v11230_v42 = vld [vmem:[#allocation20 + $0x320] sm:$0xff]  ;;  %v11227_v62 = vld [vmem:[#allocation20 + $0x308] sm:$0xff] }
 0xeb7   :  { %11924 = vmatprep.subr.bf16.mxu1 %v14434_v44  ;;  %11965 = vmatprep.subr.bf16.mxu0 %v14436_v35  ;;  %v14490_v29 = vcombine.high %v11226_v12, %v11230_v42  ;;  %v14492_v44 = vcombine.high %v11227_v62, %v11231_v15  ;;  %v11239_v35 = vld [vmem:[#allocation20 + $0x368] sm:$0xff]  ;;  %v14489_v36 = vcombine.low %v11226_v12, %v11230_v42 }
 0xeb8   :  { %v14491_v11 = vcombine.low %v11227_v62, %v11231_v15 }
 0xeba   :  { %11925 = vmatpush1.bf16.msra.mxu1 %v14433_v54  ;;  %11966 = vmatpush1.bf16.msra.mxu0 %v14435_v38  ;;  %v11238_v54 = vld [vmem:[#allocation20 + $0x360] sm:$0xff]  ;;  %v11235_v38 = vld [vmem:[#allocation20 + $0x348] sm:$0xff] }
 0xebb   :  { %11926 = vmatprep.subr.bf16.mxu1 %v14442_v16  ;;  %11967 = vmatprep.subr.bf16.mxu0 %v14444_v19  ;;  %v14498_v47 = vcombine.high %v11234_v14, %v11238_v54  ;;  %v14500_v16 = vcombine.high %v11235_v38, %v11239_v35  ;;  %v11247_v19 = vld [vmem:[#allocation20 + $0x3a8] sm:$0xff]  ;;  %v14497_v27 = vcombine.low %v11234_v14, %v11238_v54 }
 0xebc   :  { %v14499_v23 = vcombine.low %v11235_v38, %v11239_v35 }
 0xebe   :  { %11927 = vmatpush1.bf16.msra.mxu1 %v14441_v61  ;;  %11968 = vmatpush1.bf16.msra.mxu0 %v14443_v17  ;;  %v11246_v61 = vld [vmem:[#allocation20 + $0x3a0] sm:$0xff]  ;;  %v11243_v17 = vld [vmem:[#allocation20 + $0x388] sm:$0xff] }
 0xebf   :  { %11928 = vmatprep.subr.bf16.mxu1 %v14450_v3  ;;  %11969 = vmatprep.subr.bf16.mxu0 %v14452_v43  ;;  %v14506_v18 = vcombine.high %v11242_v59, %v11246_v61  ;;  %v14508_v3 = vcombine.high %v11243_v17, %v11247_v19  ;;  %v11255_v43 = vld [vmem:[#allocation20 + $0x3e8] sm:$0xff]  ;;  %v14505_v34 = vcombine.low %v11242_v59, %v11246_v61 }
 0xec0   :  { %v14507_v60 = vcombine.low %v11243_v17, %v11247_v19  ;;  %v9969_v17 = vld [vmem:[#allocation3 + $0x6] ss:$8 sm:$0xf] }
 0xec1   :  { %v9973_v19 = vld [vmem:[#allocation3 + $0x46] ss:$8 sm:$0xf] }
 0xec2   :  { %11929 = vmatpush1.bf16.msra.mxu1 %v14449_v22  ;;  %11970 = vmatpush1.bf16.msra.mxu0 %v14451_v41  ;;  %v11254_v22 = vld [vmem:[#allocation20 + $0x3e0] sm:$0xff]  ;;  %v11251_v41 = vld [vmem:[#allocation20 + $0x3c8] sm:$0xff] }
 0xec3   :  { %11930 = vmatprep.subr.bf16.mxu1 %v14458_v55  ;;  %11971 = vmatprep.subr.bf16.mxu0 %v14460_v24  ;;  %v14514_v46 = vcombine.high %v11250_v32, %v11254_v22  ;;  %v14516_v51 = vcombine.high %v11251_v41, %v11255_v43  ;;  %v14513_v58 = vcombine.low %v11250_v32, %v11254_v22 }
 0xec4   :  { %v14515_v57 = vcombine.low %v11251_v41, %v11255_v43 }
 0xec6   :  { %11931 = vmatpush1.bf16.msra.mxu1 %v14457_v7  ;;  %11972 = vmatpush1.bf16.msra.mxu0 %v14459_v20 }
 0xec7   :  { %11932 = vmatprep.subr.bf16.mxu1 %v14466_v31  ;;  %11973 = vmatprep.subr.bf16.mxu0 %v14468_v49 }
 0xeca   :  { %11933 = vmatpush1.bf16.msra.mxu1 %v14465_v45  ;;  %11974 = vmatpush1.bf16.msra.mxu0 %v14467_v5 }
 0xecb   :  { %11934 = vmatprep.subr.bf16.mxu1 %v14474_v1  ;;  %11975 = vmatprep.subr.bf16.mxu0 %v14476_v9  ;;  %v18006_v1 = vld [vmem:[#allocation20 + $0x10] sm:$0xff] }
 0xecc   :  { %v18008_v9 = vld [vmem:[#allocation20 + $0x30] sm:$0xff] }
 0xecd   :  { %v14397_v52 = vcombine.low %v18006_v1, %v18008_v9  ;;  %v14398_v33 = vcombine.high %v18006_v1, %v18008_v9 }
 0xece   :  { %11935 = vmatpush1.bf16.msra.mxu1 %v14473_v50  ;;  %11976 = vmatpush1.bf16.msra.mxu0 %v14475_v0  ;;  %v14399_v50 = vcombine.low %v18010_v30, %v18016_v8  ;;  %v14400_v0 = vcombine.high %v18010_v30, %v18016_v8  ;;  %v11164_v8 = vld [vmem:[#allocation20 + $0x110] sm:$0xff] }
 0xecf   :  { %11936 = vmatprep.subr.bf16.mxu1 %v14482_v4  ;;  %11977 = vmatprep.subr.bf16.mxu0 %v14484_v21 }
 0xed2   :  { %11937 = vmatpush1.bf16.msra.mxu1 %v14481_v53  ;;  %11978 = vmatpush1.bf16.msra.mxu0 %v14483_v13 }
 0xed3   :  { %11938 = vmatprep.subr.bf16.mxu1 %v14490_v29  ;;  %11979 = vmatprep.subr.bf16.mxu0 %v14492_v44 }
 0xed6   :  { %11939 = vmatpush1.bf16.msra.mxu1 %v14489_v36  ;;  %11980 = vmatpush1.bf16.msra.mxu0 %v14491_v11  ;;  %v9970_v36 = vld [vmem:[#allocation3 + $0x6] ss:$8 sm:$0xf0] }
 0xed7   :  { %11940 = vmatprep.subr.bf16.mxu1 %v14498_v47  ;;  %11981 = vmatprep.subr.bf16.mxu0 %v14500_v16  ;;  %v9974_v11 = vld [vmem:[#allocation3 + $0x46] ss:$8 sm:$0xf0] }
 0xeda   :  { %11941 = vmatpush1.bf16.msra.mxu1 %v14497_v27  ;;  %11982 = vmatpush1.bf16.msra.mxu0 %v14499_v23  ;;  %v9971_v27 = vor.u32 %v9970_v36, %v9969_v17  ;;  %v9975_v23 = vor.u32 %v9974_v11, %v9973_v19 }
 0xedb   :  { %11942 = vmatprep.subr.bf16.mxu1 %v14506_v18  ;;  %11983 = vmatprep.subr.bf16.mxu0 %v14508_v3 }
 0xede   :  { %11943 = vmatpush1.bf16.msra.mxu1 %v14505_v34  ;;  %11984 = vmatpush1.bf16.msra.mxu0 %v14507_v60 }
 0xedf   :  { %11944 = vmatprep.subr.bf16.mxu1 %v14514_v46  ;;  %11985 = vmatprep.subr.bf16.mxu0 %v14516_v51 }
 0xee2   :  { %11945 = vmatpush1.bf16.msra.mxu1 %v14513_v58  ;;  %11986 = vmatpush1.bf16.msra.mxu0 %v14515_v57 }
 0xee3   :  { %11996 = vmatprep.subr.bf16.mxu1 %v14398_v33  ;;  %12037 = vmatprep.subr.bf16.mxu0 %v14400_v0 }
 0xf38   :  { %v10820_v37 = vpop.f32.mrb[64].mxu1  ;;  %v10861_v28 = vpop.f32.mrb[72].mxu0 }
 0xf39   :  { %v10822_v7 = vpop.f32.mrb[65].mxu1  ;;  %v10863_v55 = vpop.f32.mrb[73].mxu0 }
 0xf3a   :  { %v10958_v25 = vcombine.low %v10820_v37, %v10822_v7  ;;  %v10959_v20 = vcombine.low %v10861_v28, %v10863_v55  ;;  %v10824_v24 = vpop.f32.mrb[66].mxu1  ;;  %v10865_v31 = vpop.f32.mrb[74].mxu0 }
 0xf3b   :  { %v10825_v63 = vpop.f32.mrb[67].mxu1  ;;  %v10866_v10 = vpop.f32.mrb[75].mxu0 }
 0xf3c   :  { %v10968_v49 = vrot.slane %v10958_v25, %v18874_v48  ;;  %v10975_v56 = vrot.slane %v10959_v20, %v18874_v48 }
 0xf3e   :  { %v10990_v45 = vcombine.low %v10968_v49, %v10975_v56  ;;  %v10991_v5 = vcombine.high %v10968_v49, %v10975_v56 }
 0xf40   :  { %v11000_v47 = vrot.slane %v10990_v45, %v18874_v48  ;;  %v11007_v16 = vrot.slane %v10991_v5, %v18874_v48 }
 0xf78   :  { %v10902_v4 = vpop.f32.mrb[68].mxu1  ;;  %v10943_v21 = vpop.f32.mrb[76].mxu0 }
 0xf79   :  { %v10904_v12 = vpop.f32.mrb[69].mxu1  ;;  %v10945_v42 = vpop.f32.mrb[77].mxu0 }
 0xf7a   :  { %v10960_v62 = vcombine.low %v10902_v4, %v10904_v12  ;;  %v10961_v15 = vcombine.low %v10943_v21, %v10945_v42  ;;  %v10906_v53 = vpop.f32.mrb[70].mxu1  ;;  %v10947_v13 = vpop.f32.mrb[78].mxu0 }
 0xf7b   :  { %v10907_v29 = vpop.f32.mrb[71].mxu1  ;;  %v10948_v44 = vpop.f32.mrb[79].mxu0 }
 0xf7c   :  { %v10982_v14 = vrot.slane %v10960_v62, %v18874_v48  ;;  %v10989_v54 = vrot.slane %v10961_v15, %v18874_v48 }
 0xf7e   :  { %v10992_v38 = vcombine.low %v10982_v14, %v10989_v54  ;;  %v10993_v35 = vcombine.high %v10982_v14, %v10989_v54 }
 0xf80   :  { %v11014_v59 = vrot.slane %v10992_v38, %v18874_v48  ;;  %v11021_v61 = vrot.slane %v10993_v35, %v18874_v48 }
 0xf82   :  { %v11022_v18 = vcombine.low %v11000_v47, %v11014_v59  ;;  %v11023_v3 = vcombine.low %v11007_v16, %v11021_v61 }
 0xf84   :  { %v11026_v32 = vadd.f32 %v11022_v18, %v9971_v27  ;;  %v11027_v22 = vadd.f32 %v11023_v3, %v9975_v23 }
 0xf86   :  { %v14387_v41 = vmul.f32 -1.442695, %v11026_v32  ;;  %v14388_v43 = vmul.f32 -1.442695, %v11027_v22  ;;  %v11042_v37 = vrot.slane %v11026_v32, 2  ;;  %v11043_v28 = vrot.slane %v11027_v22, 2 }
 0xf87   :  { %v11064_v55 = vrot.slane %v11026_v32, 6  ;;  %v11065_v60 = vrot.slane %v11027_v22, 6  ;;  %v11058_v46 = vrot.slane %v11026_v32, 4  ;;  %v11059_v25 = vrot.slane %v11027_v22, 4 }
 0xf88   :  { %15364 = vpow2.f32 %v14387_v41  ;;  %v14389_v34 = vmul.f32 -1.442695, %v11042_v37  ;;  %v14390_v7 = vmul.f32 -1.442695, %v11043_v28  ;;  %v11140_v37 = vld [vmem:[#allocation20 + $0x50] sm:$0xff] }
 0xf89   :  { %15366 = vpow2.f32 %v14388_v43  ;;  %v14391_v20 = vmul.f32 -1.442695, %v11064_v55  ;;  %v14392_v24 = vmul.f32 -1.442695, %v11065_v60  ;;  %v11141_v55 = vld [vmem:[#allocation20 + $0x58] sm:$0xff] }
 0xf8a   :  { %15368 = vpow2.f32 %v14389_v34  ;;  %v11145_v60 = vld [vmem:[#allocation20 + $0x78] sm:$0xff] }
 0xf8b   :  { %15370 = vpow2.f32 %v14390_v7  ;;  %v11144_v7 = vld [vmem:[#allocation20 + $0x70] sm:$0xff] }
 0xf8c   :  { %15372 = vtanh.f32 %v11058_v46 }
 0xf8d   :  { %15374 = vtanh.f32 %v11059_v25 }
 0xf8e   :  { %15376 = vpow2.f32 %v14391_v20  ;;  %v11148_v20 = vld [vmem:[#allocation20 + $0x90] sm:$0xff] }
 0xf8f   :  { %15378 = vpow2.f32 %v14392_v24  ;;  %v14406_v24 = vcombine.high %v11140_v37, %v11144_v7 }
 0xf92   :  { %v15365_v31 = vpop.eup %15364 }
 0xf93   :  { %v15367_v51 = vpop.eup %15366  ;;  %v11034_v63 = vadd.f32 1.0, %v15365_v31  ;;  %v14408_v31 = vcombine.high %v11141_v55, %v11145_v60 }
 0xf94   :  { %v15369_v10 = vpop.eup %15368  ;;  %v11035_v49 = vadd.f32 1.0, %v15367_v51  ;;  %v11152_v51 = vld [vmem:[#allocation20 + $0xb0] sm:$0xff] }
 0xf95   :  { %v15371_v56 = vpop.eup %15370  ;;  %15380 = vrcp.f32 %v11034_v63  ;;  %v11052_v58 = vadd.f32 1.0, %v15369_v10  ;;  %v11149_v63 = vld [vmem:[#allocation20 + $0x98] sm:$0xff]  ;;  %v14413_v1 = vcombine.low %v11148_v20, %v11152_v51 }
 0xf96   :  { %15382 = vrcp.f32 %v11035_v49  ;;  %v11053_v57 = vadd.f32 1.0, %v15371_v56  ;;  %v15373_v45 = vpop.eup %15372  ;;  %v11153_v10 = vld [vmem:[#allocation20 + $0xb8] sm:$0xff]  ;;  %v14405_v49 = vcombine.low %v11140_v37, %v11144_v7  ;;  %v14407_v56 = vcombine.low %v11141_v55, %v11145_v60  ;;  %v11196_v37 = vld [vmem:[#allocation20 + $0x210] sm:$0xff] }
 0xf97   :  { %15384 = vrcp.f32 %v11052_v58  ;;  %v15375_v5 = vpop.eup %15374  ;;  %v14414_v58 = vcombine.high %v11148_v20, %v11152_v51  ;;  %v14415_v9 = vcombine.low %v11149_v63, %v11153_v10  ;;  %v11201_v7 = vld [vmem:[#allocation20 + $0x238] sm:$0xff] }
 0xf98   :  { %15386 = vrcp.f32 %v11053_v57  ;;  %v15377_v33 = vpop.eup %15376  ;;  %v14416_v57 = vcombine.high %v11149_v63, %v11153_v10  ;;  %v11205_v51 = vld [vmem:[#allocation20 + $0x258] sm:$0xff] }
 0xf99   :  { %v15379_v0 = vpop.eup %15378  ;;  %v11074_v12 = vadd.f32 1.0, %v15377_v33  ;;  %v11157_v33 = vld [vmem:[#allocation20 + $0xd8] sm:$0xff] }
 0xf9a   :  { %v11075_v62 = vadd.f32 1.0, %v15379_v0  ;;  %v11161_v0 = vld [vmem:[#allocation20 + $0xf8] sm:$0xff] }
 0xf9b   :  { %15388 = vrcp.f32 %v11074_v12  ;;  %v11209_v63 = vld [vmem:[#allocation20 + $0x278] sm:$0xff] }
 0xf9c   :  { %15390 = vrcp.f32 %v11075_v62 }
 0xf9f   :  { %v15381_v4 = vpop.eup %15380 }
 0xfa0   :  { %v15383_v21 = vpop.eup %15382  ;;  %v11082_v53 = vmul.f32 %v15381_v4, %v15373_v45  ;;  %v11156_v45 = vld [vmem:[#allocation20 + $0xd0] sm:$0xff]  ;;  %v11165_v4 = vld [vmem:[#allocation20 + $0x118] sm:$0xff] }
 0xfa1   :  { %v15385_v42 = vpop.eup %15384  ;;  %v11083_v29 = vmul.f32 %v15383_v21, %v15375_v5  ;;  %v11160_v5 = vld [vmem:[#allocation20 + $0xf0] sm:$0xff]  ;;  %v11169_v21 = vld [vmem:[#allocation20 + $0x138] sm:$0xff] }
 0xfa2   :  { %v15387_v15 = vpop.eup %15386  ;;  %v11080_v13 = vmul.f32 %v15385_v42, %v17920_v6  ;;  %v14422_v30 = vcombine.high %v11156_v45, %v11160_v5  ;;  %v14421_v12 = vcombine.low %v11156_v45, %v11160_v5  ;;  %v14423_v42 = vcombine.low %v11157_v33, %v11161_v0  ;;  %v11216_v45 = vld [vmem:[#allocation20 + $0x2b0] sm:$0xff]  ;;  %v11213_v5 = vld [vmem:[#allocation20 + $0x298] sm:$0xff] }
 0xfa3   :  { %v11081_v44 = vmul.f32 %v15387_v15, %v17922_v26  ;;  %v14432_v15 = vcombine.high %v11165_v4, %v11169_v21 }
 0xfa4   :  { %v18030_v14 = vadd.f32 %v11082_v53, %v11080_v13  ;;  %v11172_v53 = vld [vmem:[#allocation20 + $0x150] sm:$0xff] }
 0xfa5   :  { %v18032_v54 = vadd.f32 %v11083_v29, %v11081_v44  ;;  %v15389_v38 = vpop.eup %15388  ;;  %v11176_v13 = vld [vmem:[#allocation20 + $0x170] sm:$0xff]  ;;  %v11173_v29 = vld [vmem:[#allocation20 + $0x158] sm:$0xff] }
 0xfa6   :  { %15392 = vtanh.f32 %v18030_v14  ;;  %v15391_v35 = vpop.eup %15390  ;;  %v11177_v44 = vld [vmem:[#allocation20 + $0x178] sm:$0xff] }
 0xfa7   :  { %15394 = vtanh.f32 %v18032_v54 }
 0xfb0   :  { %v15393_v36 = vpop.eup %15392 }
 0xfb1   :  { %v15395_v11 = vpop.eup %15394  ;;  %v11088_v47 = vmul.f32 %v15393_v36, %v15389_v38  ;;  %v14438_v36 = vcombine.high %v11172_v53, %v11176_v13 }
 0xfb2   :  { %v11089_v16 = vmul.f32 %v15395_v11, %v15391_v35  ;;  %v14431_v35 = vcombine.low %v11165_v4, %v11169_v21  ;;  %v14440_v11 = vcombine.high %v11173_v29, %v11177_v44  ;;  %v11225_v4 = vld [vmem:[#allocation20 + $0x2f8] sm:$0xff] }
 0xfb3   :  { %11091 = vst.msk [vmem:[#allocation4 + $0x6] ss:$8 sm:$0x3] %vm16143_vm1, %v11088_v47  ;;  %v11113_v6 = vrot.slane %v11088_v47, %v16192_v40  ;;  %v11109_v26 = vrot.slane %v11088_v47, %v16189_v39  ;;  %v11180_v47 = vld [vmem:[#allocation20 + $0x190] sm:$0xff] }
 0xfb4   :  { %11094 = vst.msk [vmem:[#allocation4 + $0x16] ss:$8 sm:$0x3] %vm16143_vm1, %v11089_v16  ;;  %v11121_v59 = vrot.slane %v11089_v16, %v16192_v40  ;;  %v11117_v61 = vrot.slane %v11089_v16, %v16189_v39  ;;  %v11184_v16 = vld [vmem:[#allocation20 + $0x1b0] sm:$0xff] }
 0xfb5   :  { %v11127_v17 = vpack.c.bf16 %v11113_v6, %v11113_v6  ;;  %v11126_v27 = vpack.c.bf16 %v11109_v26, %v11109_v26  ;;  %v11181_v6 = vld [vmem:[#allocation20 + $0x198] sm:$0xff] }
 0xfb6   :  { %v11129_v19 = vpack.c.bf16 %v11121_v59, %v11121_v59  ;;  %v11128_v23 = vpack.c.bf16 %v11117_v61, %v11117_v61  ;;  %v11185_v26 = vld [vmem:[#allocation20 + $0x1b8] sm:$0xff]  ;;  %v14437_v59 = vcombine.low %v11172_v53, %v11176_v13  ;;  %v14439_v61 = vcombine.low %v11173_v29, %v11177_v44  ;;  %v11232_v53 = vld [vmem:[#allocation20 + $0x330] sm:$0xff] }
 0xfb7   :  { %v11263_v32 = vunpack.c.l.b16 %v11127_v17  ;;  %v11262_v41 = vunpack.c.l.b16 %v11126_v27  ;;  %v14446_v17 = vcombine.high %v11180_v47, %v11184_v16  ;;  %v11188_v27 = vld [vmem:[#allocation20 + $0x1d0] sm:$0xff]  ;;  %v11229_v13 = vld [vmem:[#allocation20 + $0x318] sm:$0xff] }
 0xfb8   :  { %v11265_v18 = vunpack.c.l.b16 %v11129_v19  ;;  %v11264_v3 = vunpack.c.l.b16 %v11128_v23  ;;  %v14448_v19 = vcombine.high %v11181_v6, %v11185_v26  ;;  %v11192_v23 = vld [vmem:[#allocation20 + $0x1f0] sm:$0xff]  ;;  %v11233_v29 = vld [vmem:[#allocation20 + $0x338] sm:$0xff] }
 0xfb9   :  { %v14453_v55 = vcombine.low %v11188_v27, %v11192_v23 }
 0xfba   :  { %v11268_v22 = vrot.slane %v11265_v18, 7  ;;  %v11266_v43 = vrot.slane %v11264_v3, 7  ;;  %v11189_v18 = vld [vmem:[#allocation20 + $0x1d8] sm:$0xff] }
 0xfbb   :  { %v11193_v3 = vld [vmem:[#allocation20 + $0x1f8] sm:$0xff] }
 0xfbc   :  { %v11269_v28 = vsel %vm4498_vm3, %v11268_v22, %v11263_v32  ;;  %v11267_v34 = vsel %vm4498_vm3, %v11266_v43, %v11262_v41  ;;  %v14445_v32 = vcombine.low %v11180_v47, %v11184_v16  ;;  %v14447_v22 = vcombine.low %v11181_v6, %v11185_v26  ;;  %v11240_v47 = vld [vmem:[#allocation20 + $0x370] sm:$0xff]  ;;  %v11237_v16 = vld [vmem:[#allocation20 + $0x358] sm:$0xff] }
 0xfbd   :  { %v11271_v46 = vpack.c.b16 %v11269_v28, %v11269_v28  ;;  %v18046_v25 = vpack.c.b16 %v11267_v34, %v11267_v34  ;;  %v14454_v41 = vcombine.high %v11188_v27, %v11192_v23  ;;  %v14456_v43 = vcombine.high %v11189_v18, %v11193_v3  ;;  %v11200_v28 = vld [vmem:[#allocation20 + $0x230] sm:$0xff]  ;;  %v11197_v34 = vld [vmem:[#allocation20 + $0x218] sm:$0xff] }
 0xfbe   :  { %v14455_v60 = vcombine.low %v11189_v18, %v11193_v3  ;;  %v14464_v20 = vcombine.high %v11197_v34, %v11201_v7  ;;  %v14461_v10 = vcombine.low %v11196_v37, %v11200_v28  ;;  %v11241_v6 = vld [vmem:[#allocation20 + $0x378] sm:$0xff]  ;;  %v11248_v27 = vld [vmem:[#allocation20 + $0x3b0] sm:$0xff] }
 0xfbf   :  { %11946 = vmatprep.mubr.bf16.mxu1 %v11271_v46  ;;  %11987 = vmatprep.mubr.bf16.mxu0 %v11271_v46  ;;  %v11245_v23 = vld [vmem:[#allocation20 + $0x398] sm:$0xff] }
 0xfc0   :  { %11947 = vmatmul.mubr.bf16.vlgmr.msra.gmra.mrb[72].mxu1 %v18046_v25  ;;  %11988 = vmatmul.mubr.bf16.vlgmr.msra.gmra.mrb[80].mxu0 %v18046_v25  ;;  %v11249_v18 = vld [vmem:[#allocation20 + $0x3b8] sm:$0xff] }
 0xfc1   :  { %11997 = vmatpush1.bf16.msra.mxu1 %v14397_v52  ;;  %12038 = vmatpush1.bf16.msra.mxu0 %v14399_v50  ;;  %v14424_v52 = vcombine.high %v11157_v33, %v11161_v0  ;;  %v11168_v50 = vld [vmem:[#allocation20 + $0x130] sm:$0xff]  ;;  %v11217_v33 = vld [vmem:[#allocation20 + $0x2b8] sm:$0xff] }
 0xfc2   :  { %12028 = vmatprep.mubr.bf16.mxu1 %v11271_v46  ;;  %12069 = vmatprep.mubr.bf16.mxu0 %v11271_v46  ;;  %v14430_v62 = vcombine.high %v11164_v8, %v11168_v50  ;;  %v14429_v38 = vcombine.low %v11164_v8, %v11168_v50  ;;  %v14462_v46 = vcombine.high %v11196_v37, %v11200_v28  ;;  %v11224_v8 = vld [vmem:[#allocation20 + $0x2f0] sm:$0xff]  ;;  %v11221_v50 = vld [vmem:[#allocation20 + $0x2d8] sm:$0xff] }
 0xfc3   :  { %11998 = vmatprep.subr.bf16.mxu1 %v14406_v24  ;;  %12039 = vmatprep.subr.bf16.mxu0 %v14408_v31  ;;  %v11204_v24 = vld [vmem:[#allocation20 + $0x250] sm:$0xff]  ;;  %v11253_v28 = vld [vmem:[#allocation20 + $0x3d8] sm:$0xff] }
 0xfc4   :  { %v11208_v31 = vld [vmem:[#allocation20 + $0x270] sm:$0xff] }
 0xfc5   :  { %11999 = vmatpush1.bf16.msra.mxu1 %v14405_v49  ;;  %12040 = vmatpush1.bf16.msra.mxu0 %v14407_v56  ;;  %v14463_v49 = vcombine.low %v11197_v34, %v11201_v7  ;;  %v14470_v56 = vcombine.high %v11204_v24, %v11208_v31  ;;  %v14469_v0 = vcombine.low %v11204_v24, %v11208_v31  ;;  %v11256_v37 = vld [vmem:[#allocation20 + $0x3f0] sm:$0xff]  ;;  %v11257_v34 = vld [vmem:[#allocation20 + $0x3f8] sm:$0xff]  ;;  %v15062_v31 = vld [vmem:[#allocation22 + $0x4] ss:$8 sps:$4 sm:$0xff]  }
 0xfc6   :  { %12000 = vmatprep.subr.bf16.mxu1 %v14414_v58  ;;  %12041 = vmatprep.subr.bf16.mxu0 %v14416_v57  ;;  %v14472_v58 = vcombine.high %v11205_v51, %v11209_v63  ;;  %v11212_v57 = vld [vmem:[#allocation20 + $0x290] sm:$0xff]  ;;  %v14519_v24 = vcombine.low %v11253_v28, %v11257_v34 }
 0xfc7   :  { %v14477_v21 = vcombine.low %v11212_v57, %v11216_v45 }
 0xfc9   :  { %12001 = vmatpush1.bf16.msra.mxu1 %v14413_v1  ;;  %12042 = vmatpush1.bf16.msra.mxu0 %v14415_v9  ;;  %v14471_v1 = vcombine.low %v11205_v51, %v11209_v63  ;;  %v14478_v9 = vcombine.high %v11212_v57, %v11216_v45  ;;  %v15060_v51 = vld [vmem:[#allocation22] ss:$8 sps:$4 sm:$0xff]   ;;  %v15065_v63 = vld [vmem:[#allocation22 + $0x14] ss:$8 sps:$4 sm:$0xff]   ;;  %v15069_v57 = vld [vmem:[#allocation22 + $0x30] ss:$8 sps:$4 sm:$0xff]  }
 0xfca   :  { %12002 = vmatprep.subr.bf16.mxu1 %v14422_v30  ;;  %12043 = vmatprep.subr.bf16.mxu0 %v14424_v52  ;;  %v14480_v30 = vcombine.high %v11213_v5, %v11217_v33  ;;  %v11220_v52 = vld [vmem:[#allocation20 + $0x2d0] sm:$0xff]  ;;  %v15074_v45 = vld [vmem:[#allocation22 + $0x44] ss:$8 sps:$4 sm:$0xff]  }
 0xfcb   :  { %v14485_v44 = vcombine.low %v11220_v52, %v11224_v8 }
 0xfcd   :  { %12003 = vmatpush1.bf16.msra.mxu1 %v14421_v12  ;;  %12044 = vmatpush1.bf16.msra.mxu0 %v14423_v42  ;;  %v14479_v12 = vcombine.low %v11213_v5, %v11217_v33  ;;  %v14486_v42 = vcombine.high %v11220_v52, %v11224_v8  ;;  %v15072_v5 = vld [vmem:[#allocation22 + $0x40] ss:$8 sps:$4 sm:$0xff]   ;;  %v15075_v33 = vld [vmem:[#allocation22 + $0x50] ss:$8 sps:$4 sm:$0xff]   ;;  %v15086_v52 = vld [vmem:[#allocation22 + $0x84] ss:$8 sps:$4 sm:$0xff]  }
 0xfce   :  { %12004 = vmatprep.subr.bf16.mxu1 %v14430_v62  ;;  %12045 = vmatprep.subr.bf16.mxu0 %v14432_v15  ;;  %v14488_v62 = vcombine.high %v11221_v50, %v11225_v4  ;;  %v11228_v15 = vld [vmem:[#allocation20 + $0x310] sm:$0xff]  ;;  %v15084_v8 = vld [vmem:[#allocation22 + $0x80] ss:$8 sps:$4 sm:$0xff]  }
 0xfcf   :  { %v14493_v26 = vcombine.low %v11228_v15, %v11232_v53 }
 0xfd1   :  { %12005 = vmatpush1.bf16.msra.mxu1 %v14429_v38  ;;  %12046 = vmatpush1.bf16.msra.mxu0 %v14431_v35  ;;  %v14487_v38 = vcombine.low %v11221_v50, %v11225_v4  ;;  %v14494_v35 = vcombine.high %v11228_v15, %v11232_v53  ;;  %v15089_v50 = vld [vmem:[#allocation22 + $0x94] ss:$8 sps:$4 sm:$0xff]   ;;  %v15087_v4 = vld [vmem:[#allocation22 + $0x90] ss:$8 sps:$4 sm:$0xff]   ;;  %v15098_v15 = vld [vmem:[#allocation22 + $0xc4] ss:$8 sps:$4 sm:$0xff]  }
 0xfd2   :  { %12006 = vmatprep.subr.bf16.mxu1 %v14438_v36  ;;  %12047 = vmatprep.subr.bf16.mxu0 %v14440_v11  ;;  %v14496_v36 = vcombine.high %v11229_v13, %v11233_v29  ;;  %v11236_v11 = vld [vmem:[#allocation20 + $0x350] sm:$0xff]  ;;  %v15096_v53 = vld [vmem:[#allocation22 + $0xc0] ss:$8 sps:$4 sm:$0xff]  }
 0xfd3   :  { %v14501_v3 = vcombine.low %v11236_v11, %v11240_v47 }
 0xfd5   :  { %12007 = vmatpush1.bf16.msra.mxu1 %v14437_v59  ;;  %12048 = vmatpush1.bf16.msra.mxu0 %v14439_v61  ;;  %v14495_v59 = vcombine.low %v11229_v13, %v11233_v29  ;;  %v14502_v61 = vcombine.high %v11236_v11, %v11240_v47  ;;  %v15099_v13 = vld [vmem:[#allocation22 + $0xd0] ss:$8 sps:$4 sm:$0xff]   ;;  %v15101_v29 = vld [vmem:[#allocation22 + $0xd4] ss:$8 sps:$4 sm:$0xff]  }
 0xfd6   :  { %12008 = vmatprep.subr.bf16.mxu1 %v14446_v17  ;;  %12049 = vmatprep.subr.bf16.mxu0 %v14448_v19  ;;  %v14504_v17 = vcombine.high %v11237_v16, %v11241_v6  ;;  %v11244_v19 = vld [vmem:[#allocation20 + $0x390] sm:$0xff] }
 0xfd7   :  { %v14509_v7 = vcombine.low %v11244_v19, %v11248_v27 }
 0xfd9   :  { %12009 = vmatpush1.bf16.msra.mxu1 %v14445_v32  ;;  %12050 = vmatpush1.bf16.msra.mxu0 %v14447_v22  ;;  %v14503_v32 = vcombine.low %v11237_v16, %v11241_v6  ;;  %v14510_v22 = vcombine.high %v11244_v19, %v11248_v27  ;;  %v15107_v16 = vld [vmem:[#allocation22 + $0xf4] ss:$8 sps:$4 sm:$0xff]  }
 0xfda   :  { %12010 = vmatprep.subr.bf16.mxu1 %v14454_v41  ;;  %12051 = vmatprep.subr.bf16.mxu0 %v14456_v43  ;;  %v14512_v41 = vcombine.high %v11245_v23, %v11249_v18  ;;  %v11252_v43 = vld [vmem:[#allocation20 + $0x3d0] sm:$0xff] }
 0xfdd   :  { %12011 = vmatpush1.bf16.msra.mxu1 %v14453_v55  ;;  %12052 = vmatpush1.bf16.msra.mxu0 %v14455_v60  ;;  %v14511_v55 = vcombine.low %v11245_v23, %v11249_v18  ;;  %v14518_v60 = vcombine.high %v11252_v43, %v11256_v37  ;;  %v15105_v18 = vld [vmem:[#allocation22 + $0xf0] ss:$8 sps:$4 sm:$0xff]  }
 0xfde   :  { %12012 = vmatprep.subr.bf16.mxu1 %v14462_v46  ;;  %12053 = vmatprep.subr.bf16.mxu0 %v14464_v20  ;;  %v14520_v46 = vcombine.high %v11253_v28, %v11257_v34  ;;  %v14517_v20 = vcombine.low %v11252_v43, %v11256_v37 }
 0xfe1   :  { %12013 = vmatpush1.bf16.msra.mxu1 %v14461_v10  ;;  %12054 = vmatpush1.bf16.msra.mxu0 %v14463_v49  ;;  %v15063_v10 = vld [vmem:[#allocation22 + $0x10] ss:$8 sps:$4 sm:$0xff]   ;;  %v15068_v49 = vld [vmem:[#allocation22 + $0x24] ss:$8 sps:$4 sm:$0xff]  }
 0xfe2   :  { %12014 = vmatprep.subr.bf16.mxu1 %v14470_v56  ;;  %12055 = vmatprep.subr.bf16.mxu0 %v14472_v58  ;;  %v15066_v56 = vld [vmem:[#allocation22 + $0x20] ss:$8 sps:$4 sm:$0xff]   ;;  %v15071_v58 = vld [vmem:[#allocation22 + $0x34] ss:$8 sps:$4 sm:$0xff]  }
 0xfe5   :  { %12015 = vmatpush1.bf16.msra.mxu1 %v14469_v0  ;;  %12056 = vmatpush1.bf16.msra.mxu0 %v14471_v1  ;;  %v15080_v0 = vld [vmem:[#allocation22 + $0x64] ss:$8 sps:$4 sm:$0xff]   ;;  %v15078_v1 = vld [vmem:[#allocation22 + $0x60] ss:$8 sps:$4 sm:$0xff]  }
 0xfe6   :  { %12016 = vmatprep.subr.bf16.mxu1 %v14478_v9  ;;  %12057 = vmatprep.subr.bf16.mxu0 %v14480_v30  ;;  %v15083_v9 = vld [vmem:[#allocation22 + $0x74] ss:$8 sps:$4 sm:$0xff]   ;;  %v15081_v30 = vld [vmem:[#allocation22 + $0x70] ss:$8 sps:$4 sm:$0xff]  }
 0xfe9   :  { %12017 = vmatpush1.bf16.msra.mxu1 %v14477_v21  ;;  %12058 = vmatpush1.bf16.msra.mxu0 %v14479_v12  ;;  %v15092_v21 = vld [vmem:[#allocation22 + $0xa4] ss:$8 sps:$4 sm:$0xff]   ;;  %v15090_v12 = vld [vmem:[#allocation22 + $0xa0] ss:$8 sps:$4 sm:$0xff]  }
 0xfea   :  { %12018 = vmatprep.subr.bf16.mxu1 %v14486_v42  ;;  %12059 = vmatprep.subr.bf16.mxu0 %v14488_v62  ;;  %v15095_v42 = vld [vmem:[#allocation22 + $0xb4] ss:$8 sps:$4 sm:$0xff]   ;;  %v15093_v62 = vld [vmem:[#allocation22 + $0xb0] ss:$8 sps:$4 sm:$0xff]  }
 0xfed   :  { %12019 = vmatpush1.bf16.msra.mxu1 %v14485_v44  ;;  %12060 = vmatpush1.bf16.msra.mxu0 %v14487_v38  ;;  %v15104_v44 = vld [vmem:[#allocation22 + $0xe4] ss:$8 sps:$4 sm:$0xff]  }
 0xfee   :  { %12020 = vmatprep.subr.bf16.mxu1 %v14494_v35  ;;  %12061 = vmatprep.subr.bf16.mxu0 %v14496_v36  ;;  %v15102_v36 = vld [vmem:[#allocation22 + $0xe0] ss:$8 sps:$4 sm:$0xff]  }
 0xff1   :  { %12021 = vmatpush1.bf16.msra.mxu1 %v14493_v26  ;;  %12062 = vmatpush1.bf16.msra.mxu0 %v14495_v59 }
 0xff2   :  { %12022 = vmatprep.subr.bf16.mxu1 %v14502_v61  ;;  %12063 = vmatprep.subr.bf16.mxu0 %v14504_v17 }
 0xff5   :  { %12023 = vmatpush1.bf16.msra.mxu1 %v14501_v3  ;;  %12064 = vmatpush1.bf16.msra.mxu0 %v14503_v32 }
 0xff6   :  { %12024 = vmatprep.subr.bf16.mxu1 %v14510_v22  ;;  %12065 = vmatprep.subr.bf16.mxu0 %v14512_v41 }
 0xff9   :  { %12025 = vmatpush1.bf16.msra.mxu1 %v14509_v7  ;;  %12066 = vmatpush1.bf16.msra.mxu0 %v14511_v55 }
 0xffa   :  { %12026 = vmatprep.subr.bf16.mxu1 %v14518_v60  ;;  %12067 = vmatprep.subr.bf16.mxu0 %v14520_v46 }
 0xffd   :  { %12027 = vmatpush1.bf16.msra.mxu1 %v14517_v20  ;;  %12068 = vmatpush1.bf16.msra.mxu0 %v14519_v24 }
 0xffe   :  { %12448 = vmatprep.subr.bf16.mxu1 %v15062_v31 }
0x1000   :  { %12029 = vmatmul.mubr.bf16.vlgmr.msra.gmra.mrb[76].mxu1 %v18046_v25  ;;  %12070 = vmatmul.mubr.bf16.vlgmr.msra.gmra.mrb[84].mxu0 %v18046_v25  ;;  %v15077_v25 = vld [vmem:[#allocation22 + $0x54] ss:$8 sps:$4 sm:$0xff]  }
0x1001   :  { %12449 = vmatpush1.bf16.msra.mxu1 %v15060_v51 }
0x1002   :  { %12450 = vmatprep.subr.bf16.mxu1 %v15065_v63  ;;  %v11098_v63 = vld [vmem:[#allocation3 + $0x7] ss:$8 sm:$0xf0] }
0x1005   :  { %12451 = vmatpush1.bf16.msra.mxu1 %v15063_v10  ;;  %v11102_v10 = vld [vmem:[#allocation3 + $0x47] ss:$8 sm:$0xf0] }
0x1006   :  { %12452 = vmatprep.subr.bf16.mxu1 %v15068_v49 }
0x1009   :  { %12453 = vmatpush1.bf16.msra.mxu1 %v15066_v56 }
0x100a   :  { %12454 = vmatprep.subr.bf16.mxu1 %v15071_v58 }
0x100d   :  { %12455 = vmatpush1.bf16.msra.mxu1 %v15069_v57 }
0x100e   :  { %12456 = vmatprep.subr.bf16.mxu1 %v15074_v45  ;;  %v11097_v45 = vld [vmem:[#allocation3 + $0x7] ss:$8 sm:$0xf] }
0x1011   :  { %12457 = vmatpush1.bf16.msra.mxu1 %v15072_v5  ;;  %v11101_v5 = vld [vmem:[#allocation3 + $0x47] ss:$8 sm:$0xf] }
0x1012   :  { %12458 = vmatprep.subr.bf16.mxu1 %v15077_v25  ;;  %v11099_v25 = vor.u32 %v11098_v63, %v11097_v45 }
0x1015   :  { %12459 = vmatpush1.bf16.msra.mxu1 %v15075_v33  ;;  %v11103_v33 = vor.u32 %v11102_v10, %v11101_v5  ;;  %v12269_v10 = vrot.slane %v12264_v2, %v16189_v39 }
0x1016   :  { %12460 = vmatprep.subr.bf16.mxu1 %v15080_v0 }
0x1019   :  { %12461 = vmatpush1.bf16.msra.mxu1 %v15078_v1 }
0x101a   :  { %12462 = vmatprep.subr.bf16.mxu1 %v15083_v9 }
0x101d   :  { %12463 = vmatpush1.bf16.msra.mxu1 %v15081_v30 }
0x101e   :  { %12464 = vmatprep.subr.bf16.mxu1 %v15086_v52 }
0x1021   :  { %12465 = vmatpush1.bf16.msra.mxu1 %v15084_v8 }
0x1022   :  { %12466 = vmatprep.subr.bf16.mxu1 %v15089_v50 }
0x1025   :  { %12467 = vmatpush1.bf16.msra.mxu1 %v15087_v4 }
0x1026   :  { %12468 = vmatprep.subr.bf16.mxu1 %v15092_v21 }
0x1029   :  { %12469 = vmatpush1.bf16.msra.mxu1 %v15090_v12 }
0x102a   :  { %12470 = vmatprep.subr.bf16.mxu1 %v15095_v42 }
0x102d   :  { %12471 = vmatpush1.bf16.msra.mxu1 %v15093_v62 }
0x102e   :  { %12472 = vmatprep.subr.bf16.mxu1 %v15098_v15 }
0x1031   :  { %12473 = vmatpush1.bf16.msra.mxu1 %v15096_v53 }
0x1032   :  { %12474 = vmatprep.subr.bf16.mxu1 %v15101_v29 }
0x1035   :  { %12475 = vmatpush1.bf16.msra.mxu1 %v15099_v13 }
0x1036   :  { %12476 = vmatprep.subr.bf16.mxu1 %v15104_v44 }
0x1039   :  { %12477 = vmatpush1.bf16.msra.mxu1 %v15102_v36 }
0x103a   :  { %12478 = vmatprep.subr.bf16.mxu1 %v15107_v16 }
0x103d   :  { %12479 = vmatpush1.bf16.msra.mxu1 %v15105_v18 }
0x1093   :  { %v11948_v38 = vpop.f32.mrb[72].mxu1  ;;  %v11989_v35 = vpop.f32.mrb[80].mxu0 }
0x1094   :  { %v11950_v11 = vpop.f32.mrb[73].mxu1  ;;  %v11991_v47 = vpop.f32.mrb[81].mxu0 }
0x1095   :  { %v12086_v6 = vcombine.low %v11948_v38, %v11950_v11  ;;  %v12087_v26 = vcombine.low %v11989_v35, %v11991_v47  ;;  %v11952_v59 = vpop.f32.mrb[74].mxu1  ;;  %v11993_v61 = vpop.f32.mrb[82].mxu0 }
0x1096   :  { %v11953_v17 = vpop.f32.mrb[75].mxu1  ;;  %v11994_v19 = vpop.f32.mrb[83].mxu0 }
0x1097   :  { %v12096_v27 = vrot.slane %v12086_v6, %v18874_v48  ;;  %v12103_v23 = vrot.slane %v12087_v26, %v18874_v48 }
0x1099   :  { %v12118_v3 = vcombine.low %v12096_v27, %v12103_v23  ;;  %v12119_v32 = vcombine.high %v12096_v27, %v12103_v23 }
0x109b   :  { %v12128_v49 = vrot.slane %v12118_v3, %v18874_v48  ;;  %v12135_v56 = vrot.slane %v12119_v32, %v18874_v48 }
0x10d3   :  { %v12030_v22 = vpop.f32.mrb[76].mxu1  ;;  %v12071_v41 = vpop.f32.mrb[84].mxu0 }
0x10d4   :  { %v12032_v43 = vpop.f32.mrb[77].mxu1  ;;  %v12073_v37 = vpop.f32.mrb[85].mxu0 }
0x10d5   :  { %v12088_v28 = vcombine.low %v12030_v22, %v12032_v43  ;;  %v12089_v34 = vcombine.low %v12071_v41, %v12073_v37  ;;  %v12034_v7 = vpop.f32.mrb[78].mxu1  ;;  %v12075_v55 = vpop.f32.mrb[86].mxu0 }
0x10d6   :  { %v12035_v60 = vpop.f32.mrb[79].mxu1  ;;  %v12076_v46 = vpop.f32.mrb[87].mxu0 }
0x10d7   :  { %v12110_v20 = vrot.slane %v12088_v28, %v18874_v48  ;;  %v12117_v24 = vrot.slane %v12089_v34, %v18874_v48 }
0x10d9   :  { %v12120_v31 = vcombine.low %v12110_v20, %v12117_v24  ;;  %v12121_v51 = vcombine.high %v12110_v20, %v12117_v24 }
0x10db   :  { %v12142_v58 = vrot.slane %v12120_v31, %v18874_v48  ;;  %v12149_v57 = vrot.slane %v12121_v51, %v18874_v48 }
0x10dd   :  { %v12150_v0 = vcombine.low %v12128_v49, %v12142_v58  ;;  %v12151_v1 = vcombine.low %v12135_v56, %v12149_v57  ;;  %v12273_v49 = vrot.slane %v12264_v2, %v16192_v40  ;;  %v15120_v2 = vld [vmem:[#allocation23 + $0x40] ss:$8 sps:$4 sm:$0xff]  }
0x10df   :  { %v12154_v9 = vadd.f32 %v12150_v0, %v11099_v25  ;;  %v12155_v30 = vadd.f32 %v12151_v1, %v11103_v33  ;;  %v12495_v1 = vld [vmem:[%s18168_s16] sm:$0x3] }
0x10e1   :  { %v14521_v52 = vmul.f32 -1.442695, %v12154_v9  ;;  %v14522_v8 = vmul.f32 -1.442695, %v12155_v30  ;;  %v12170_v50 = vrot.slane %v12154_v9, 2  ;;  %v12171_v4 = vrot.slane %v12155_v30, 2 }
0x10e2   :  { %v12192_v42 = vrot.slane %v12154_v9, 6  ;;  %v12193_v48 = vrot.slane %v12155_v30, 6  ;;  %v12186_v62 = vrot.slane %v12154_v9, 4  ;;  %v12187_v15 = vrot.slane %v12155_v30, 4 }
0x10e3   :  { %15396 = vpow2.f32 %v14521_v52  ;;  %v14523_v21 = vmul.f32 -1.442695, %v12170_v50  ;;  %v14524_v12 = vmul.f32 -1.442695, %v12171_v4  ;;  %v12500_v9 = vrot.slane %v12495_v1, %v16189_v39 }
0x10e4   :  { %15398 = vpow2.f32 %v14522_v8  ;;  %v14525_v53 = vmul.f32 -1.442695, %v12192_v42  ;;  %v14526_v13 = vmul.f32 -1.442695, %v12193_v48  ;;  %v12504_v30 = vrot.slane %v12495_v1, %v16192_v40 }
0x10e5   :  { %15400 = vpow2.f32 %v14523_v21 }
0x10e6   :  { %15402 = vpow2.f32 %v14524_v12 }
0x10e7   :  { %15404 = vtanh.f32 %v12186_v62 }
0x10e8   :  { %15406 = vtanh.f32 %v12187_v15 }
0x10e9   :  { %15408 = vpow2.f32 %v14525_v53  ;;  %v18920_v53 = vlaneseq }
0x10ea   :  { %15410 = vpow2.f32 %v14526_v13 }
0x10eb   :  { %v12520_v13 = vand.u32 127, %v18920_v53  ;;  %v15149_v53 = vld [vmem:[#allocation23 + $0xd4] ss:$8 sps:$4 sm:$0xff]  }
0x10ed   :  { %v15397_v29 = vpop.eup %15396 }
0x10ee   :  { %v15399_v44 = vpop.eup %15398  ;;  %v12162_v38 = vadd.f32 1.0, %v15397_v29 }
0x10ef   :  { %v15401_v35 = vpop.eup %15400  ;;  %v12163_v36 = vadd.f32 1.0, %v15399_v44  ;;  %v18921_v44 = vld [vmem:[#allocation38_spill] sm:$0xff] }
0x10f0   :  { %v15403_v11 = vpop.eup %15402  ;;  %15412 = vrcp.f32 %v12162_v38  ;;  %v12180_v47 = vadd.f32 1.0, %v15401_v35  ;;  %v18096_v38 = vsub.s32 %v12520_v13, %v18921_v44  ;;  %v15147_v13 = vld [vmem:[#allocation23 + $0xd0] ss:$8 sps:$4 sm:$0xff]   ;;  %v15150_v44 = vld [vmem:[#allocation23 + $0xe0] ss:$8 sps:$4 sm:$0xff]  }
0x10f1   :  { %15414 = vrcp.f32 %v12163_v36  ;;  %v12181_v16 = vadd.f32 1.0, %v15403_v11  ;;  %v15405_v6 = vpop.eup %15404 }
0x10f2   :  { %15416 = vrcp.f32 %v12180_v47  ;;  %v15407_v26 = vpop.eup %15406 }
0x10f3   :  { %15418 = vrcp.f32 %v12181_v16  ;;  %v15409_v59 = vpop.eup %15408 }
0x10f4   :  { %v15411_v61 = vpop.eup %15410  ;;  %v12202_v27 = vadd.f32 1.0, %v15409_v59 }
0x10f5   :  { %v12203_v18 = vadd.f32 1.0, %v15411_v61 }
0x10f6   :  { %15420 = vrcp.f32 %v12202_v27 }
0x10f7   :  { %15422 = vrcp.f32 %v12203_v18 }
0x10fa   :  { %v15413_v17 = vpop.eup %15412 }
0x10fb   :  { %v15415_v19 = vpop.eup %15414  ;;  %v12210_v22 = vmul.f32 %v15413_v17, %v15405_v6 }
0x10fc   :  { %v15417_v23 = vpop.eup %15416  ;;  %v12211_v43 = vmul.f32 %v15415_v19, %v15407_v26 }
0x10fd   :  { %v15419_v3 = vpop.eup %15418  ;;  %v12208_v32 = vmul.f32 %v15417_v23, %v18030_v14 }
0x10fe   :  { %v12209_v41 = vmul.f32 %v15419_v3, %v18032_v54 }
0x10ff   :  { %v12212_v37 = vadd.f32 %v12210_v22, %v12208_v32 }
0x1100   :  { %v12213_v28 = vadd.f32 %v12211_v43, %v12209_v41  ;;  %v15421_v34 = vpop.eup %15420 }
0x1101   :  { %15424 = vtanh.f32 %v12212_v37  ;;  %v15423_v7 = vpop.eup %15422 }
0x1102   :  { %15426 = vtanh.f32 %v12213_v28  ;;  %v15108_v28 = vld [vmem:[#allocation23] ss:$8 sps:$4 sm:$0xff]  }
0x110b   :  { %v15425_v55 = vpop.eup %15424 }
0x110c   :  { %v15427_v60 = vpop.eup %15426  ;;  %v12216_v46 = vmul.f32 %v15425_v55, %v15421_v34  ;;  %v15110_v34 = vld [vmem:[#allocation23 + $0x4] ss:$8 sps:$4 sm:$0xff]   ;;  %v15111_v55 = vld [vmem:[#allocation23 + $0x10] ss:$8 sps:$4 sm:$0xff]  }
0x110d   :  { %v12217_v20 = vmul.f32 %v15427_v60, %v15423_v7  ;;  %v15113_v7 = vld [vmem:[#allocation23 + $0x14] ss:$8 sps:$4 sm:$0xff]   ;;  %12859 = vmatprep.subr.bf16.mxu0 %v15110_v34  ;;  %v15116_v60 = vld [vmem:[#allocation23 + $0x24] ss:$8 sps:$4 sm:$0xff]  }
0x110e   :  { %12219 = vst.msk [vmem:[#allocation4 + $0x7] ss:$8 sm:$0x3] %vm16143_vm1, %v12216_v46  ;;  %12860 = vmatpush1.bf16.msra.mxu0 %v15108_v28  ;;  %v15114_v46 = vld [vmem:[#allocation23 + $0x20] ss:$8 sps:$4 sm:$0xff]  }
0x110f   :  { %12222 = vst.msk [vmem:[#allocation4 + $0x17] ss:$8 sm:$0x3] %vm16143_vm1, %v12217_v20  ;;  %12861 = vmatprep.subr.bf16.mxu0 %v15113_v7  ;;  %v15119_v20 = vld [vmem:[#allocation23 + $0x34] ss:$8 sps:$4 sm:$0xff]  }
0x1112   :  { %12862 = vmatpush1.bf16.msra.mxu0 %v15111_v55 }
0x1113   :  { %12863 = vmatprep.subr.bf16.mxu0 %v15116_v60 }
0x1115   :  { %v18072_v14 = vld [vmem:[#allocation4 + $0x8] sm:$0xff]  ;;  %v18074_v54 = vld [vmem:[#allocation4] sm:$0xff] }
0x1116   :  { %v18076_v24 = vld [vmem:[#allocation4 + $0x18] sm:$0xff]  ;;  %v18078_v31 = vld [vmem:[#allocation4 + $0x10] sm:$0xff]  ;;  %12864 = vmatpush1.bf16.msra.mxu0 %v15114_v46 }
0x1117   :  { %v14628_v51 = vpack.c.bf16 %v18076_v24, %v18072_v14  ;;  %v14627_v63 = vpack.c.bf16 %v18078_v31, %v18074_v54  ;;  %12865 = vmatprep.subr.bf16.mxu0 %v15119_v20 }
0x1119   :  { %12480 = vmatprep.mubr.bf16.mxu1 %v14628_v51  ;;  %v15117_v51 = vld [vmem:[#allocation23 + $0x30] ss:$8 sps:$4 sm:$0xff]  }
0x111a   :  { %12481 = vmatmul.mubr.bf16.vlgmr.msra.gmra.mrb[80].mxu1 %v14627_v63  ;;  %v15122_v63 = vld [vmem:[#allocation23 + $0x44] ss:$8 sps:$4 sm:$0xff]   ;;  %12866 = vmatpush1.bf16.msra.mxu0 %v15117_v51 }
0x111b   :  { %12867 = vmatprep.subr.bf16.mxu0 %v15122_v63 }
0x111e   :  { %12868 = vmatpush1.bf16.msra.mxu0 %v15120_v2 }
0x11ed   :  { %v12482_v56 = vpop.f32.mrb[80].mxu1 }
0x11ee   :  { %v12483_v58 = vadd.f32 %v12482_v56, %v12269_v10  ;;  %v12484_v57 = vpop.f32.mrb[81].mxu1  ;;  %v15128_v56 = vld [vmem:[#allocation23 + $0x64] ss:$8 sps:$4 sm:$0xff]  }
0x11ef   :  { %v12485_v45 = vadd.f32 %v12484_v57, %v12273_v49  ;;  %v12486_v5 = vpop.f32.mrb[82].mxu1  ;;  %v15131_v57 = vld [vmem:[#allocation23 + $0x74] ss:$8 sps:$4 sm:$0xff]  }
0x11f0   :  { %15428 = vtanh.f32 %v12483_v58  ;;  %v12487_v25 = vadd.f32 %v12486_v5, %v12269_v10  ;;  %v12488_v33 = vpop.f32.mrb[83].mxu1  ;;  %v15125_v10 = vld [vmem:[#allocation23 + $0x54] ss:$8 sps:$4 sm:$0xff]   ;;  %v15126_v58 = vld [vmem:[#allocation23 + $0x60] ss:$8 sps:$4 sm:$0xff]  }
0x11f1   :  { %15430 = vtanh.f32 %v12485_v45  ;;  %v12489_v0 = vadd.f32 %v12488_v33, %v12273_v49  ;;  %v15123_v49 = vld [vmem:[#allocation23 + $0x50] ss:$8 sps:$4 sm:$0xff]   ;;  %12869 = vmatprep.subr.bf16.mxu0 %v15125_v10  ;;  %v15134_v5 = vld [vmem:[#allocation23 + $0x84] ss:$8 sps:$4 sm:$0xff]   ;;  %v15137_v33 = vld [vmem:[#allocation23 + $0x94] ss:$8 sps:$4 sm:$0xff]  }
0x11f2   :  { %15432 = vtanh.f32 %v12487_v25  ;;  %12870 = vmatpush1.bf16.msra.mxu0 %v15123_v49  ;;  %v15129_v45 = vld [vmem:[#allocation23 + $0x70] ss:$8 sps:$4 sm:$0xff]   ;;  %v15132_v25 = vld [vmem:[#allocation23 + $0x80] ss:$8 sps:$4 sm:$0xff]  }
0x11f3   :  { %15434 = vtanh.f32 %v12489_v0  ;;  %12871 = vmatprep.subr.bf16.mxu0 %v15128_v56  ;;  %v15135_v0 = vld [vmem:[#allocation23 + $0x90] ss:$8 sps:$4 sm:$0xff]  }
0x11f6   :  { %12872 = vmatpush1.bf16.msra.mxu0 %v15126_v58 }
0x11f7   :  { %12873 = vmatprep.subr.bf16.mxu0 %v15131_v57 }
0x11fa   :  { %v15429_v52 = vpop.eup %15428  ;;  %12874 = vmatpush1.bf16.msra.mxu0 %v15129_v45 }
0x11fb   :  { %v15431_v8 = vpop.eup %15430  ;;  %v12507_v50 = vmul.f32 %v15429_v52, %v12500_v9  ;;  %12875 = vmatprep.subr.bf16.mxu0 %v15134_v5 }
0x11fc   :  { %v15433_v4 = vpop.eup %15432  ;;  %v12508_v21 = vmul.f32 %v15431_v8, %v12504_v30 }
0x11fd   :  { %v15435_v12 = vpop.eup %15434  ;;  %v12509_v42 = vmul.f32 %v15433_v4, %v12500_v9 }
0x11fe   :  { %v12511_v48 = vadd.f32 %v12508_v21, %v12507_v50  ;;  %v12510_v62 = vmul.f32 %v15435_v12, %v12504_v30  ;;  %12876 = vmatpush1.bf16.msra.mxu0 %v15132_v25  ;;  %v15140_v21 = vld [vmem:[#allocation23 + $0xa4] ss:$8 sps:$4 sm:$0xff]   ;;  %v15138_v12 = vld [vmem:[#allocation23 + $0xa0] ss:$8 sps:$4 sm:$0xff]  }
0x11ff   :  { %12877 = vmatprep.subr.bf16.mxu0 %v15137_v33 }
0x1200   :  { %12512 = vadd.xlane.f32.xlu0 %v12511_v48  ;;  %v12514_v15 = vadd.f32 %v12510_v62, %v12509_v42  ;;  %v15143_v42 = vld [vmem:[#allocation23 + $0xb4] ss:$8 sps:$4 sm:$0xff]   ;;  %v15141_v48 = vld [vmem:[#allocation23 + $0xb0] ss:$8 sps:$4 sm:$0xff]   ;;  %v15146_v62 = vld [vmem:[#allocation23 + $0xc4] ss:$8 sps:$4 sm:$0xff]  }
0x1202   :  { %12878 = vmatpush1.bf16.msra.mxu0 %v15135_v0 }
0x1203   :  { %12879 = vmatprep.subr.bf16.mxu0 %v15140_v21 }
0x1204   :  { %12515 = vadd.xlane.f32.xlu0 %v12514_v15  ;;  %v15144_v15 = vld [vmem:[#allocation23 + $0xc0] ss:$8 sps:$4 sm:$0xff]  }
0x1206   :  { %12880 = vmatpush1.bf16.msra.mxu0 %v15138_v12 }
0x1207   :  { %12881 = vmatprep.subr.bf16.mxu0 %v15143_v42 }
0x120a   :  { %12882 = vmatpush1.bf16.msra.mxu0 %v15141_v48 }
0x120b   :  { %12883 = vmatprep.subr.bf16.mxu0 %v15146_v62 }
0x120e   :  { %12884 = vmatpush1.bf16.msra.mxu0 %v15144_v15 }
0x120f   :  { %12885 = vmatprep.subr.bf16.mxu0 %v15149_v53 }
0x1212   :  { %12886 = vmatpush1.bf16.msra.mxu0 %v15147_v13  ;;  %v15168_v13 = vld [vmem:[#allocation25 + $0x70] sm:$0xff]  }
0x128d   :  { %v12513_v29 = vpop.xlane.xlu0 %12512 }
0x128e   :  { %v12524_v36 = vrot.slane %v12513_v29, %v18096_v38 }
0x1291   :  { %v12516_v35 = vpop.xlane.xlu0 %12515 }
0x1292   :  { %v12528_v11 = vrot.slane %v12516_v35, %v18096_v38 }
0x1294   :  { %v12529_v47 = vsel %vm4498_vm3, %v12528_v11, %v12524_v36  ;;  %v15153_v36 = vld [vmem:[#allocation23 + $0xf0] ss:$8 sps:$4 sm:$0xff]   ;;  %v15156_v11 = vld [vmem:[#allocation25 + $0x40] sm:$0xff]  }
0x1295   :  { %v12532_v16 = vsel %vm12531_vm4, %v12529_v47, -inf  ;;  %v15157_v47 = vld [vmem:[#allocation25] sm:$0xff]   ;;  %14691 = vmatprep.subr.bf16.mxu1 %v15156_v11 }
0x1296   :  { %12533 = vmax.xlane.f32.xlu1 %v12532_v16  ;;  %v15158_v16 = vld [vmem:[#allocation25 + $0x48] sm:$0xff]   ;;  %14692 = vmatpush3.bf16.msra.mxu1 %v15157_v47 }
0x1297   :  { %14693 = vmatprep.subr.bf16.mxu1 %v15158_v16 }
0x1323   :  { %v12534_v6 = vpop.xlane.xlu1 %12533 }
0x1324   :  { %v12539_v26 = vrot.slane %v12534_v6, %v16189_v39  ;;  %v12543_v59 = vrot.slane %v12534_v6, %v16192_v40  ;;  %v15159_v6 = vld [vmem:[#allocation25 + $0x8] sm:$0xff]  }
0x1325   :  { %14694 = vmatpush3.bf16.msra.mxu1 %v15159_v6 }
0x1326   :  { %v12546_v61 = vsub.f32 %v12513_v29, %v12539_v26  ;;  %v12547_v17 = vsub.f32 %v12516_v35, %v12543_v59  ;;  %v15152_v29 = vld [vmem:[#allocation23 + $0xe4] ss:$8 sps:$4 sm:$0xff]   ;;  %v15155_v35 = vld [vmem:[#allocation23 + $0xf4] ss:$8 sps:$4 sm:$0xff]  }
0x1327   :  { %12887 = vmatprep.subr.bf16.mxu0 %v15152_v29  ;;  %v15160_v26 = vld [vmem:[#allocation25 + $0x50] sm:$0xff]  }
0x1328   :  { %v12548_v19 = vmul.f32 1.442695, %v12546_v61  ;;  %v12550_v27 = vmul.f32 1.442695, %v12547_v17  ;;  %12888 = vmatpush1.bf16.msra.mxu0 %v15150_v44  ;;  %v15161_v59 = vld [vmem:[#allocation25 + $0x10] sm:$0xff]   ;;  %14695 = vmatprep.subr.bf16.mxu1 %v15160_v26  ;;  %v15162_v61 = vld [vmem:[#allocation25 + $0x58] sm:$0xff]  }
0x1329   :  { %12889 = vmatprep.subr.bf16.mxu0 %v15155_v35  ;;  %14696 = vmatpush3.bf16.msra.mxu1 %v15161_v59  ;;  %v15163_v17 = vld [vmem:[#allocation25 + $0x18] sm:$0xff]   ;;  %v15169_v29 = vld [vmem:[#allocation25 + $0x30] sm:$0xff]  }
0x132a   :  { %15436 = vpow2.f32 %v12548_v19  ;;  %14697 = vmatprep.subr.bf16.mxu1 %v15162_v61  ;;  %v15164_v19 = vld [vmem:[#allocation25 + $0x60] sm:$0xff]   ;;  %v15170_v44 = vld [vmem:[#allocation25 + $0x78] sm:$0xff]  }
0x132b   :  { %15438 = vpow2.f32 %v12550_v27  ;;  %v15165_v27 = vld [vmem:[#allocation25 + $0x20] sm:$0xff]   ;;  %v15171_v35 = vld [vmem:[#allocation25 + $0x38] sm:$0xff]  }
0x132c   :  { %12890 = vmatpush1.bf16.msra.mxu0 %v15153_v36  ;;  %v12673_v36 = vld [vmem:[%s18170_s18] sm:$0x3]  ;;  %s15730_s18 = scalar_lea.vmem %s13097_s11, 32 }
0x132d   :  { %14698 = vmatpush3.bf16.msra.mxu1 %v15163_v17  ;;  %v12678_v11 = vrot.slane %v12673_v36, %v16189_v39  ;;  %v12682_v47 = vrot.slane %v12673_v36, %v16192_v40  ;;  %p15731_p6 = scmp.ne.s32.totalorder %s13097_s11, %s15730_s18  ;;  %p15736_p8 = scmp.lt.s32.totalorder %s15730_s18, %s15730_s18 }
0x132e   :  { %14699 = vmatprep.subr.bf16.mxu1 %v15164_v19 }
0x132f   :  { %p15737_p9 = por %p15736_p8, %p15735_p7 }
0x1331   :  { %14700 = vmatpush3.bf16.msra.mxu1 %v15165_v27  ;;  %p15738_p10 = pnand %p15737_p9, %p15731_p6 }
0x1334   :  { %v15437_v23 = vpop.eup %15436 }
0x1335   :  { %v15439_v18 = vpop.eup %15438  ;;  %12555 = vperm.xlu1 %14794, %v15437_v23  }
0x1336   :  { %12558 = vperm.xlu0 %14795, %v15439_v18  }
0x13b4   :  { %v12556_v3 = vpop.permute.xlu1 %12555 }
0x13b5   :  { %v12559_v32 = vpop.permute.xlu0 %12558  ;;  %v12563_v22 = vrot.slane %v12556_v3, %v18096_v38 }
0x13b6   :  { %v12567_v41 = vrot.slane %v12559_v32, %v18096_v38 }
0x13b8   :  { %v12568_v43 = vsel %vm4498_vm3, %v12567_v41, %v12563_v22 }
0x13b9   :  { %v12570_v37 = vsel %vm12531_vm4, %v12568_v43, 0.0 }
0x13ba   :  { %12571 = vadd.xlane.f32.xlu1 %v12570_v37 }
0x1447   :  { %v12572_v1 = vpop.xlane.xlu1 %12571 }
0x1448   :  { %v12577_v9 = vrot.slane %v12572_v1, %v16189_v39  ;;  %v12581_v30 = vrot.slane %v12572_v1, %v16192_v40 }
0x144a   :  { %15440 = vrcp.f32 %v12577_v9 }
0x144b   :  { %15442 = vrcp.f32 %v12581_v30 }
0x1454   :  { %v15441_v52 = vpop.eup %15440 }
0x1455   :  { %v12585_v8 = vmul.f32 %v15441_v52, %v15437_v23  ;;  %v15443_v50 = vpop.eup %15442  ;;  %v15166_v23 = vld [vmem:[#allocation25 + $0x68] sm:$0xff]  }
0x1456   :  { %v12587_v4 = vmul.f32 %v15443_v50, %v15439_v18  ;;  %v15167_v18 = vld [vmem:[#allocation25 + $0x28] sm:$0xff]   ;;  %14701 = vmatprep.subr.bf16.mxu1 %v15166_v23 }
0x1457   :  { %12591 = vperm.xlu0 %14795, %v12585_v8   ;;  %14702 = vmatpush3.bf16.msra.mxu1 %v15167_v18 }
0x1458   :  { %14703 = vmatprep.subr.bf16.mxu1 %v15168_v13 }
0x145b   :  { %12594 = vperm.xlu0 %14795, %v12587_v4   ;;  %14704 = vmatpush3.bf16.msra.mxu1 %v15169_v29 }
0x145c   :  { %14705 = vmatprep.subr.bf16.mxu1 %v15170_v44 }
0x145f   :  { %14706 = vmatpush3.bf16.msra.mxu1 %v15171_v35 }
0x14d6   :  { %v12592_v3 = vpop.permute.xlu0 %12591 }
0x14d7   :  { %v12609_v32 = vmul.f32 %v12592_v3, %v18074_v54  ;;  %v12610_v22 = vmul.f32 %v12592_v3, %v18072_v14  ;;  %v12599_v37 = vrot.slane %v12592_v3, %v18096_v38 }
0x14d9   :  { %v12613_v41 = vrot.slane %v12609_v32, 4  ;;  %v12619_v43 = vrot.slane %v12610_v22, 4 }
0x14da   :  { %v12595_v28 = vpop.permute.xlu0 %12594 }
0x14db   :  { %v12614_v34 = vadd.f32 %v12613_v41, %v12609_v32  ;;  %v12620_v7 = vadd.f32 %v12619_v43, %v12610_v22  ;;  %v12603_v55 = vrot.slane %v12595_v28, %v18096_v38  ;;  %v12611_v60 = vmul.f32 %v12595_v28, %v18078_v31 }
0x14dc   :  { %v12612_v46 = vmul.f32 %v12595_v28, %v18076_v24 }
0x14dd   :  { %v12615_v20 = vrot.slane %v12614_v34, 2  ;;  %v12621_v51 = vrot.slane %v12620_v7, 2  ;;  %v12625_v63 = vrot.slane %v12611_v60, 4  ;;  %v12604_v54 = vsel %vm4498_vm3, %v12603_v55, %v12599_v37 }
0x14de   :  { %v12631_v2 = vrot.slane %v12612_v46, 4  ;;  %12606 = vst.msk [vmem:[#allocation27] sm:$0x3] %vm12531_vm4, %v12604_v54 }
0x14df   :  { %v12616_v14 = vadd.f32 %v12615_v20, %v12614_v34  ;;  %v12622_v10 = vadd.f32 %v12621_v51, %v12620_v7  ;;  %v12626_v49 = vadd.f32 %v12625_v63, %v12611_v60 }
0x14e0   :  { %v12632_v56 = vadd.f32 %v12631_v2, %v12612_v46 }
0x14e1   :  { %v12617_v58 = vrot.slane %v12616_v14, 1  ;;  %v12623_v57 = vrot.slane %v12622_v10, 1  ;;  %v12627_v45 = vrot.slane %v12626_v49, 2 }
0x14e2   :  { %v12633_v38 = vrot.slane %v12632_v56, 2 }
0x14e3   :  { %v12618_v5 = vadd.f32 %v12617_v58, %v12616_v14  ;;  %v12628_v31 = vadd.f32 %v12627_v45, %v12626_v49  ;;  %v12624_v25 = vadd.f32 %v12623_v57, %v12622_v10 }
0x14e4   :  { %v12634_v24 = vadd.f32 %v12633_v38, %v12632_v56 }
0x14e5   :  { %v12629_v33 = vrot.slane %v12628_v31, 1  ;;  %v12637_v1 = vpack.c.bf16 %v12618_v5, %v12618_v5  ;;  %v12638_v52 = vpack.c.bf16 %v12624_v25, %v12624_v25 }
0x14e6   :  { %v12635_v0 = vrot.slane %v12634_v24, 1 }
0x14e7   :  { %v12630_v9 = vadd.f32 %v12629_v33, %v12628_v31  ;;  %v12689_v4 = vunpack.c.l.b16 %v12637_v1  ;;  %v12690_v12 = vunpack.c.l.b16 %v12638_v52 }
0x14e8   :  { %v12636_v30 = vadd.f32 %v12635_v0, %v12634_v24 }
0x14e9   :  { %v12639_v8 = vpack.c.bf16 %v12630_v9, %v12630_v9 }
0x14ea   :  { %v12640_v50 = vpack.c.bf16 %v12636_v30, %v12636_v30 }
0x14eb   :  { %v12691_v21 = vunpack.c.l.b16 %v12639_v8 }
0x14ec   :  { %v12692_v42 = vunpack.c.l.b16 %v12640_v50 }
0x14ed   :  { %v12693_v48 = vsel %vm4498_vm3, %v12691_v21, %v12689_v4 }
0x14ee   :  { %v12694_v62 = vsel %vm4498_vm3, %v12692_v42, %v12690_v12  ;;  %v12695_v15 = vpack.c.b16 %v12693_v48, %v12693_v48 }
0x14ef   :  { %v12696_v53 = vpack.c.b16 %v12694_v62, %v12694_v62 }
0x14f1   :  { %12891 = vmatprep.mubr.bf16.mxu0 %v12696_v53 }
0x14f2   :  { %12892 = vmatmul.mubr.bf16.vlgmr.msra.gmra.mrb[88].mxu0 %v12695_v15 }
0x15c5   :  { %v12893_v16 = vpop.f32.mrb[88].mxu0 }
0x15c6   :  { %v12894_v6 = vadd.f32 %v12893_v16, %v12678_v11  ;;  %v12895_v26 = vpop.f32.mrb[89].mxu0 }
0x15c7   :  { %v12896_v59 = vadd.f32 %v12895_v26, %v12682_v47  ;;  %v12897_v61 = vpop.f32.mrb[90].mxu0 }
0x15c8   :  { %v12900_v17 = vmax.f32 %v12894_v6, 0.0  ;;  %v12898_v19 = vpop.f32.mrb[91].mxu0 }
0x15c9   :  { %v12901_v27 = vmax.f32 %v12896_v59, 0.0 }
0x15ca   :  { %v12902_v18 = vpack.c.bf16 %v12900_v17, %v12900_v17 }
0x15cb   :  { %v12903_v23 = vpack.c.bf16 %v12901_v27, %v12901_v27 }
0x15cd   :  { %13071 = vmatprep.mubr.bf16.mxu1 %v12903_v23 }
0x15ce   :  { %13072 = vmatmul.mubr.bf16.vlgmr.msra.gmra.mrb[84].mxu1 %v12902_v18 }
0x15cf   :  { %15741 = shalt.err (!%p15738_p10)
}
0x15d0   :  { %s18922_s25 = sld [smem:[#allocation127_spill]] }
0x15d6   :  { %s15742_s20 = scalar_lea.hbm %s18922_s25, 32 }
0x15d7   :  { %p15743_p11 = scmp.ne.s32.totalorder %s18922_s25, %s15742_s20  ;;  %p15746_p12 = scmp.lt.u32.totalorder %s15742_s20, %s18922_s25 }
0x15d9   :  { %p15748_p13 = pnand %p15746_p12, %p15743_p11 }
0x15db   :  { %15751 = shalt.err (!%p15748_p13)
}
0x15dc   :  { %13099 = dma.vmem_to_hbm [thread:$0]  %s13097_s11, 32, %s18922_s25, [#allocation28]  }
0x15dd   :  { %s18923_s0 = sld [smem:[#allocation125_spill]]  ;;  %s15816_s22 = smov [#allocation26]  }
0x15de   :  { %s13086_s19 = sshll.u32 %s15816_s22, 4  ;;  %s13087_s19 = int_to_ptr.vmem [resolvable:$true] %s13086_s19 }
0x15df   :  { %s15752_s26 = scalar_lea.vmem %s13087_s19, 32  ;;  %p15757_p1 = scmp.lt.s32.totalorder %s13087_s19, %s13087_s19 }
0x15e0   :  { %p15753_p0 = scmp.ne.s32.totalorder %s13087_s19, %s15752_s26  ;;  %p15758_p2 = scmp.lt.s32.totalorder %s15752_s26, %s15752_s26 }
0x15e2   :  { %p15759_p3 = por %p15758_p2, %p15757_p1 }
0x15e3   :  { %v14593_v40 = vld [vmem:[%s18923_s0] ss:$0 sm:$0xff] }
0x15e4   :  { %p15760_p4 = pnand %p15759_p3, %p15753_p0 }
0x16a1   :  { %v14707_v39 = vpop.f32.mrb[84].mxu1 }
0x16a2   :  { %v14708_v3 = vpop.f32.mrb[85].mxu1 }
0x16a3   :  { %v14709_v32 = vadd.f32 %v14708_v3, %v14707_v39  ;;  %v14710_v22 = vpop.f32.mrb[86].mxu1 }
0x16a4   :  { %v14711_v41 = vpop.f32.mrb[87].mxu1 }
0x16a5   :  { %v13074_v43 = vadd.f32 %v14709_v32, %v14593_v40 }
0x16a7   :  { %13079 = vst [vmem:[#allocation26] sm:$0x3] %v13074_v43 }
0x16a8   :  { %15763 = shalt.err (!%p15760_p4)
}
0x16a9   :  { %s18924_s28 = sld [smem:[#allocation126_spill]] }
0x16af   :  { %s15764_s6 = scalar_lea.hbm %s18924_s28, 32 }
0x16b0   :  { %p15765_p5 = scmp.ne.s32.totalorder %s18924_s28, %s15764_s6  ;;  %p15768_p6 = scmp.lt.u32.totalorder %s15764_s6, %s18924_s28 }
0x16b2   :  { %p15770_p7 = pnand %p15768_p6, %p15765_p5 }
0x16b4   :  { %15773 = shalt.err (!%p15770_p7)
}
0x16b5   :  { %13089 = dma.vmem_to_hbm [thread:$0]  %s13087_s19, 32, %s18924_s28, [#allocation7]  }
0x16b6   :  { %15788 = dma.done.wait [#allocation7], 32  }
0x16b7   :  { %15789 = vsyncadd [#allocation7], 4294967264 }
0x16b8   :  { %15790 = dma.done.wait [#allocation28], 32  }
0x16b9   :  { %15791 = vsyncadd [#allocation28], 4294967264 }
0x16ba   :  { %13106 = vsyncpa [#allocation6], 1 }
0x16bb   :  { %13107 = vsyncpa [#allocation9], 1 }
0x16bc   :  { %13108 = vsyncpa [#allocation12], 1 }
0x16bd   :  { %13109 = vsyncpa [#allocation15], 1 }
0x16be   :  { %13110 = vsyncpa [#allocation18], 1 }
0x16bf   :  { %13111 = vsyncpa [#allocation21], 1 }
0x16c0   :  { %13112 = vsyncpa [#allocation24], 1 }
0x16c1   :  { %13113 = vsyncpa [#allocation7], 1 }
0x16c2   :  { %13114 = vsyncpa [#allocation28], 1 }

</bundles_post_ra>
